<compile_context>
chip_gen: v5e
topology: v5e:2x2
jax: 0.10.0
libtpu: 0.0.40
codegen_flags: <defaults>
</compile_context>

<pallas_src>
import functools

import jax
import jax.numpy as jnp
from jax.experimental import pallas as pl
from jax.experimental.pallas import tpu as pltpu

BN_EPS = 1e-5
LRELU_SLOPE = 0.2
PITCH_RANGE = 128
GF_DIM = 64
Z_DIM = 100

# Static registries: kernel-side indices into the stacked weight arrays.
MAT_NAMES = (
    "w0p",
    "w1p_k0", "w1p_k1", "w2p_k0", "w2p_k1", "w3p_k0", "w3p_k1",
    "wlin_0", "wlin_1",
    "wd1_k0", "wd1_k1", "wp1_k0", "wp1_k1",
    "wd2_k0", "wd2_k1", "wp2_k0", "wp2_k1",
    "wd3_k0", "wd3_k1", "wp3_k0", "wp3_k1",
    "w4d", "w4p",
)
VEC_NAMES = (
    "b0p", "bn0p_g", "bn0p_b",
    "b1p", "bn1p_g", "bn1p_b",
    "b2p", "bn2p_g", "bn2p_b",
    "b3p", "bn3p_g", "bn3p_b",
    "blin_0", "blin_1", "bn1d0_g", "bn1d0_b", "bn1d1_g", "bn1d1_b",
    "bd1", "bn2_g", "bn2_b",
    "bd2", "bn3_g", "bn3_b",
    "bd3", "bn4_g", "bn4_b",
    "b4",
)
MI = {n: i for i, n in enumerate(MAT_NAMES)}
VI = {n: i for i, n in enumerate(VEC_NAMES)}


# ---------------------------------------------------------------------------
# Fused Pallas kernel: the whole generator forward pass.
# ---------------------------------------------------------------------------
def _generator_kernel(px_ref, y_ref, z_ref, mats_ref, vecs_ref, o_ref):
    B = z_ref.shape[0]

    def mat(name):                      # (128, 128) weight block
        return mats_ref[MI[name]]

    def vec(name):                      # (1, 128) bias / BN row
        return vecs_ref[pl.ds(VI[name], 1), :]

    def mm(x, w):
        return jnp.dot(x, w, preferred_element_type=jnp.float32)

    def bn_lrelu(blocks, bn, count):
        # training-mode BatchNorm (biased var) pooled over batch + all h-blocks,
        # one-pass sum / sum-of-squares statistics, then LeakyReLU(0.2).
        ssum = jnp.sum(blocks[0], axis=0, keepdims=True)
        ssq = jnp.sum(blocks[0] * blocks[0], axis=0, keepdims=True)
        for blk in blocks[1:]:
            ssum = ssum + jnp.sum(blk, axis=0, keepdims=True)
            ssq = ssq + jnp.sum(blk * blk, axis=0, keepdims=True)
        inv = 1.0 / float(count)
        mean = ssum * inv
        var = jnp.maximum(ssq * inv - mean * mean, 0.0)
        scale = jax.lax.rsqrt(var + BN_EPS) * vec(bn + "_g")
        shift = vec(bn + "_b") - mean * scale
        out = []
        for blk in blocks:
            yh = blk * scale + shift
            out.append(jnp.where(yh >= 0.0, yh, LRELU_SLOPE * yh))
        return out

    # ---- prev_x conditioning path -----------------------------------------
    # Conv2d(1, 16, (1,P), (1,2)) + BN + LReLU : one (B,128)@(128,128) per h.
    w0, b0 = mat("w0p"), vec("b0p")
    h0pre = [mm(px_ref[h], w0) + b0 for h in range(16)]
    h0p = bn_lrelu(h0pre, "bn0p", B * 16)
    # channel concat with the label embedding (embedding pre-placed in cols 16..31)
    h0cat = [h0p[h] + y_ref[h] for h in range(16)]

    def conv_stage(x, wname, bname, bnname, h_out):
        # Conv2d(C_in, C_out, (2,1), (2,2)) : out row oh uses input rows 2oh, 2oh+1
        k0, k1, bb = mat(wname + "_k0"), mat(wname + "_k1"), vec(bname)
        pre = [mm(x[2 * oh], k0) + mm(x[2 * oh + 1], k1) + bb for oh in range(h_out)]
        return bn_lrelu(pre, bnname, B * h_out)

    h1p = conv_stage(h0cat, "w1p", "b1p", "bn1p", 8)   # 32 ->  48 ch, H 16 -> 8
    h2p = conv_stage(h1p, "w2p", "b2p", "bn2p", 4)     # 48 ->  64 ch, H  8 -> 4
    h3p = conv_stage(h2p, "w3p", "b3p", "bn3p", 2)     # 64 -> 128 ch, H  4 -> 2

    # ---- z path : Linear(100,256) + BN1d + LReLU, pre-permuted to (h, c) ----
    zb = z_ref[...]
    h1 = []
    for ih in range(2):
        pre = mm(zb, mat(f"wlin_{ih}")) + vec(f"blin_{ih}")
        h1 += bn_lrelu([pre], f"bn1d{ih}", B)          # per-feature stats over batch

    # ---- deconv path --------------------------------------------------------
    def deconv_stage(d, prev, wd, wp, bname, bnname, h_in):
        # ConvTranspose2d(C_in, 128, (2,1), (2,2)); concat with the prev-path skip
        # is folded into a sum of two matmuls.  Output row = 2*ih + kh.
        kd = [mat(wd + "_k0"), mat(wd + "_k1")]
        kp = [mat(wp + "_k0"), mat(wp + "_k1")]
        bb = vec(bname)
        pre = []
        for ih in range(h_in):
            for kh in range(2):
                pre.append(mm(d[ih], kd[kh]) + mm(prev[ih], kp[kh]) + bb)
        return bn_lrelu(pre, bnname, B * 2 * h_in)

    h2 = deconv_stage(h1, h3p, "wd1", "wp1", "bd1", "bn2", 2)   # H 2 ->  4
    h3 = deconv_stage(h2, h2p, "wd2", "wp2", "bd2", "bn3", 4)   # H 4 ->  8
    h4 = deconv_stage(h3, h1p, "wd3", "wp3", "bd3", "bn4", 8)   # H 8 -> 16

    # ---- final ConvTranspose2d(160, 1, (1,P), (1,2)) + sigmoid --------------
    # input channels = 128 (h4) + 32 (h0_prev ⊕ embedding)
    w4d, w4p, b4 = mat("w4d"), mat("w4p"), vec("b4")
    outs = [jax.nn.sigmoid(mm(h4[h], w4d) + mm(h0cat[h], w4p) + b4)
            for h in range(16)]
    o_ref[...] = jnp.concatenate(outs, axis=1)          # lane-dense (B, 16*128)


# ---------------------------------------------------------------------------
# Deterministic parameter initialization (shapes from generator.__init__)
# ---------------------------------------------------------------------------
def init_params(key, pitch_range=PITCH_RANGE):
    def nrm(k, shape, scale=0.05):
        return scale * jax.random.normal(k, shape, dtype=jnp.float32)

    keys = iter(jax.random.split(key, 40))
    p = {}
    p["emb"] = nrm(next(keys), (25, 256), 0.5)                  # nn.Embedding(25, 256)
    p["linear_w"] = nrm(next(keys), (256, 100))                 # nn.Linear(100, 256) (out, in)
    p["linear_b"] = nrm(next(keys), (256,))
    # prev-path convs (Conv2d weight: (out, in, kh, kw))
    p["h0p_w"] = nrm(next(keys), (16, 1, 1, pitch_range)); p["h0p_b"] = nrm(next(keys), (16,))
    p["h1p_w"] = nrm(next(keys), (48, 32, 2, 1));           p["h1p_b"] = nrm(next(keys), (48,))
    p["h2p_w"] = nrm(next(keys), (64, 48, 2, 1));           p["h2p_b"] = nrm(next(keys), (64,))
    p["h3p_w"] = nrm(next(keys), (128, 64, 2, 1));          p["h3p_b"] = nrm(next(keys), (128,))
    # deconvs (ConvTranspose2d weight: (in, out, kh, kw))
    p["h1_w"] = nrm(next(keys), (256, pitch_range, 2, 1)); p["h1_b"] = nrm(next(keys), (pitch_range,))
    p["h2_w"] = nrm(next(keys), (192, pitch_range, 2, 1)); p["h2_b"] = nrm(next(keys), (pitch_range,))
    p["h3_w"] = nrm(next(keys), (176, pitch_range, 2, 1)); p["h3_b"] = nrm(next(keys), (pitch_range,))
    p["h4_w"] = nrm(next(keys), (160, 1, 1, pitch_range)); p["h4_b"] = nrm(next(keys), (1,))
    # BatchNorm affine params (training-mode batch statistics, like a freshly
    # constructed PyTorch module in its default train() state).
    for name, c in [("bn0p", 16), ("bn1p", 48), ("bn2p", 64), ("bn3p", 128),
                    ("bn2", 128), ("bn3", 128), ("bn4", 128), ("bn1d", 256)]:
        p[name + "_g"] = 1.0 + nrm(next(keys), (c,), 0.1)
        p[name + "_b"] = nrm(next(keys), (c,), 0.1)
    return p


# ---------------------------------------------------------------------------
# One-time parameter preparation into the kernel's lane-dense layout.
# ---------------------------------------------------------------------------
def prepare_params(p, pitch_range=PITCH_RANGE):
    P = pitch_range
    assert P == 128, "kernel layout assumes pitch_range == 128"
    f32 = jnp.float32

    def pad_mat(m):
        m = jnp.asarray(m, f32)
        return jnp.zeros((128, 128), f32).at[: m.shape[0], : m.shape[1]].set(m)

    def pad_vec(v):
        v = jnp.asarray(v, f32)
        return jnp.zeros((128,), f32).at[: v.shape[0]].set(v)

    mats, vecs = {}, {}

    # h0_prev : Conv2d(1,16,(1,P)) -> (P, 16) matmul, zero-padded to (128,128)
    mats["w0p"] = pad_mat(p["h0p_w"].reshape(16, P).T)
    vecs["b0p"] = pad_vec(p["h0p_b"])
    vecs["bn0p_g"] = pad_vec(p["bn0p_g"])
    vecs["bn0p_b"] = pad_vec(p["bn0p_b"])

    # prev-path (2,1) convs: one (ic, oc) matrix per kh tap
    for tag, wk, bk, bn in (("w1p", "h1p_w", "h1p_b", "bn1p"),
                            ("w2p", "h2p_w", "h2p_b", "bn2p"),
                            ("w3p", "h3p_w", "h3p_b", "bn3p")):
        w = p[wk]                                            # (oc, ic, 2, 1)
        for kh in range(2):
            mats[f"{tag}_k{kh}"] = pad_mat(w[:, :, kh, 0].T)  # (ic, oc)
        vecs["b" + tag[1:]] = pad_vec(p[bk])
        vecs[bn + "_g"] = pad_vec(p[bn + "_g"])
        vecs[bn + "_b"] = pad_vec(p[bn + "_b"])

    # z path: Linear(100,256) with its 256 output features pre-permuted into the
    # flat (h, c) layout: flat column (ih*128 + c) <- linear feature (2*c + ih).
    wl, bl = p["linear_w"], p["linear_b"]
    for ih in range(2):
        mats[f"wlin_{ih}"] = pad_mat(wl[ih::2, :].T)          # (100,128) -> (128,128)
        vecs[f"blin_{ih}"] = jnp.asarray(bl[ih::2], f32)
        vecs[f"bn1d{ih}_g"] = jnp.asarray(p["bn1d_g"][ih::2], f32)
        vecs[f"bn1d{ih}_b"] = jnp.asarray(p["bn1d_b"][ih::2], f32)

    # deconvs (2,1): weight (C_in, 128, 2, 1); split into the deconv-path part
    # (first 128 input channels) and the prev-path skip part (rest, zero-padded).
    for tag, wk, bk, bn in (("1", "h1_w", "h1_b", "bn2"),
                            ("2", "h2_w", "h2_b", "bn3"),
                            ("3", "h3_w", "h3_b", "bn4")):
        w = p[wk]
        for kh in range(2):
            mats[f"wd{tag}_k{kh}"] = jnp.asarray(w[:128, :, kh, 0], f32)
            mats[f"wp{tag}_k{kh}"] = pad_mat(w[128:, :, kh, 0])
        vecs[f"bd{tag}"] = jnp.asarray(p[bk], f32)
        vecs[bn + "_g"] = jnp.asarray(p[bn + "_g"], f32)
        vecs[bn + "_b"] = jnp.asarray(p[bn + "_b"], f32)

    # final ConvTranspose2d(160, 1, (1,P)): 128 channels from h4, 32 from h0cat
    w4 = p["h4_w"][:, 0, 0, :]                               # (160, P)
    mats["w4d"] = jnp.asarray(w4[:128], f32)
    mats["w4p"] = pad_mat(w4[128:])
    vecs["b4"] = jnp.full((128,), p["h4_b"][0], f32)

    # label-embedding table permuted into the flat layout and placed in
    # columns 16..31 of every h-block:  emb[i, c*16 + h] -> table[i, h, 16 + c]
    emb = p["emb"].reshape(25, 16, 16).transpose(0, 2, 1)    # (idx, h, c)
    table = jnp.zeros((25, 16, 128), f32).at[:, :, 16:32].set(emb)

    return {
        "mats": jnp.stack([mats[n] for n in MAT_NAMES]),     # (23, 128, 128)
        "vecs": jnp.stack([vecs[n] for n in VEC_NAMES]),     # (28, 128)
        "emb": table,                                        # (25, 16, 128)
    }


# ---------------------------------------------------------------------------
# Forward pass wrapper: one fused pallas_call.
# ---------------------------------------------------------------------------
def generator_forward(prep, z, prev_x, y, batch_size, pitch_range=PITCH_RANGE):
    B, P = batch_size, pitch_range
    assert P == 128

    # thin wrapper glue: embedding gather, (h, b, lane) layout, zero-pad z to 128
    yfeat = jnp.transpose(jnp.take(prep["emb"], y, axis=0), (1, 0, 2))            # (16,B,128)
    px = jnp.transpose(prev_x.reshape(B, 16, P).astype(jnp.float32), (1, 0, 2))   # (16,B,128)
    zp = jnp.zeros((B, 128), jnp.float32).at[:, :Z_DIM].set(z.astype(jnp.float32))

    mats, vecs = prep["mats"], prep["vecs"]

    def fs(shape):
        return pl.BlockSpec(shape, lambda i, _n=len(shape): (0,) * _n)

    out_flat = pl.pallas_call(
        _generator_kernel,
        out_shape=jax.ShapeDtypeStruct((B, 16 * P), jnp.float32),
        grid=(1,),
        in_specs=[fs((16, B, P)), fs((16, B, P)), fs((B, 128)),
                  fs(mats.shape), fs(vecs.shape)],
        out_specs=fs((B, 16 * P)),
        compiler_params=pltpu.CompilerParams(dimension_semantics=("arbitrary",)),
    )(px, yfeat, zp, mats, vecs)

    return out_flat.reshape(B, 16, P)[:, None, :, :]          # NCHW (B, 1, 16, P)


# ---------------------------------------------------------------------------
if __name__ == "__main__":
    B = 2
    key = jax.random.PRNGKey(0)
    kp, kz, kx, ky = jax.random.split(key, 4)
    params = init_params(kp)
    prep = prepare_params(params)

    z = jax.random.normal(kz, (B, Z_DIM), dtype=jnp.float32)
    prev_x = jax.random.normal(kx, (B, 1, 16, PITCH_RANGE), dtype=jnp.float32)
    y_idx = jax.random.randint(ky, (B,), 0, 25)

    fwd = jax.jit(functools.partial(generator_forward, batch_size=B))
    out = jax.block_until_ready(fwd(prep, z, prev_x, y_idx))

    assert out.shape == (B, 1, 16, PITCH_RANGE), out.shape
    assert bool(jnp.all(jnp.isfinite(out)))
    assert bool(jnp.all((out >= 0.0) & (out <= 1.0)))   # sigmoid output range
    print("KERNEL_OK")
</pallas_src>

<mosaic_0001>
module attributes {stable_mosaic.version = 11 : i64} {
  func.func @_generator_kernel(%arg0: i32, %arg1: memref<16x2x128xf32, #tpu.memory_space<vmem>>, %arg2: memref<16x2x128xf32, #tpu.memory_space<vmem>>, %arg3: memref<2x128xf32, #tpu.memory_space<vmem>>, %arg4: memref<23x128x128xf32, #tpu.memory_space<vmem>>, %arg5: memref<28x128xf32, #tpu.memory_space<vmem>>, %arg6: memref<2x2048xf32, #tpu.memory_space<vmem>>) attributes {dimension_semantics = [#tpu.dimension_semantics<arbitrary>], iteration_bounds = array<i64: 1>, scalar_prefetch = 0 : i64, scratch_operands = 0 : i64, tpu.core_type = #tpu.core_type<tc>, window_params = [{pipeline_mode = #tpu.pipeline_mode<synchronous>, transform_indices = @transform_0, window_bounds = array<i64: 16, 2, 128>}, {pipeline_mode = #tpu.pipeline_mode<synchronous>, transform_indices = @transform_1, window_bounds = array<i64: 16, 2, 128>}, {pipeline_mode = #tpu.pipeline_mode<synchronous>, transform_indices = @transform_2, window_bounds = array<i64: 2, 128>}, {pipeline_mode = #tpu.pipeline_mode<synchronous>, transform_indices = @transform_3, window_bounds = array<i64: 23, 128, 128>}, {pipeline_mode = #tpu.pipeline_mode<synchronous>, transform_indices = @transform_4, window_bounds = array<i64: 28, 128>}, {pipeline_mode = #tpu.pipeline_mode<synchronous>, transform_indices = @transform_5, window_bounds = array<i64: 2, 2048>}]} {
    %c0 = arith.constant 0 : index
    %c0_0 = arith.constant 0 : index
    %c0_1 = arith.constant 0 : index
    %0 = vector.load %arg4[%c0, %c0_0, %c0_1] : memref<23x128x128xf32, #tpu.memory_space<vmem>>, vector<1x128x128xf32>
    %1 = vector.shape_cast %0 : vector<1x128x128xf32> to vector<128x128xf32>
    %c0_2 = arith.constant 0 : index
    %c0_3 = arith.constant 0 : index
    %2 = vector.load %arg5[%c0_2, %c0_3] : memref<28x128xf32, #tpu.memory_space<vmem>>, vector<1x128xf32>
    %c0_4 = arith.constant 0 : index
    %c0_5 = arith.constant 0 : index
    %c0_6 = arith.constant 0 : index
    %3 = vector.load %arg1[%c0_4, %c0_5, %c0_6] : memref<16x2x128xf32, #tpu.memory_space<vmem>>, vector<1x2x128xf32>
    %4 = vector.shape_cast %3 : vector<1x2x128xf32> to vector<2x128xf32>
    %cst = arith.constant dense<0.000000e+00> : vector<2x128xf32>
    %5 = tpu.matmul %4, %1, %cst {dimension_numbers = #tpu.dot_dimension_numbers<[1], [0], [0], [1], [0, 0, 1, 1], [], []>} : vector<2x128xf32>, vector<128x128xf32>, vector<2x128xf32> -> vector<2x128xf32>
    %6 = vector.broadcast %2 : vector<1x128xf32> to vector<2x128xf32>
    %7 = arith.addf %5, %6 : vector<2x128xf32>
    %c1 = arith.constant 1 : index
    %c0_7 = arith.constant 0 : index
    %c0_8 = arith.constant 0 : index
    %8 = vector.load %arg1[%c1, %c0_7, %c0_8] : memref<16x2x128xf32, #tpu.memory_space<vmem>>, vector<1x2x128xf32>
    %9 = vector.shape_cast %8 : vector<1x2x128xf32> to vector<2x128xf32>
    %cst_9 = arith.constant dense<0.000000e+00> : vector<2x128xf32>
    %10 = tpu.matmul %9, %1, %cst_9 {dimension_numbers = #tpu.dot_dimension_numbers<[1], [0], [0], [1], [0, 0, 1, 1], [], []>} : vector<2x128xf32>, vector<128x128xf32>, vector<2x128xf32> -> vector<2x128xf32>
    %11 = vector.broadcast %2 : vector<1x128xf32> to vector<2x128xf32>
    %12 = arith.addf %10, %11 : vector<2x128xf32>
    %c2 = arith.constant 2 : index
    %c0_10 = arith.constant 0 : index
    %c0_11 = arith.constant 0 : index
    %13 = vector.load %arg1[%c2, %c0_10, %c0_11] : memref<16x2x128xf32, #tpu.memory_space<vmem>>, vector<1x2x128xf32>
    %14 = vector.shape_cast %13 : vector<1x2x128xf32> to vector<2x128xf32>
    %cst_12 = arith.constant dense<0.000000e+00> : vector<2x128xf32>
    %15 = tpu.matmul %14, %1, %cst_12 {dimension_numbers = #tpu.dot_dimension_numbers<[1], [0], [0], [1], [0, 0, 1, 1], [], []>} : vector<2x128xf32>, vector<128x128xf32>, vector<2x128xf32> -> vector<2x128xf32>
    %16 = vector.broadcast %2 : vector<1x128xf32> to vector<2x128xf32>
    %17 = arith.addf %15, %16 : vector<2x128xf32>
    %c3 = arith.constant 3 : index
    %c0_13 = arith.constant 0 : index
    %c0_14 = arith.constant 0 : index
    %18 = vector.load %arg1[%c3, %c0_13, %c0_14] : memref<16x2x128xf32, #tpu.memory_space<vmem>>, vector<1x2x128xf32>
    %19 = vector.shape_cast %18 : vector<1x2x128xf32> to vector<2x128xf32>
    %cst_15 = arith.constant dense<0.000000e+00> : vector<2x128xf32>
    %20 = tpu.matmul %19, %1, %cst_15 {dimension_numbers = #tpu.dot_dimension_numbers<[1], [0], [0], [1], [0, 0, 1, 1], [], []>} : vector<2x128xf32>, vector<128x128xf32>, vector<2x128xf32> -> vector<2x128xf32>
    %21 = vector.broadcast %2 : vector<1x128xf32> to vector<2x128xf32>
    %22 = arith.addf %20, %21 : vector<2x128xf32>
    %c4 = arith.constant 4 : index
    %c0_16 = arith.constant 0 : index
    %c0_17 = arith.constant 0 : index
    %23 = vector.load %arg1[%c4, %c0_16, %c0_17] : memref<16x2x128xf32, #tpu.memory_space<vmem>>, vector<1x2x128xf32>
    %24 = vector.shape_cast %23 : vector<1x2x128xf32> to vector<2x128xf32>
    %cst_18 = arith.constant dense<0.000000e+00> : vector<2x128xf32>
    %25 = tpu.matmul %24, %1, %cst_18 {dimension_numbers = #tpu.dot_dimension_numbers<[1], [0], [0], [1], [0, 0, 1, 1], [], []>} : vector<2x128xf32>, vector<128x128xf32>, vector<2x128xf32> -> vector<2x128xf32>
    %26 = vector.broadcast %2 : vector<1x128xf32> to vector<2x128xf32>
    %27 = arith.addf %25, %26 : vector<2x128xf32>
    %c5 = arith.constant 5 : index
    %c0_19 = arith.constant 0 : index
    %c0_20 = arith.constant 0 : index
    %28 = vector.load %arg1[%c5, %c0_19, %c0_20] : memref<16x2x128xf32, #tpu.memory_space<vmem>>, vector<1x2x128xf32>
    %29 = vector.shape_cast %28 : vector<1x2x128xf32> to vector<2x128xf32>
    %cst_21 = arith.constant dense<0.000000e+00> : vector<2x128xf32>
    %30 = tpu.matmul %29, %1, %cst_21 {dimension_numbers = #tpu.dot_dimension_numbers<[1], [0], [0], [1], [0, 0, 1, 1], [], []>} : vector<2x128xf32>, vector<128x128xf32>, vector<2x128xf32> -> vector<2x128xf32>
    %31 = vector.broadcast %2 : vector<1x128xf32> to vector<2x128xf32>
    %32 = arith.addf %30, %31 : vector<2x128xf32>
    %c6 = arith.constant 6 : index
    %c0_22 = arith.constant 0 : index
    %c0_23 = arith.constant 0 : index
    %33 = vector.load %arg1[%c6, %c0_22, %c0_23] : memref<16x2x128xf32, #tpu.memory_space<vmem>>, vector<1x2x128xf32>
    %34 = vector.shape_cast %33 : vector<1x2x128xf32> to vector<2x128xf32>
    %cst_24 = arith.constant dense<0.000000e+00> : vector<2x128xf32>
    %35 = tpu.matmul %34, %1, %cst_24 {dimension_numbers = #tpu.dot_dimension_numbers<[1], [0], [0], [1], [0, 0, 1, 1], [], []>} : vector<2x128xf32>, vector<128x128xf32>, vector<2x128xf32> -> vector<2x128xf32>
    %36 = vector.broadcast %2 : vector<1x128xf32> to vector<2x128xf32>
    %37 = arith.addf %35, %36 : vector<2x128xf32>
    %c7 = arith.constant 7 : index
    %c0_25 = arith.constant 0 : index
    %c0_26 = arith.constant 0 : index
    %38 = vector.load %arg1[%c7, %c0_25, %c0_26] : memref<16x2x128xf32, #tpu.memory_space<vmem>>, vector<1x2x128xf32>
    %39 = vector.shape_cast %38 : vector<1x2x128xf32> to vector<2x128xf32>
    %cst_27 = arith.constant dense<0.000000e+00> : vector<2x128xf32>
    %40 = tpu.matmul %39, %1, %cst_27 {dimension_numbers = #tpu.dot_dimension_numbers<[1], [0], [0], [1], [0, 0, 1, 1], [], []>} : vector<2x128xf32>, vector<128x128xf32>, vector<2x128xf32> -> vector<2x128xf32>
    %41 = vector.broadcast %2 : vector<1x128xf32> to vector<2x128xf32>
    %42 = arith.addf %40, %41 : vector<2x128xf32>
    %c8 = arith.constant 8 : index
    %c0_28 = arith.constant 0 : index
    %c0_29 = arith.constant 0 : index
    %43 = vector.load %arg1[%c8, %c0_28, %c0_29] : memref<16x2x128xf32, #tpu.memory_space<vmem>>, vector<1x2x128xf32>
    %44 = vector.shape_cast %43 : vector<1x2x128xf32> to vector<2x128xf32>
    %cst_30 = arith.constant dense<0.000000e+00> : vector<2x128xf32>
    %45 = tpu.matmul %44, %1, %cst_30 {dimension_numbers = #tpu.dot_dimension_numbers<[1], [0], [0], [1], [0, 0, 1, 1], [], []>} : vector<2x128xf32>, vector<128x128xf32>, vector<2x128xf32> -> vector<2x128xf32>
    %46 = vector.broadcast %2 : vector<1x128xf32> to vector<2x128xf32>
    %47 = arith.addf %45, %46 : vector<2x128xf32>
    %c9 = arith.constant 9 : index
    %c0_31 = arith.constant 0 : index
    %c0_32 = arith.constant 0 : index
    %48 = vector.load %arg1[%c9, %c0_31, %c0_32] : memref<16x2x128xf32, #tpu.memory_space<vmem>>, vector<1x2x128xf32>
    %49 = vector.shape_cast %48 : vector<1x2x128xf32> to vector<2x128xf32>
    %cst_33 = arith.constant dense<0.000000e+00> : vector<2x128xf32>
    %50 = tpu.matmul %49, %1, %cst_33 {dimension_numbers = #tpu.dot_dimension_numbers<[1], [0], [0], [1], [0, 0, 1, 1], [], []>} : vector<2x128xf32>, vector<128x128xf32>, vector<2x128xf32> -> vector<2x128xf32>
    %51 = vector.broadcast %2 : vector<1x128xf32> to vector<2x128xf32>
    %52 = arith.addf %50, %51 : vector<2x128xf32>
    %c10 = arith.constant 10 : index
    %c0_34 = arith.constant 0 : index
    %c0_35 = arith.constant 0 : index
    %53 = vector.load %arg1[%c10, %c0_34, %c0_35] : memref<16x2x128xf32, #tpu.memory_space<vmem>>, vector<1x2x128xf32>
    %54 = vector.shape_cast %53 : vector<1x2x128xf32> to vector<2x128xf32>
    %cst_36 = arith.constant dense<0.000000e+00> : vector<2x128xf32>
    %55 = tpu.matmul %54, %1, %cst_36 {dimension_numbers = #tpu.dot_dimension_numbers<[1], [0], [0], [1], [0, 0, 1, 1], [], []>} : vector<2x128xf32>, vector<128x128xf32>, vector<2x128xf32> -> vector<2x128xf32>
    %56 = vector.broadcast %2 : vector<1x128xf32> to vector<2x128xf32>
    %57 = arith.addf %55, %56 : vector<2x128xf32>
    %c11 = arith.constant 11 : index
    %c0_37 = arith.constant 0 : index
    %c0_38 = arith.constant 0 : index
    %58 = vector.load %arg1[%c11, %c0_37, %c0_38] : memref<16x2x128xf32, #tpu.memory_space<vmem>>, vector<1x2x128xf32>
    %59 = vector.shape_cast %58 : vector<1x2x128xf32> to vector<2x128xf32>
    %cst_39 = arith.constant dense<0.000000e+00> : vector<2x128xf32>
    %60 = tpu.matmul %59, %1, %cst_39 {dimension_numbers = #tpu.dot_dimension_numbers<[1], [0], [0], [1], [0, 0, 1, 1], [], []>} : vector<2x128xf32>, vector<128x128xf32>, vector<2x128xf32> -> vector<2x128xf32>
    %61 = vector.broadcast %2 : vector<1x128xf32> to vector<2x128xf32>
    %62 = arith.addf %60, %61 : vector<2x128xf32>
    %c12 = arith.constant 12 : index
    %c0_40 = arith.constant 0 : index
    %c0_41 = arith.constant 0 : index
    %63 = vector.load %arg1[%c12, %c0_40, %c0_41] : memref<16x2x128xf32, #tpu.memory_space<vmem>>, vector<1x2x128xf32>
    %64 = vector.shape_cast %63 : vector<1x2x128xf32> to vector<2x128xf32>
    %cst_42 = arith.constant dense<0.000000e+00> : vector<2x128xf32>
    %65 = tpu.matmul %64, %1, %cst_42 {dimension_numbers = #tpu.dot_dimension_numbers<[1], [0], [0], [1], [0, 0, 1, 1], [], []>} : vector<2x128xf32>, vector<128x128xf32>, vector<2x128xf32> -> vector<2x128xf32>
    %66 = vector.broadcast %2 : vector<1x128xf32> to vector<2x128xf32>
    %67 = arith.addf %65, %66 : vector<2x128xf32>
    %c13 = arith.constant 13 : index
    %c0_43 = arith.constant 0 : index
    %c0_44 = arith.constant 0 : index
    %68 = vector.load %arg1[%c13, %c0_43, %c0_44] : memref<16x2x128xf32, #tpu.memory_space<vmem>>, vector<1x2x128xf32>
    %69 = vector.shape_cast %68 : vector<1x2x128xf32> to vector<2x128xf32>
    %cst_45 = arith.constant dense<0.000000e+00> : vector<2x128xf32>
    %70 = tpu.matmul %69, %1, %cst_45 {dimension_numbers = #tpu.dot_dimension_numbers<[1], [0], [0], [1], [0, 0, 1, 1], [], []>} : vector<2x128xf32>, vector<128x128xf32>, vector<2x128xf32> -> vector<2x128xf32>
    %71 = vector.broadcast %2 : vector<1x128xf32> to vector<2x128xf32>
    %72 = arith.addf %70, %71 : vector<2x128xf32>
    %c14 = arith.constant 14 : index
    %c0_46 = arith.constant 0 : index
    %c0_47 = arith.constant 0 : index
    %73 = vector.load %arg1[%c14, %c0_46, %c0_47] : memref<16x2x128xf32, #tpu.memory_space<vmem>>, vector<1x2x128xf32>
    %74 = vector.shape_cast %73 : vector<1x2x128xf32> to vector<2x128xf32>
    %cst_48 = arith.constant dense<0.000000e+00> : vector<2x128xf32>
    %75 = tpu.matmul %74, %1, %cst_48 {dimension_numbers = #tpu.dot_dimension_numbers<[1], [0], [0], [1], [0, 0, 1, 1], [], []>} : vector<2x128xf32>, vector<128x128xf32>, vector<2x128xf32> -> vector<2x128xf32>
    %76 = vector.broadcast %2 : vector<1x128xf32> to vector<2x128xf32>
    %77 = arith.addf %75, %76 : vector<2x128xf32>
    %c15 = arith.constant 15 : index
    %c0_49 = arith.constant 0 : index
    %c0_50 = arith.constant 0 : index
    %78 = vector.load %arg1[%c15, %c0_49, %c0_50] : memref<16x2x128xf32, #tpu.memory_space<vmem>>, vector<1x2x128xf32>
    %79 = vector.shape_cast %78 : vector<1x2x128xf32> to vector<2x128xf32>
    %cst_51 = arith.constant dense<0.000000e+00> : vector<2x128xf32>
    %80 = tpu.matmul %79, %1, %cst_51 {dimension_numbers = #tpu.dot_dimension_numbers<[1], [0], [0], [1], [0, 0, 1, 1], [], []>} : vector<2x128xf32>, vector<128x128xf32>, vector<2x128xf32> -> vector<2x128xf32>
    %81 = vector.broadcast %2 : vector<1x128xf32> to vector<2x128xf32>
    %82 = arith.addf %80, %81 : vector<2x128xf32>
    %cst_52 = arith.constant dense<0.000000e+00> : vector<128xf32>
    %83 = vector.multi_reduction <add>, %7, %cst_52 [0] : vector<2x128xf32> to vector<128xf32>
    %84 = vector.shape_cast %83 : vector<128xf32> to vector<1x128xf32>
    %85 = arith.mulf %7, %7 : vector<2x128xf32>
    %cst_53 = arith.constant dense<0.000000e+00> : vector<128xf32>
    %86 = vector.multi_reduction <add>, %85, %cst_53 [0] : vector<2x128xf32> to vector<128xf32>
    %87 = vector.shape_cast %86 : vector<128xf32> to vector<1x128xf32>
    %cst_54 = arith.constant dense<0.000000e+00> : vector<128xf32>
    %88 = vector.multi_reduction <add>, %12, %cst_54 [0] : vector<2x128xf32> to vector<128xf32>
    %89 = vector.shape_cast %88 : vector<128xf32> to vector<1x128xf32>
    %90 = arith.addf %84, %89 : vector<1x128xf32>
    %91 = arith.mulf %12, %12 : vector<2x128xf32>
    %cst_55 = arith.constant dense<0.000000e+00> : vector<128xf32>
    %92 = vector.multi_reduction <add>, %91, %cst_55 [0] : vector<2x128xf32> to vector<128xf32>
    %93 = vector.shape_cast %92 : vector<128xf32> to vector<1x128xf32>
    %94 = arith.addf %87, %93 : vector<1x128xf32>
    %cst_56 = arith.constant dense<0.000000e+00> : vector<128xf32>
    %95 = vector.multi_reduction <add>, %17, %cst_56 [0] : vector<2x128xf32> to vector<128xf32>
    %96 = vector.shape_cast %95 : vector<128xf32> to vector<1x128xf32>
    %97 = arith.addf %90, %96 : vector<1x128xf32>
    %98 = arith.mulf %17, %17 : vector<2x128xf32>
    %cst_57 = arith.constant dense<0.000000e+00> : vector<128xf32>
    %99 = vector.multi_reduction <add>, %98, %cst_57 [0] : vector<2x128xf32> to vector<128xf32>
    %100 = vector.shape_cast %99 : vector<128xf32> to vector<1x128xf32>
    %101 = arith.addf %94, %100 : vector<1x128xf32>
    %cst_58 = arith.constant dense<0.000000e+00> : vector<128xf32>
    %102 = vector.multi_reduction <add>, %22, %cst_58 [0] : vector<2x128xf32> to vector<128xf32>
    %103 = vector.shape_cast %102 : vector<128xf32> to vector<1x128xf32>
    %104 = arith.addf %97, %103 : vector<1x128xf32>
    %105 = arith.mulf %22, %22 : vector<2x128xf32>
    %cst_59 = arith.constant dense<0.000000e+00> : vector<128xf32>
    %106 = vector.multi_reduction <add>, %105, %cst_59 [0] : vector<2x128xf32> to vector<128xf32>
    %107 = vector.shape_cast %106 : vector<128xf32> to vector<1x128xf32>
    %108 = arith.addf %101, %107 : vector<1x128xf32>
    %cst_60 = arith.constant dense<0.000000e+00> : vector<128xf32>
    %109 = vector.multi_reduction <add>, %27, %cst_60 [0] : vector<2x128xf32> to vector<128xf32>
    %110 = vector.shape_cast %109 : vector<128xf32> to vector<1x128xf32>
    %111 = arith.addf %104, %110 : vector<1x128xf32>
    %112 = arith.mulf %27, %27 : vector<2x128xf32>
    %cst_61 = arith.constant dense<0.000000e+00> : vector<128xf32>
    %113 = vector.multi_reduction <add>, %112, %cst_61 [0] : vector<2x128xf32> to vector<128xf32>
    %114 = vector.shape_cast %113 : vector<128xf32> to vector<1x128xf32>
    %115 = arith.addf %108, %114 : vector<1x128xf32>
    %cst_62 = arith.constant dense<0.000000e+00> : vector<128xf32>
    %116 = vector.multi_reduction <add>, %32, %cst_62 [0] : vector<2x128xf32> to vector<128xf32>
    %117 = vector.shape_cast %116 : vector<128xf32> to vector<1x128xf32>
    %118 = arith.addf %111, %117 : vector<1x128xf32>
    %119 = arith.mulf %32, %32 : vector<2x128xf32>
    %cst_63 = arith.constant dense<0.000000e+00> : vector<128xf32>
    %120 = vector.multi_reduction <add>, %119, %cst_63 [0] : vector<2x128xf32> to vector<128xf32>
    %121 = vector.shape_cast %120 : vector<128xf32> to vector<1x128xf32>
    %122 = arith.addf %115, %121 : vector<1x128xf32>
    %cst_64 = arith.constant dense<0.000000e+00> : vector<128xf32>
    %123 = vector.multi_reduction <add>, %37, %cst_64 [0] : vector<2x128xf32> to vector<128xf32>
    %124 = vector.shape_cast %123 : vector<128xf32> to vector<1x128xf32>
    %125 = arith.addf %118, %124 : vector<1x128xf32>
    %126 = arith.mulf %37, %37 : vector<2x128xf32>
    %cst_65 = arith.constant dense<0.000000e+00> : vector<128xf32>
    %127 = vector.multi_reduction <add>, %126, %cst_65 [0] : vector<2x128xf32> to vector<128xf32>
    %128 = vector.shape_cast %127 : vector<128xf32> to vector<1x128xf32>
    %129 = arith.addf %122, %128 : vector<1x128xf32>
    %cst_66 = arith.constant dense<0.000000e+00> : vector<128xf32>
    %130 = vector.multi_reduction <add>, %42, %cst_66 [0] : vector<2x128xf32> to vector<128xf32>
    %131 = vector.shape_cast %130 : vector<128xf32> to vector<1x128xf32>
    %132 = arith.addf %125, %131 : vector<1x128xf32>
    %133 = arith.mulf %42, %42 : vector<2x128xf32>
    %cst_67 = arith.constant dense<0.000000e+00> : vector<128xf32>
    %134 = vector.multi_reduction <add>, %133, %cst_67 [0] : vector<2x128xf32> to vector<128xf32>
    %135 = vector.shape_cast %134 : vector<128xf32> to vector<1x128xf32>
    %136 = arith.addf %129, %135 : vector<1x128xf32>
    %cst_68 = arith.constant dense<0.000000e+00> : vector<128xf32>
    %137 = vector.multi_reduction <add>, %47, %cst_68 [0] : vector<2x128xf32> to vector<128xf32>
    %138 = vector.shape_cast %137 : vector<128xf32> to vector<1x128xf32>
    %139 = arith.addf %132, %138 : vector<1x128xf32>
    %140 = arith.mulf %47, %47 : vector<2x128xf32>
    %cst_69 = arith.constant dense<0.000000e+00> : vector<128xf32>
    %141 = vector.multi_reduction <add>, %140, %cst_69 [0] : vector<2x128xf32> to vector<128xf32>
    %142 = vector.shape_cast %141 : vector<128xf32> to vector<1x128xf32>
    %143 = arith.addf %136, %142 : vector<1x128xf32>
    %cst_70 = arith.constant dense<0.000000e+00> : vector<128xf32>
    %144 = vector.multi_reduction <add>, %52, %cst_70 [0] : vector<2x128xf32> to vector<128xf32>
    %145 = vector.shape_cast %144 : vector<128xf32> to vector<1x128xf32>
    %146 = arith.addf %139, %145 : vector<1x128xf32>
    %147 = arith.mulf %52, %52 : vector<2x128xf32>
    %cst_71 = arith.constant dense<0.000000e+00> : vector<128xf32>
    %148 = vector.multi_reduction <add>, %147, %cst_71 [0] : vector<2x128xf32> to vector<128xf32>
    %149 = vector.shape_cast %148 : vector<128xf32> to vector<1x128xf32>
    %150 = arith.addf %143, %149 : vector<1x128xf32>
    %cst_72 = arith.constant dense<0.000000e+00> : vector<128xf32>
    %151 = vector.multi_reduction <add>, %57, %cst_72 [0] : vector<2x128xf32> to vector<128xf32>
    %152 = vector.shape_cast %151 : vector<128xf32> to vector<1x128xf32>
    %153 = arith.addf %146, %152 : vector<1x128xf32>
    %154 = arith.mulf %57, %57 : vector<2x128xf32>
    %cst_73 = arith.constant dense<0.000000e+00> : vector<128xf32>
    %155 = vector.multi_reduction <add>, %154, %cst_73 [0] : vector<2x128xf32> to vector<128xf32>
    %156 = vector.shape_cast %155 : vector<128xf32> to vector<1x128xf32>
    %157 = arith.addf %150, %156 : vector<1x128xf32>
    %cst_74 = arith.constant dense<0.000000e+00> : vector<128xf32>
    %158 = vector.multi_reduction <add>, %62, %cst_74 [0] : vector<2x128xf32> to vector<128xf32>
    %159 = vector.shape_cast %158 : vector<128xf32> to vector<1x128xf32>
    %160 = arith.addf %153, %159 : vector<1x128xf32>
    %161 = arith.mulf %62, %62 : vector<2x128xf32>
    %cst_75 = arith.constant dense<0.000000e+00> : vector<128xf32>
    %162 = vector.multi_reduction <add>, %161, %cst_75 [0] : vector<2x128xf32> to vector<128xf32>
    %163 = vector.shape_cast %162 : vector<128xf32> to vector<1x128xf32>
    %164 = arith.addf %157, %163 : vector<1x128xf32>
    %cst_76 = arith.constant dense<0.000000e+00> : vector<128xf32>
    %165 = vector.multi_reduction <add>, %67, %cst_76 [0] : vector<2x128xf32> to vector<128xf32>
    %166 = vector.shape_cast %165 : vector<128xf32> to vector<1x128xf32>
    %167 = arith.addf %160, %166 : vector<1x128xf32>
    %168 = arith.mulf %67, %67 : vector<2x128xf32>
    %cst_77 = arith.constant dense<0.000000e+00> : vector<128xf32>
    %169 = vector.multi_reduction <add>, %168, %cst_77 [0] : vector<2x128xf32> to vector<128xf32>
    %170 = vector.shape_cast %169 : vector<128xf32> to vector<1x128xf32>
    %171 = arith.addf %164, %170 : vector<1x128xf32>
    %cst_78 = arith.constant dense<0.000000e+00> : vector<128xf32>
    %172 = vector.multi_reduction <add>, %72, %cst_78 [0] : vector<2x128xf32> to vector<128xf32>
    %173 = vector.shape_cast %172 : vector<128xf32> to vector<1x128xf32>
    %174 = arith.addf %167, %173 : vector<1x128xf32>
    %175 = arith.mulf %72, %72 : vector<2x128xf32>
    %cst_79 = arith.constant dense<0.000000e+00> : vector<128xf32>
    %176 = vector.multi_reduction <add>, %175, %cst_79 [0] : vector<2x128xf32> to vector<128xf32>
    %177 = vector.shape_cast %176 : vector<128xf32> to vector<1x128xf32>
    %178 = arith.addf %171, %177 : vector<1x128xf32>
    %cst_80 = arith.constant dense<0.000000e+00> : vector<128xf32>
    %179 = vector.multi_reduction <add>, %77, %cst_80 [0] : vector<2x128xf32> to vector<128xf32>
    %180 = vector.shape_cast %179 : vector<128xf32> to vector<1x128xf32>
    %181 = arith.addf %174, %180 : vector<1x128xf32>
    %182 = arith.mulf %77, %77 : vector<2x128xf32>
    %cst_81 = arith.constant dense<0.000000e+00> : vector<128xf32>
    %183 = vector.multi_reduction <add>, %182, %cst_81 [0] : vector<2x128xf32> to vector<128xf32>
    %184 = vector.shape_cast %183 : vector<128xf32> to vector<1x128xf32>
    %185 = arith.addf %178, %184 : vector<1x128xf32>
    %cst_82 = arith.constant dense<0.000000e+00> : vector<128xf32>
    %186 = vector.multi_reduction <add>, %82, %cst_82 [0] : vector<2x128xf32> to vector<128xf32>
    %187 = vector.shape_cast %186 : vector<128xf32> to vector<1x128xf32>
    %188 = arith.addf %181, %187 : vector<1x128xf32>
    %189 = arith.mulf %82, %82 : vector<2x128xf32>
    %cst_83 = arith.constant dense<0.000000e+00> : vector<128xf32>
    %190 = vector.multi_reduction <add>, %189, %cst_83 [0] : vector<2x128xf32> to vector<128xf32>
    %191 = vector.shape_cast %190 : vector<128xf32> to vector<1x128xf32>
    %192 = arith.addf %185, %191 : vector<1x128xf32>
    %cst_84 = arith.constant 3.125000e-02 : f32
    %193 = vector.broadcast %cst_84 : f32 to vector<1x128xf32>
    %194 = arith.mulf %188, %193 : vector<1x128xf32>
    %cst_85 = arith.constant 3.125000e-02 : f32
    %195 = vector.broadcast %cst_85 : f32 to vector<1x128xf32>
    %196 = arith.mulf %192, %195 : vector<1x128xf32>
    %197 = arith.mulf %194, %194 : vector<1x128xf32>
    %198 = arith.subf %196, %197 : vector<1x128xf32>
    %cst_86 = arith.constant 0.000000e+00 : f32
    %199 = vector.broadcast %cst_86 : f32 to vector<1x128xf32>
    %200 = arith.maximumf %198, %199 : vector<1x128xf32>
    %cst_87 = arith.constant 9.99999974E-6 : f32
    %201 = vector.broadcast %cst_87 : f32 to vector<1x128xf32>
    %202 = arith.addf %200, %201 : vector<1x128xf32>
    %203 = math.rsqrt %202 : vector<1x128xf32>
    %c1_88 = arith.constant 1 : index
    %c0_89 = arith.constant 0 : index
    %204 = vector.load %arg5[%c1_88, %c0_89] : memref<28x128xf32, #tpu.memory_space<vmem>>, vector<1x128xf32>
    %205 = arith.mulf %203, %204 : vector<1x128xf32>
    %c2_90 = arith.constant 2 : index
    %c0_91 = arith.constant 0 : index
    %206 = vector.load %arg5[%c2_90, %c0_91] : memref<28x128xf32, #tpu.memory_space<vmem>>, vector<1x128xf32>
    %207 = arith.mulf %194, %205 : vector<1x128xf32>
    %208 = arith.subf %206, %207 : vector<1x128xf32>
    %209 = vector.broadcast %205 : vector<1x128xf32> to vector<2x128xf32>
    %210 = arith.mulf %7, %209 : vector<2x128xf32>
    %211 = vector.broadcast %208 : vector<1x128xf32> to vector<2x128xf32>
    %212 = arith.addf %210, %211 : vector<2x128xf32>
    %cst_92 = arith.constant 0.000000e+00 : f32
    %213 = vector.broadcast %cst_92 : f32 to vector<2x128xf32>
    %214 = arith.cmpf oge, %212, %213 : vector<2x128xf32>
    %cst_93 = arith.constant 2.000000e-01 : f32
    %215 = vector.broadcast %cst_93 : f32 to vector<2x128xf32>
    %216 = arith.mulf %215, %212 : vector<2x128xf32>
    %217 = arith.select %214, %212, %216 : vector<2x128xi1>, vector<2x128xf32>
    %218 = vector.broadcast %205 : vector<1x128xf32> to vector<2x128xf32>
    %219 = arith.mulf %12, %218 : vector<2x128xf32>
    %220 = vector.broadcast %208 : vector<1x128xf32> to vector<2x128xf32>
    %221 = arith.addf %219, %220 : vector<2x128xf32>
    %cst_94 = arith.constant 0.000000e+00 : f32
    %222 = vector.broadcast %cst_94 : f32 to vector<2x128xf32>
    %223 = arith.cmpf oge, %221, %222 : vector<2x128xf32>
    %cst_95 = arith.constant 2.000000e-01 : f32
    %224 = vector.broadcast %cst_95 : f32 to vector<2x128xf32>
    %225 = arith.mulf %224, %221 : vector<2x128xf32>
    %226 = arith.select %223, %221, %225 : vector<2x128xi1>, vector<2x128xf32>
    %227 = vector.broadcast %205 : vector<1x128xf32> to vector<2x128xf32>
    %228 = arith.mulf %17, %227 : vector<2x128xf32>
    %229 = vector.broadcast %208 : vector<1x128xf32> to vector<2x128xf32>
    %230 = arith.addf %228, %229 : vector<2x128xf32>
    %cst_96 = arith.constant 0.000000e+00 : f32
    %231 = vector.broadcast %cst_96 : f32 to vector<2x128xf32>
    %232 = arith.cmpf oge, %230, %231 : vector<2x128xf32>
    %cst_97 = arith.constant 2.000000e-01 : f32
    %233 = vector.broadcast %cst_97 : f32 to vector<2x128xf32>
    %234 = arith.mulf %233, %230 : vector<2x128xf32>
    %235 = arith.select %232, %230, %234 : vector<2x128xi1>, vector<2x128xf32>
    %236 = vector.broadcast %205 : vector<1x128xf32> to vector<2x128xf32>
    %237 = arith.mulf %22, %236 : vector<2x128xf32>
    %238 = vector.broadcast %208 : vector<1x128xf32> to vector<2x128xf32>
    %239 = arith.addf %237, %238 : vector<2x128xf32>
    %cst_98 = arith.constant 0.000000e+00 : f32
    %240 = vector.broadcast %cst_98 : f32 to vector<2x128xf32>
    %241 = arith.cmpf oge, %239, %240 : vector<2x128xf32>
    %cst_99 = arith.constant 2.000000e-01 : f32
    %242 = vector.broadcast %cst_99 : f32 to vector<2x128xf32>
    %243 = arith.mulf %242, %239 : vector<2x128xf32>
    %244 = arith.select %241, %239, %243 : vector<2x128xi1>, vector<2x128xf32>
    %245 = vector.broadcast %205 : vector<1x128xf32> to vector<2x128xf32>
    %246 = arith.mulf %27, %245 : vector<2x128xf32>
    %247 = vector.broadcast %208 : vector<1x128xf32> to vector<2x128xf32>
    %248 = arith.addf %246, %247 : vector<2x128xf32>
    %cst_100 = arith.constant 0.000000e+00 : f32
    %249 = vector.broadcast %cst_100 : f32 to vector<2x128xf32>
    %250 = arith.cmpf oge, %248, %249 : vector<2x128xf32>
    %cst_101 = arith.constant 2.000000e-01 : f32
    %251 = vector.broadcast %cst_101 : f32 to vector<2x128xf32>
    %252 = arith.mulf %251, %248 : vector<2x128xf32>
    %253 = arith.select %250, %248, %252 : vector<2x128xi1>, vector<2x128xf32>
    %254 = vector.broadcast %205 : vector<1x128xf32> to vector<2x128xf32>
    %255 = arith.mulf %32, %254 : vector<2x128xf32>
    %256 = vector.broadcast %208 : vector<1x128xf32> to vector<2x128xf32>
    %257 = arith.addf %255, %256 : vector<2x128xf32>
    %cst_102 = arith.constant 0.000000e+00 : f32
    %258 = vector.broadcast %cst_102 : f32 to vector<2x128xf32>
    %259 = arith.cmpf oge, %257, %258 : vector<2x128xf32>
    %cst_103 = arith.constant 2.000000e-01 : f32
    %260 = vector.broadcast %cst_103 : f32 to vector<2x128xf32>
    %261 = arith.mulf %260, %257 : vector<2x128xf32>
    %262 = arith.select %259, %257, %261 : vector<2x128xi1>, vector<2x128xf32>
    %263 = vector.broadcast %205 : vector<1x128xf32> to vector<2x128xf32>
    %264 = arith.mulf %37, %263 : vector<2x128xf32>
    %265 = vector.broadcast %208 : vector<1x128xf32> to vector<2x128xf32>
    %266 = arith.addf %264, %265 : vector<2x128xf32>
    %cst_104 = arith.constant 0.000000e+00 : f32
    %267 = vector.broadcast %cst_104 : f32 to vector<2x128xf32>
    %268 = arith.cmpf oge, %266, %267 : vector<2x128xf32>
    %cst_105 = arith.constant 2.000000e-01 : f32
    %269 = vector.broadcast %cst_105 : f32 to vector<2x128xf32>
    %270 = arith.mulf %269, %266 : vector<2x128xf32>
    %271 = arith.select %268, %266, %270 : vector<2x128xi1>, vector<2x128xf32>
    %272 = vector.broadcast %205 : vector<1x128xf32> to vector<2x128xf32>
    %273 = arith.mulf %42, %272 : vector<2x128xf32>
    %274 = vector.broadcast %208 : vector<1x128xf32> to vector<2x128xf32>
    %275 = arith.addf %273, %274 : vector<2x128xf32>
    %cst_106 = arith.constant 0.000000e+00 : f32
    %276 = vector.broadcast %cst_106 : f32 to vector<2x128xf32>
    %277 = arith.cmpf oge, %275, %276 : vector<2x128xf32>
    %cst_107 = arith.constant 2.000000e-01 : f32
    %278 = vector.broadcast %cst_107 : f32 to vector<2x128xf32>
    %279 = arith.mulf %278, %275 : vector<2x128xf32>
    %280 = arith.select %277, %275, %279 : vector<2x128xi1>, vector<2x128xf32>
    %281 = vector.broadcast %205 : vector<1x128xf32> to vector<2x128xf32>
    %282 = arith.mulf %47, %281 : vector<2x128xf32>
    %283 = vector.broadcast %208 : vector<1x128xf32> to vector<2x128xf32>
    %284 = arith.addf %282, %283 : vector<2x128xf32>
    %cst_108 = arith.constant 0.000000e+00 : f32
    %285 = vector.broadcast %cst_108 : f32 to vector<2x128xf32>
    %286 = arith.cmpf oge, %284, %285 : vector<2x128xf32>
    %cst_109 = arith.constant 2.000000e-01 : f32
    %287 = vector.broadcast %cst_109 : f32 to vector<2x128xf32>
    %288 = arith.mulf %287, %284 : vector<2x128xf32>
    %289 = arith.select %286, %284, %288 : vector<2x128xi1>, vector<2x128xf32>
    %290 = vector.broadcast %205 : vector<1x128xf32> to vector<2x128xf32>
    %291 = arith.mulf %52, %290 : vector<2x128xf32>
    %292 = vector.broadcast %208 : vector<1x128xf32> to vector<2x128xf32>
    %293 = arith.addf %291, %292 : vector<2x128xf32>
    %cst_110 = arith.constant 0.000000e+00 : f32
    %294 = vector.broadcast %cst_110 : f32 to vector<2x128xf32>
    %295 = arith.cmpf oge, %293, %294 : vector<2x128xf32>
    %cst_111 = arith.constant 2.000000e-01 : f32
    %296 = vector.broadcast %cst_111 : f32 to vector<2x128xf32>
    %297 = arith.mulf %296, %293 : vector<2x128xf32>
    %298 = arith.select %295, %293, %297 : vector<2x128xi1>, vector<2x128xf32>
    %299 = vector.broadcast %205 : vector<1x128xf32> to vector<2x128xf32>
    %300 = arith.mulf %57, %299 : vector<2x128xf32>
    %301 = vector.broadcast %208 : vector<1x128xf32> to vector<2x128xf32>
    %302 = arith.addf %300, %301 : vector<2x128xf32>
    %cst_112 = arith.constant 0.000000e+00 : f32
    %303 = vector.broadcast %cst_112 : f32 to vector<2x128xf32>
    %304 = arith.cmpf oge, %302, %303 : vector<2x128xf32>
    %cst_113 = arith.constant 2.000000e-01 : f32
    %305 = vector.broadcast %cst_113 : f32 to vector<2x128xf32>
    %306 = arith.mulf %305, %302 : vector<2x128xf32>
    %307 = arith.select %304, %302, %306 : vector<2x128xi1>, vector<2x128xf32>
    %308 = vector.broadcast %205 : vector<1x128xf32> to vector<2x128xf32>
    %309 = arith.mulf %62, %308 : vector<2x128xf32>
    %310 = vector.broadcast %208 : vector<1x128xf32> to vector<2x128xf32>
    %311 = arith.addf %309, %310 : vector<2x128xf32>
    %cst_114 = arith.constant 0.000000e+00 : f32
    %312 = vector.broadcast %cst_114 : f32 to vector<2x128xf32>
    %313 = arith.cmpf oge, %311, %312 : vector<2x128xf32>
    %cst_115 = arith.constant 2.000000e-01 : f32
    %314 = vector.broadcast %cst_115 : f32 to vector<2x128xf32>
    %315 = arith.mulf %314, %311 : vector<2x128xf32>
    %316 = arith.select %313, %311, %315 : vector<2x128xi1>, vector<2x128xf32>
    %317 = vector.broadcast %205 : vector<1x128xf32> to vector<2x128xf32>
    %318 = arith.mulf %67, %317 : vector<2x128xf32>
    %319 = vector.broadcast %208 : vector<1x128xf32> to vector<2x128xf32>
    %320 = arith.addf %318, %319 : vector<2x128xf32>
    %cst_116 = arith.constant 0.000000e+00 : f32
    %321 = vector.broadcast %cst_116 : f32 to vector<2x128xf32>
    %322 = arith.cmpf oge, %320, %321 : vector<2x128xf32>
    %cst_117 = arith.constant 2.000000e-01 : f32
    %323 = vector.broadcast %cst_117 : f32 to vector<2x128xf32>
    %324 = arith.mulf %323, %320 : vector<2x128xf32>
    %325 = arith.select %322, %320, %324 : vector<2x128xi1>, vector<2x128xf32>
    %326 = vector.broadcast %205 : vector<1x128xf32> to vector<2x128xf32>
    %327 = arith.mulf %72, %326 : vector<2x128xf32>
    %328 = vector.broadcast %208 : vector<1x128xf32> to vector<2x128xf32>
    %329 = arith.addf %327, %328 : vector<2x128xf32>
    %cst_118 = arith.constant 0.000000e+00 : f32
    %330 = vector.broadcast %cst_118 : f32 to vector<2x128xf32>
    %331 = arith.cmpf oge, %329, %330 : vector<2x128xf32>
    %cst_119 = arith.constant 2.000000e-01 : f32
    %332 = vector.broadcast %cst_119 : f32 to vector<2x128xf32>
    %333 = arith.mulf %332, %329 : vector<2x128xf32>
    %334 = arith.select %331, %329, %333 : vector<2x128xi1>, vector<2x128xf32>
    %335 = vector.broadcast %205 : vector<1x128xf32> to vector<2x128xf32>
    %336 = arith.mulf %77, %335 : vector<2x128xf32>
    %337 = vector.broadcast %208 : vector<1x128xf32> to vector<2x128xf32>
    %338 = arith.addf %336, %337 : vector<2x128xf32>
    %cst_120 = arith.constant 0.000000e+00 : f32
    %339 = vector.broadcast %cst_120 : f32 to vector<2x128xf32>
    %340 = arith.cmpf oge, %338, %339 : vector<2x128xf32>
    %cst_121 = arith.constant 2.000000e-01 : f32
    %341 = vector.broadcast %cst_121 : f32 to vector<2x128xf32>
    %342 = arith.mulf %341, %338 : vector<2x128xf32>
    %343 = arith.select %340, %338, %342 : vector<2x128xi1>, vector<2x128xf32>
    %344 = vector.broadcast %205 : vector<1x128xf32> to vector<2x128xf32>
    %345 = arith.mulf %82, %344 : vector<2x128xf32>
    %346 = vector.broadcast %208 : vector<1x128xf32> to vector<2x128xf32>
    %347 = arith.addf %345, %346 : vector<2x128xf32>
    %cst_122 = arith.constant 0.000000e+00 : f32
    %348 = vector.broadcast %cst_122 : f32 to vector<2x128xf32>
    %349 = arith.cmpf oge, %347, %348 : vector<2x128xf32>
    %cst_123 = arith.constant 2.000000e-01 : f32
    %350 = vector.broadcast %cst_123 : f32 to vector<2x128xf32>
    %351 = arith.mulf %350, %347 : vector<2x128xf32>
    %352 = arith.select %349, %347, %351 : vector<2x128xi1>, vector<2x128xf32>
    %c0_124 = arith.constant 0 : index
    %c0_125 = arith.constant 0 : index
    %c0_126 = arith.constant 0 : index
    %353 = vector.load %arg2[%c0_124, %c0_125, %c0_126] : memref<16x2x128xf32, #tpu.memory_space<vmem>>, vector<1x2x128xf32>
    %354 = vector.shape_cast %353 : vector<1x2x128xf32> to vector<2x128xf32>
    %355 = arith.addf %217, %354 : vector<2x128xf32>
    %c1_127 = arith.constant 1 : index
    %c0_128 = arith.constant 0 : index
    %c0_129 = arith.constant 0 : index
    %356 = vector.load %arg2[%c1_127, %c0_128, %c0_129] : memref<16x2x128xf32, #tpu.memory_space<vmem>>, vector<1x2x128xf32>
    %357 = vector.shape_cast %356 : vector<1x2x128xf32> to vector<2x128xf32>
    %358 = arith.addf %226, %357 : vector<2x128xf32>
    %c2_130 = arith.constant 2 : index
    %c0_131 = arith.constant 0 : index
    %c0_132 = arith.constant 0 : index
    %359 = vector.load %arg2[%c2_130, %c0_131, %c0_132] : memref<16x2x128xf32, #tpu.memory_space<vmem>>, vector<1x2x128xf32>
    %360 = vector.shape_cast %359 : vector<1x2x128xf32> to vector<2x128xf32>
    %361 = arith.addf %235, %360 : vector<2x128xf32>
    %c3_133 = arith.constant 3 : index
    %c0_134 = arith.constant 0 : index
    %c0_135 = arith.constant 0 : index
    %362 = vector.load %arg2[%c3_133, %c0_134, %c0_135] : memref<16x2x128xf32, #tpu.memory_space<vmem>>, vector<1x2x128xf32>
    %363 = vector.shape_cast %362 : vector<1x2x128xf32> to vector<2x128xf32>
    %364 = arith.addf %244, %363 : vector<2x128xf32>
    %c4_136 = arith.constant 4 : index
    %c0_137 = arith.constant 0 : index
    %c0_138 = arith.constant 0 : index
    %365 = vector.load %arg2[%c4_136, %c0_137, %c0_138] : memref<16x2x128xf32, #tpu.memory_space<vmem>>, vector<1x2x128xf32>
    %366 = vector.shape_cast %365 : vector<1x2x128xf32> to vector<2x128xf32>
    %367 = arith.addf %253, %366 : vector<2x128xf32>
    %c5_139 = arith.constant 5 : index
    %c0_140 = arith.constant 0 : index
    %c0_141 = arith.constant 0 : index
    %368 = vector.load %arg2[%c5_139, %c0_140, %c0_141] : memref<16x2x128xf32, #tpu.memory_space<vmem>>, vector<1x2x128xf32>
    %369 = vector.shape_cast %368 : vector<1x2x128xf32> to vector<2x128xf32>
    %370 = arith.addf %262, %369 : vector<2x128xf32>
    %c6_142 = arith.constant 6 : index
    %c0_143 = arith.constant 0 : index
    %c0_144 = arith.constant 0 : index
    %371 = vector.load %arg2[%c6_142, %c0_143, %c0_144] : memref<16x2x128xf32, #tpu.memory_space<vmem>>, vector<1x2x128xf32>
    %372 = vector.shape_cast %371 : vector<1x2x128xf32> to vector<2x128xf32>
    %373 = arith.addf %271, %372 : vector<2x128xf32>
    %c7_145 = arith.constant 7 : index
    %c0_146 = arith.constant 0 : index
    %c0_147 = arith.constant 0 : index
    %374 = vector.load %arg2[%c7_145, %c0_146, %c0_147] : memref<16x2x128xf32, #tpu.memory_space<vmem>>, vector<1x2x128xf32>
    %375 = vector.shape_cast %374 : vector<1x2x128xf32> to vector<2x128xf32>
    %376 = arith.addf %280, %375 : vector<2x128xf32>
    %c8_148 = arith.constant 8 : index
    %c0_149 = arith.constant 0 : index
    %c0_150 = arith.constant 0 : index
    %377 = vector.load %arg2[%c8_148, %c0_149, %c0_150] : memref<16x2x128xf32, #tpu.memory_space<vmem>>, vector<1x2x128xf32>
    %378 = vector.shape_cast %377 : vector<1x2x128xf32> to vector<2x128xf32>
    %379 = arith.addf %289, %378 : vector<2x128xf32>
    %c9_151 = arith.constant 9 : index
    %c0_152 = arith.constant 0 : index
    %c0_153 = arith.constant 0 : index
    %380 = vector.load %arg2[%c9_151, %c0_152, %c0_153] : memref<16x2x128xf32, #tpu.memory_space<vmem>>, vector<1x2x128xf32>
    %381 = vector.shape_cast %380 : vector<1x2x128xf32> to vector<2x128xf32>
    %382 = arith.addf %298, %381 : vector<2x128xf32>
    %c10_154 = arith.constant 10 : index
    %c0_155 = arith.constant 0 : index
    %c0_156 = arith.constant 0 : index
    %383 = vector.load %arg2[%c10_154, %c0_155, %c0_156] : memref<16x2x128xf32, #tpu.memory_space<vmem>>, vector<1x2x128xf32>
    %384 = vector.shape_cast %383 : vector<1x2x128xf32> to vector<2x128xf32>
    %385 = arith.addf %307, %384 : vector<2x128xf32>
    %c11_157 = arith.constant 11 : index
    %c0_158 = arith.constant 0 : index
    %c0_159 = arith.constant 0 : index
    %386 = vector.load %arg2[%c11_157, %c0_158, %c0_159] : memref<16x2x128xf32, #tpu.memory_space<vmem>>, vector<1x2x128xf32>
    %387 = vector.shape_cast %386 : vector<1x2x128xf32> to vector<2x128xf32>
    %388 = arith.addf %316, %387 : vector<2x128xf32>
    %c12_160 = arith.constant 12 : index
    %c0_161 = arith.constant 0 : index
    %c0_162 = arith.constant 0 : index
    %389 = vector.load %arg2[%c12_160, %c0_161, %c0_162] : memref<16x2x128xf32, #tpu.memory_space<vmem>>, vector<1x2x128xf32>
    %390 = vector.shape_cast %389 : vector<1x2x128xf32> to vector<2x128xf32>
    %391 = arith.addf %325, %390 : vector<2x128xf32>
    %c13_163 = arith.constant 13 : index
    %c0_164 = arith.constant 0 : index
    %c0_165 = arith.constant 0 : index
    %392 = vector.load %arg2[%c13_163, %c0_164, %c0_165] : memref<16x2x128xf32, #tpu.memory_space<vmem>>, vector<1x2x128xf32>
    %393 = vector.shape_cast %392 : vector<1x2x128xf32> to vector<2x128xf32>
    %394 = arith.addf %334, %393 : vector<2x128xf32>
    %c14_166 = arith.constant 14 : index
    %c0_167 = arith.constant 0 : index
    %c0_168 = arith.constant 0 : index
    %395 = vector.load %arg2[%c14_166, %c0_167, %c0_168] : memref<16x2x128xf32, #tpu.memory_space<vmem>>, vector<1x2x128xf32>
    %396 = vector.shape_cast %395 : vector<1x2x128xf32> to vector<2x128xf32>
    %397 = arith.addf %343, %396 : vector<2x128xf32>
    %c15_169 = arith.constant 15 : index
    %c0_170 = arith.constant 0 : index
    %c0_171 = arith.constant 0 : index
    %398 = vector.load %arg2[%c15_169, %c0_170, %c0_171] : memref<16x2x128xf32, #tpu.memory_space<vmem>>, vector<1x2x128xf32>
    %399 = vector.shape_cast %398 : vector<1x2x128xf32> to vector<2x128xf32>
    %400 = arith.addf %352, %399 : vector<2x128xf32>
    %c1_172 = arith.constant 1 : index
    %c0_173 = arith.constant 0 : index
    %c0_174 = arith.constant 0 : index
    %401 = vector.load %arg4[%c1_172, %c0_173, %c0_174] : memref<23x128x128xf32, #tpu.memory_space<vmem>>, vector<1x128x128xf32>
    %402 = vector.shape_cast %401 : vector<1x128x128xf32> to vector<128x128xf32>
    %c2_175 = arith.constant 2 : index
    %c0_176 = arith.constant 0 : index
    %c0_177 = arith.constant 0 : index
    %403 = vector.load %arg4[%c2_175, %c0_176, %c0_177] : memref<23x128x128xf32, #tpu.memory_space<vmem>>, vector<1x128x128xf32>
    %404 = vector.shape_cast %403 : vector<1x128x128xf32> to vector<128x128xf32>
    %c3_178 = arith.constant 3 : index
    %c0_179 = arith.constant 0 : index
    %405 = vector.load %arg5[%c3_178, %c0_179] : memref<28x128xf32, #tpu.memory_space<vmem>>, vector<1x128xf32>
    %cst_180 = arith.constant dense<0.000000e+00> : vector<2x128xf32>
    %406 = tpu.matmul %355, %402, %cst_180 {dimension_numbers = #tpu.dot_dimension_numbers<[1], [0], [0], [1], [0, 0, 1, 1], [], []>} : vector<2x128xf32>, vector<128x128xf32>, vector<2x128xf32> -> vector<2x128xf32>
    %cst_181 = arith.constant dense<0.000000e+00> : vector<2x128xf32>
    %407 = tpu.matmul %358, %404, %cst_181 {dimension_numbers = #tpu.dot_dimension_numbers<[1], [0], [0], [1], [0, 0, 1, 1], [], []>} : vector<2x128xf32>, vector<128x128xf32>, vector<2x128xf32> -> vector<2x128xf32>
    %408 = arith.addf %406, %407 : vector<2x128xf32>
    %409 = vector.broadcast %405 : vector<1x128xf32> to vector<2x128xf32>
    %410 = arith.addf %408, %409 : vector<2x128xf32>
    %cst_182 = arith.constant dense<0.000000e+00> : vector<2x128xf32>
    %411 = tpu.matmul %361, %402, %cst_182 {dimension_numbers = #tpu.dot_dimension_numbers<[1], [0], [0], [1], [0, 0, 1, 1], [], []>} : vector<2x128xf32>, vector<128x128xf32>, vector<2x128xf32> -> vector<2x128xf32>
    %cst_183 = arith.constant dense<0.000000e+00> : vector<2x128xf32>
    %412 = tpu.matmul %364, %404, %cst_183 {dimension_numbers = #tpu.dot_dimension_numbers<[1], [0], [0], [1], [0, 0, 1, 1], [], []>} : vector<2x128xf32>, vector<128x128xf32>, vector<2x128xf32> -> vector<2x128xf32>
    %413 = arith.addf %411, %412 : vector<2x128xf32>
    %414 = vector.broadcast %405 : vector<1x128xf32> to vector<2x128xf32>
    %415 = arith.addf %413, %414 : vector<2x128xf32>
    %cst_184 = arith.constant dense<0.000000e+00> : vector<2x128xf32>
    %416 = tpu.matmul %367, %402, %cst_184 {dimension_numbers = #tpu.dot_dimension_numbers<[1], [0], [0], [1], [0, 0, 1, 1], [], []>} : vector<2x128xf32>, vector<128x128xf32>, vector<2x128xf32> -> vector<2x128xf32>
    %cst_185 = arith.constant dense<0.000000e+00> : vector<2x128xf32>
    %417 = tpu.matmul %370, %404, %cst_185 {dimension_numbers = #tpu.dot_dimension_numbers<[1], [0], [0], [1], [0, 0, 1, 1], [], []>} : vector<2x128xf32>, vector<128x128xf32>, vector<2x128xf32> -> vector<2x128xf32>
    %418 = arith.addf %416, %417 : vector<2x128xf32>
    %419 = vector.broadcast %405 : vector<1x128xf32> to vector<2x128xf32>
    %420 = arith.addf %418, %419 : vector<2x128xf32>
    %cst_186 = arith.constant dense<0.000000e+00> : vector<2x128xf32>
    %421 = tpu.matmul %373, %402, %cst_186 {dimension_numbers = #tpu.dot_dimension_numbers<[1], [0], [0], [1], [0, 0, 1, 1], [], []>} : vector<2x128xf32>, vector<128x128xf32>, vector<2x128xf32> -> vector<2x128xf32>
    %cst_187 = arith.constant dense<0.000000e+00> : vector<2x128xf32>
    %422 = tpu.matmul %376, %404, %cst_187 {dimension_numbers = #tpu.dot_dimension_numbers<[1], [0], [0], [1], [0, 0, 1, 1], [], []>} : vector<2x128xf32>, vector<128x128xf32>, vector<2x128xf32> -> vector<2x128xf32>
    %423 = arith.addf %421, %422 : vector<2x128xf32>
    %424 = vector.broadcast %405 : vector<1x128xf32> to vector<2x128xf32>
    %425 = arith.addf %423, %424 : vector<2x128xf32>
    %cst_188 = arith.constant dense<0.000000e+00> : vector<2x128xf32>
    %426 = tpu.matmul %379, %402, %cst_188 {dimension_numbers = #tpu.dot_dimension_numbers<[1], [0], [0], [1], [0, 0, 1, 1], [], []>} : vector<2x128xf32>, vector<128x128xf32>, vector<2x128xf32> -> vector<2x128xf32>
    %cst_189 = arith.constant dense<0.000000e+00> : vector<2x128xf32>
    %427 = tpu.matmul %382, %404, %cst_189 {dimension_numbers = #tpu.dot_dimension_numbers<[1], [0], [0], [1], [0, 0, 1, 1], [], []>} : vector<2x128xf32>, vector<128x128xf32>, vector<2x128xf32> -> vector<2x128xf32>
    %428 = arith.addf %426, %427 : vector<2x128xf32>
    %429 = vector.broadcast %405 : vector<1x128xf32> to vector<2x128xf32>
    %430 = arith.addf %428, %429 : vector<2x128xf32>
    %cst_190 = arith.constant dense<0.000000e+00> : vector<2x128xf32>
    %431 = tpu.matmul %385, %402, %cst_190 {dimension_numbers = #tpu.dot_dimension_numbers<[1], [0], [0], [1], [0, 0, 1, 1], [], []>} : vector<2x128xf32>, vector<128x128xf32>, vector<2x128xf32> -> vector<2x128xf32>
    %cst_191 = arith.constant dense<0.000000e+00> : vector<2x128xf32>
    %432 = tpu.matmul %388, %404, %cst_191 {dimension_numbers = #tpu.dot_dimension_numbers<[1], [0], [0], [1], [0, 0, 1, 1], [], []>} : vector<2x128xf32>, vector<128x128xf32>, vector<2x128xf32> -> vector<2x128xf32>
    %433 = arith.addf %431, %432 : vector<2x128xf32>
    %434 = vector.broadcast %405 : vector<1x128xf32> to vector<2x128xf32>
    %435 = arith.addf %433, %434 : vector<2x128xf32>
    %cst_192 = arith.constant dense<0.000000e+00> : vector<2x128xf32>
    %436 = tpu.matmul %391, %402, %cst_192 {dimension_numbers = #tpu.dot_dimension_numbers<[1], [0], [0], [1], [0, 0, 1, 1], [], []>} : vector<2x128xf32>, vector<128x128xf32>, vector<2x128xf32> -> vector<2x128xf32>
    %cst_193 = arith.constant dense<0.000000e+00> : vector<2x128xf32>
    %437 = tpu.matmul %394, %404, %cst_193 {dimension_numbers = #tpu.dot_dimension_numbers<[1], [0], [0], [1], [0, 0, 1, 1], [], []>} : vector<2x128xf32>, vector<128x128xf32>, vector<2x128xf32> -> vector<2x128xf32>
    %438 = arith.addf %436, %437 : vector<2x128xf32>
    %439 = vector.broadcast %405 : vector<1x128xf32> to vector<2x128xf32>
    %440 = arith.addf %438, %439 : vector<2x128xf32>
    %cst_194 = arith.constant dense<0.000000e+00> : vector<2x128xf32>
    %441 = tpu.matmul %397, %402, %cst_194 {dimension_numbers = #tpu.dot_dimension_numbers<[1], [0], [0], [1], [0, 0, 1, 1], [], []>} : vector<2x128xf32>, vector<128x128xf32>, vector<2x128xf32> -> vector<2x128xf32>
    %cst_195 = arith.constant dense<0.000000e+00> : vector<2x128xf32>
    %442 = tpu.matmul %400, %404, %cst_195 {dimension_numbers = #tpu.dot_dimension_numbers<[1], [0], [0], [1], [0, 0, 1, 1], [], []>} : vector<2x128xf32>, vector<128x128xf32>, vector<2x128xf32> -> vector<2x128xf32>
    %443 = arith.addf %441, %442 : vector<2x128xf32>
    %444 = vector.broadcast %405 : vector<1x128xf32> to vector<2x128xf32>
    %445 = arith.addf %443, %444 : vector<2x128xf32>
    %cst_196 = arith.constant dense<0.000000e+00> : vector<128xf32>
    %446 = vector.multi_reduction <add>, %410, %cst_196 [0] : vector<2x128xf32> to vector<128xf32>
    %447 = vector.shape_cast %446 : vector<128xf32> to vector<1x128xf32>
    %448 = arith.mulf %410, %410 : vector<2x128xf32>
    %cst_197 = arith.constant dense<0.000000e+00> : vector<128xf32>
    %449 = vector.multi_reduction <add>, %448, %cst_197 [0] : vector<2x128xf32> to vector<128xf32>
    %450 = vector.shape_cast %449 : vector<128xf32> to vector<1x128xf32>
    %cst_198 = arith.constant dense<0.000000e+00> : vector<128xf32>
    %451 = vector.multi_reduction <add>, %415, %cst_198 [0] : vector<2x128xf32> to vector<128xf32>
    %452 = vector.shape_cast %451 : vector<128xf32> to vector<1x128xf32>
    %453 = arith.addf %447, %452 : vector<1x128xf32>
    %454 = arith.mulf %415, %415 : vector<2x128xf32>
    %cst_199 = arith.constant dense<0.000000e+00> : vector<128xf32>
    %455 = vector.multi_reduction <add>, %454, %cst_199 [0] : vector<2x128xf32> to vector<128xf32>
    %456 = vector.shape_cast %455 : vector<128xf32> to vector<1x128xf32>
    %457 = arith.addf %450, %456 : vector<1x128xf32>
    %cst_200 = arith.constant dense<0.000000e+00> : vector<128xf32>
    %458 = vector.multi_reduction <add>, %420, %cst_200 [0] : vector<2x128xf32> to vector<128xf32>
    %459 = vector.shape_cast %458 : vector<128xf32> to vector<1x128xf32>
    %460 = arith.addf %453, %459 : vector<1x128xf32>
    %461 = arith.mulf %420, %420 : vector<2x128xf32>
    %cst_201 = arith.constant dense<0.000000e+00> : vector<128xf32>
    %462 = vector.multi_reduction <add>, %461, %cst_201 [0] : vector<2x128xf32> to vector<128xf32>
    %463 = vector.shape_cast %462 : vector<128xf32> to vector<1x128xf32>
    %464 = arith.addf %457, %463 : vector<1x128xf32>
    %cst_202 = arith.constant dense<0.000000e+00> : vector<128xf32>
    %465 = vector.multi_reduction <add>, %425, %cst_202 [0] : vector<2x128xf32> to vector<128xf32>
    %466 = vector.shape_cast %465 : vector<128xf32> to vector<1x128xf32>
    %467 = arith.addf %460, %466 : vector<1x128xf32>
    %468 = arith.mulf %425, %425 : vector<2x128xf32>
    %cst_203 = arith.constant dense<0.000000e+00> : vector<128xf32>
    %469 = vector.multi_reduction <add>, %468, %cst_203 [0] : vector<2x128xf32> to vector<128xf32>
    %470 = vector.shape_cast %469 : vector<128xf32> to vector<1x128xf32>
    %471 = arith.addf %464, %470 : vector<1x128xf32>
    %cst_204 = arith.constant dense<0.000000e+00> : vector<128xf32>
    %472 = vector.multi_reduction <add>, %430, %cst_204 [0] : vector<2x128xf32> to vector<128xf32>
    %473 = vector.shape_cast %472 : vector<128xf32> to vector<1x128xf32>
    %474 = arith.addf %467, %473 : vector<1x128xf32>
    %475 = arith.mulf %430, %430 : vector<2x128xf32>
    %cst_205 = arith.constant dense<0.000000e+00> : vector<128xf32>
    %476 = vector.multi_reduction <add>, %475, %cst_205 [0] : vector<2x128xf32> to vector<128xf32>
    %477 = vector.shape_cast %476 : vector<128xf32> to vector<1x128xf32>
    %478 = arith.addf %471, %477 : vector<1x128xf32>
    %cst_206 = arith.constant dense<0.000000e+00> : vector<128xf32>
    %479 = vector.multi_reduction <add>, %435, %cst_206 [0] : vector<2x128xf32> to vector<128xf32>
    %480 = vector.shape_cast %479 : vector<128xf32> to vector<1x128xf32>
    %481 = arith.addf %474, %480 : vector<1x128xf32>
    %482 = arith.mulf %435, %435 : vector<2x128xf32>
    %cst_207 = arith.constant dense<0.000000e+00> : vector<128xf32>
    %483 = vector.multi_reduction <add>, %482, %cst_207 [0] : vector<2x128xf32> to vector<128xf32>
    %484 = vector.shape_cast %483 : vector<128xf32> to vector<1x128xf32>
    %485 = arith.addf %478, %484 : vector<1x128xf32>
    %cst_208 = arith.constant dense<0.000000e+00> : vector<128xf32>
    %486 = vector.multi_reduction <add>, %440, %cst_208 [0] : vector<2x128xf32> to vector<128xf32>
    %487 = vector.shape_cast %486 : vector<128xf32> to vector<1x128xf32>
    %488 = arith.addf %481, %487 : vector<1x128xf32>
    %489 = arith.mulf %440, %440 : vector<2x128xf32>
    %cst_209 = arith.constant dense<0.000000e+00> : vector<128xf32>
    %490 = vector.multi_reduction <add>, %489, %cst_209 [0] : vector<2x128xf32> to vector<128xf32>
    %491 = vector.shape_cast %490 : vector<128xf32> to vector<1x128xf32>
    %492 = arith.addf %485, %491 : vector<1x128xf32>
    %cst_210 = arith.constant dense<0.000000e+00> : vector<128xf32>
    %493 = vector.multi_reduction <add>, %445, %cst_210 [0] : vector<2x128xf32> to vector<128xf32>
    %494 = vector.shape_cast %493 : vector<128xf32> to vector<1x128xf32>
    %495 = arith.addf %488, %494 : vector<1x128xf32>
    %496 = arith.mulf %445, %445 : vector<2x128xf32>
    %cst_211 = arith.constant dense<0.000000e+00> : vector<128xf32>
    %497 = vector.multi_reduction <add>, %496, %cst_211 [0] : vector<2x128xf32> to vector<128xf32>
    %498 = vector.shape_cast %497 : vector<128xf32> to vector<1x128xf32>
    %499 = arith.addf %492, %498 : vector<1x128xf32>
    %cst_212 = arith.constant 6.250000e-02 : f32
    %500 = vector.broadcast %cst_212 : f32 to vector<1x128xf32>
    %501 = arith.mulf %495, %500 : vector<1x128xf32>
    %cst_213 = arith.constant 6.250000e-02 : f32
    %502 = vector.broadcast %cst_213 : f32 to vector<1x128xf32>
    %503 = arith.mulf %499, %502 : vector<1x128xf32>
    %504 = arith.mulf %501, %501 : vector<1x128xf32>
    %505 = arith.subf %503, %504 : vector<1x128xf32>
    %cst_214 = arith.constant 0.000000e+00 : f32
    %506 = vector.broadcast %cst_214 : f32 to vector<1x128xf32>
    %507 = arith.maximumf %505, %506 : vector<1x128xf32>
    %cst_215 = arith.constant 9.99999974E-6 : f32
    %508 = vector.broadcast %cst_215 : f32 to vector<1x128xf32>
    %509 = arith.addf %507, %508 : vector<1x128xf32>
    %510 = math.rsqrt %509 : vector<1x128xf32>
    %c4_216 = arith.constant 4 : index
    %c0_217 = arith.constant 0 : index
    %511 = vector.load %arg5[%c4_216, %c0_217] : memref<28x128xf32, #tpu.memory_space<vmem>>, vector<1x128xf32>
    %512 = arith.mulf %510, %511 : vector<1x128xf32>
    %c5_218 = arith.constant 5 : index
    %c0_219 = arith.constant 0 : index
    %513 = vector.load %arg5[%c5_218, %c0_219] : memref<28x128xf32, #tpu.memory_space<vmem>>, vector<1x128xf32>
    %514 = arith.mulf %501, %512 : vector<1x128xf32>
    %515 = arith.subf %513, %514 : vector<1x128xf32>
    %516 = vector.broadcast %512 : vector<1x128xf32> to vector<2x128xf32>
    %517 = arith.mulf %410, %516 : vector<2x128xf32>
    %518 = vector.broadcast %515 : vector<1x128xf32> to vector<2x128xf32>
    %519 = arith.addf %517, %518 : vector<2x128xf32>
    %cst_220 = arith.constant 0.000000e+00 : f32
    %520 = vector.broadcast %cst_220 : f32 to vector<2x128xf32>
    %521 = arith.cmpf oge, %519, %520 : vector<2x128xf32>
    %cst_221 = arith.constant 2.000000e-01 : f32
    %522 = vector.broadcast %cst_221 : f32 to vector<2x128xf32>
    %523 = arith.mulf %522, %519 : vector<2x128xf32>
    %524 = arith.select %521, %519, %523 : vector<2x128xi1>, vector<2x128xf32>
    %525 = vector.broadcast %512 : vector<1x128xf32> to vector<2x128xf32>
    %526 = arith.mulf %415, %525 : vector<2x128xf32>
    %527 = vector.broadcast %515 : vector<1x128xf32> to vector<2x128xf32>
    %528 = arith.addf %526, %527 : vector<2x128xf32>
    %cst_222 = arith.constant 0.000000e+00 : f32
    %529 = vector.broadcast %cst_222 : f32 to vector<2x128xf32>
    %530 = arith.cmpf oge, %528, %529 : vector<2x128xf32>
    %cst_223 = arith.constant 2.000000e-01 : f32
    %531 = vector.broadcast %cst_223 : f32 to vector<2x128xf32>
    %532 = arith.mulf %531, %528 : vector<2x128xf32>
    %533 = arith.select %530, %528, %532 : vector<2x128xi1>, vector<2x128xf32>
    %534 = vector.broadcast %512 : vector<1x128xf32> to vector<2x128xf32>
    %535 = arith.mulf %420, %534 : vector<2x128xf32>
    %536 = vector.broadcast %515 : vector<1x128xf32> to vector<2x128xf32>
    %537 = arith.addf %535, %536 : vector<2x128xf32>
    %cst_224 = arith.constant 0.000000e+00 : f32
    %538 = vector.broadcast %cst_224 : f32 to vector<2x128xf32>
    %539 = arith.cmpf oge, %537, %538 : vector<2x128xf32>
    %cst_225 = arith.constant 2.000000e-01 : f32
    %540 = vector.broadcast %cst_225 : f32 to vector<2x128xf32>
    %541 = arith.mulf %540, %537 : vector<2x128xf32>
    %542 = arith.select %539, %537, %541 : vector<2x128xi1>, vector<2x128xf32>
    %543 = vector.broadcast %512 : vector<1x128xf32> to vector<2x128xf32>
    %544 = arith.mulf %425, %543 : vector<2x128xf32>
    %545 = vector.broadcast %515 : vector<1x128xf32> to vector<2x128xf32>
    %546 = arith.addf %544, %545 : vector<2x128xf32>
    %cst_226 = arith.constant 0.000000e+00 : f32
    %547 = vector.broadcast %cst_226 : f32 to vector<2x128xf32>
    %548 = arith.cmpf oge, %546, %547 : vector<2x128xf32>
    %cst_227 = arith.constant 2.000000e-01 : f32
    %549 = vector.broadcast %cst_227 : f32 to vector<2x128xf32>
    %550 = arith.mulf %549, %546 : vector<2x128xf32>
    %551 = arith.select %548, %546, %550 : vector<2x128xi1>, vector<2x128xf32>
    %552 = vector.broadcast %512 : vector<1x128xf32> to vector<2x128xf32>
    %553 = arith.mulf %430, %552 : vector<2x128xf32>
    %554 = vector.broadcast %515 : vector<1x128xf32> to vector<2x128xf32>
    %555 = arith.addf %553, %554 : vector<2x128xf32>
    %cst_228 = arith.constant 0.000000e+00 : f32
    %556 = vector.broadcast %cst_228 : f32 to vector<2x128xf32>
    %557 = arith.cmpf oge, %555, %556 : vector<2x128xf32>
    %cst_229 = arith.constant 2.000000e-01 : f32
    %558 = vector.broadcast %cst_229 : f32 to vector<2x128xf32>
    %559 = arith.mulf %558, %555 : vector<2x128xf32>
    %560 = arith.select %557, %555, %559 : vector<2x128xi1>, vector<2x128xf32>
    %561 = vector.broadcast %512 : vector<1x128xf32> to vector<2x128xf32>
    %562 = arith.mulf %435, %561 : vector<2x128xf32>
    %563 = vector.broadcast %515 : vector<1x128xf32> to vector<2x128xf32>
    %564 = arith.addf %562, %563 : vector<2x128xf32>
    %cst_230 = arith.constant 0.000000e+00 : f32
    %565 = vector.broadcast %cst_230 : f32 to vector<2x128xf32>
    %566 = arith.cmpf oge, %564, %565 : vector<2x128xf32>
    %cst_231 = arith.constant 2.000000e-01 : f32
    %567 = vector.broadcast %cst_231 : f32 to vector<2x128xf32>
    %568 = arith.mulf %567, %564 : vector<2x128xf32>
    %569 = arith.select %566, %564, %568 : vector<2x128xi1>, vector<2x128xf32>
    %570 = vector.broadcast %512 : vector<1x128xf32> to vector<2x128xf32>
    %571 = arith.mulf %440, %570 : vector<2x128xf32>
    %572 = vector.broadcast %515 : vector<1x128xf32> to vector<2x128xf32>
    %573 = arith.addf %571, %572 : vector<2x128xf32>
    %cst_232 = arith.constant 0.000000e+00 : f32
    %574 = vector.broadcast %cst_232 : f32 to vector<2x128xf32>
    %575 = arith.cmpf oge, %573, %574 : vector<2x128xf32>
    %cst_233 = arith.constant 2.000000e-01 : f32
    %576 = vector.broadcast %cst_233 : f32 to vector<2x128xf32>
    %577 = arith.mulf %576, %573 : vector<2x128xf32>
    %578 = arith.select %575, %573, %577 : vector<2x128xi1>, vector<2x128xf32>
    %579 = vector.broadcast %512 : vector<1x128xf32> to vector<2x128xf32>
    %580 = arith.mulf %445, %579 : vector<2x128xf32>
    %581 = vector.broadcast %515 : vector<1x128xf32> to vector<2x128xf32>
    %582 = arith.addf %580, %581 : vector<2x128xf32>
    %cst_234 = arith.constant 0.000000e+00 : f32
    %583 = vector.broadcast %cst_234 : f32 to vector<2x128xf32>
    %584 = arith.cmpf oge, %582, %583 : vector<2x128xf32>
    %cst_235 = arith.constant 2.000000e-01 : f32
    %585 = vector.broadcast %cst_235 : f32 to vector<2x128xf32>
    %586 = arith.mulf %585, %582 : vector<2x128xf32>
    %587 = arith.select %584, %582, %586 : vector<2x128xi1>, vector<2x128xf32>
    %c3_236 = arith.constant 3 : index
    %c0_237 = arith.constant 0 : index
    %c0_238 = arith.constant 0 : index
    %588 = vector.load %arg4[%c3_236, %c0_237, %c0_238] : memref<23x128x128xf32, #tpu.memory_space<vmem>>, vector<1x128x128xf32>
    %589 = vector.shape_cast %588 : vector<1x128x128xf32> to vector<128x128xf32>
    %c4_239 = arith.constant 4 : index
    %c0_240 = arith.constant 0 : index
    %c0_241 = arith.constant 0 : index
    %590 = vector.load %arg4[%c4_239, %c0_240, %c0_241] : memref<23x128x128xf32, #tpu.memory_space<vmem>>, vector<1x128x128xf32>
    %591 = vector.shape_cast %590 : vector<1x128x128xf32> to vector<128x128xf32>
    %c6_242 = arith.constant 6 : index
    %c0_243 = arith.constant 0 : index
    %592 = vector.load %arg5[%c6_242, %c0_243] : memref<28x128xf32, #tpu.memory_space<vmem>>, vector<1x128xf32>
    %cst_244 = arith.constant dense<0.000000e+00> : vector<2x128xf32>
    %593 = tpu.matmul %524, %589, %cst_244 {dimension_numbers = #tpu.dot_dimension_numbers<[1], [0], [0], [1], [0, 0, 1, 1], [], []>} : vector<2x128xf32>, vector<128x128xf32>, vector<2x128xf32> -> vector<2x128xf32>
    %cst_245 = arith.constant dense<0.000000e+00> : vector<2x128xf32>
    %594 = tpu.matmul %533, %591, %cst_245 {dimension_numbers = #tpu.dot_dimension_numbers<[1], [0], [0], [1], [0, 0, 1, 1], [], []>} : vector<2x128xf32>, vector<128x128xf32>, vector<2x128xf32> -> vector<2x128xf32>
    %595 = arith.addf %593, %594 : vector<2x128xf32>
    %596 = vector.broadcast %592 : vector<1x128xf32> to vector<2x128xf32>
    %597 = arith.addf %595, %596 : vector<2x128xf32>
    %cst_246 = arith.constant dense<0.000000e+00> : vector<2x128xf32>
    %598 = tpu.matmul %542, %589, %cst_246 {dimension_numbers = #tpu.dot_dimension_numbers<[1], [0], [0], [1], [0, 0, 1, 1], [], []>} : vector<2x128xf32>, vector<128x128xf32>, vector<2x128xf32> -> vector<2x128xf32>
    %cst_247 = arith.constant dense<0.000000e+00> : vector<2x128xf32>
    %599 = tpu.matmul %551, %591, %cst_247 {dimension_numbers = #tpu.dot_dimension_numbers<[1], [0], [0], [1], [0, 0, 1, 1], [], []>} : vector<2x128xf32>, vector<128x128xf32>, vector<2x128xf32> -> vector<2x128xf32>
    %600 = arith.addf %598, %599 : vector<2x128xf32>
    %601 = vector.broadcast %592 : vector<1x128xf32> to vector<2x128xf32>
    %602 = arith.addf %600, %601 : vector<2x128xf32>
    %cst_248 = arith.constant dense<0.000000e+00> : vector<2x128xf32>
    %603 = tpu.matmul %560, %589, %cst_248 {dimension_numbers = #tpu.dot_dimension_numbers<[1], [0], [0], [1], [0, 0, 1, 1], [], []>} : vector<2x128xf32>, vector<128x128xf32>, vector<2x128xf32> -> vector<2x128xf32>
    %cst_249 = arith.constant dense<0.000000e+00> : vector<2x128xf32>
    %604 = tpu.matmul %569, %591, %cst_249 {dimension_numbers = #tpu.dot_dimension_numbers<[1], [0], [0], [1], [0, 0, 1, 1], [], []>} : vector<2x128xf32>, vector<128x128xf32>, vector<2x128xf32> -> vector<2x128xf32>
    %605 = arith.addf %603, %604 : vector<2x128xf32>
    %606 = vector.broadcast %592 : vector<1x128xf32> to vector<2x128xf32>
    %607 = arith.addf %605, %606 : vector<2x128xf32>
    %cst_250 = arith.constant dense<0.000000e+00> : vector<2x128xf32>
    %608 = tpu.matmul %578, %589, %cst_250 {dimension_numbers = #tpu.dot_dimension_numbers<[1], [0], [0], [1], [0, 0, 1, 1], [], []>} : vector<2x128xf32>, vector<128x128xf32>, vector<2x128xf32> -> vector<2x128xf32>
    %cst_251 = arith.constant dense<0.000000e+00> : vector<2x128xf32>
    %609 = tpu.matmul %587, %591, %cst_251 {dimension_numbers = #tpu.dot_dimension_numbers<[1], [0], [0], [1], [0, 0, 1, 1], [], []>} : vector<2x128xf32>, vector<128x128xf32>, vector<2x128xf32> -> vector<2x128xf32>
    %610 = arith.addf %608, %609 : vector<2x128xf32>
    %611 = vector.broadcast %592 : vector<1x128xf32> to vector<2x128xf32>
    %612 = arith.addf %610, %611 : vector<2x128xf32>
    %cst_252 = arith.constant dense<0.000000e+00> : vector<128xf32>
    %613 = vector.multi_reduction <add>, %597, %cst_252 [0] : vector<2x128xf32> to vector<128xf32>
    %614 = vector.shape_cast %613 : vector<128xf32> to vector<1x128xf32>
    %615 = arith.mulf %597, %597 : vector<2x128xf32>
    %cst_253 = arith.constant dense<0.000000e+00> : vector<128xf32>
    %616 = vector.multi_reduction <add>, %615, %cst_253 [0] : vector<2x128xf32> to vector<128xf32>
    %617 = vector.shape_cast %616 : vector<128xf32> to vector<1x128xf32>
    %cst_254 = arith.constant dense<0.000000e+00> : vector<128xf32>
    %618 = vector.multi_reduction <add>, %602, %cst_254 [0] : vector<2x128xf32> to vector<128xf32>
    %619 = vector.shape_cast %618 : vector<128xf32> to vector<1x128xf32>
    %620 = arith.addf %614, %619 : vector<1x128xf32>
    %621 = arith.mulf %602, %602 : vector<2x128xf32>
    %cst_255 = arith.constant dense<0.000000e+00> : vector<128xf32>
    %622 = vector.multi_reduction <add>, %621, %cst_255 [0] : vector<2x128xf32> to vector<128xf32>
    %623 = vector.shape_cast %622 : vector<128xf32> to vector<1x128xf32>
    %624 = arith.addf %617, %623 : vector<1x128xf32>
    %cst_256 = arith.constant dense<0.000000e+00> : vector<128xf32>
    %625 = vector.multi_reduction <add>, %607, %cst_256 [0] : vector<2x128xf32> to vector<128xf32>
    %626 = vector.shape_cast %625 : vector<128xf32> to vector<1x128xf32>
    %627 = arith.addf %620, %626 : vector<1x128xf32>
    %628 = arith.mulf %607, %607 : vector<2x128xf32>
    %cst_257 = arith.constant dense<0.000000e+00> : vector<128xf32>
    %629 = vector.multi_reduction <add>, %628, %cst_257 [0] : vector<2x128xf32> to vector<128xf32>
    %630 = vector.shape_cast %629 : vector<128xf32> to vector<1x128xf32>
    %631 = arith.addf %624, %630 : vector<1x128xf32>
    %cst_258 = arith.constant dense<0.000000e+00> : vector<128xf32>
    %632 = vector.multi_reduction <add>, %612, %cst_258 [0] : vector<2x128xf32> to vector<128xf32>
    %633 = vector.shape_cast %632 : vector<128xf32> to vector<1x128xf32>
    %634 = arith.addf %627, %633 : vector<1x128xf32>
    %635 = arith.mulf %612, %612 : vector<2x128xf32>
    %cst_259 = arith.constant dense<0.000000e+00> : vector<128xf32>
    %636 = vector.multi_reduction <add>, %635, %cst_259 [0] : vector<2x128xf32> to vector<128xf32>
    %637 = vector.shape_cast %636 : vector<128xf32> to vector<1x128xf32>
    %638 = arith.addf %631, %637 : vector<1x128xf32>
    %cst_260 = arith.constant 1.250000e-01 : f32
    %639 = vector.broadcast %cst_260 : f32 to vector<1x128xf32>
    %640 = arith.mulf %634, %639 : vector<1x128xf32>
    %cst_261 = arith.constant 1.250000e-01 : f32
    %641 = vector.broadcast %cst_261 : f32 to vector<1x128xf32>
    %642 = arith.mulf %638, %641 : vector<1x128xf32>
    %643 = arith.mulf %640, %640 : vector<1x128xf32>
    %644 = arith.subf %642, %643 : vector<1x128xf32>
    %cst_262 = arith.constant 0.000000e+00 : f32
    %645 = vector.broadcast %cst_262 : f32 to vector<1x128xf32>
    %646 = arith.maximumf %644, %645 : vector<1x128xf32>
    %cst_263 = arith.constant 9.99999974E-6 : f32
    %647 = vector.broadcast %cst_263 : f32 to vector<1x128xf32>
    %648 = arith.addf %646, %647 : vector<1x128xf32>
    %649 = math.rsqrt %648 : vector<1x128xf32>
    %c7_264 = arith.constant 7 : index
    %c0_265 = arith.constant 0 : index
    %650 = vector.load %arg5[%c7_264, %c0_265] : memref<28x128xf32, #tpu.memory_space<vmem>>, vector<1x128xf32>
    %651 = arith.mulf %649, %650 : vector<1x128xf32>
    %c8_266 = arith.constant 8 : index
    %c0_267 = arith.constant 0 : index
    %652 = vector.load %arg5[%c8_266, %c0_267] : memref<28x128xf32, #tpu.memory_space<vmem>>, vector<1x128xf32>
    %653 = arith.mulf %640, %651 : vector<1x128xf32>
    %654 = arith.subf %652, %653 : vector<1x128xf32>
    %655 = vector.broadcast %651 : vector<1x128xf32> to vector<2x128xf32>
    %656 = arith.mulf %597, %655 : vector<2x128xf32>
    %657 = vector.broadcast %654 : vector<1x128xf32> to vector<2x128xf32>
    %658 = arith.addf %656, %657 : vector<2x128xf32>
    %cst_268 = arith.constant 0.000000e+00 : f32
    %659 = vector.broadcast %cst_268 : f32 to vector<2x128xf32>
    %660 = arith.cmpf oge, %658, %659 : vector<2x128xf32>
    %cst_269 = arith.constant 2.000000e-01 : f32
    %661 = vector.broadcast %cst_269 : f32 to vector<2x128xf32>
    %662 = arith.mulf %661, %658 : vector<2x128xf32>
    %663 = arith.select %660, %658, %662 : vector<2x128xi1>, vector<2x128xf32>
    %664 = vector.broadcast %651 : vector<1x128xf32> to vector<2x128xf32>
    %665 = arith.mulf %602, %664 : vector<2x128xf32>
    %666 = vector.broadcast %654 : vector<1x128xf32> to vector<2x128xf32>
    %667 = arith.addf %665, %666 : vector<2x128xf32>
    %cst_270 = arith.constant 0.000000e+00 : f32
    %668 = vector.broadcast %cst_270 : f32 to vector<2x128xf32>
    %669 = arith.cmpf oge, %667, %668 : vector<2x128xf32>
    %cst_271 = arith.constant 2.000000e-01 : f32
    %670 = vector.broadcast %cst_271 : f32 to vector<2x128xf32>
    %671 = arith.mulf %670, %667 : vector<2x128xf32>
    %672 = arith.select %669, %667, %671 : vector<2x128xi1>, vector<2x128xf32>
    %673 = vector.broadcast %651 : vector<1x128xf32> to vector<2x128xf32>
    %674 = arith.mulf %607, %673 : vector<2x128xf32>
    %675 = vector.broadcast %654 : vector<1x128xf32> to vector<2x128xf32>
    %676 = arith.addf %674, %675 : vector<2x128xf32>
    %cst_272 = arith.constant 0.000000e+00 : f32
    %677 = vector.broadcast %cst_272 : f32 to vector<2x128xf32>
    %678 = arith.cmpf oge, %676, %677 : vector<2x128xf32>
    %cst_273 = arith.constant 2.000000e-01 : f32
    %679 = vector.broadcast %cst_273 : f32 to vector<2x128xf32>
    %680 = arith.mulf %679, %676 : vector<2x128xf32>
    %681 = arith.select %678, %676, %680 : vector<2x128xi1>, vector<2x128xf32>
    %682 = vector.broadcast %651 : vector<1x128xf32> to vector<2x128xf32>
    %683 = arith.mulf %612, %682 : vector<2x128xf32>
    %684 = vector.broadcast %654 : vector<1x128xf32> to vector<2x128xf32>
    %685 = arith.addf %683, %684 : vector<2x128xf32>
    %cst_274 = arith.constant 0.000000e+00 : f32
    %686 = vector.broadcast %cst_274 : f32 to vector<2x128xf32>
    %687 = arith.cmpf oge, %685, %686 : vector<2x128xf32>
    %cst_275 = arith.constant 2.000000e-01 : f32
    %688 = vector.broadcast %cst_275 : f32 to vector<2x128xf32>
    %689 = arith.mulf %688, %685 : vector<2x128xf32>
    %690 = arith.select %687, %685, %689 : vector<2x128xi1>, vector<2x128xf32>
    %c5_276 = arith.constant 5 : index
    %c0_277 = arith.constant 0 : index
    %c0_278 = arith.constant 0 : index
    %691 = vector.load %arg4[%c5_276, %c0_277, %c0_278] : memref<23x128x128xf32, #tpu.memory_space<vmem>>, vector<1x128x128xf32>
    %692 = vector.shape_cast %691 : vector<1x128x128xf32> to vector<128x128xf32>
    %c6_279 = arith.constant 6 : index
    %c0_280 = arith.constant 0 : index
    %c0_281 = arith.constant 0 : index
    %693 = vector.load %arg4[%c6_279, %c0_280, %c0_281] : memref<23x128x128xf32, #tpu.memory_space<vmem>>, vector<1x128x128xf32>
    %694 = vector.shape_cast %693 : vector<1x128x128xf32> to vector<128x128xf32>
    %c9_282 = arith.constant 9 : index
    %c0_283 = arith.constant 0 : index
    %695 = vector.load %arg5[%c9_282, %c0_283] : memref<28x128xf32, #tpu.memory_space<vmem>>, vector<1x128xf32>
    %cst_284 = arith.constant dense<0.000000e+00> : vector<2x128xf32>
    %696 = tpu.matmul %663, %692, %cst_284 {dimension_numbers = #tpu.dot_dimension_numbers<[1], [0], [0], [1], [0, 0, 1, 1], [], []>} : vector<2x128xf32>, vector<128x128xf32>, vector<2x128xf32> -> vector<2x128xf32>
    %cst_285 = arith.constant dense<0.000000e+00> : vector<2x128xf32>
    %697 = tpu.matmul %672, %694, %cst_285 {dimension_numbers = #tpu.dot_dimension_numbers<[1], [0], [0], [1], [0, 0, 1, 1], [], []>} : vector<2x128xf32>, vector<128x128xf32>, vector<2x128xf32> -> vector<2x128xf32>
    %698 = arith.addf %696, %697 : vector<2x128xf32>
    %699 = vector.broadcast %695 : vector<1x128xf32> to vector<2x128xf32>
    %700 = arith.addf %698, %699 : vector<2x128xf32>
    %cst_286 = arith.constant dense<0.000000e+00> : vector<2x128xf32>
    %701 = tpu.matmul %681, %692, %cst_286 {dimension_numbers = #tpu.dot_dimension_numbers<[1], [0], [0], [1], [0, 0, 1, 1], [], []>} : vector<2x128xf32>, vector<128x128xf32>, vector<2x128xf32> -> vector<2x128xf32>
    %cst_287 = arith.constant dense<0.000000e+00> : vector<2x128xf32>
    %702 = tpu.matmul %690, %694, %cst_287 {dimension_numbers = #tpu.dot_dimension_numbers<[1], [0], [0], [1], [0, 0, 1, 1], [], []>} : vector<2x128xf32>, vector<128x128xf32>, vector<2x128xf32> -> vector<2x128xf32>
    %703 = arith.addf %701, %702 : vector<2x128xf32>
    %704 = vector.broadcast %695 : vector<1x128xf32> to vector<2x128xf32>
    %705 = arith.addf %703, %704 : vector<2x128xf32>
    %cst_288 = arith.constant dense<0.000000e+00> : vector<128xf32>
    %706 = vector.multi_reduction <add>, %700, %cst_288 [0] : vector<2x128xf32> to vector<128xf32>
    %707 = vector.shape_cast %706 : vector<128xf32> to vector<1x128xf32>
    %708 = arith.mulf %700, %700 : vector<2x128xf32>
    %cst_289 = arith.constant dense<0.000000e+00> : vector<128xf32>
    %709 = vector.multi_reduction <add>, %708, %cst_289 [0] : vector<2x128xf32> to vector<128xf32>
    %710 = vector.shape_cast %709 : vector<128xf32> to vector<1x128xf32>
    %cst_290 = arith.constant dense<0.000000e+00> : vector<128xf32>
    %711 = vector.multi_reduction <add>, %705, %cst_290 [0] : vector<2x128xf32> to vector<128xf32>
    %712 = vector.shape_cast %711 : vector<128xf32> to vector<1x128xf32>
    %713 = arith.addf %707, %712 : vector<1x128xf32>
    %714 = arith.mulf %705, %705 : vector<2x128xf32>
    %cst_291 = arith.constant dense<0.000000e+00> : vector<128xf32>
    %715 = vector.multi_reduction <add>, %714, %cst_291 [0] : vector<2x128xf32> to vector<128xf32>
    %716 = vector.shape_cast %715 : vector<128xf32> to vector<1x128xf32>
    %717 = arith.addf %710, %716 : vector<1x128xf32>
    %cst_292 = arith.constant 2.500000e-01 : f32
    %718 = vector.broadcast %cst_292 : f32 to vector<1x128xf32>
    %719 = arith.mulf %713, %718 : vector<1x128xf32>
    %cst_293 = arith.constant 2.500000e-01 : f32
    %720 = vector.broadcast %cst_293 : f32 to vector<1x128xf32>
    %721 = arith.mulf %717, %720 : vector<1x128xf32>
    %722 = arith.mulf %719, %719 : vector<1x128xf32>
    %723 = arith.subf %721, %722 : vector<1x128xf32>
    %cst_294 = arith.constant 0.000000e+00 : f32
    %724 = vector.broadcast %cst_294 : f32 to vector<1x128xf32>
    %725 = arith.maximumf %723, %724 : vector<1x128xf32>
    %cst_295 = arith.constant 9.99999974E-6 : f32
    %726 = vector.broadcast %cst_295 : f32 to vector<1x128xf32>
    %727 = arith.addf %725, %726 : vector<1x128xf32>
    %728 = math.rsqrt %727 : vector<1x128xf32>
    %c10_296 = arith.constant 10 : index
    %c0_297 = arith.constant 0 : index
    %729 = vector.load %arg5[%c10_296, %c0_297] : memref<28x128xf32, #tpu.memory_space<vmem>>, vector<1x128xf32>
    %730 = arith.mulf %728, %729 : vector<1x128xf32>
    %c11_298 = arith.constant 11 : index
    %c0_299 = arith.constant 0 : index
    %731 = vector.load %arg5[%c11_298, %c0_299] : memref<28x128xf32, #tpu.memory_space<vmem>>, vector<1x128xf32>
    %732 = arith.mulf %719, %730 : vector<1x128xf32>
    %733 = arith.subf %731, %732 : vector<1x128xf32>
    %734 = vector.broadcast %730 : vector<1x128xf32> to vector<2x128xf32>
    %735 = arith.mulf %700, %734 : vector<2x128xf32>
    %736 = vector.broadcast %733 : vector<1x128xf32> to vector<2x128xf32>
    %737 = arith.addf %735, %736 : vector<2x128xf32>
    %cst_300 = arith.constant 0.000000e+00 : f32
    %738 = vector.broadcast %cst_300 : f32 to vector<2x128xf32>
    %739 = arith.cmpf oge, %737, %738 : vector<2x128xf32>
    %cst_301 = arith.constant 2.000000e-01 : f32
    %740 = vector.broadcast %cst_301 : f32 to vector<2x128xf32>
    %741 = arith.mulf %740, %737 : vector<2x128xf32>
    %742 = arith.select %739, %737, %741 : vector<2x128xi1>, vector<2x128xf32>
    %743 = vector.broadcast %730 : vector<1x128xf32> to vector<2x128xf32>
    %744 = arith.mulf %705, %743 : vector<2x128xf32>
    %745 = vector.broadcast %733 : vector<1x128xf32> to vector<2x128xf32>
    %746 = arith.addf %744, %745 : vector<2x128xf32>
    %cst_302 = arith.constant 0.000000e+00 : f32
    %747 = vector.broadcast %cst_302 : f32 to vector<2x128xf32>
    %748 = arith.cmpf oge, %746, %747 : vector<2x128xf32>
    %cst_303 = arith.constant 2.000000e-01 : f32
    %749 = vector.broadcast %cst_303 : f32 to vector<2x128xf32>
    %750 = arith.mulf %749, %746 : vector<2x128xf32>
    %751 = arith.select %748, %746, %750 : vector<2x128xi1>, vector<2x128xf32>
    %c0_304 = arith.constant 0 : index
    %c0_305 = arith.constant 0 : index
    %752 = vector.load %arg3[%c0_304, %c0_305] : memref<2x128xf32, #tpu.memory_space<vmem>>, vector<2x128xf32>
    %c7_306 = arith.constant 7 : index
    %c0_307 = arith.constant 0 : index
    %c0_308 = arith.constant 0 : index
    %753 = vector.load %arg4[%c7_306, %c0_307, %c0_308] : memref<23x128x128xf32, #tpu.memory_space<vmem>>, vector<1x128x128xf32>
    %754 = vector.shape_cast %753 : vector<1x128x128xf32> to vector<128x128xf32>
    %cst_309 = arith.constant dense<0.000000e+00> : vector<2x128xf32>
    %755 = tpu.matmul %752, %754, %cst_309 {dimension_numbers = #tpu.dot_dimension_numbers<[1], [0], [0], [1], [0, 0, 1, 1], [], []>} : vector<2x128xf32>, vector<128x128xf32>, vector<2x128xf32> -> vector<2x128xf32>
    %c12_310 = arith.constant 12 : index
    %c0_311 = arith.constant 0 : index
    %756 = vector.load %arg5[%c12_310, %c0_311] : memref<28x128xf32, #tpu.memory_space<vmem>>, vector<1x128xf32>
    %757 = vector.broadcast %756 : vector<1x128xf32> to vector<2x128xf32>
    %758 = arith.addf %755, %757 : vector<2x128xf32>
    %cst_312 = arith.constant dense<0.000000e+00> : vector<128xf32>
    %759 = vector.multi_reduction <add>, %758, %cst_312 [0] : vector<2x128xf32> to vector<128xf32>
    %760 = vector.shape_cast %759 : vector<128xf32> to vector<1x128xf32>
    %761 = arith.mulf %758, %758 : vector<2x128xf32>
    %cst_313 = arith.constant dense<0.000000e+00> : vector<128xf32>
    %762 = vector.multi_reduction <add>, %761, %cst_313 [0] : vector<2x128xf32> to vector<128xf32>
    %763 = vector.shape_cast %762 : vector<128xf32> to vector<1x128xf32>
    %cst_314 = arith.constant 5.000000e-01 : f32
    %764 = vector.broadcast %cst_314 : f32 to vector<1x128xf32>
    %765 = arith.mulf %760, %764 : vector<1x128xf32>
    %cst_315 = arith.constant 5.000000e-01 : f32
    %766 = vector.broadcast %cst_315 : f32 to vector<1x128xf32>
    %767 = arith.mulf %763, %766 : vector<1x128xf32>
    %768 = arith.mulf %765, %765 : vector<1x128xf32>
    %769 = arith.subf %767, %768 : vector<1x128xf32>
    %cst_316 = arith.constant 0.000000e+00 : f32
    %770 = vector.broadcast %cst_316 : f32 to vector<1x128xf32>
    %771 = arith.maximumf %769, %770 : vector<1x128xf32>
    %cst_317 = arith.constant 9.99999974E-6 : f32
    %772 = vector.broadcast %cst_317 : f32 to vector<1x128xf32>
    %773 = arith.addf %771, %772 : vector<1x128xf32>
    %774 = math.rsqrt %773 : vector<1x128xf32>
    %c14_318 = arith.constant 14 : index
    %c0_319 = arith.constant 0 : index
    %775 = vector.load %arg5[%c14_318, %c0_319] : memref<28x128xf32, #tpu.memory_space<vmem>>, vector<1x128xf32>
    %776 = arith.mulf %774, %775 : vector<1x128xf32>
    %c15_320 = arith.constant 15 : index
    %c0_321 = arith.constant 0 : index
    %777 = vector.load %arg5[%c15_320, %c0_321] : memref<28x128xf32, #tpu.memory_space<vmem>>, vector<1x128xf32>
    %778 = arith.mulf %765, %776 : vector<1x128xf32>
    %779 = arith.subf %777, %778 : vector<1x128xf32>
    %780 = vector.broadcast %776 : vector<1x128xf32> to vector<2x128xf32>
    %781 = arith.mulf %758, %780 : vector<2x128xf32>
    %782 = vector.broadcast %779 : vector<1x128xf32> to vector<2x128xf32>
    %783 = arith.addf %781, %782 : vector<2x128xf32>
    %cst_322 = arith.constant 0.000000e+00 : f32
    %784 = vector.broadcast %cst_322 : f32 to vector<2x128xf32>
    %785 = arith.cmpf oge, %783, %784 : vector<2x128xf32>
    %cst_323 = arith.constant 2.000000e-01 : f32
    %786 = vector.broadcast %cst_323 : f32 to vector<2x128xf32>
    %787 = arith.mulf %786, %783 : vector<2x128xf32>
    %788 = arith.select %785, %783, %787 : vector<2x128xi1>, vector<2x128xf32>
    %c8_324 = arith.constant 8 : index
    %c0_325 = arith.constant 0 : index
    %c0_326 = arith.constant 0 : index
    %789 = vector.load %arg4[%c8_324, %c0_325, %c0_326] : memref<23x128x128xf32, #tpu.memory_space<vmem>>, vector<1x128x128xf32>
    %790 = vector.shape_cast %789 : vector<1x128x128xf32> to vector<128x128xf32>
    %cst_327 = arith.constant dense<0.000000e+00> : vector<2x128xf32>
    %791 = tpu.matmul %752, %790, %cst_327 {dimension_numbers = #tpu.dot_dimension_numbers<[1], [0], [0], [1], [0, 0, 1, 1], [], []>} : vector<2x128xf32>, vector<128x128xf32>, vector<2x128xf32> -> vector<2x128xf32>
    %c13_328 = arith.constant 13 : index
    %c0_329 = arith.constant 0 : index
    %792 = vector.load %arg5[%c13_328, %c0_329] : memref<28x128xf32, #tpu.memory_space<vmem>>, vector<1x128xf32>
    %793 = vector.broadcast %792 : vector<1x128xf32> to vector<2x128xf32>
    %794 = arith.addf %791, %793 : vector<2x128xf32>
    %cst_330 = arith.constant dense<0.000000e+00> : vector<128xf32>
    %795 = vector.multi_reduction <add>, %794, %cst_330 [0] : vector<2x128xf32> to vector<128xf32>
    %796 = vector.shape_cast %795 : vector<128xf32> to vector<1x128xf32>
    %797 = arith.mulf %794, %794 : vector<2x128xf32>
    %cst_331 = arith.constant dense<0.000000e+00> : vector<128xf32>
    %798 = vector.multi_reduction <add>, %797, %cst_331 [0] : vector<2x128xf32> to vector<128xf32>
    %799 = vector.shape_cast %798 : vector<128xf32> to vector<1x128xf32>
    %cst_332 = arith.constant 5.000000e-01 : f32
    %800 = vector.broadcast %cst_332 : f32 to vector<1x128xf32>
    %801 = arith.mulf %796, %800 : vector<1x128xf32>
    %cst_333 = arith.constant 5.000000e-01 : f32
    %802 = vector.broadcast %cst_333 : f32 to vector<1x128xf32>
    %803 = arith.mulf %799, %802 : vector<1x128xf32>
    %804 = arith.mulf %801, %801 : vector<1x128xf32>
    %805 = arith.subf %803, %804 : vector<1x128xf32>
    %cst_334 = arith.constant 0.000000e+00 : f32
    %806 = vector.broadcast %cst_334 : f32 to vector<1x128xf32>
    %807 = arith.maximumf %805, %806 : vector<1x128xf32>
    %cst_335 = arith.constant 9.99999974E-6 : f32
    %808 = vector.broadcast %cst_335 : f32 to vector<1x128xf32>
    %809 = arith.addf %807, %808 : vector<1x128xf32>
    %810 = math.rsqrt %809 : vector<1x128xf32>
    %c16 = arith.constant 16 : index
    %c0_336 = arith.constant 0 : index
    %811 = vector.load %arg5[%c16, %c0_336] : memref<28x128xf32, #tpu.memory_space<vmem>>, vector<1x128xf32>
    %812 = arith.mulf %810, %811 : vector<1x128xf32>
    %c17 = arith.constant 17 : index
    %c0_337 = arith.constant 0 : index
    %813 = vector.load %arg5[%c17, %c0_337] : memref<28x128xf32, #tpu.memory_space<vmem>>, vector<1x128xf32>
    %814 = arith.mulf %801, %812 : vector<1x128xf32>
    %815 = arith.subf %813, %814 : vector<1x128xf32>
    %816 = vector.broadcast %812 : vector<1x128xf32> to vector<2x128xf32>
    %817 = arith.mulf %794, %816 : vector<2x128xf32>
    %818 = vector.broadcast %815 : vector<1x128xf32> to vector<2x128xf32>
    %819 = arith.addf %817, %818 : vector<2x128xf32>
    %cst_338 = arith.constant 0.000000e+00 : f32
    %820 = vector.broadcast %cst_338 : f32 to vector<2x128xf32>
    %821 = arith.cmpf oge, %819, %820 : vector<2x128xf32>
    %cst_339 = arith.constant 2.000000e-01 : f32
    %822 = vector.broadcast %cst_339 : f32 to vector<2x128xf32>
    %823 = arith.mulf %822, %819 : vector<2x128xf32>
    %824 = arith.select %821, %819, %823 : vector<2x128xi1>, vector<2x128xf32>
    %c9_340 = arith.constant 9 : index
    %c0_341 = arith.constant 0 : index
    %c0_342 = arith.constant 0 : index
    %825 = vector.load %arg4[%c9_340, %c0_341, %c0_342] : memref<23x128x128xf32, #tpu.memory_space<vmem>>, vector<1x128x128xf32>
    %826 = vector.shape_cast %825 : vector<1x128x128xf32> to vector<128x128xf32>
    %c10_343 = arith.constant 10 : index
    %c0_344 = arith.constant 0 : index
    %c0_345 = arith.constant 0 : index
    %827 = vector.load %arg4[%c10_343, %c0_344, %c0_345] : memref<23x128x128xf32, #tpu.memory_space<vmem>>, vector<1x128x128xf32>
    %828 = vector.shape_cast %827 : vector<1x128x128xf32> to vector<128x128xf32>
    %c11_346 = arith.constant 11 : index
    %c0_347 = arith.constant 0 : index
    %c0_348 = arith.constant 0 : index
    %829 = vector.load %arg4[%c11_346, %c0_347, %c0_348] : memref<23x128x128xf32, #tpu.memory_space<vmem>>, vector<1x128x128xf32>
    %830 = vector.shape_cast %829 : vector<1x128x128xf32> to vector<128x128xf32>
    %c12_349 = arith.constant 12 : index
    %c0_350 = arith.constant 0 : index
    %c0_351 = arith.constant 0 : index
    %831 = vector.load %arg4[%c12_349, %c0_350, %c0_351] : memref<23x128x128xf32, #tpu.memory_space<vmem>>, vector<1x128x128xf32>
    %832 = vector.shape_cast %831 : vector<1x128x128xf32> to vector<128x128xf32>
    %c18 = arith.constant 18 : index
    %c0_352 = arith.constant 0 : index
    %833 = vector.load %arg5[%c18, %c0_352] : memref<28x128xf32, #tpu.memory_space<vmem>>, vector<1x128xf32>
    %cst_353 = arith.constant dense<0.000000e+00> : vector<2x128xf32>
    %834 = tpu.matmul %788, %826, %cst_353 {dimension_numbers = #tpu.dot_dimension_numbers<[1], [0], [0], [1], [0, 0, 1, 1], [], []>} : vector<2x128xf32>, vector<128x128xf32>, vector<2x128xf32> -> vector<2x128xf32>
    %cst_354 = arith.constant dense<0.000000e+00> : vector<2x128xf32>
    %835 = tpu.matmul %742, %830, %cst_354 {dimension_numbers = #tpu.dot_dimension_numbers<[1], [0], [0], [1], [0, 0, 1, 1], [], []>} : vector<2x128xf32>, vector<128x128xf32>, vector<2x128xf32> -> vector<2x128xf32>
    %836 = arith.addf %834, %835 : vector<2x128xf32>
    %837 = vector.broadcast %833 : vector<1x128xf32> to vector<2x128xf32>
    %838 = arith.addf %836, %837 : vector<2x128xf32>
    %cst_355 = arith.constant dense<0.000000e+00> : vector<2x128xf32>
    %839 = tpu.matmul %788, %828, %cst_355 {dimension_numbers = #tpu.dot_dimension_numbers<[1], [0], [0], [1], [0, 0, 1, 1], [], []>} : vector<2x128xf32>, vector<128x128xf32>, vector<2x128xf32> -> vector<2x128xf32>
    %cst_356 = arith.constant dense<0.000000e+00> : vector<2x128xf32>
    %840 = tpu.matmul %742, %832, %cst_356 {dimension_numbers = #tpu.dot_dimension_numbers<[1], [0], [0], [1], [0, 0, 1, 1], [], []>} : vector<2x128xf32>, vector<128x128xf32>, vector<2x128xf32> -> vector<2x128xf32>
    %841 = arith.addf %839, %840 : vector<2x128xf32>
    %842 = vector.broadcast %833 : vector<1x128xf32> to vector<2x128xf32>
    %843 = arith.addf %841, %842 : vector<2x128xf32>
    %cst_357 = arith.constant dense<0.000000e+00> : vector<2x128xf32>
    %844 = tpu.matmul %824, %826, %cst_357 {dimension_numbers = #tpu.dot_dimension_numbers<[1], [0], [0], [1], [0, 0, 1, 1], [], []>} : vector<2x128xf32>, vector<128x128xf32>, vector<2x128xf32> -> vector<2x128xf32>
    %cst_358 = arith.constant dense<0.000000e+00> : vector<2x128xf32>
    %845 = tpu.matmul %751, %830, %cst_358 {dimension_numbers = #tpu.dot_dimension_numbers<[1], [0], [0], [1], [0, 0, 1, 1], [], []>} : vector<2x128xf32>, vector<128x128xf32>, vector<2x128xf32> -> vector<2x128xf32>
    %846 = arith.addf %844, %845 : vector<2x128xf32>
    %847 = vector.broadcast %833 : vector<1x128xf32> to vector<2x128xf32>
    %848 = arith.addf %846, %847 : vector<2x128xf32>
    %cst_359 = arith.constant dense<0.000000e+00> : vector<2x128xf32>
    %849 = tpu.matmul %824, %828, %cst_359 {dimension_numbers = #tpu.dot_dimension_numbers<[1], [0], [0], [1], [0, 0, 1, 1], [], []>} : vector<2x128xf32>, vector<128x128xf32>, vector<2x128xf32> -> vector<2x128xf32>
    %cst_360 = arith.constant dense<0.000000e+00> : vector<2x128xf32>
    %850 = tpu.matmul %751, %832, %cst_360 {dimension_numbers = #tpu.dot_dimension_numbers<[1], [0], [0], [1], [0, 0, 1, 1], [], []>} : vector<2x128xf32>, vector<128x128xf32>, vector<2x128xf32> -> vector<2x128xf32>
    %851 = arith.addf %849, %850 : vector<2x128xf32>
    %852 = vector.broadcast %833 : vector<1x128xf32> to vector<2x128xf32>
    %853 = arith.addf %851, %852 : vector<2x128xf32>
    %cst_361 = arith.constant dense<0.000000e+00> : vector<128xf32>
    %854 = vector.multi_reduction <add>, %838, %cst_361 [0] : vector<2x128xf32> to vector<128xf32>
    %855 = vector.shape_cast %854 : vector<128xf32> to vector<1x128xf32>
    %856 = arith.mulf %838, %838 : vector<2x128xf32>
    %cst_362 = arith.constant dense<0.000000e+00> : vector<128xf32>
    %857 = vector.multi_reduction <add>, %856, %cst_362 [0] : vector<2x128xf32> to vector<128xf32>
    %858 = vector.shape_cast %857 : vector<128xf32> to vector<1x128xf32>
    %cst_363 = arith.constant dense<0.000000e+00> : vector<128xf32>
    %859 = vector.multi_reduction <add>, %843, %cst_363 [0] : vector<2x128xf32> to vector<128xf32>
    %860 = vector.shape_cast %859 : vector<128xf32> to vector<1x128xf32>
    %861 = arith.addf %855, %860 : vector<1x128xf32>
    %862 = arith.mulf %843, %843 : vector<2x128xf32>
    %cst_364 = arith.constant dense<0.000000e+00> : vector<128xf32>
    %863 = vector.multi_reduction <add>, %862, %cst_364 [0] : vector<2x128xf32> to vector<128xf32>
    %864 = vector.shape_cast %863 : vector<128xf32> to vector<1x128xf32>
    %865 = arith.addf %858, %864 : vector<1x128xf32>
    %cst_365 = arith.constant dense<0.000000e+00> : vector<128xf32>
    %866 = vector.multi_reduction <add>, %848, %cst_365 [0] : vector<2x128xf32> to vector<128xf32>
    %867 = vector.shape_cast %866 : vector<128xf32> to vector<1x128xf32>
    %868 = arith.addf %861, %867 : vector<1x128xf32>
    %869 = arith.mulf %848, %848 : vector<2x128xf32>
    %cst_366 = arith.constant dense<0.000000e+00> : vector<128xf32>
    %870 = vector.multi_reduction <add>, %869, %cst_366 [0] : vector<2x128xf32> to vector<128xf32>
    %871 = vector.shape_cast %870 : vector<128xf32> to vector<1x128xf32>
    %872 = arith.addf %865, %871 : vector<1x128xf32>
    %cst_367 = arith.constant dense<0.000000e+00> : vector<128xf32>
    %873 = vector.multi_reduction <add>, %853, %cst_367 [0] : vector<2x128xf32> to vector<128xf32>
    %874 = vector.shape_cast %873 : vector<128xf32> to vector<1x128xf32>
    %875 = arith.addf %868, %874 : vector<1x128xf32>
    %876 = arith.mulf %853, %853 : vector<2x128xf32>
    %cst_368 = arith.constant dense<0.000000e+00> : vector<128xf32>
    %877 = vector.multi_reduction <add>, %876, %cst_368 [0] : vector<2x128xf32> to vector<128xf32>
    %878 = vector.shape_cast %877 : vector<128xf32> to vector<1x128xf32>
    %879 = arith.addf %872, %878 : vector<1x128xf32>
    %cst_369 = arith.constant 1.250000e-01 : f32
    %880 = vector.broadcast %cst_369 : f32 to vector<1x128xf32>
    %881 = arith.mulf %875, %880 : vector<1x128xf32>
    %cst_370 = arith.constant 1.250000e-01 : f32
    %882 = vector.broadcast %cst_370 : f32 to vector<1x128xf32>
    %883 = arith.mulf %879, %882 : vector<1x128xf32>
    %884 = arith.mulf %881, %881 : vector<1x128xf32>
    %885 = arith.subf %883, %884 : vector<1x128xf32>
    %cst_371 = arith.constant 0.000000e+00 : f32
    %886 = vector.broadcast %cst_371 : f32 to vector<1x128xf32>
    %887 = arith.maximumf %885, %886 : vector<1x128xf32>
    %cst_372 = arith.constant 9.99999974E-6 : f32
    %888 = vector.broadcast %cst_372 : f32 to vector<1x128xf32>
    %889 = arith.addf %887, %888 : vector<1x128xf32>
    %890 = math.rsqrt %889 : vector<1x128xf32>
    %c19 = arith.constant 19 : index
    %c0_373 = arith.constant 0 : index
    %891 = vector.load %arg5[%c19, %c0_373] : memref<28x128xf32, #tpu.memory_space<vmem>>, vector<1x128xf32>
    %892 = arith.mulf %890, %891 : vector<1x128xf32>
    %c20 = arith.constant 20 : index
    %c0_374 = arith.constant 0 : index
    %893 = vector.load %arg5[%c20, %c0_374] : memref<28x128xf32, #tpu.memory_space<vmem>>, vector<1x128xf32>
    %894 = arith.mulf %881, %892 : vector<1x128xf32>
    %895 = arith.subf %893, %894 : vector<1x128xf32>
    %896 = vector.broadcast %892 : vector<1x128xf32> to vector<2x128xf32>
    %897 = arith.mulf %838, %896 : vector<2x128xf32>
    %898 = vector.broadcast %895 : vector<1x128xf32> to vector<2x128xf32>
    %899 = arith.addf %897, %898 : vector<2x128xf32>
    %cst_375 = arith.constant 0.000000e+00 : f32
    %900 = vector.broadcast %cst_375 : f32 to vector<2x128xf32>
    %901 = arith.cmpf oge, %899, %900 : vector<2x128xf32>
    %cst_376 = arith.constant 2.000000e-01 : f32
    %902 = vector.broadcast %cst_376 : f32 to vector<2x128xf32>
    %903 = arith.mulf %902, %899 : vector<2x128xf32>
    %904 = arith.select %901, %899, %903 : vector<2x128xi1>, vector<2x128xf32>
    %905 = vector.broadcast %892 : vector<1x128xf32> to vector<2x128xf32>
    %906 = arith.mulf %843, %905 : vector<2x128xf32>
    %907 = vector.broadcast %895 : vector<1x128xf32> to vector<2x128xf32>
    %908 = arith.addf %906, %907 : vector<2x128xf32>
    %cst_377 = arith.constant 0.000000e+00 : f32
    %909 = vector.broadcast %cst_377 : f32 to vector<2x128xf32>
    %910 = arith.cmpf oge, %908, %909 : vector<2x128xf32>
    %cst_378 = arith.constant 2.000000e-01 : f32
    %911 = vector.broadcast %cst_378 : f32 to vector<2x128xf32>
    %912 = arith.mulf %911, %908 : vector<2x128xf32>
    %913 = arith.select %910, %908, %912 : vector<2x128xi1>, vector<2x128xf32>
    %914 = vector.broadcast %892 : vector<1x128xf32> to vector<2x128xf32>
    %915 = arith.mulf %848, %914 : vector<2x128xf32>
    %916 = vector.broadcast %895 : vector<1x128xf32> to vector<2x128xf32>
    %917 = arith.addf %915, %916 : vector<2x128xf32>
    %cst_379 = arith.constant 0.000000e+00 : f32
    %918 = vector.broadcast %cst_379 : f32 to vector<2x128xf32>
    %919 = arith.cmpf oge, %917, %918 : vector<2x128xf32>
    %cst_380 = arith.constant 2.000000e-01 : f32
    %920 = vector.broadcast %cst_380 : f32 to vector<2x128xf32>
    %921 = arith.mulf %920, %917 : vector<2x128xf32>
    %922 = arith.select %919, %917, %921 : vector<2x128xi1>, vector<2x128xf32>
    %923 = vector.broadcast %892 : vector<1x128xf32> to vector<2x128xf32>
    %924 = arith.mulf %853, %923 : vector<2x128xf32>
    %925 = vector.broadcast %895 : vector<1x128xf32> to vector<2x128xf32>
    %926 = arith.addf %924, %925 : vector<2x128xf32>
    %cst_381 = arith.constant 0.000000e+00 : f32
    %927 = vector.broadcast %cst_381 : f32 to vector<2x128xf32>
    %928 = arith.cmpf oge, %926, %927 : vector<2x128xf32>
    %cst_382 = arith.constant 2.000000e-01 : f32
    %929 = vector.broadcast %cst_382 : f32 to vector<2x128xf32>
    %930 = arith.mulf %929, %926 : vector<2x128xf32>
    %931 = arith.select %928, %926, %930 : vector<2x128xi1>, vector<2x128xf32>
    %c13_383 = arith.constant 13 : index
    %c0_384 = arith.constant 0 : index
    %c0_385 = arith.constant 0 : index
    %932 = vector.load %arg4[%c13_383, %c0_384, %c0_385] : memref<23x128x128xf32, #tpu.memory_space<vmem>>, vector<1x128x128xf32>
    %933 = vector.shape_cast %932 : vector<1x128x128xf32> to vector<128x128xf32>
    %c14_386 = arith.constant 14 : index
    %c0_387 = arith.constant 0 : index
    %c0_388 = arith.constant 0 : index
    %934 = vector.load %arg4[%c14_386, %c0_387, %c0_388] : memref<23x128x128xf32, #tpu.memory_space<vmem>>, vector<1x128x128xf32>
    %935 = vector.shape_cast %934 : vector<1x128x128xf32> to vector<128x128xf32>
    %c15_389 = arith.constant 15 : index
    %c0_390 = arith.constant 0 : index
    %c0_391 = arith.constant 0 : index
    %936 = vector.load %arg4[%c15_389, %c0_390, %c0_391] : memref<23x128x128xf32, #tpu.memory_space<vmem>>, vector<1x128x128xf32>
    %937 = vector.shape_cast %936 : vector<1x128x128xf32> to vector<128x128xf32>
    %c16_392 = arith.constant 16 : index
    %c0_393 = arith.constant 0 : index
    %c0_394 = arith.constant 0 : index
    %938 = vector.load %arg4[%c16_392, %c0_393, %c0_394] : memref<23x128x128xf32, #tpu.memory_space<vmem>>, vector<1x128x128xf32>
    %939 = vector.shape_cast %938 : vector<1x128x128xf32> to vector<128x128xf32>
    %c21 = arith.constant 21 : index
    %c0_395 = arith.constant 0 : index
    %940 = vector.load %arg5[%c21, %c0_395] : memref<28x128xf32, #tpu.memory_space<vmem>>, vector<1x128xf32>
    %cst_396 = arith.constant dense<0.000000e+00> : vector<2x128xf32>
    %941 = tpu.matmul %904, %933, %cst_396 {dimension_numbers = #tpu.dot_dimension_numbers<[1], [0], [0], [1], [0, 0, 1, 1], [], []>} : vector<2x128xf32>, vector<128x128xf32>, vector<2x128xf32> -> vector<2x128xf32>
    %cst_397 = arith.constant dense<0.000000e+00> : vector<2x128xf32>
    %942 = tpu.matmul %663, %937, %cst_397 {dimension_numbers = #tpu.dot_dimension_numbers<[1], [0], [0], [1], [0, 0, 1, 1], [], []>} : vector<2x128xf32>, vector<128x128xf32>, vector<2x128xf32> -> vector<2x128xf32>
    %943 = arith.addf %941, %942 : vector<2x128xf32>
    %944 = vector.broadcast %940 : vector<1x128xf32> to vector<2x128xf32>
    %945 = arith.addf %943, %944 : vector<2x128xf32>
    %cst_398 = arith.constant dense<0.000000e+00> : vector<2x128xf32>
    %946 = tpu.matmul %904, %935, %cst_398 {dimension_numbers = #tpu.dot_dimension_numbers<[1], [0], [0], [1], [0, 0, 1, 1], [], []>} : vector<2x128xf32>, vector<128x128xf32>, vector<2x128xf32> -> vector<2x128xf32>
    %cst_399 = arith.constant dense<0.000000e+00> : vector<2x128xf32>
    %947 = tpu.matmul %663, %939, %cst_399 {dimension_numbers = #tpu.dot_dimension_numbers<[1], [0], [0], [1], [0, 0, 1, 1], [], []>} : vector<2x128xf32>, vector<128x128xf32>, vector<2x128xf32> -> vector<2x128xf32>
    %948 = arith.addf %946, %947 : vector<2x128xf32>
    %949 = vector.broadcast %940 : vector<1x128xf32> to vector<2x128xf32>
    %950 = arith.addf %948, %949 : vector<2x128xf32>
    %cst_400 = arith.constant dense<0.000000e+00> : vector<2x128xf32>
    %951 = tpu.matmul %913, %933, %cst_400 {dimension_numbers = #tpu.dot_dimension_numbers<[1], [0], [0], [1], [0, 0, 1, 1], [], []>} : vector<2x128xf32>, vector<128x128xf32>, vector<2x128xf32> -> vector<2x128xf32>
    %cst_401 = arith.constant dense<0.000000e+00> : vector<2x128xf32>
    %952 = tpu.matmul %672, %937, %cst_401 {dimension_numbers = #tpu.dot_dimension_numbers<[1], [0], [0], [1], [0, 0, 1, 1], [], []>} : vector<2x128xf32>, vector<128x128xf32>, vector<2x128xf32> -> vector<2x128xf32>
    %953 = arith.addf %951, %952 : vector<2x128xf32>
    %954 = vector.broadcast %940 : vector<1x128xf32> to vector<2x128xf32>
    %955 = arith.addf %953, %954 : vector<2x128xf32>
    %cst_402 = arith.constant dense<0.000000e+00> : vector<2x128xf32>
    %956 = tpu.matmul %913, %935, %cst_402 {dimension_numbers = #tpu.dot_dimension_numbers<[1], [0], [0], [1], [0, 0, 1, 1], [], []>} : vector<2x128xf32>, vector<128x128xf32>, vector<2x128xf32> -> vector<2x128xf32>
    %cst_403 = arith.constant dense<0.000000e+00> : vector<2x128xf32>
    %957 = tpu.matmul %672, %939, %cst_403 {dimension_numbers = #tpu.dot_dimension_numbers<[1], [0], [0], [1], [0, 0, 1, 1], [], []>} : vector<2x128xf32>, vector<128x128xf32>, vector<2x128xf32> -> vector<2x128xf32>
    %958 = arith.addf %956, %957 : vector<2x128xf32>
    %959 = vector.broadcast %940 : vector<1x128xf32> to vector<2x128xf32>
    %960 = arith.addf %958, %959 : vector<2x128xf32>
    %cst_404 = arith.constant dense<0.000000e+00> : vector<2x128xf32>
    %961 = tpu.matmul %922, %933, %cst_404 {dimension_numbers = #tpu.dot_dimension_numbers<[1], [0], [0], [1], [0, 0, 1, 1], [], []>} : vector<2x128xf32>, vector<128x128xf32>, vector<2x128xf32> -> vector<2x128xf32>
    %cst_405 = arith.constant dense<0.000000e+00> : vector<2x128xf32>
    %962 = tpu.matmul %681, %937, %cst_405 {dimension_numbers = #tpu.dot_dimension_numbers<[1], [0], [0], [1], [0, 0, 1, 1], [], []>} : vector<2x128xf32>, vector<128x128xf32>, vector<2x128xf32> -> vector<2x128xf32>
    %963 = arith.addf %961, %962 : vector<2x128xf32>
    %964 = vector.broadcast %940 : vector<1x128xf32> to vector<2x128xf32>
    %965 = arith.addf %963, %964 : vector<2x128xf32>
    %cst_406 = arith.constant dense<0.000000e+00> : vector<2x128xf32>
    %966 = tpu.matmul %922, %935, %cst_406 {dimension_numbers = #tpu.dot_dimension_numbers<[1], [0], [0], [1], [0, 0, 1, 1], [], []>} : vector<2x128xf32>, vector<128x128xf32>, vector<2x128xf32> -> vector<2x128xf32>
    %cst_407 = arith.constant dense<0.000000e+00> : vector<2x128xf32>
    %967 = tpu.matmul %681, %939, %cst_407 {dimension_numbers = #tpu.dot_dimension_numbers<[1], [0], [0], [1], [0, 0, 1, 1], [], []>} : vector<2x128xf32>, vector<128x128xf32>, vector<2x128xf32> -> vector<2x128xf32>
    %968 = arith.addf %966, %967 : vector<2x128xf32>
    %969 = vector.broadcast %940 : vector<1x128xf32> to vector<2x128xf32>
    %970 = arith.addf %968, %969 : vector<2x128xf32>
    %cst_408 = arith.constant dense<0.000000e+00> : vector<2x128xf32>
    %971 = tpu.matmul %931, %933, %cst_408 {dimension_numbers = #tpu.dot_dimension_numbers<[1], [0], [0], [1], [0, 0, 1, 1], [], []>} : vector<2x128xf32>, vector<128x128xf32>, vector<2x128xf32> -> vector<2x128xf32>
    %cst_409 = arith.constant dense<0.000000e+00> : vector<2x128xf32>
    %972 = tpu.matmul %690, %937, %cst_409 {dimension_numbers = #tpu.dot_dimension_numbers<[1], [0], [0], [1], [0, 0, 1, 1], [], []>} : vector<2x128xf32>, vector<128x128xf32>, vector<2x128xf32> -> vector<2x128xf32>
    %973 = arith.addf %971, %972 : vector<2x128xf32>
    %974 = vector.broadcast %940 : vector<1x128xf32> to vector<2x128xf32>
    %975 = arith.addf %973, %974 : vector<2x128xf32>
    %cst_410 = arith.constant dense<0.000000e+00> : vector<2x128xf32>
    %976 = tpu.matmul %931, %935, %cst_410 {dimension_numbers = #tpu.dot_dimension_numbers<[1], [0], [0], [1], [0, 0, 1, 1], [], []>} : vector<2x128xf32>, vector<128x128xf32>, vector<2x128xf32> -> vector<2x128xf32>
    %cst_411 = arith.constant dense<0.000000e+00> : vector<2x128xf32>
    %977 = tpu.matmul %690, %939, %cst_411 {dimension_numbers = #tpu.dot_dimension_numbers<[1], [0], [0], [1], [0, 0, 1, 1], [], []>} : vector<2x128xf32>, vector<128x128xf32>, vector<2x128xf32> -> vector<2x128xf32>
    %978 = arith.addf %976, %977 : vector<2x128xf32>
    %979 = vector.broadcast %940 : vector<1x128xf32> to vector<2x128xf32>
    %980 = arith.addf %978, %979 : vector<2x128xf32>
    %cst_412 = arith.constant dense<0.000000e+00> : vector<128xf32>
    %981 = vector.multi_reduction <add>, %945, %cst_412 [0] : vector<2x128xf32> to vector<128xf32>
    %982 = vector.shape_cast %981 : vector<128xf32> to vector<1x128xf32>
    %983 = arith.mulf %945, %945 : vector<2x128xf32>
    %cst_413 = arith.constant dense<0.000000e+00> : vector<128xf32>
    %984 = vector.multi_reduction <add>, %983, %cst_413 [0] : vector<2x128xf32> to vector<128xf32>
    %985 = vector.shape_cast %984 : vector<128xf32> to vector<1x128xf32>
    %cst_414 = arith.constant dense<0.000000e+00> : vector<128xf32>
    %986 = vector.multi_reduction <add>, %950, %cst_414 [0] : vector<2x128xf32> to vector<128xf32>
    %987 = vector.shape_cast %986 : vector<128xf32> to vector<1x128xf32>
    %988 = arith.addf %982, %987 : vector<1x128xf32>
    %989 = arith.mulf %950, %950 : vector<2x128xf32>
    %cst_415 = arith.constant dense<0.000000e+00> : vector<128xf32>
    %990 = vector.multi_reduction <add>, %989, %cst_415 [0] : vector<2x128xf32> to vector<128xf32>
    %991 = vector.shape_cast %990 : vector<128xf32> to vector<1x128xf32>
    %992 = arith.addf %985, %991 : vector<1x128xf32>
    %cst_416 = arith.constant dense<0.000000e+00> : vector<128xf32>
    %993 = vector.multi_reduction <add>, %955, %cst_416 [0] : vector<2x128xf32> to vector<128xf32>
    %994 = vector.shape_cast %993 : vector<128xf32> to vector<1x128xf32>
    %995 = arith.addf %988, %994 : vector<1x128xf32>
    %996 = arith.mulf %955, %955 : vector<2x128xf32>
    %cst_417 = arith.constant dense<0.000000e+00> : vector<128xf32>
    %997 = vector.multi_reduction <add>, %996, %cst_417 [0] : vector<2x128xf32> to vector<128xf32>
    %998 = vector.shape_cast %997 : vector<128xf32> to vector<1x128xf32>
    %999 = arith.addf %992, %998 : vector<1x128xf32>
    %cst_418 = arith.constant dense<0.000000e+00> : vector<128xf32>
    %1000 = vector.multi_reduction <add>, %960, %cst_418 [0] : vector<2x128xf32> to vector<128xf32>
    %1001 = vector.shape_cast %1000 : vector<128xf32> to vector<1x128xf32>
    %1002 = arith.addf %995, %1001 : vector<1x128xf32>
    %1003 = arith.mulf %960, %960 : vector<2x128xf32>
    %cst_419 = arith.constant dense<0.000000e+00> : vector<128xf32>
    %1004 = vector.multi_reduction <add>, %1003, %cst_419 [0] : vector<2x128xf32> to vector<128xf32>
    %1005 = vector.shape_cast %1004 : vector<128xf32> to vector<1x128xf32>
    %1006 = arith.addf %999, %1005 : vector<1x128xf32>
    %cst_420 = arith.constant dense<0.000000e+00> : vector<128xf32>
    %1007 = vector.multi_reduction <add>, %965, %cst_420 [0] : vector<2x128xf32> to vector<128xf32>
    %1008 = vector.shape_cast %1007 : vector<128xf32> to vector<1x128xf32>
    %1009 = arith.addf %1002, %1008 : vector<1x128xf32>
    %1010 = arith.mulf %965, %965 : vector<2x128xf32>
    %cst_421 = arith.constant dense<0.000000e+00> : vector<128xf32>
    %1011 = vector.multi_reduction <add>, %1010, %cst_421 [0] : vector<2x128xf32> to vector<128xf32>
    %1012 = vector.shape_cast %1011 : vector<128xf32> to vector<1x128xf32>
    %1013 = arith.addf %1006, %1012 : vector<1x128xf32>
    %cst_422 = arith.constant dense<0.000000e+00> : vector<128xf32>
    %1014 = vector.multi_reduction <add>, %970, %cst_422 [0] : vector<2x128xf32> to vector<128xf32>
    %1015 = vector.shape_cast %1014 : vector<128xf32> to vector<1x128xf32>
    %1016 = arith.addf %1009, %1015 : vector<1x128xf32>
    %1017 = arith.mulf %970, %970 : vector<2x128xf32>
    %cst_423 = arith.constant dense<0.000000e+00> : vector<128xf32>
    %1018 = vector.multi_reduction <add>, %1017, %cst_423 [0] : vector<2x128xf32> to vector<128xf32>
    %1019 = vector.shape_cast %1018 : vector<128xf32> to vector<1x128xf32>
    %1020 = arith.addf %1013, %1019 : vector<1x128xf32>
    %cst_424 = arith.constant dense<0.000000e+00> : vector<128xf32>
    %1021 = vector.multi_reduction <add>, %975, %cst_424 [0] : vector<2x128xf32> to vector<128xf32>
    %1022 = vector.shape_cast %1021 : vector<128xf32> to vector<1x128xf32>
    %1023 = arith.addf %1016, %1022 : vector<1x128xf32>
    %1024 = arith.mulf %975, %975 : vector<2x128xf32>
    %cst_425 = arith.constant dense<0.000000e+00> : vector<128xf32>
    %1025 = vector.multi_reduction <add>, %1024, %cst_425 [0] : vector<2x128xf32> to vector<128xf32>
    %1026 = vector.shape_cast %1025 : vector<128xf32> to vector<1x128xf32>
    %1027 = arith.addf %1020, %1026 : vector<1x128xf32>
    %cst_426 = arith.constant dense<0.000000e+00> : vector<128xf32>
    %1028 = vector.multi_reduction <add>, %980, %cst_426 [0] : vector<2x128xf32> to vector<128xf32>
    %1029 = vector.shape_cast %1028 : vector<128xf32> to vector<1x128xf32>
    %1030 = arith.addf %1023, %1029 : vector<1x128xf32>
    %1031 = arith.mulf %980, %980 : vector<2x128xf32>
    %cst_427 = arith.constant dense<0.000000e+00> : vector<128xf32>
    %1032 = vector.multi_reduction <add>, %1031, %cst_427 [0] : vector<2x128xf32> to vector<128xf32>
    %1033 = vector.shape_cast %1032 : vector<128xf32> to vector<1x128xf32>
    %1034 = arith.addf %1027, %1033 : vector<1x128xf32>
    %cst_428 = arith.constant 6.250000e-02 : f32
    %1035 = vector.broadcast %cst_428 : f32 to vector<1x128xf32>
    %1036 = arith.mulf %1030, %1035 : vector<1x128xf32>
    %cst_429 = arith.constant 6.250000e-02 : f32
    %1037 = vector.broadcast %cst_429 : f32 to vector<1x128xf32>
    %1038 = arith.mulf %1034, %1037 : vector<1x128xf32>
    %1039 = arith.mulf %1036, %1036 : vector<1x128xf32>
    %1040 = arith.subf %1038, %1039 : vector<1x128xf32>
    %cst_430 = arith.constant 0.000000e+00 : f32
    %1041 = vector.broadcast %cst_430 : f32 to vector<1x128xf32>
    %1042 = arith.maximumf %1040, %1041 : vector<1x128xf32>
    %cst_431 = arith.constant 9.99999974E-6 : f32
    %1043 = vector.broadcast %cst_431 : f32 to vector<1x128xf32>
    %1044 = arith.addf %1042, %1043 : vector<1x128xf32>
    %1045 = math.rsqrt %1044 : vector<1x128xf32>
    %c22 = arith.constant 22 : index
    %c0_432 = arith.constant 0 : index
    %1046 = vector.load %arg5[%c22, %c0_432] : memref<28x128xf32, #tpu.memory_space<vmem>>, vector<1x128xf32>
    %1047 = arith.mulf %1045, %1046 : vector<1x128xf32>
    %c23 = arith.constant 23 : index
    %c0_433 = arith.constant 0 : index
    %1048 = vector.load %arg5[%c23, %c0_433] : memref<28x128xf32, #tpu.memory_space<vmem>>, vector<1x128xf32>
    %1049 = arith.mulf %1036, %1047 : vector<1x128xf32>
    %1050 = arith.subf %1048, %1049 : vector<1x128xf32>
    %1051 = vector.broadcast %1047 : vector<1x128xf32> to vector<2x128xf32>
    %1052 = arith.mulf %945, %1051 : vector<2x128xf32>
    %1053 = vector.broadcast %1050 : vector<1x128xf32> to vector<2x128xf32>
    %1054 = arith.addf %1052, %1053 : vector<2x128xf32>
    %cst_434 = arith.constant 0.000000e+00 : f32
    %1055 = vector.broadcast %cst_434 : f32 to vector<2x128xf32>
    %1056 = arith.cmpf oge, %1054, %1055 : vector<2x128xf32>
    %cst_435 = arith.constant 2.000000e-01 : f32
    %1057 = vector.broadcast %cst_435 : f32 to vector<2x128xf32>
    %1058 = arith.mulf %1057, %1054 : vector<2x128xf32>
    %1059 = arith.select %1056, %1054, %1058 : vector<2x128xi1>, vector<2x128xf32>
    %1060 = vector.broadcast %1047 : vector<1x128xf32> to vector<2x128xf32>
    %1061 = arith.mulf %950, %1060 : vector<2x128xf32>
    %1062 = vector.broadcast %1050 : vector<1x128xf32> to vector<2x128xf32>
    %1063 = arith.addf %1061, %1062 : vector<2x128xf32>
    %cst_436 = arith.constant 0.000000e+00 : f32
    %1064 = vector.broadcast %cst_436 : f32 to vector<2x128xf32>
    %1065 = arith.cmpf oge, %1063, %1064 : vector<2x128xf32>
    %cst_437 = arith.constant 2.000000e-01 : f32
    %1066 = vector.broadcast %cst_437 : f32 to vector<2x128xf32>
    %1067 = arith.mulf %1066, %1063 : vector<2x128xf32>
    %1068 = arith.select %1065, %1063, %1067 : vector<2x128xi1>, vector<2x128xf32>
    %1069 = vector.broadcast %1047 : vector<1x128xf32> to vector<2x128xf32>
    %1070 = arith.mulf %955, %1069 : vector<2x128xf32>
    %1071 = vector.broadcast %1050 : vector<1x128xf32> to vector<2x128xf32>
    %1072 = arith.addf %1070, %1071 : vector<2x128xf32>
    %cst_438 = arith.constant 0.000000e+00 : f32
    %1073 = vector.broadcast %cst_438 : f32 to vector<2x128xf32>
    %1074 = arith.cmpf oge, %1072, %1073 : vector<2x128xf32>
    %cst_439 = arith.constant 2.000000e-01 : f32
    %1075 = vector.broadcast %cst_439 : f32 to vector<2x128xf32>
    %1076 = arith.mulf %1075, %1072 : vector<2x128xf32>
    %1077 = arith.select %1074, %1072, %1076 : vector<2x128xi1>, vector<2x128xf32>
    %1078 = vector.broadcast %1047 : vector<1x128xf32> to vector<2x128xf32>
    %1079 = arith.mulf %960, %1078 : vector<2x128xf32>
    %1080 = vector.broadcast %1050 : vector<1x128xf32> to vector<2x128xf32>
    %1081 = arith.addf %1079, %1080 : vector<2x128xf32>
    %cst_440 = arith.constant 0.000000e+00 : f32
    %1082 = vector.broadcast %cst_440 : f32 to vector<2x128xf32>
    %1083 = arith.cmpf oge, %1081, %1082 : vector<2x128xf32>
    %cst_441 = arith.constant 2.000000e-01 : f32
    %1084 = vector.broadcast %cst_441 : f32 to vector<2x128xf32>
    %1085 = arith.mulf %1084, %1081 : vector<2x128xf32>
    %1086 = arith.select %1083, %1081, %1085 : vector<2x128xi1>, vector<2x128xf32>
    %1087 = vector.broadcast %1047 : vector<1x128xf32> to vector<2x128xf32>
    %1088 = arith.mulf %965, %1087 : vector<2x128xf32>
    %1089 = vector.broadcast %1050 : vector<1x128xf32> to vector<2x128xf32>
    %1090 = arith.addf %1088, %1089 : vector<2x128xf32>
    %cst_442 = arith.constant 0.000000e+00 : f32
    %1091 = vector.broadcast %cst_442 : f32 to vector<2x128xf32>
    %1092 = arith.cmpf oge, %1090, %1091 : vector<2x128xf32>
    %cst_443 = arith.constant 2.000000e-01 : f32
    %1093 = vector.broadcast %cst_443 : f32 to vector<2x128xf32>
    %1094 = arith.mulf %1093, %1090 : vector<2x128xf32>
    %1095 = arith.select %1092, %1090, %1094 : vector<2x128xi1>, vector<2x128xf32>
    %1096 = vector.broadcast %1047 : vector<1x128xf32> to vector<2x128xf32>
    %1097 = arith.mulf %970, %1096 : vector<2x128xf32>
    %1098 = vector.broadcast %1050 : vector<1x128xf32> to vector<2x128xf32>
    %1099 = arith.addf %1097, %1098 : vector<2x128xf32>
    %cst_444 = arith.constant 0.000000e+00 : f32
    %1100 = vector.broadcast %cst_444 : f32 to vector<2x128xf32>
    %1101 = arith.cmpf oge, %1099, %1100 : vector<2x128xf32>
    %cst_445 = arith.constant 2.000000e-01 : f32
    %1102 = vector.broadcast %cst_445 : f32 to vector<2x128xf32>
    %1103 = arith.mulf %1102, %1099 : vector<2x128xf32>
    %1104 = arith.select %1101, %1099, %1103 : vector<2x128xi1>, vector<2x128xf32>
    %1105 = vector.broadcast %1047 : vector<1x128xf32> to vector<2x128xf32>
    %1106 = arith.mulf %975, %1105 : vector<2x128xf32>
    %1107 = vector.broadcast %1050 : vector<1x128xf32> to vector<2x128xf32>
    %1108 = arith.addf %1106, %1107 : vector<2x128xf32>
    %cst_446 = arith.constant 0.000000e+00 : f32
    %1109 = vector.broadcast %cst_446 : f32 to vector<2x128xf32>
    %1110 = arith.cmpf oge, %1108, %1109 : vector<2x128xf32>
    %cst_447 = arith.constant 2.000000e-01 : f32
    %1111 = vector.broadcast %cst_447 : f32 to vector<2x128xf32>
    %1112 = arith.mulf %1111, %1108 : vector<2x128xf32>
    %1113 = arith.select %1110, %1108, %1112 : vector<2x128xi1>, vector<2x128xf32>
    %1114 = vector.broadcast %1047 : vector<1x128xf32> to vector<2x128xf32>
    %1115 = arith.mulf %980, %1114 : vector<2x128xf32>
    %1116 = vector.broadcast %1050 : vector<1x128xf32> to vector<2x128xf32>
    %1117 = arith.addf %1115, %1116 : vector<2x128xf32>
    %cst_448 = arith.constant 0.000000e+00 : f32
    %1118 = vector.broadcast %cst_448 : f32 to vector<2x128xf32>
    %1119 = arith.cmpf oge, %1117, %1118 : vector<2x128xf32>
    %cst_449 = arith.constant 2.000000e-01 : f32
    %1120 = vector.broadcast %cst_449 : f32 to vector<2x128xf32>
    %1121 = arith.mulf %1120, %1117 : vector<2x128xf32>
    %1122 = arith.select %1119, %1117, %1121 : vector<2x128xi1>, vector<2x128xf32>
    %c17_450 = arith.constant 17 : index
    %c0_451 = arith.constant 0 : index
    %c0_452 = arith.constant 0 : index
    %1123 = vector.load %arg4[%c17_450, %c0_451, %c0_452] : memref<23x128x128xf32, #tpu.memory_space<vmem>>, vector<1x128x128xf32>
    %1124 = vector.shape_cast %1123 : vector<1x128x128xf32> to vector<128x128xf32>
    %c18_453 = arith.constant 18 : index
    %c0_454 = arith.constant 0 : index
    %c0_455 = arith.constant 0 : index
    %1125 = vector.load %arg4[%c18_453, %c0_454, %c0_455] : memref<23x128x128xf32, #tpu.memory_space<vmem>>, vector<1x128x128xf32>
    %1126 = vector.shape_cast %1125 : vector<1x128x128xf32> to vector<128x128xf32>
    %c19_456 = arith.constant 19 : index
    %c0_457 = arith.constant 0 : index
    %c0_458 = arith.constant 0 : index
    %1127 = vector.load %arg4[%c19_456, %c0_457, %c0_458] : memref<23x128x128xf32, #tpu.memory_space<vmem>>, vector<1x128x128xf32>
    %1128 = vector.shape_cast %1127 : vector<1x128x128xf32> to vector<128x128xf32>
    %c20_459 = arith.constant 20 : index
    %c0_460 = arith.constant 0 : index
    %c0_461 = arith.constant 0 : index
    %1129 = vector.load %arg4[%c20_459, %c0_460, %c0_461] : memref<23x128x128xf32, #tpu.memory_space<vmem>>, vector<1x128x128xf32>
    %1130 = vector.shape_cast %1129 : vector<1x128x128xf32> to vector<128x128xf32>
    %c24 = arith.constant 24 : index
    %c0_462 = arith.constant 0 : index
    %1131 = vector.load %arg5[%c24, %c0_462] : memref<28x128xf32, #tpu.memory_space<vmem>>, vector<1x128xf32>
    %cst_463 = arith.constant dense<0.000000e+00> : vector<2x128xf32>
    %1132 = tpu.matmul %1059, %1124, %cst_463 {dimension_numbers = #tpu.dot_dimension_numbers<[1], [0], [0], [1], [0, 0, 1, 1], [], []>} : vector<2x128xf32>, vector<128x128xf32>, vector<2x128xf32> -> vector<2x128xf32>
    %cst_464 = arith.constant dense<0.000000e+00> : vector<2x128xf32>
    %1133 = tpu.matmul %524, %1128, %cst_464 {dimension_numbers = #tpu.dot_dimension_numbers<[1], [0], [0], [1], [0, 0, 1, 1], [], []>} : vector<2x128xf32>, vector<128x128xf32>, vector<2x128xf32> -> vector<2x128xf32>
    %1134 = arith.addf %1132, %1133 : vector<2x128xf32>
    %1135 = vector.broadcast %1131 : vector<1x128xf32> to vector<2x128xf32>
    %1136 = arith.addf %1134, %1135 : vector<2x128xf32>
    %cst_465 = arith.constant dense<0.000000e+00> : vector<2x128xf32>
    %1137 = tpu.matmul %1059, %1126, %cst_465 {dimension_numbers = #tpu.dot_dimension_numbers<[1], [0], [0], [1], [0, 0, 1, 1], [], []>} : vector<2x128xf32>, vector<128x128xf32>, vector<2x128xf32> -> vector<2x128xf32>
    %cst_466 = arith.constant dense<0.000000e+00> : vector<2x128xf32>
    %1138 = tpu.matmul %524, %1130, %cst_466 {dimension_numbers = #tpu.dot_dimension_numbers<[1], [0], [0], [1], [0, 0, 1, 1], [], []>} : vector<2x128xf32>, vector<128x128xf32>, vector<2x128xf32> -> vector<2x128xf32>
    %1139 = arith.addf %1137, %1138 : vector<2x128xf32>
    %1140 = vector.broadcast %1131 : vector<1x128xf32> to vector<2x128xf32>
    %1141 = arith.addf %1139, %1140 : vector<2x128xf32>
    %cst_467 = arith.constant dense<0.000000e+00> : vector<2x128xf32>
    %1142 = tpu.matmul %1068, %1124, %cst_467 {dimension_numbers = #tpu.dot_dimension_numbers<[1], [0], [0], [1], [0, 0, 1, 1], [], []>} : vector<2x128xf32>, vector<128x128xf32>, vector<2x128xf32> -> vector<2x128xf32>
    %cst_468 = arith.constant dense<0.000000e+00> : vector<2x128xf32>
    %1143 = tpu.matmul %533, %1128, %cst_468 {dimension_numbers = #tpu.dot_dimension_numbers<[1], [0], [0], [1], [0, 0, 1, 1], [], []>} : vector<2x128xf32>, vector<128x128xf32>, vector<2x128xf32> -> vector<2x128xf32>
    %1144 = arith.addf %1142, %1143 : vector<2x128xf32>
    %1145 = vector.broadcast %1131 : vector<1x128xf32> to vector<2x128xf32>
    %1146 = arith.addf %1144, %1145 : vector<2x128xf32>
    %cst_469 = arith.constant dense<0.000000e+00> : vector<2x128xf32>
    %1147 = tpu.matmul %1068, %1126, %cst_469 {dimension_numbers = #tpu.dot_dimension_numbers<[1], [0], [0], [1], [0, 0, 1, 1], [], []>} : vector<2x128xf32>, vector<128x128xf32>, vector<2x128xf32> -> vector<2x128xf32>
    %cst_470 = arith.constant dense<0.000000e+00> : vector<2x128xf32>
    %1148 = tpu.matmul %533, %1130, %cst_470 {dimension_numbers = #tpu.dot_dimension_numbers<[1], [0], [0], [1], [0, 0, 1, 1], [], []>} : vector<2x128xf32>, vector<128x128xf32>, vector<2x128xf32> -> vector<2x128xf32>
    %1149 = arith.addf %1147, %1148 : vector<2x128xf32>
    %1150 = vector.broadcast %1131 : vector<1x128xf32> to vector<2x128xf32>
    %1151 = arith.addf %1149, %1150 : vector<2x128xf32>
    %cst_471 = arith.constant dense<0.000000e+00> : vector<2x128xf32>
    %1152 = tpu.matmul %1077, %1124, %cst_471 {dimension_numbers = #tpu.dot_dimension_numbers<[1], [0], [0], [1], [0, 0, 1, 1], [], []>} : vector<2x128xf32>, vector<128x128xf32>, vector<2x128xf32> -> vector<2x128xf32>
    %cst_472 = arith.constant dense<0.000000e+00> : vector<2x128xf32>
    %1153 = tpu.matmul %542, %1128, %cst_472 {dimension_numbers = #tpu.dot_dimension_numbers<[1], [0], [0], [1], [0, 0, 1, 1], [], []>} : vector<2x128xf32>, vector<128x128xf32>, vector<2x128xf32> -> vector<2x128xf32>
    %1154 = arith.addf %1152, %1153 : vector<2x128xf32>
    %1155 = vector.broadcast %1131 : vector<1x128xf32> to vector<2x128xf32>
    %1156 = arith.addf %1154, %1155 : vector<2x128xf32>
    %cst_473 = arith.constant dense<0.000000e+00> : vector<2x128xf32>
    %1157 = tpu.matmul %1077, %1126, %cst_473 {dimension_numbers = #tpu.dot_dimension_numbers<[1], [0], [0], [1], [0, 0, 1, 1], [], []>} : vector<2x128xf32>, vector<128x128xf32>, vector<2x128xf32> -> vector<2x128xf32>
    %cst_474 = arith.constant dense<0.000000e+00> : vector<2x128xf32>
    %1158 = tpu.matmul %542, %1130, %cst_474 {dimension_numbers = #tpu.dot_dimension_numbers<[1], [0], [0], [1], [0, 0, 1, 1], [], []>} : vector<2x128xf32>, vector<128x128xf32>, vector<2x128xf32> -> vector<2x128xf32>
    %1159 = arith.addf %1157, %1158 : vector<2x128xf32>
    %1160 = vector.broadcast %1131 : vector<1x128xf32> to vector<2x128xf32>
    %1161 = arith.addf %1159, %1160 : vector<2x128xf32>
    %cst_475 = arith.constant dense<0.000000e+00> : vector<2x128xf32>
    %1162 = tpu.matmul %1086, %1124, %cst_475 {dimension_numbers = #tpu.dot_dimension_numbers<[1], [0], [0], [1], [0, 0, 1, 1], [], []>} : vector<2x128xf32>, vector<128x128xf32>, vector<2x128xf32> -> vector<2x128xf32>
    %cst_476 = arith.constant dense<0.000000e+00> : vector<2x128xf32>
    %1163 = tpu.matmul %551, %1128, %cst_476 {dimension_numbers = #tpu.dot_dimension_numbers<[1], [0], [0], [1], [0, 0, 1, 1], [], []>} : vector<2x128xf32>, vector<128x128xf32>, vector<2x128xf32> -> vector<2x128xf32>
    %1164 = arith.addf %1162, %1163 : vector<2x128xf32>
    %1165 = vector.broadcast %1131 : vector<1x128xf32> to vector<2x128xf32>
    %1166 = arith.addf %1164, %1165 : vector<2x128xf32>
    %cst_477 = arith.constant dense<0.000000e+00> : vector<2x128xf32>
    %1167 = tpu.matmul %1086, %1126, %cst_477 {dimension_numbers = #tpu.dot_dimension_numbers<[1], [0], [0], [1], [0, 0, 1, 1], [], []>} : vector<2x128xf32>, vector<128x128xf32>, vector<2x128xf32> -> vector<2x128xf32>
    %cst_478 = arith.constant dense<0.000000e+00> : vector<2x128xf32>
    %1168 = tpu.matmul %551, %1130, %cst_478 {dimension_numbers = #tpu.dot_dimension_numbers<[1], [0], [0], [1], [0, 0, 1, 1], [], []>} : vector<2x128xf32>, vector<128x128xf32>, vector<2x128xf32> -> vector<2x128xf32>
    %1169 = arith.addf %1167, %1168 : vector<2x128xf32>
    %1170 = vector.broadcast %1131 : vector<1x128xf32> to vector<2x128xf32>
    %1171 = arith.addf %1169, %1170 : vector<2x128xf32>
    %cst_479 = arith.constant dense<0.000000e+00> : vector<2x128xf32>
    %1172 = tpu.matmul %1095, %1124, %cst_479 {dimension_numbers = #tpu.dot_dimension_numbers<[1], [0], [0], [1], [0, 0, 1, 1], [], []>} : vector<2x128xf32>, vector<128x128xf32>, vector<2x128xf32> -> vector<2x128xf32>
    %cst_480 = arith.constant dense<0.000000e+00> : vector<2x128xf32>
    %1173 = tpu.matmul %560, %1128, %cst_480 {dimension_numbers = #tpu.dot_dimension_numbers<[1], [0], [0], [1], [0, 0, 1, 1], [], []>} : vector<2x128xf32>, vector<128x128xf32>, vector<2x128xf32> -> vector<2x128xf32>
    %1174 = arith.addf %1172, %1173 : vector<2x128xf32>
    %1175 = vector.broadcast %1131 : vector<1x128xf32> to vector<2x128xf32>
    %1176 = arith.addf %1174, %1175 : vector<2x128xf32>
    %cst_481 = arith.constant dense<0.000000e+00> : vector<2x128xf32>
    %1177 = tpu.matmul %1095, %1126, %cst_481 {dimension_numbers = #tpu.dot_dimension_numbers<[1], [0], [0], [1], [0, 0, 1, 1], [], []>} : vector<2x128xf32>, vector<128x128xf32>, vector<2x128xf32> -> vector<2x128xf32>
    %cst_482 = arith.constant dense<0.000000e+00> : vector<2x128xf32>
    %1178 = tpu.matmul %560, %1130, %cst_482 {dimension_numbers = #tpu.dot_dimension_numbers<[1], [0], [0], [1], [0, 0, 1, 1], [], []>} : vector<2x128xf32>, vector<128x128xf32>, vector<2x128xf32> -> vector<2x128xf32>
    %1179 = arith.addf %1177, %1178 : vector<2x128xf32>
    %1180 = vector.broadcast %1131 : vector<1x128xf32> to vector<2x128xf32>
    %1181 = arith.addf %1179, %1180 : vector<2x128xf32>
    %cst_483 = arith.constant dense<0.000000e+00> : vector<2x128xf32>
    %1182 = tpu.matmul %1104, %1124, %cst_483 {dimension_numbers = #tpu.dot_dimension_numbers<[1], [0], [0], [1], [0, 0, 1, 1], [], []>} : vector<2x128xf32>, vector<128x128xf32>, vector<2x128xf32> -> vector<2x128xf32>
    %cst_484 = arith.constant dense<0.000000e+00> : vector<2x128xf32>
    %1183 = tpu.matmul %569, %1128, %cst_484 {dimension_numbers = #tpu.dot_dimension_numbers<[1], [0], [0], [1], [0, 0, 1, 1], [], []>} : vector<2x128xf32>, vector<128x128xf32>, vector<2x128xf32> -> vector<2x128xf32>
    %1184 = arith.addf %1182, %1183 : vector<2x128xf32>
    %1185 = vector.broadcast %1131 : vector<1x128xf32> to vector<2x128xf32>
    %1186 = arith.addf %1184, %1185 : vector<2x128xf32>
    %cst_485 = arith.constant dense<0.000000e+00> : vector<2x128xf32>
    %1187 = tpu.matmul %1104, %1126, %cst_485 {dimension_numbers = #tpu.dot_dimension_numbers<[1], [0], [0], [1], [0, 0, 1, 1], [], []>} : vector<2x128xf32>, vector<128x128xf32>, vector<2x128xf32> -> vector<2x128xf32>
    %cst_486 = arith.constant dense<0.000000e+00> : vector<2x128xf32>
    %1188 = tpu.matmul %569, %1130, %cst_486 {dimension_numbers = #tpu.dot_dimension_numbers<[1], [0], [0], [1], [0, 0, 1, 1], [], []>} : vector<2x128xf32>, vector<128x128xf32>, vector<2x128xf32> -> vector<2x128xf32>
    %1189 = arith.addf %1187, %1188 : vector<2x128xf32>
    %1190 = vector.broadcast %1131 : vector<1x128xf32> to vector<2x128xf32>
    %1191 = arith.addf %1189, %1190 : vector<2x128xf32>
    %cst_487 = arith.constant dense<0.000000e+00> : vector<2x128xf32>
    %1192 = tpu.matmul %1113, %1124, %cst_487 {dimension_numbers = #tpu.dot_dimension_numbers<[1], [0], [0], [1], [0, 0, 1, 1], [], []>} : vector<2x128xf32>, vector<128x128xf32>, vector<2x128xf32> -> vector<2x128xf32>
    %cst_488 = arith.constant dense<0.000000e+00> : vector<2x128xf32>
    %1193 = tpu.matmul %578, %1128, %cst_488 {dimension_numbers = #tpu.dot_dimension_numbers<[1], [0], [0], [1], [0, 0, 1, 1], [], []>} : vector<2x128xf32>, vector<128x128xf32>, vector<2x128xf32> -> vector<2x128xf32>
    %1194 = arith.addf %1192, %1193 : vector<2x128xf32>
    %1195 = vector.broadcast %1131 : vector<1x128xf32> to vector<2x128xf32>
    %1196 = arith.addf %1194, %1195 : vector<2x128xf32>
    %cst_489 = arith.constant dense<0.000000e+00> : vector<2x128xf32>
    %1197 = tpu.matmul %1113, %1126, %cst_489 {dimension_numbers = #tpu.dot_dimension_numbers<[1], [0], [0], [1], [0, 0, 1, 1], [], []>} : vector<2x128xf32>, vector<128x128xf32>, vector<2x128xf32> -> vector<2x128xf32>
    %cst_490 = arith.constant dense<0.000000e+00> : vector<2x128xf32>
    %1198 = tpu.matmul %578, %1130, %cst_490 {dimension_numbers = #tpu.dot_dimension_numbers<[1], [0], [0], [1], [0, 0, 1, 1], [], []>} : vector<2x128xf32>, vector<128x128xf32>, vector<2x128xf32> -> vector<2x128xf32>
    %1199 = arith.addf %1197, %1198 : vector<2x128xf32>
    %1200 = vector.broadcast %1131 : vector<1x128xf32> to vector<2x128xf32>
    %1201 = arith.addf %1199, %1200 : vector<2x128xf32>
    %cst_491 = arith.constant dense<0.000000e+00> : vector<2x128xf32>
    %1202 = tpu.matmul %1122, %1124, %cst_491 {dimension_numbers = #tpu.dot_dimension_numbers<[1], [0], [0], [1], [0, 0, 1, 1], [], []>} : vector<2x128xf32>, vector<128x128xf32>, vector<2x128xf32> -> vector<2x128xf32>
    %cst_492 = arith.constant dense<0.000000e+00> : vector<2x128xf32>
    %1203 = tpu.matmul %587, %1128, %cst_492 {dimension_numbers = #tpu.dot_dimension_numbers<[1], [0], [0], [1], [0, 0, 1, 1], [], []>} : vector<2x128xf32>, vector<128x128xf32>, vector<2x128xf32> -> vector<2x128xf32>
    %1204 = arith.addf %1202, %1203 : vector<2x128xf32>
    %1205 = vector.broadcast %1131 : vector<1x128xf32> to vector<2x128xf32>
    %1206 = arith.addf %1204, %1205 : vector<2x128xf32>
    %cst_493 = arith.constant dense<0.000000e+00> : vector<2x128xf32>
    %1207 = tpu.matmul %1122, %1126, %cst_493 {dimension_numbers = #tpu.dot_dimension_numbers<[1], [0], [0], [1], [0, 0, 1, 1], [], []>} : vector<2x128xf32>, vector<128x128xf32>, vector<2x128xf32> -> vector<2x128xf32>
    %cst_494 = arith.constant dense<0.000000e+00> : vector<2x128xf32>
    %1208 = tpu.matmul %587, %1130, %cst_494 {dimension_numbers = #tpu.dot_dimension_numbers<[1], [0], [0], [1], [0, 0, 1, 1], [], []>} : vector<2x128xf32>, vector<128x128xf32>, vector<2x128xf32> -> vector<2x128xf32>
    %1209 = arith.addf %1207, %1208 : vector<2x128xf32>
    %1210 = vector.broadcast %1131 : vector<1x128xf32> to vector<2x128xf32>
    %1211 = arith.addf %1209, %1210 : vector<2x128xf32>
    %cst_495 = arith.constant dense<0.000000e+00> : vector<128xf32>
    %1212 = vector.multi_reduction <add>, %1136, %cst_495 [0] : vector<2x128xf32> to vector<128xf32>
    %1213 = vector.shape_cast %1212 : vector<128xf32> to vector<1x128xf32>
    %1214 = arith.mulf %1136, %1136 : vector<2x128xf32>
    %cst_496 = arith.constant dense<0.000000e+00> : vector<128xf32>
    %1215 = vector.multi_reduction <add>, %1214, %cst_496 [0] : vector<2x128xf32> to vector<128xf32>
    %1216 = vector.shape_cast %1215 : vector<128xf32> to vector<1x128xf32>
    %cst_497 = arith.constant dense<0.000000e+00> : vector<128xf32>
    %1217 = vector.multi_reduction <add>, %1141, %cst_497 [0] : vector<2x128xf32> to vector<128xf32>
    %1218 = vector.shape_cast %1217 : vector<128xf32> to vector<1x128xf32>
    %1219 = arith.addf %1213, %1218 : vector<1x128xf32>
    %1220 = arith.mulf %1141, %1141 : vector<2x128xf32>
    %cst_498 = arith.constant dense<0.000000e+00> : vector<128xf32>
    %1221 = vector.multi_reduction <add>, %1220, %cst_498 [0] : vector<2x128xf32> to vector<128xf32>
    %1222 = vector.shape_cast %1221 : vector<128xf32> to vector<1x128xf32>
    %1223 = arith.addf %1216, %1222 : vector<1x128xf32>
    %cst_499 = arith.constant dense<0.000000e+00> : vector<128xf32>
    %1224 = vector.multi_reduction <add>, %1146, %cst_499 [0] : vector<2x128xf32> to vector<128xf32>
    %1225 = vector.shape_cast %1224 : vector<128xf32> to vector<1x128xf32>
    %1226 = arith.addf %1219, %1225 : vector<1x128xf32>
    %1227 = arith.mulf %1146, %1146 : vector<2x128xf32>
    %cst_500 = arith.constant dense<0.000000e+00> : vector<128xf32>
    %1228 = vector.multi_reduction <add>, %1227, %cst_500 [0] : vector<2x128xf32> to vector<128xf32>
    %1229 = vector.shape_cast %1228 : vector<128xf32> to vector<1x128xf32>
    %1230 = arith.addf %1223, %1229 : vector<1x128xf32>
    %cst_501 = arith.constant dense<0.000000e+00> : vector<128xf32>
    %1231 = vector.multi_reduction <add>, %1151, %cst_501 [0] : vector<2x128xf32> to vector<128xf32>
    %1232 = vector.shape_cast %1231 : vector<128xf32> to vector<1x128xf32>
    %1233 = arith.addf %1226, %1232 : vector<1x128xf32>
    %1234 = arith.mulf %1151, %1151 : vector<2x128xf32>
    %cst_502 = arith.constant dense<0.000000e+00> : vector<128xf32>
    %1235 = vector.multi_reduction <add>, %1234, %cst_502 [0] : vector<2x128xf32> to vector<128xf32>
    %1236 = vector.shape_cast %1235 : vector<128xf32> to vector<1x128xf32>
    %1237 = arith.addf %1230, %1236 : vector<1x128xf32>
    %cst_503 = arith.constant dense<0.000000e+00> : vector<128xf32>
    %1238 = vector.multi_reduction <add>, %1156, %cst_503 [0] : vector<2x128xf32> to vector<128xf32>
    %1239 = vector.shape_cast %1238 : vector<128xf32> to vector<1x128xf32>
    %1240 = arith.addf %1233, %1239 : vector<1x128xf32>
    %1241 = arith.mulf %1156, %1156 : vector<2x128xf32>
    %cst_504 = arith.constant dense<0.000000e+00> : vector<128xf32>
    %1242 = vector.multi_reduction <add>, %1241, %cst_504 [0] : vector<2x128xf32> to vector<128xf32>
    %1243 = vector.shape_cast %1242 : vector<128xf32> to vector<1x128xf32>
    %1244 = arith.addf %1237, %1243 : vector<1x128xf32>
    %cst_505 = arith.constant dense<0.000000e+00> : vector<128xf32>
    %1245 = vector.multi_reduction <add>, %1161, %cst_505 [0] : vector<2x128xf32> to vector<128xf32>
    %1246 = vector.shape_cast %1245 : vector<128xf32> to vector<1x128xf32>
    %1247 = arith.addf %1240, %1246 : vector<1x128xf32>
    %1248 = arith.mulf %1161, %1161 : vector<2x128xf32>
    %cst_506 = arith.constant dense<0.000000e+00> : vector<128xf32>
    %1249 = vector.multi_reduction <add>, %1248, %cst_506 [0] : vector<2x128xf32> to vector<128xf32>
    %1250 = vector.shape_cast %1249 : vector<128xf32> to vector<1x128xf32>
    %1251 = arith.addf %1244, %1250 : vector<1x128xf32>
    %cst_507 = arith.constant dense<0.000000e+00> : vector<128xf32>
    %1252 = vector.multi_reduction <add>, %1166, %cst_507 [0] : vector<2x128xf32> to vector<128xf32>
    %1253 = vector.shape_cast %1252 : vector<128xf32> to vector<1x128xf32>
    %1254 = arith.addf %1247, %1253 : vector<1x128xf32>
    %1255 = arith.mulf %1166, %1166 : vector<2x128xf32>
    %cst_508 = arith.constant dense<0.000000e+00> : vector<128xf32>
    %1256 = vector.multi_reduction <add>, %1255, %cst_508 [0] : vector<2x128xf32> to vector<128xf32>
    %1257 = vector.shape_cast %1256 : vector<128xf32> to vector<1x128xf32>
    %1258 = arith.addf %1251, %1257 : vector<1x128xf32>
    %cst_509 = arith.constant dense<0.000000e+00> : vector<128xf32>
    %1259 = vector.multi_reduction <add>, %1171, %cst_509 [0] : vector<2x128xf32> to vector<128xf32>
    %1260 = vector.shape_cast %1259 : vector<128xf32> to vector<1x128xf32>
    %1261 = arith.addf %1254, %1260 : vector<1x128xf32>
    %1262 = arith.mulf %1171, %1171 : vector<2x128xf32>
    %cst_510 = arith.constant dense<0.000000e+00> : vector<128xf32>
    %1263 = vector.multi_reduction <add>, %1262, %cst_510 [0] : vector<2x128xf32> to vector<128xf32>
    %1264 = vector.shape_cast %1263 : vector<128xf32> to vector<1x128xf32>
    %1265 = arith.addf %1258, %1264 : vector<1x128xf32>
    %cst_511 = arith.constant dense<0.000000e+00> : vector<128xf32>
    %1266 = vector.multi_reduction <add>, %1176, %cst_511 [0] : vector<2x128xf32> to vector<128xf32>
    %1267 = vector.shape_cast %1266 : vector<128xf32> to vector<1x128xf32>
    %1268 = arith.addf %1261, %1267 : vector<1x128xf32>
    %1269 = arith.mulf %1176, %1176 : vector<2x128xf32>
    %cst_512 = arith.constant dense<0.000000e+00> : vector<128xf32>
    %1270 = vector.multi_reduction <add>, %1269, %cst_512 [0] : vector<2x128xf32> to vector<128xf32>
    %1271 = vector.shape_cast %1270 : vector<128xf32> to vector<1x128xf32>
    %1272 = arith.addf %1265, %1271 : vector<1x128xf32>
    %cst_513 = arith.constant dense<0.000000e+00> : vector<128xf32>
    %1273 = vector.multi_reduction <add>, %1181, %cst_513 [0] : vector<2x128xf32> to vector<128xf32>
    %1274 = vector.shape_cast %1273 : vector<128xf32> to vector<1x128xf32>
    %1275 = arith.addf %1268, %1274 : vector<1x128xf32>
    %1276 = arith.mulf %1181, %1181 : vector<2x128xf32>
    %cst_514 = arith.constant dense<0.000000e+00> : vector<128xf32>
    %1277 = vector.multi_reduction <add>, %1276, %cst_514 [0] : vector<2x128xf32> to vector<128xf32>
    %1278 = vector.shape_cast %1277 : vector<128xf32> to vector<1x128xf32>
    %1279 = arith.addf %1272, %1278 : vector<1x128xf32>
    %cst_515 = arith.constant dense<0.000000e+00> : vector<128xf32>
    %1280 = vector.multi_reduction <add>, %1186, %cst_515 [0] : vector<2x128xf32> to vector<128xf32>
    %1281 = vector.shape_cast %1280 : vector<128xf32> to vector<1x128xf32>
    %1282 = arith.addf %1275, %1281 : vector<1x128xf32>
    %1283 = arith.mulf %1186, %1186 : vector<2x128xf32>
    %cst_516 = arith.constant dense<0.000000e+00> : vector<128xf32>
    %1284 = vector.multi_reduction <add>, %1283, %cst_516 [0] : vector<2x128xf32> to vector<128xf32>
    %1285 = vector.shape_cast %1284 : vector<128xf32> to vector<1x128xf32>
    %1286 = arith.addf %1279, %1285 : vector<1x128xf32>
    %cst_517 = arith.constant dense<0.000000e+00> : vector<128xf32>
    %1287 = vector.multi_reduction <add>, %1191, %cst_517 [0] : vector<2x128xf32> to vector<128xf32>
    %1288 = vector.shape_cast %1287 : vector<128xf32> to vector<1x128xf32>
    %1289 = arith.addf %1282, %1288 : vector<1x128xf32>
    %1290 = arith.mulf %1191, %1191 : vector<2x128xf32>
    %cst_518 = arith.constant dense<0.000000e+00> : vector<128xf32>
    %1291 = vector.multi_reduction <add>, %1290, %cst_518 [0] : vector<2x128xf32> to vector<128xf32>
    %1292 = vector.shape_cast %1291 : vector<128xf32> to vector<1x128xf32>
    %1293 = arith.addf %1286, %1292 : vector<1x128xf32>
    %cst_519 = arith.constant dense<0.000000e+00> : vector<128xf32>
    %1294 = vector.multi_reduction <add>, %1196, %cst_519 [0] : vector<2x128xf32> to vector<128xf32>
    %1295 = vector.shape_cast %1294 : vector<128xf32> to vector<1x128xf32>
    %1296 = arith.addf %1289, %1295 : vector<1x128xf32>
    %1297 = arith.mulf %1196, %1196 : vector<2x128xf32>
    %cst_520 = arith.constant dense<0.000000e+00> : vector<128xf32>
    %1298 = vector.multi_reduction <add>, %1297, %cst_520 [0] : vector<2x128xf32> to vector<128xf32>
    %1299 = vector.shape_cast %1298 : vector<128xf32> to vector<1x128xf32>
    %1300 = arith.addf %1293, %1299 : vector<1x128xf32>
    %cst_521 = arith.constant dense<0.000000e+00> : vector<128xf32>
    %1301 = vector.multi_reduction <add>, %1201, %cst_521 [0] : vector<2x128xf32> to vector<128xf32>
    %1302 = vector.shape_cast %1301 : vector<128xf32> to vector<1x128xf32>
    %1303 = arith.addf %1296, %1302 : vector<1x128xf32>
    %1304 = arith.mulf %1201, %1201 : vector<2x128xf32>
    %cst_522 = arith.constant dense<0.000000e+00> : vector<128xf32>
    %1305 = vector.multi_reduction <add>, %1304, %cst_522 [0] : vector<2x128xf32> to vector<128xf32>
    %1306 = vector.shape_cast %1305 : vector<128xf32> to vector<1x128xf32>
    %1307 = arith.addf %1300, %1306 : vector<1x128xf32>
    %cst_523 = arith.constant dense<0.000000e+00> : vector<128xf32>
    %1308 = vector.multi_reduction <add>, %1206, %cst_523 [0] : vector<2x128xf32> to vector<128xf32>
    %1309 = vector.shape_cast %1308 : vector<128xf32> to vector<1x128xf32>
    %1310 = arith.addf %1303, %1309 : vector<1x128xf32>
    %1311 = arith.mulf %1206, %1206 : vector<2x128xf32>
    %cst_524 = arith.constant dense<0.000000e+00> : vector<128xf32>
    %1312 = vector.multi_reduction <add>, %1311, %cst_524 [0] : vector<2x128xf32> to vector<128xf32>
    %1313 = vector.shape_cast %1312 : vector<128xf32> to vector<1x128xf32>
    %1314 = arith.addf %1307, %1313 : vector<1x128xf32>
    %cst_525 = arith.constant dense<0.000000e+00> : vector<128xf32>
    %1315 = vector.multi_reduction <add>, %1211, %cst_525 [0] : vector<2x128xf32> to vector<128xf32>
    %1316 = vector.shape_cast %1315 : vector<128xf32> to vector<1x128xf32>
    %1317 = arith.addf %1310, %1316 : vector<1x128xf32>
    %1318 = arith.mulf %1211, %1211 : vector<2x128xf32>
    %cst_526 = arith.constant dense<0.000000e+00> : vector<128xf32>
    %1319 = vector.multi_reduction <add>, %1318, %cst_526 [0] : vector<2x128xf32> to vector<128xf32>
    %1320 = vector.shape_cast %1319 : vector<128xf32> to vector<1x128xf32>
    %1321 = arith.addf %1314, %1320 : vector<1x128xf32>
    %cst_527 = arith.constant 3.125000e-02 : f32
    %1322 = vector.broadcast %cst_527 : f32 to vector<1x128xf32>
    %1323 = arith.mulf %1317, %1322 : vector<1x128xf32>
    %cst_528 = arith.constant 3.125000e-02 : f32
    %1324 = vector.broadcast %cst_528 : f32 to vector<1x128xf32>
    %1325 = arith.mulf %1321, %1324 : vector<1x128xf32>
    %1326 = arith.mulf %1323, %1323 : vector<1x128xf32>
    %1327 = arith.subf %1325, %1326 : vector<1x128xf32>
    %cst_529 = arith.constant 0.000000e+00 : f32
    %1328 = vector.broadcast %cst_529 : f32 to vector<1x128xf32>
    %1329 = arith.maximumf %1327, %1328 : vector<1x128xf32>
    %cst_530 = arith.constant 9.99999974E-6 : f32
    %1330 = vector.broadcast %cst_530 : f32 to vector<1x128xf32>
    %1331 = arith.addf %1329, %1330 : vector<1x128xf32>
    %1332 = math.rsqrt %1331 : vector<1x128xf32>
    %c25 = arith.constant 25 : index
    %c0_531 = arith.constant 0 : index
    %1333 = vector.load %arg5[%c25, %c0_531] : memref<28x128xf32, #tpu.memory_space<vmem>>, vector<1x128xf32>
    %1334 = arith.mulf %1332, %1333 : vector<1x128xf32>
    %c26 = arith.constant 26 : index
    %c0_532 = arith.constant 0 : index
    %1335 = vector.load %arg5[%c26, %c0_532] : memref<28x128xf32, #tpu.memory_space<vmem>>, vector<1x128xf32>
    %1336 = arith.mulf %1323, %1334 : vector<1x128xf32>
    %1337 = arith.subf %1335, %1336 : vector<1x128xf32>
    %1338 = vector.broadcast %1334 : vector<1x128xf32> to vector<2x128xf32>
    %1339 = arith.mulf %1136, %1338 : vector<2x128xf32>
    %1340 = vector.broadcast %1337 : vector<1x128xf32> to vector<2x128xf32>
    %1341 = arith.addf %1339, %1340 : vector<2x128xf32>
    %cst_533 = arith.constant 0.000000e+00 : f32
    %1342 = vector.broadcast %cst_533 : f32 to vector<2x128xf32>
    %1343 = arith.cmpf oge, %1341, %1342 : vector<2x128xf32>
    %cst_534 = arith.constant 2.000000e-01 : f32
    %1344 = vector.broadcast %cst_534 : f32 to vector<2x128xf32>
    %1345 = arith.mulf %1344, %1341 : vector<2x128xf32>
    %1346 = arith.select %1343, %1341, %1345 : vector<2x128xi1>, vector<2x128xf32>
    %1347 = vector.broadcast %1334 : vector<1x128xf32> to vector<2x128xf32>
    %1348 = arith.mulf %1141, %1347 : vector<2x128xf32>
    %1349 = vector.broadcast %1337 : vector<1x128xf32> to vector<2x128xf32>
    %1350 = arith.addf %1348, %1349 : vector<2x128xf32>
    %cst_535 = arith.constant 0.000000e+00 : f32
    %1351 = vector.broadcast %cst_535 : f32 to vector<2x128xf32>
    %1352 = arith.cmpf oge, %1350, %1351 : vector<2x128xf32>
    %cst_536 = arith.constant 2.000000e-01 : f32
    %1353 = vector.broadcast %cst_536 : f32 to vector<2x128xf32>
    %1354 = arith.mulf %1353, %1350 : vector<2x128xf32>
    %1355 = arith.select %1352, %1350, %1354 : vector<2x128xi1>, vector<2x128xf32>
    %1356 = vector.broadcast %1334 : vector<1x128xf32> to vector<2x128xf32>
    %1357 = arith.mulf %1146, %1356 : vector<2x128xf32>
    %1358 = vector.broadcast %1337 : vector<1x128xf32> to vector<2x128xf32>
    %1359 = arith.addf %1357, %1358 : vector<2x128xf32>
    %cst_537 = arith.constant 0.000000e+00 : f32
    %1360 = vector.broadcast %cst_537 : f32 to vector<2x128xf32>
    %1361 = arith.cmpf oge, %1359, %1360 : vector<2x128xf32>
    %cst_538 = arith.constant 2.000000e-01 : f32
    %1362 = vector.broadcast %cst_538 : f32 to vector<2x128xf32>
    %1363 = arith.mulf %1362, %1359 : vector<2x128xf32>
    %1364 = arith.select %1361, %1359, %1363 : vector<2x128xi1>, vector<2x128xf32>
    %1365 = vector.broadcast %1334 : vector<1x128xf32> to vector<2x128xf32>
    %1366 = arith.mulf %1151, %1365 : vector<2x128xf32>
    %1367 = vector.broadcast %1337 : vector<1x128xf32> to vector<2x128xf32>
    %1368 = arith.addf %1366, %1367 : vector<2x128xf32>
    %cst_539 = arith.constant 0.000000e+00 : f32
    %1369 = vector.broadcast %cst_539 : f32 to vector<2x128xf32>
    %1370 = arith.cmpf oge, %1368, %1369 : vector<2x128xf32>
    %cst_540 = arith.constant 2.000000e-01 : f32
    %1371 = vector.broadcast %cst_540 : f32 to vector<2x128xf32>
    %1372 = arith.mulf %1371, %1368 : vector<2x128xf32>
    %1373 = arith.select %1370, %1368, %1372 : vector<2x128xi1>, vector<2x128xf32>
    %1374 = vector.broadcast %1334 : vector<1x128xf32> to vector<2x128xf32>
    %1375 = arith.mulf %1156, %1374 : vector<2x128xf32>
    %1376 = vector.broadcast %1337 : vector<1x128xf32> to vector<2x128xf32>
    %1377 = arith.addf %1375, %1376 : vector<2x128xf32>
    %cst_541 = arith.constant 0.000000e+00 : f32
    %1378 = vector.broadcast %cst_541 : f32 to vector<2x128xf32>
    %1379 = arith.cmpf oge, %1377, %1378 : vector<2x128xf32>
    %cst_542 = arith.constant 2.000000e-01 : f32
    %1380 = vector.broadcast %cst_542 : f32 to vector<2x128xf32>
    %1381 = arith.mulf %1380, %1377 : vector<2x128xf32>
    %1382 = arith.select %1379, %1377, %1381 : vector<2x128xi1>, vector<2x128xf32>
    %1383 = vector.broadcast %1334 : vector<1x128xf32> to vector<2x128xf32>
    %1384 = arith.mulf %1161, %1383 : vector<2x128xf32>
    %1385 = vector.broadcast %1337 : vector<1x128xf32> to vector<2x128xf32>
    %1386 = arith.addf %1384, %1385 : vector<2x128xf32>
    %cst_543 = arith.constant 0.000000e+00 : f32
    %1387 = vector.broadcast %cst_543 : f32 to vector<2x128xf32>
    %1388 = arith.cmpf oge, %1386, %1387 : vector<2x128xf32>
    %cst_544 = arith.constant 2.000000e-01 : f32
    %1389 = vector.broadcast %cst_544 : f32 to vector<2x128xf32>
    %1390 = arith.mulf %1389, %1386 : vector<2x128xf32>
    %1391 = arith.select %1388, %1386, %1390 : vector<2x128xi1>, vector<2x128xf32>
    %1392 = vector.broadcast %1334 : vector<1x128xf32> to vector<2x128xf32>
    %1393 = arith.mulf %1166, %1392 : vector<2x128xf32>
    %1394 = vector.broadcast %1337 : vector<1x128xf32> to vector<2x128xf32>
    %1395 = arith.addf %1393, %1394 : vector<2x128xf32>
    %cst_545 = arith.constant 0.000000e+00 : f32
    %1396 = vector.broadcast %cst_545 : f32 to vector<2x128xf32>
    %1397 = arith.cmpf oge, %1395, %1396 : vector<2x128xf32>
    %cst_546 = arith.constant 2.000000e-01 : f32
    %1398 = vector.broadcast %cst_546 : f32 to vector<2x128xf32>
    %1399 = arith.mulf %1398, %1395 : vector<2x128xf32>
    %1400 = arith.select %1397, %1395, %1399 : vector<2x128xi1>, vector<2x128xf32>
    %1401 = vector.broadcast %1334 : vector<1x128xf32> to vector<2x128xf32>
    %1402 = arith.mulf %1171, %1401 : vector<2x128xf32>
    %1403 = vector.broadcast %1337 : vector<1x128xf32> to vector<2x128xf32>
    %1404 = arith.addf %1402, %1403 : vector<2x128xf32>
    %cst_547 = arith.constant 0.000000e+00 : f32
    %1405 = vector.broadcast %cst_547 : f32 to vector<2x128xf32>
    %1406 = arith.cmpf oge, %1404, %1405 : vector<2x128xf32>
    %cst_548 = arith.constant 2.000000e-01 : f32
    %1407 = vector.broadcast %cst_548 : f32 to vector<2x128xf32>
    %1408 = arith.mulf %1407, %1404 : vector<2x128xf32>
    %1409 = arith.select %1406, %1404, %1408 : vector<2x128xi1>, vector<2x128xf32>
    %1410 = vector.broadcast %1334 : vector<1x128xf32> to vector<2x128xf32>
    %1411 = arith.mulf %1176, %1410 : vector<2x128xf32>
    %1412 = vector.broadcast %1337 : vector<1x128xf32> to vector<2x128xf32>
    %1413 = arith.addf %1411, %1412 : vector<2x128xf32>
    %cst_549 = arith.constant 0.000000e+00 : f32
    %1414 = vector.broadcast %cst_549 : f32 to vector<2x128xf32>
    %1415 = arith.cmpf oge, %1413, %1414 : vector<2x128xf32>
    %cst_550 = arith.constant 2.000000e-01 : f32
    %1416 = vector.broadcast %cst_550 : f32 to vector<2x128xf32>
    %1417 = arith.mulf %1416, %1413 : vector<2x128xf32>
    %1418 = arith.select %1415, %1413, %1417 : vector<2x128xi1>, vector<2x128xf32>
    %1419 = vector.broadcast %1334 : vector<1x128xf32> to vector<2x128xf32>
    %1420 = arith.mulf %1181, %1419 : vector<2x128xf32>
    %1421 = vector.broadcast %1337 : vector<1x128xf32> to vector<2x128xf32>
    %1422 = arith.addf %1420, %1421 : vector<2x128xf32>
    %cst_551 = arith.constant 0.000000e+00 : f32
    %1423 = vector.broadcast %cst_551 : f32 to vector<2x128xf32>
    %1424 = arith.cmpf oge, %1422, %1423 : vector<2x128xf32>
    %cst_552 = arith.constant 2.000000e-01 : f32
    %1425 = vector.broadcast %cst_552 : f32 to vector<2x128xf32>
    %1426 = arith.mulf %1425, %1422 : vector<2x128xf32>
    %1427 = arith.select %1424, %1422, %1426 : vector<2x128xi1>, vector<2x128xf32>
    %1428 = vector.broadcast %1334 : vector<1x128xf32> to vector<2x128xf32>
    %1429 = arith.mulf %1186, %1428 : vector<2x128xf32>
    %1430 = vector.broadcast %1337 : vector<1x128xf32> to vector<2x128xf32>
    %1431 = arith.addf %1429, %1430 : vector<2x128xf32>
    %cst_553 = arith.constant 0.000000e+00 : f32
    %1432 = vector.broadcast %cst_553 : f32 to vector<2x128xf32>
    %1433 = arith.cmpf oge, %1431, %1432 : vector<2x128xf32>
    %cst_554 = arith.constant 2.000000e-01 : f32
    %1434 = vector.broadcast %cst_554 : f32 to vector<2x128xf32>
    %1435 = arith.mulf %1434, %1431 : vector<2x128xf32>
    %1436 = arith.select %1433, %1431, %1435 : vector<2x128xi1>, vector<2x128xf32>
    %1437 = vector.broadcast %1334 : vector<1x128xf32> to vector<2x128xf32>
    %1438 = arith.mulf %1191, %1437 : vector<2x128xf32>
    %1439 = vector.broadcast %1337 : vector<1x128xf32> to vector<2x128xf32>
    %1440 = arith.addf %1438, %1439 : vector<2x128xf32>
    %cst_555 = arith.constant 0.000000e+00 : f32
    %1441 = vector.broadcast %cst_555 : f32 to vector<2x128xf32>
    %1442 = arith.cmpf oge, %1440, %1441 : vector<2x128xf32>
    %cst_556 = arith.constant 2.000000e-01 : f32
    %1443 = vector.broadcast %cst_556 : f32 to vector<2x128xf32>
    %1444 = arith.mulf %1443, %1440 : vector<2x128xf32>
    %1445 = arith.select %1442, %1440, %1444 : vector<2x128xi1>, vector<2x128xf32>
    %1446 = vector.broadcast %1334 : vector<1x128xf32> to vector<2x128xf32>
    %1447 = arith.mulf %1196, %1446 : vector<2x128xf32>
    %1448 = vector.broadcast %1337 : vector<1x128xf32> to vector<2x128xf32>
    %1449 = arith.addf %1447, %1448 : vector<2x128xf32>
    %cst_557 = arith.constant 0.000000e+00 : f32
    %1450 = vector.broadcast %cst_557 : f32 to vector<2x128xf32>
    %1451 = arith.cmpf oge, %1449, %1450 : vector<2x128xf32>
    %cst_558 = arith.constant 2.000000e-01 : f32
    %1452 = vector.broadcast %cst_558 : f32 to vector<2x128xf32>
    %1453 = arith.mulf %1452, %1449 : vector<2x128xf32>
    %1454 = arith.select %1451, %1449, %1453 : vector<2x128xi1>, vector<2x128xf32>
    %1455 = vector.broadcast %1334 : vector<1x128xf32> to vector<2x128xf32>
    %1456 = arith.mulf %1201, %1455 : vector<2x128xf32>
    %1457 = vector.broadcast %1337 : vector<1x128xf32> to vector<2x128xf32>
    %1458 = arith.addf %1456, %1457 : vector<2x128xf32>
    %cst_559 = arith.constant 0.000000e+00 : f32
    %1459 = vector.broadcast %cst_559 : f32 to vector<2x128xf32>
    %1460 = arith.cmpf oge, %1458, %1459 : vector<2x128xf32>
    %cst_560 = arith.constant 2.000000e-01 : f32
    %1461 = vector.broadcast %cst_560 : f32 to vector<2x128xf32>
    %1462 = arith.mulf %1461, %1458 : vector<2x128xf32>
    %1463 = arith.select %1460, %1458, %1462 : vector<2x128xi1>, vector<2x128xf32>
    %1464 = vector.broadcast %1334 : vector<1x128xf32> to vector<2x128xf32>
    %1465 = arith.mulf %1206, %1464 : vector<2x128xf32>
    %1466 = vector.broadcast %1337 : vector<1x128xf32> to vector<2x128xf32>
    %1467 = arith.addf %1465, %1466 : vector<2x128xf32>
    %cst_561 = arith.constant 0.000000e+00 : f32
    %1468 = vector.broadcast %cst_561 : f32 to vector<2x128xf32>
    %1469 = arith.cmpf oge, %1467, %1468 : vector<2x128xf32>
    %cst_562 = arith.constant 2.000000e-01 : f32
    %1470 = vector.broadcast %cst_562 : f32 to vector<2x128xf32>
    %1471 = arith.mulf %1470, %1467 : vector<2x128xf32>
    %1472 = arith.select %1469, %1467, %1471 : vector<2x128xi1>, vector<2x128xf32>
    %1473 = vector.broadcast %1334 : vector<1x128xf32> to vector<2x128xf32>
    %1474 = arith.mulf %1211, %1473 : vector<2x128xf32>
    %1475 = vector.broadcast %1337 : vector<1x128xf32> to vector<2x128xf32>
    %1476 = arith.addf %1474, %1475 : vector<2x128xf32>
    %cst_563 = arith.constant 0.000000e+00 : f32
    %1477 = vector.broadcast %cst_563 : f32 to vector<2x128xf32>
    %1478 = arith.cmpf oge, %1476, %1477 : vector<2x128xf32>
    %cst_564 = arith.constant 2.000000e-01 : f32
    %1479 = vector.broadcast %cst_564 : f32 to vector<2x128xf32>
    %1480 = arith.mulf %1479, %1476 : vector<2x128xf32>
    %1481 = arith.select %1478, %1476, %1480 : vector<2x128xi1>, vector<2x128xf32>
    %c21_565 = arith.constant 21 : index
    %c0_566 = arith.constant 0 : index
    %c0_567 = arith.constant 0 : index
    %1482 = vector.load %arg4[%c21_565, %c0_566, %c0_567] : memref<23x128x128xf32, #tpu.memory_space<vmem>>, vector<1x128x128xf32>
    %1483 = vector.shape_cast %1482 : vector<1x128x128xf32> to vector<128x128xf32>
    %c22_568 = arith.constant 22 : index
    %c0_569 = arith.constant 0 : index
    %c0_570 = arith.constant 0 : index
    %1484 = vector.load %arg4[%c22_568, %c0_569, %c0_570] : memref<23x128x128xf32, #tpu.memory_space<vmem>>, vector<1x128x128xf32>
    %1485 = vector.shape_cast %1484 : vector<1x128x128xf32> to vector<128x128xf32>
    %c27 = arith.constant 27 : index
    %c0_571 = arith.constant 0 : index
    %1486 = vector.load %arg5[%c27, %c0_571] : memref<28x128xf32, #tpu.memory_space<vmem>>, vector<1x128xf32>
    %cst_572 = arith.constant dense<0.000000e+00> : vector<2x128xf32>
    %1487 = tpu.matmul %1346, %1483, %cst_572 {dimension_numbers = #tpu.dot_dimension_numbers<[1], [0], [0], [1], [0, 0, 1, 1], [], []>} : vector<2x128xf32>, vector<128x128xf32>, vector<2x128xf32> -> vector<2x128xf32>
    %cst_573 = arith.constant dense<0.000000e+00> : vector<2x128xf32>
    %1488 = tpu.matmul %355, %1485, %cst_573 {dimension_numbers = #tpu.dot_dimension_numbers<[1], [0], [0], [1], [0, 0, 1, 1], [], []>} : vector<2x128xf32>, vector<128x128xf32>, vector<2x128xf32> -> vector<2x128xf32>
    %1489 = arith.addf %1487, %1488 : vector<2x128xf32>
    %1490 = vector.broadcast %1486 : vector<1x128xf32> to vector<2x128xf32>
    %1491 = arith.addf %1489, %1490 : vector<2x128xf32>
    %1492 = arith.negf %1491 : vector<2x128xf32>
    %1493 = math.exp %1492 : vector<2x128xf32>
    %cst_574 = arith.constant 1.000000e+00 : f32
    %1494 = vector.broadcast %cst_574 : f32 to vector<2x128xf32>
    %1495 = arith.addf %1494, %1493 : vector<2x128xf32>
    %1496 = arith.divf %1494, %1495 : vector<2x128xf32>
    %cst_575 = arith.constant dense<0.000000e+00> : vector<2x128xf32>
    %1497 = tpu.matmul %1355, %1483, %cst_575 {dimension_numbers = #tpu.dot_dimension_numbers<[1], [0], [0], [1], [0, 0, 1, 1], [], []>} : vector<2x128xf32>, vector<128x128xf32>, vector<2x128xf32> -> vector<2x128xf32>
    %cst_576 = arith.constant dense<0.000000e+00> : vector<2x128xf32>
    %1498 = tpu.matmul %358, %1485, %cst_576 {dimension_numbers = #tpu.dot_dimension_numbers<[1], [0], [0], [1], [0, 0, 1, 1], [], []>} : vector<2x128xf32>, vector<128x128xf32>, vector<2x128xf32> -> vector<2x128xf32>
    %1499 = arith.addf %1497, %1498 : vector<2x128xf32>
    %1500 = vector.broadcast %1486 : vector<1x128xf32> to vector<2x128xf32>
    %1501 = arith.addf %1499, %1500 : vector<2x128xf32>
    %1502 = arith.negf %1501 : vector<2x128xf32>
    %1503 = math.exp %1502 : vector<2x128xf32>
    %cst_577 = arith.constant 1.000000e+00 : f32
    %1504 = vector.broadcast %cst_577 : f32 to vector<2x128xf32>
    %1505 = arith.addf %1504, %1503 : vector<2x128xf32>
    %1506 = arith.divf %1504, %1505 : vector<2x128xf32>
    %cst_578 = arith.constant dense<0.000000e+00> : vector<2x128xf32>
    %1507 = tpu.matmul %1364, %1483, %cst_578 {dimension_numbers = #tpu.dot_dimension_numbers<[1], [0], [0], [1], [0, 0, 1, 1], [], []>} : vector<2x128xf32>, vector<128x128xf32>, vector<2x128xf32> -> vector<2x128xf32>
    %cst_579 = arith.constant dense<0.000000e+00> : vector<2x128xf32>
    %1508 = tpu.matmul %361, %1485, %cst_579 {dimension_numbers = #tpu.dot_dimension_numbers<[1], [0], [0], [1], [0, 0, 1, 1], [], []>} : vector<2x128xf32>, vector<128x128xf32>, vector<2x128xf32> -> vector<2x128xf32>
    %1509 = arith.addf %1507, %1508 : vector<2x128xf32>
    %1510 = vector.broadcast %1486 : vector<1x128xf32> to vector<2x128xf32>
    %1511 = arith.addf %1509, %1510 : vector<2x128xf32>
    %1512 = arith.negf %1511 : vector<2x128xf32>
    %1513 = math.exp %1512 : vector<2x128xf32>
    %cst_580 = arith.constant 1.000000e+00 : f32
    %1514 = vector.broadcast %cst_580 : f32 to vector<2x128xf32>
    %1515 = arith.addf %1514, %1513 : vector<2x128xf32>
    %1516 = arith.divf %1514, %1515 : vector<2x128xf32>
    %cst_581 = arith.constant dense<0.000000e+00> : vector<2x128xf32>
    %1517 = tpu.matmul %1373, %1483, %cst_581 {dimension_numbers = #tpu.dot_dimension_numbers<[1], [0], [0], [1], [0, 0, 1, 1], [], []>} : vector<2x128xf32>, vector<128x128xf32>, vector<2x128xf32> -> vector<2x128xf32>
    %cst_582 = arith.constant dense<0.000000e+00> : vector<2x128xf32>
    %1518 = tpu.matmul %364, %1485, %cst_582 {dimension_numbers = #tpu.dot_dimension_numbers<[1], [0], [0], [1], [0, 0, 1, 1], [], []>} : vector<2x128xf32>, vector<128x128xf32>, vector<2x128xf32> -> vector<2x128xf32>
    %1519 = arith.addf %1517, %1518 : vector<2x128xf32>
    %1520 = vector.broadcast %1486 : vector<1x128xf32> to vector<2x128xf32>
    %1521 = arith.addf %1519, %1520 : vector<2x128xf32>
    %1522 = arith.negf %1521 : vector<2x128xf32>
    %1523 = math.exp %1522 : vector<2x128xf32>
    %cst_583 = arith.constant 1.000000e+00 : f32
    %1524 = vector.broadcast %cst_583 : f32 to vector<2x128xf32>
    %1525 = arith.addf %1524, %1523 : vector<2x128xf32>
    %1526 = arith.divf %1524, %1525 : vector<2x128xf32>
    %cst_584 = arith.constant dense<0.000000e+00> : vector<2x128xf32>
    %1527 = tpu.matmul %1382, %1483, %cst_584 {dimension_numbers = #tpu.dot_dimension_numbers<[1], [0], [0], [1], [0, 0, 1, 1], [], []>} : vector<2x128xf32>, vector<128x128xf32>, vector<2x128xf32> -> vector<2x128xf32>
    %cst_585 = arith.constant dense<0.000000e+00> : vector<2x128xf32>
    %1528 = tpu.matmul %367, %1485, %cst_585 {dimension_numbers = #tpu.dot_dimension_numbers<[1], [0], [0], [1], [0, 0, 1, 1], [], []>} : vector<2x128xf32>, vector<128x128xf32>, vector<2x128xf32> -> vector<2x128xf32>
    %1529 = arith.addf %1527, %1528 : vector<2x128xf32>
    %1530 = vector.broadcast %1486 : vector<1x128xf32> to vector<2x128xf32>
    %1531 = arith.addf %1529, %1530 : vector<2x128xf32>
    %1532 = arith.negf %1531 : vector<2x128xf32>
    %1533 = math.exp %1532 : vector<2x128xf32>
    %cst_586 = arith.constant 1.000000e+00 : f32
    %1534 = vector.broadcast %cst_586 : f32 to vector<2x128xf32>
    %1535 = arith.addf %1534, %1533 : vector<2x128xf32>
    %1536 = arith.divf %1534, %1535 : vector<2x128xf32>
    %cst_587 = arith.constant dense<0.000000e+00> : vector<2x128xf32>
    %1537 = tpu.matmul %1391, %1483, %cst_587 {dimension_numbers = #tpu.dot_dimension_numbers<[1], [0], [0], [1], [0, 0, 1, 1], [], []>} : vector<2x128xf32>, vector<128x128xf32>, vector<2x128xf32> -> vector<2x128xf32>
    %cst_588 = arith.constant dense<0.000000e+00> : vector<2x128xf32>
    %1538 = tpu.matmul %370, %1485, %cst_588 {dimension_numbers = #tpu.dot_dimension_numbers<[1], [0], [0], [1], [0, 0, 1, 1], [], []>} : vector<2x128xf32>, vector<128x128xf32>, vector<2x128xf32> -> vector<2x128xf32>
    %1539 = arith.addf %1537, %1538 : vector<2x128xf32>
    %1540 = vector.broadcast %1486 : vector<1x128xf32> to vector<2x128xf32>
    %1541 = arith.addf %1539, %1540 : vector<2x128xf32>
    %1542 = arith.negf %1541 : vector<2x128xf32>
    %1543 = math.exp %1542 : vector<2x128xf32>
    %cst_589 = arith.constant 1.000000e+00 : f32
    %1544 = vector.broadcast %cst_589 : f32 to vector<2x128xf32>
    %1545 = arith.addf %1544, %1543 : vector<2x128xf32>
    %1546 = arith.divf %1544, %1545 : vector<2x128xf32>
    %cst_590 = arith.constant dense<0.000000e+00> : vector<2x128xf32>
    %1547 = tpu.matmul %1400, %1483, %cst_590 {dimension_numbers = #tpu.dot_dimension_numbers<[1], [0], [0], [1], [0, 0, 1, 1], [], []>} : vector<2x128xf32>, vector<128x128xf32>, vector<2x128xf32> -> vector<2x128xf32>
    %cst_591 = arith.constant dense<0.000000e+00> : vector<2x128xf32>
    %1548 = tpu.matmul %373, %1485, %cst_591 {dimension_numbers = #tpu.dot_dimension_numbers<[1], [0], [0], [1], [0, 0, 1, 1], [], []>} : vector<2x128xf32>, vector<128x128xf32>, vector<2x128xf32> -> vector<2x128xf32>
    %1549 = arith.addf %1547, %1548 : vector<2x128xf32>
    %1550 = vector.broadcast %1486 : vector<1x128xf32> to vector<2x128xf32>
    %1551 = arith.addf %1549, %1550 : vector<2x128xf32>
    %1552 = arith.negf %1551 : vector<2x128xf32>
    %1553 = math.exp %1552 : vector<2x128xf32>
    %cst_592 = arith.constant 1.000000e+00 : f32
    %1554 = vector.broadcast %cst_592 : f32 to vector<2x128xf32>
    %1555 = arith.addf %1554, %1553 : vector<2x128xf32>
    %1556 = arith.divf %1554, %1555 : vector<2x128xf32>
    %cst_593 = arith.constant dense<0.000000e+00> : vector<2x128xf32>
    %1557 = tpu.matmul %1409, %1483, %cst_593 {dimension_numbers = #tpu.dot_dimension_numbers<[1], [0], [0], [1], [0, 0, 1, 1], [], []>} : vector<2x128xf32>, vector<128x128xf32>, vector<2x128xf32> -> vector<2x128xf32>
    %cst_594 = arith.constant dense<0.000000e+00> : vector<2x128xf32>
    %1558 = tpu.matmul %376, %1485, %cst_594 {dimension_numbers = #tpu.dot_dimension_numbers<[1], [0], [0], [1], [0, 0, 1, 1], [], []>} : vector<2x128xf32>, vector<128x128xf32>, vector<2x128xf32> -> vector<2x128xf32>
    %1559 = arith.addf %1557, %1558 : vector<2x128xf32>
    %1560 = vector.broadcast %1486 : vector<1x128xf32> to vector<2x128xf32>
    %1561 = arith.addf %1559, %1560 : vector<2x128xf32>
    %1562 = arith.negf %1561 : vector<2x128xf32>
    %1563 = math.exp %1562 : vector<2x128xf32>
    %cst_595 = arith.constant 1.000000e+00 : f32
    %1564 = vector.broadcast %cst_595 : f32 to vector<2x128xf32>
    %1565 = arith.addf %1564, %1563 : vector<2x128xf32>
    %1566 = arith.divf %1564, %1565 : vector<2x128xf32>
    %cst_596 = arith.constant dense<0.000000e+00> : vector<2x128xf32>
    %1567 = tpu.matmul %1418, %1483, %cst_596 {dimension_numbers = #tpu.dot_dimension_numbers<[1], [0], [0], [1], [0, 0, 1, 1], [], []>} : vector<2x128xf32>, vector<128x128xf32>, vector<2x128xf32> -> vector<2x128xf32>
    %cst_597 = arith.constant dense<0.000000e+00> : vector<2x128xf32>
    %1568 = tpu.matmul %379, %1485, %cst_597 {dimension_numbers = #tpu.dot_dimension_numbers<[1], [0], [0], [1], [0, 0, 1, 1], [], []>} : vector<2x128xf32>, vector<128x128xf32>, vector<2x128xf32> -> vector<2x128xf32>
    %1569 = arith.addf %1567, %1568 : vector<2x128xf32>
    %1570 = vector.broadcast %1486 : vector<1x128xf32> to vector<2x128xf32>
    %1571 = arith.addf %1569, %1570 : vector<2x128xf32>
    %1572 = arith.negf %1571 : vector<2x128xf32>
    %1573 = math.exp %1572 : vector<2x128xf32>
    %cst_598 = arith.constant 1.000000e+00 : f32
    %1574 = vector.broadcast %cst_598 : f32 to vector<2x128xf32>
    %1575 = arith.addf %1574, %1573 : vector<2x128xf32>
    %1576 = arith.divf %1574, %1575 : vector<2x128xf32>
    %cst_599 = arith.constant dense<0.000000e+00> : vector<2x128xf32>
    %1577 = tpu.matmul %1427, %1483, %cst_599 {dimension_numbers = #tpu.dot_dimension_numbers<[1], [0], [0], [1], [0, 0, 1, 1], [], []>} : vector<2x128xf32>, vector<128x128xf32>, vector<2x128xf32> -> vector<2x128xf32>
    %cst_600 = arith.constant dense<0.000000e+00> : vector<2x128xf32>
    %1578 = tpu.matmul %382, %1485, %cst_600 {dimension_numbers = #tpu.dot_dimension_numbers<[1], [0], [0], [1], [0, 0, 1, 1], [], []>} : vector<2x128xf32>, vector<128x128xf32>, vector<2x128xf32> -> vector<2x128xf32>
    %1579 = arith.addf %1577, %1578 : vector<2x128xf32>
    %1580 = vector.broadcast %1486 : vector<1x128xf32> to vector<2x128xf32>
    %1581 = arith.addf %1579, %1580 : vector<2x128xf32>
    %1582 = arith.negf %1581 : vector<2x128xf32>
    %1583 = math.exp %1582 : vector<2x128xf32>
    %cst_601 = arith.constant 1.000000e+00 : f32
    %1584 = vector.broadcast %cst_601 : f32 to vector<2x128xf32>
    %1585 = arith.addf %1584, %1583 : vector<2x128xf32>
    %1586 = arith.divf %1584, %1585 : vector<2x128xf32>
    %cst_602 = arith.constant dense<0.000000e+00> : vector<2x128xf32>
    %1587 = tpu.matmul %1436, %1483, %cst_602 {dimension_numbers = #tpu.dot_dimension_numbers<[1], [0], [0], [1], [0, 0, 1, 1], [], []>} : vector<2x128xf32>, vector<128x128xf32>, vector<2x128xf32> -> vector<2x128xf32>
    %cst_603 = arith.constant dense<0.000000e+00> : vector<2x128xf32>
    %1588 = tpu.matmul %385, %1485, %cst_603 {dimension_numbers = #tpu.dot_dimension_numbers<[1], [0], [0], [1], [0, 0, 1, 1], [], []>} : vector<2x128xf32>, vector<128x128xf32>, vector<2x128xf32> -> vector<2x128xf32>
    %1589 = arith.addf %1587, %1588 : vector<2x128xf32>
    %1590 = vector.broadcast %1486 : vector<1x128xf32> to vector<2x128xf32>
    %1591 = arith.addf %1589, %1590 : vector<2x128xf32>
    %1592 = arith.negf %1591 : vector<2x128xf32>
    %1593 = math.exp %1592 : vector<2x128xf32>
    %cst_604 = arith.constant 1.000000e+00 : f32
    %1594 = vector.broadcast %cst_604 : f32 to vector<2x128xf32>
    %1595 = arith.addf %1594, %1593 : vector<2x128xf32>
    %1596 = arith.divf %1594, %1595 : vector<2x128xf32>
    %cst_605 = arith.constant dense<0.000000e+00> : vector<2x128xf32>
    %1597 = tpu.matmul %1445, %1483, %cst_605 {dimension_numbers = #tpu.dot_dimension_numbers<[1], [0], [0], [1], [0, 0, 1, 1], [], []>} : vector<2x128xf32>, vector<128x128xf32>, vector<2x128xf32> -> vector<2x128xf32>
    %cst_606 = arith.constant dense<0.000000e+00> : vector<2x128xf32>
    %1598 = tpu.matmul %388, %1485, %cst_606 {dimension_numbers = #tpu.dot_dimension_numbers<[1], [0], [0], [1], [0, 0, 1, 1], [], []>} : vector<2x128xf32>, vector<128x128xf32>, vector<2x128xf32> -> vector<2x128xf32>
    %1599 = arith.addf %1597, %1598 : vector<2x128xf32>
    %1600 = vector.broadcast %1486 : vector<1x128xf32> to vector<2x128xf32>
    %1601 = arith.addf %1599, %1600 : vector<2x128xf32>
    %1602 = arith.negf %1601 : vector<2x128xf32>
    %1603 = math.exp %1602 : vector<2x128xf32>
    %cst_607 = arith.constant 1.000000e+00 : f32
    %1604 = vector.broadcast %cst_607 : f32 to vector<2x128xf32>
    %1605 = arith.addf %1604, %1603 : vector<2x128xf32>
    %1606 = arith.divf %1604, %1605 : vector<2x128xf32>
    %cst_608 = arith.constant dense<0.000000e+00> : vector<2x128xf32>
    %1607 = tpu.matmul %1454, %1483, %cst_608 {dimension_numbers = #tpu.dot_dimension_numbers<[1], [0], [0], [1], [0, 0, 1, 1], [], []>} : vector<2x128xf32>, vector<128x128xf32>, vector<2x128xf32> -> vector<2x128xf32>
    %cst_609 = arith.constant dense<0.000000e+00> : vector<2x128xf32>
    %1608 = tpu.matmul %391, %1485, %cst_609 {dimension_numbers = #tpu.dot_dimension_numbers<[1], [0], [0], [1], [0, 0, 1, 1], [], []>} : vector<2x128xf32>, vector<128x128xf32>, vector<2x128xf32> -> vector<2x128xf32>
    %1609 = arith.addf %1607, %1608 : vector<2x128xf32>
    %1610 = vector.broadcast %1486 : vector<1x128xf32> to vector<2x128xf32>
    %1611 = arith.addf %1609, %1610 : vector<2x128xf32>
    %1612 = arith.negf %1611 : vector<2x128xf32>
    %1613 = math.exp %1612 : vector<2x128xf32>
    %cst_610 = arith.constant 1.000000e+00 : f32
    %1614 = vector.broadcast %cst_610 : f32 to vector<2x128xf32>
    %1615 = arith.addf %1614, %1613 : vector<2x128xf32>
    %1616 = arith.divf %1614, %1615 : vector<2x128xf32>
    %cst_611 = arith.constant dense<0.000000e+00> : vector<2x128xf32>
    %1617 = tpu.matmul %1463, %1483, %cst_611 {dimension_numbers = #tpu.dot_dimension_numbers<[1], [0], [0], [1], [0, 0, 1, 1], [], []>} : vector<2x128xf32>, vector<128x128xf32>, vector<2x128xf32> -> vector<2x128xf32>
    %cst_612 = arith.constant dense<0.000000e+00> : vector<2x128xf32>
    %1618 = tpu.matmul %394, %1485, %cst_612 {dimension_numbers = #tpu.dot_dimension_numbers<[1], [0], [0], [1], [0, 0, 1, 1], [], []>} : vector<2x128xf32>, vector<128x128xf32>, vector<2x128xf32> -> vector<2x128xf32>
    %1619 = arith.addf %1617, %1618 : vector<2x128xf32>
    %1620 = vector.broadcast %1486 : vector<1x128xf32> to vector<2x128xf32>
    %1621 = arith.addf %1619, %1620 : vector<2x128xf32>
    %1622 = arith.negf %1621 : vector<2x128xf32>
    %1623 = math.exp %1622 : vector<2x128xf32>
    %cst_613 = arith.constant 1.000000e+00 : f32
    %1624 = vector.broadcast %cst_613 : f32 to vector<2x128xf32>
    %1625 = arith.addf %1624, %1623 : vector<2x128xf32>
    %1626 = arith.divf %1624, %1625 : vector<2x128xf32>
    %cst_614 = arith.constant dense<0.000000e+00> : vector<2x128xf32>
    %1627 = tpu.matmul %1472, %1483, %cst_614 {dimension_numbers = #tpu.dot_dimension_numbers<[1], [0], [0], [1], [0, 0, 1, 1], [], []>} : vector<2x128xf32>, vector<128x128xf32>, vector<2x128xf32> -> vector<2x128xf32>
    %cst_615 = arith.constant dense<0.000000e+00> : vector<2x128xf32>
    %1628 = tpu.matmul %397, %1485, %cst_615 {dimension_numbers = #tpu.dot_dimension_numbers<[1], [0], [0], [1], [0, 0, 1, 1], [], []>} : vector<2x128xf32>, vector<128x128xf32>, vector<2x128xf32> -> vector<2x128xf32>
    %1629 = arith.addf %1627, %1628 : vector<2x128xf32>
    %1630 = vector.broadcast %1486 : vector<1x128xf32> to vector<2x128xf32>
    %1631 = arith.addf %1629, %1630 : vector<2x128xf32>
    %1632 = arith.negf %1631 : vector<2x128xf32>
    %1633 = math.exp %1632 : vector<2x128xf32>
    %cst_616 = arith.constant 1.000000e+00 : f32
    %1634 = vector.broadcast %cst_616 : f32 to vector<2x128xf32>
    %1635 = arith.addf %1634, %1633 : vector<2x128xf32>
    %1636 = arith.divf %1634, %1635 : vector<2x128xf32>
    %cst_617 = arith.constant dense<0.000000e+00> : vector<2x128xf32>
    %1637 = tpu.matmul %1481, %1483, %cst_617 {dimension_numbers = #tpu.dot_dimension_numbers<[1], [0], [0], [1], [0, 0, 1, 1], [], []>} : vector<2x128xf32>, vector<128x128xf32>, vector<2x128xf32> -> vector<2x128xf32>
    %cst_618 = arith.constant dense<0.000000e+00> : vector<2x128xf32>
    %1638 = tpu.matmul %400, %1485, %cst_618 {dimension_numbers = #tpu.dot_dimension_numbers<[1], [0], [0], [1], [0, 0, 1, 1], [], []>} : vector<2x128xf32>, vector<128x128xf32>, vector<2x128xf32> -> vector<2x128xf32>
    %1639 = arith.addf %1637, %1638 : vector<2x128xf32>
    %1640 = vector.broadcast %1486 : vector<1x128xf32> to vector<2x128xf32>
    %1641 = arith.addf %1639, %1640 : vector<2x128xf32>
    %1642 = arith.negf %1641 : vector<2x128xf32>
    %1643 = math.exp %1642 : vector<2x128xf32>
    %cst_619 = arith.constant 1.000000e+00 : f32
    %1644 = vector.broadcast %cst_619 : f32 to vector<2x128xf32>
    %1645 = arith.addf %1644, %1643 : vector<2x128xf32>
    %1646 = arith.divf %1644, %1645 : vector<2x128xf32>
    %1647 = tpu.concatenate %1496, %1506, %1516, %1526, %1536, %1546, %1556, %1566, %1576, %1586, %1596, %1606, %1616, %1626, %1636, %1646 in 1 : vector<2x128xf32>, vector<2x128xf32>, vector<2x128xf32>, vector<2x128xf32>, vector<2x128xf32>, vector<2x128xf32>, vector<2x128xf32>, vector<2x128xf32>, vector<2x128xf32>, vector<2x128xf32>, vector<2x128xf32>, vector<2x128xf32>, vector<2x128xf32>, vector<2x128xf32>, vector<2x128xf32>, vector<2x128xf32> -> vector<2x2048xf32>
    %c0_620 = arith.constant 0 : index
    %c0_621 = arith.constant 0 : index
    %1648 = vector.load %arg6[%c0_620, %c0_621] : memref<2x2048xf32, #tpu.memory_space<vmem>>, vector<2x2048xf32>
    tpu.vector_store %arg6[%c0_620, %c0_621], %1647 {strides = array<i32>} : memref<2x2048xf32, #tpu.memory_space<vmem>>, vector<2x2048xf32>,
    return
  }
  func.func @transform_0(%arg0: i32) -> (i32, i32, i32) {
    %c0_i32 = arith.constant 0 : i32
    %c0_i32_0 = arith.constant 0 : i32
    %c0_i32_1 = arith.constant 0 : i32
    %c0_i32_2 = arith.constant 0 : i32
    return %c0_i32, %c0_i32_0, %c0_i32_1 : i32, i32, i32
  }
  func.func @transform_1(%arg0: i32) -> (i32, i32, i32) {
    %c0_i32 = arith.constant 0 : i32
    %c0_i32_0 = arith.constant 0 : i32
    %c0_i32_1 = arith.constant 0 : i32
    %c0_i32_2 = arith.constant 0 : i32
    return %c0_i32, %c0_i32_0, %c0_i32_1 : i32, i32, i32
  }
  func.func @transform_2(%arg0: i32) -> (i32, i32) {
    %c0_i32 = arith.constant 0 : i32
    %c0_i32_0 = arith.constant 0 : i32
    %c0_i32_1 = arith.constant 0 : i32
    return %c0_i32, %c0_i32_0 : i32, i32
  }
  func.func @transform_3(%arg0: i32) -> (i32, i32, i32) {
    %c0_i32 = arith.constant 0 : i32
    %c0_i32_0 = arith.constant 0 : i32
    %c0_i32_1 = arith.constant 0 : i32
    %c0_i32_2 = arith.constant 0 : i32
    return %c0_i32, %c0_i32_0, %c0_i32_1 : i32, i32, i32
  }
  func.func @transform_4(%arg0: i32) -> (i32, i32) {
    %c0_i32 = arith.constant 0 : i32
    %c0_i32_0 = arith.constant 0 : i32
    %c0_i32_1 = arith.constant 0 : i32
    return %c0_i32, %c0_i32_0 : i32, i32
  }
  func.func @transform_5(%arg0: i32) -> (i32, i32) {
    %c0_i32 = arith.constant 0 : i32
    %c0_i32_0 = arith.constant 0 : i32
    %c0_i32_1 = arith.constant 0 : i32
    return %c0_i32, %c0_i32_0 : i32, i32
  }
}

</mosaic_0001>

<bundles_post_ra>
// kernel: generator_forward.1
= control target key start
LH: loop header
LB: loop body
LE: loop exit
PB: predicated region body
PF: predicated region fallthrough
CT: control target
= control target key end

     0   :  { %10 = vsyncpa [#allocation3], 0  ;;  %s9373_s0 = inlined_call_operand.vmem [shape: f32[16,2,128], index: 0, kind: input, shape index: {}]   ;;  %s9374_s1 = inlined_call_operand.vmem [shape: f32[16,2,128], index: 1, kind: input, shape index: {}]   ;;  %s9375_s2 = inlined_call_operand.vmem [shape: f32[2,128], index: 2, kind: input, shape index: {}]   ;;  %s9376_s3 = inlined_call_operand.hbm [shape: f32[23,128,128], index: 3, kind: input, shape index: {}]   ;;  %s9377_s4 = inlined_call_operand.hbm [shape: f32[28,128], index: 4, kind: input, shape index: {}]   ;;  %s9378_s5 = inlined_call_operand.vmem [shape: f32[2,2048], index: 5, kind: output, shape index: {}]  }
   0x1   :  { %s22_s20 = sshll.u32 %s9376_s3, 4  ;;  %s23_s20 = int_to_ptr.hbm [resolvable:$true] %s22_s20 }
   0x2   :  { %11 = vsyncpa [#allocation5], 0  ;;  %s5415_s21 = smov [#allocation2]   ;;  %s35_s25 = sshll.u32 %s9377_s4, 4  ;;  %s36_s25 = int_to_ptr.hbm [resolvable:$true] %s35_s25 }
   0x3   :  { %s24_s22 = sshll.u32 %s5415_s21, 4  ;;  %s5416_s26 = smov 128   ;;  %s25_s22 = int_to_ptr.vmem [resolvable:$true] %s24_s22 }
   0x4   :  { %s5417_s27 = smov 8   ;;  %s5418_s28 = smov [#allocation4]  }
   0x5   :  { %30 = dma.hbm_to_vmem [thread:$0]  %s23_s20, 47104, %s25_s22, [#allocation3], %s5416_s26, %s5416_s26, %s5417_s27  }
   0x6   :  { %s37_s29 = sshll.u32 %s5418_s28, 4  ;;  %s38_s29 = int_to_ptr.vmem [resolvable:$true] %s37_s29 }
   0x7   :  { %43 = dma.hbm_to_vmem [thread:$0]  %s36_s25, 512, %s38_s29, [#allocation5], %s5416_s26, %s5416_s26, %s5417_s27  }
   0x8   :  { %5411 = dma.done.wait [#allocation3], 47104  }
   0x9   :  { %5412 = vsyncadd [#allocation3], 4294920192 }
   0xa   :  { %5413 = dma.done.wait [#allocation5], 512  }
   0xb   :  { %5414 = vsyncadd [#allocation5], 4294966784  ;;  %v5455_v0 = vld [vmem:[#allocation2 + $0x78] sm:$0xff]  ;;  %v5457_v1 = vld [vmem:[#allocation2 + $0x70] sm:$0xff]  ;;  %vm421_vm0 = vcmask 1041408  }
   0xc   :  { %71 = vmatpush.msra.mxu0 %v5455_v0  ;;  %93 = vmatpush.msra.mxu1 %v5455_v0  ;;  %v5463_v2 = vld [vmem:[#allocation2 + $0x68] sm:$0xff]  ;;  %v5469_v3 = vld [vmem:[#allocation2 + $0x60] sm:$0xff]  ;;  %v5473_v4 = vld [vmem:[#allocation2 + $0x58] sm:$0xff] }
   0xd   :  { %115 = vmatpush.msra.mxu2 %v5455_v0  ;;  %137 = vmatpush.msra.mxu3 %v5455_v0  ;;  %v5481_v5 = vld [vmem:[#allocation2 + $0x50] sm:$0xff]  ;;  %v5487_v6 = vld [vmem:[#allocation2 + $0x48] sm:$0xff]  ;;  %v5493_v7 = vld [vmem:[#allocation2 + $0x40] sm:$0xff] }
   0xe   :  { %72 = vmatpush.msra.mxu0 %v5457_v1  ;;  %94 = vmatpush.msra.mxu1 %v5457_v1  ;;  %v5499_v8 = vld [vmem:[#allocation2 + $0x38] sm:$0xff]  ;;  %v5505_v9 = vld [vmem:[#allocation2 + $0x30] sm:$0xff]  ;;  %v5511_v10 = vld [vmem:[#allocation2 + $0x28] sm:$0xff] }
   0xf   :  { %116 = vmatpush.msra.mxu2 %v5457_v1  ;;  %138 = vmatpush.msra.mxu3 %v5457_v1  ;;  %v5517_v11 = vld [vmem:[#allocation2 + $0x20] sm:$0xff]  ;;  %v5523_v12 = vld [vmem:[#allocation2 + $0x18] sm:$0xff]  ;;  %v5529_v13 = vld [vmem:[#allocation2 + $0x10] sm:$0xff] }
  0x10   :  { %73 = vmatpush.msra.mxu0 %v5463_v2  ;;  %95 = vmatpush.msra.mxu1 %v5463_v2  ;;  %v5535_v14 = vld [vmem:[#allocation2 + $0x8] sm:$0xff]  ;;  %v5541_v15 = vld [vmem:[#allocation2] sm:$0xff]  ;;  %v5156_v24 = vld [vmem:[%s9373_s0 + $0x10] sm:$0x3] }
  0x11   :  { %117 = vmatpush.msra.mxu2 %v5463_v2  ;;  %139 = vmatpush.msra.mxu3 %v5463_v2  ;;  %v5150_v16 = vld [vmem:[%s9373_s0 + $0x4] sm:$0x3]  ;;  %v69_v17 = vld [vmem:[%s9373_s0] sm:$0x3]  ;;  %v5151_v18 = vld [vmem:[%s9373_s0 + $0x6] sm:$0x3] }
  0x12   :  { %74 = vmatpush.msra.mxu0 %v5469_v3  ;;  %96 = vmatpush.msra.mxu1 %v5469_v3  ;;  %v5149_v19 = vld [vmem:[%s9373_s0 + $0x2] sm:$0x3]  ;;  %v5154_v20 = vld [vmem:[%s9373_s0 + $0xc] sm:$0x3]  ;;  %v5152_v21 = vld [vmem:[%s9373_s0 + $0x8] sm:$0x3] }
  0x13   :  { %118 = vmatpush.msra.mxu2 %v5469_v3  ;;  %140 = vmatpush.msra.mxu3 %v5469_v3  ;;  %v5155_v22 = vld [vmem:[%s9373_s0 + $0xe] sm:$0x3]  ;;  %v5153_v23 = vld [vmem:[%s9373_s0 + $0xa] sm:$0x3]  ;;  %v5158_v25 = vld [vmem:[%s9373_s0 + $0x14] sm:$0x3] }
  0x14   :  { %75 = vmatpush.msra.mxu0 %v5473_v4  ;;  %97 = vmatpush.msra.mxu1 %v5473_v4  ;;  %v5157_v26 = vld [vmem:[%s9373_s0 + $0x12] sm:$0x3]  ;;  %v5159_v27 = vld [vmem:[%s9373_s0 + $0x16] sm:$0x3]  ;;  %v5160_v28 = vld [vmem:[%s9373_s0 + $0x18] sm:$0x3] }
  0x15   :  { %119 = vmatpush.msra.mxu2 %v5473_v4  ;;  %141 = vmatpush.msra.mxu3 %v5473_v4  ;;  %v5161_v29 = vld [vmem:[%s9373_s0 + $0x1a] sm:$0x3]  ;;  %v5162_v30 = vld [vmem:[%s9373_s0 + $0x1c] sm:$0x3]  ;;  %v5163_v31 = vld [vmem:[%s9373_s0 + $0x1e] sm:$0x3] }
  0x16   :  { %76 = vmatpush.msra.mxu0 %v5481_v5  ;;  %98 = vmatpush.msra.mxu1 %v5481_v5  ;;  %v5791_v32 = vld [vmem:[#allocation4] ss:$0 sm:$0xff] }
  0x17   :  { %120 = vmatpush.msra.mxu2 %v5481_v5  ;;  %142 = vmatpush.msra.mxu3 %v5481_v5 }
  0x18   :  { %77 = vmatpush.msra.mxu0 %v5487_v6  ;;  %99 = vmatpush.msra.mxu1 %v5487_v6 }
  0x19   :  { %121 = vmatpush.msra.mxu2 %v5487_v6  ;;  %143 = vmatpush.msra.mxu3 %v5487_v6 }
  0x1a   :  { %78 = vmatpush.msra.mxu0 %v5493_v7  ;;  %100 = vmatpush.msra.mxu1 %v5493_v7 }
  0x1b   :  { %122 = vmatpush.msra.mxu2 %v5493_v7  ;;  %144 = vmatpush.msra.mxu3 %v5493_v7 }
  0x1c   :  { %79 = vmatpush.msra.mxu0 %v5499_v8  ;;  %101 = vmatpush.msra.mxu1 %v5499_v8 }
  0x1d   :  { %123 = vmatpush.msra.mxu2 %v5499_v8  ;;  %145 = vmatpush.msra.mxu3 %v5499_v8 }
  0x1e   :  { %80 = vmatpush.msra.mxu0 %v5505_v9  ;;  %102 = vmatpush.msra.mxu1 %v5505_v9 }
  0x1f   :  { %124 = vmatpush.msra.mxu2 %v5505_v9  ;;  %146 = vmatpush.msra.mxu3 %v5505_v9 }
  0x20   :  { %81 = vmatpush.msra.mxu0 %v5511_v10  ;;  %103 = vmatpush.msra.mxu1 %v5511_v10 }
  0x21   :  { %125 = vmatpush.msra.mxu2 %v5511_v10  ;;  %147 = vmatpush.msra.mxu3 %v5511_v10 }
  0x22   :  { %82 = vmatpush.msra.mxu0 %v5517_v11  ;;  %104 = vmatpush.msra.mxu1 %v5517_v11 }
  0x23   :  { %126 = vmatpush.msra.mxu2 %v5517_v11  ;;  %148 = vmatpush.msra.mxu3 %v5517_v11 }
  0x24   :  { %83 = vmatpush.msra.mxu0 %v5523_v12  ;;  %105 = vmatpush.msra.mxu1 %v5523_v12 }
  0x25   :  { %127 = vmatpush.msra.mxu2 %v5523_v12  ;;  %149 = vmatpush.msra.mxu3 %v5523_v12 }
  0x26   :  { %84 = vmatpush.msra.mxu0 %v5529_v13  ;;  %106 = vmatpush.msra.mxu1 %v5529_v13 }
  0x27   :  { %128 = vmatpush.msra.mxu2 %v5529_v13  ;;  %150 = vmatpush.msra.mxu3 %v5529_v13 }
  0x28   :  { %85 = vmatpush.msra.mxu0 %v5535_v14  ;;  %107 = vmatpush.msra.mxu1 %v5535_v14 }
  0x29   :  { %129 = vmatpush.msra.mxu2 %v5535_v14  ;;  %151 = vmatpush.msra.mxu3 %v5535_v14 }
  0x2a   :  { %86 = vmatpush.msra.mxu0 %v5541_v15  ;;  %108 = vmatpush.msra.mxu1 %v5541_v15 }
  0x2b   :  { %130 = vmatpush.msra.mxu2 %v5541_v15  ;;  %152 = vmatpush.msra.mxu3 %v5541_v15 }
  0x2c   :  { %159 = vmatpush.msrb.mxu0 %v5455_v0  ;;  %181 = vmatpush.msrb.mxu1 %v5455_v0 }
  0x2d   :  { %203 = vmatpush.msrb.mxu2 %v5455_v0  ;;  %225 = vmatpush.msrb.mxu3 %v5455_v0 }
  0x2e   :  { %160 = vmatpush.msrb.mxu0 %v5457_v1  ;;  %182 = vmatpush.msrb.mxu1 %v5457_v1 }
  0x2f   :  { %204 = vmatpush.msrb.mxu2 %v5457_v1  ;;  %226 = vmatpush.msrb.mxu3 %v5457_v1 }
  0x30   :  { %161 = vmatpush.msrb.mxu0 %v5463_v2  ;;  %183 = vmatpush.msrb.mxu1 %v5463_v2 }
  0x31   :  { %205 = vmatpush.msrb.mxu2 %v5463_v2  ;;  %227 = vmatpush.msrb.mxu3 %v5463_v2 }
  0x32   :  { %162 = vmatpush.msrb.mxu0 %v5469_v3  ;;  %184 = vmatpush.msrb.mxu1 %v5469_v3 }
  0x33   :  { %206 = vmatpush.msrb.mxu2 %v5469_v3  ;;  %228 = vmatpush.msrb.mxu3 %v5469_v3 }
  0x34   :  { %163 = vmatpush.msrb.mxu0 %v5473_v4  ;;  %185 = vmatpush.msrb.mxu1 %v5473_v4 }
  0x35   :  { %207 = vmatpush.msrb.mxu2 %v5473_v4  ;;  %229 = vmatpush.msrb.mxu3 %v5473_v4 }
  0x36   :  { %164 = vmatpush.msrb.mxu0 %v5481_v5  ;;  %186 = vmatpush.msrb.mxu1 %v5481_v5 }
  0x37   :  { %208 = vmatpush.msrb.mxu2 %v5481_v5  ;;  %230 = vmatpush.msrb.mxu3 %v5481_v5 }
  0x38   :  { %165 = vmatpush.msrb.mxu0 %v5487_v6  ;;  %187 = vmatpush.msrb.mxu1 %v5487_v6 }
  0x39   :  { %209 = vmatpush.msrb.mxu2 %v5487_v6  ;;  %231 = vmatpush.msrb.mxu3 %v5487_v6 }
  0x3a   :  { %166 = vmatpush.msrb.mxu0 %v5493_v7  ;;  %188 = vmatpush.msrb.mxu1 %v5493_v7 }
  0x3b   :  { %210 = vmatpush.msrb.mxu2 %v5493_v7  ;;  %232 = vmatpush.msrb.mxu3 %v5493_v7 }
  0x3c   :  { %167 = vmatpush.msrb.mxu0 %v5499_v8  ;;  %189 = vmatpush.msrb.mxu1 %v5499_v8 }
  0x3d   :  { %211 = vmatpush.msrb.mxu2 %v5499_v8  ;;  %233 = vmatpush.msrb.mxu3 %v5499_v8 }
  0x3e   :  { %168 = vmatpush.msrb.mxu0 %v5505_v9  ;;  %190 = vmatpush.msrb.mxu1 %v5505_v9 }
  0x3f   :  { %212 = vmatpush.msrb.mxu2 %v5505_v9  ;;  %234 = vmatpush.msrb.mxu3 %v5505_v9 }
  0x40   :  { %169 = vmatpush.msrb.mxu0 %v5511_v10  ;;  %191 = vmatpush.msrb.mxu1 %v5511_v10 }
  0x41   :  { %213 = vmatpush.msrb.mxu2 %v5511_v10  ;;  %235 = vmatpush.msrb.mxu3 %v5511_v10 }
  0x42   :  { %170 = vmatpush.msrb.mxu0 %v5517_v11  ;;  %192 = vmatpush.msrb.mxu1 %v5517_v11 }
  0x43   :  { %214 = vmatpush.msrb.mxu2 %v5517_v11  ;;  %236 = vmatpush.msrb.mxu3 %v5517_v11 }
  0x44   :  { %131 = vmatmul.f32.vlgmr.msra.gmra.mxu2 %v5150_v16  ;;  %171 = vmatpush.msrb.mxu0 %v5523_v12 }
  0x45   :  { %193 = vmatpush.msrb.mxu1 %v5523_v12  ;;  %215 = vmatpush.msrb.mxu2 %v5523_v12 }
  0x46   :  { %237 = vmatpush.msrb.mxu3 %v5523_v12  ;;  %87 = vmatmul.f32.vlgmr.msra.gmra.mxu0 %v69_v17 }
  0x47   :  { %153 = vmatmul.f32.vlgmr.msra.gmra.mxu3 %v5151_v18  ;;  %172 = vmatpush.msrb.mxu0 %v5529_v13 }
  0x48   :  { %194 = vmatpush.msrb.mxu1 %v5529_v13  ;;  %216 = vmatpush.msrb.mxu2 %v5529_v13 }
  0x49   :  { %238 = vmatpush.msrb.mxu3 %v5529_v13  ;;  %109 = vmatmul.f32.vlgmr.msra.gmra.mxu1 %v5149_v19 }
  0x4a   :  { %173 = vmatpush.msrb.mxu0 %v5535_v14  ;;  %195 = vmatpush.msrb.mxu1 %v5535_v14 }
  0x4b   :  { %217 = vmatpush.msrb.mxu2 %v5535_v14  ;;  %239 = vmatpush.msrb.mxu3 %v5535_v14 }
  0x4c   :  { %174 = vmatpush.msrb.mxu0 %v5541_v15  ;;  %196 = vmatpush.msrb.mxu1 %v5541_v15 }
  0x4d   :  { %218 = vmatpush.msrb.mxu2 %v5541_v15  ;;  %240 = vmatpush.msrb.mxu3 %v5541_v15 }
  0x4e   :  { %219 = vmatmul.f32.vlgmr.msrb.gmra.mxu2 %v5154_v20  ;;  %247 = vmatpush.msra.mxu0 %v5455_v0 }
  0x4f   :  { %269 = vmatpush.msra.mxu1 %v5455_v0  ;;  %291 = vmatpush.msra.mxu2 %v5455_v0 }
  0x50   :  { %313 = vmatpush.msra.mxu3 %v5455_v0  ;;  %175 = vmatmul.f32.vlgmr.msrb.gmra.mxu0 %v5152_v21 }
  0x51   :  { %241 = vmatmul.f32.vlgmr.msrb.gmra.mxu3 %v5155_v22  ;;  %248 = vmatpush.msra.mxu0 %v5457_v1 }
  0x52   :  { %270 = vmatpush.msra.mxu1 %v5457_v1  ;;  %292 = vmatpush.msra.mxu2 %v5457_v1 }
  0x53   :  { %314 = vmatpush.msra.mxu3 %v5457_v1  ;;  %197 = vmatmul.f32.vlgmr.msrb.gmra.mxu1 %v5153_v23 }
  0x54   :  { %249 = vmatpush.msra.mxu0 %v5463_v2  ;;  %271 = vmatpush.msra.mxu1 %v5463_v2 }
  0x55   :  { %293 = vmatpush.msra.mxu2 %v5463_v2  ;;  %315 = vmatpush.msra.mxu3 %v5463_v2 }
  0x56   :  { %250 = vmatpush.msra.mxu0 %v5469_v3  ;;  %272 = vmatpush.msra.mxu1 %v5469_v3 }
  0x57   :  { %294 = vmatpush.msra.mxu2 %v5469_v3  ;;  %316 = vmatpush.msra.mxu3 %v5469_v3 }
  0x58   :  { %251 = vmatpush.msra.mxu0 %v5473_v4  ;;  %273 = vmatpush.msra.mxu1 %v5473_v4 }
  0x59   :  { %295 = vmatpush.msra.mxu2 %v5473_v4  ;;  %317 = vmatpush.msra.mxu3 %v5473_v4 }
  0x5a   :  { %252 = vmatpush.msra.mxu0 %v5481_v5  ;;  %274 = vmatpush.msra.mxu1 %v5481_v5 }
  0x5b   :  { %296 = vmatpush.msra.mxu2 %v5481_v5  ;;  %318 = vmatpush.msra.mxu3 %v5481_v5 }
  0x5c   :  { %253 = vmatpush.msra.mxu0 %v5487_v6  ;;  %275 = vmatpush.msra.mxu1 %v5487_v6 }
  0x5d   :  { %297 = vmatpush.msra.mxu2 %v5487_v6  ;;  %319 = vmatpush.msra.mxu3 %v5487_v6 }
  0x5e   :  { %254 = vmatpush.msra.mxu0 %v5493_v7  ;;  %276 = vmatpush.msra.mxu1 %v5493_v7 }
  0x5f   :  { %298 = vmatpush.msra.mxu2 %v5493_v7  ;;  %320 = vmatpush.msra.mxu3 %v5493_v7 }
  0x60   :  { %255 = vmatpush.msra.mxu0 %v5499_v8  ;;  %277 = vmatpush.msra.mxu1 %v5499_v8 }
  0x61   :  { %299 = vmatpush.msra.mxu2 %v5499_v8  ;;  %321 = vmatpush.msra.mxu3 %v5499_v8 }
  0x62   :  { %256 = vmatpush.msra.mxu0 %v5505_v9  ;;  %278 = vmatpush.msra.mxu1 %v5505_v9 }
  0x63   :  { %300 = vmatpush.msra.mxu2 %v5505_v9  ;;  %322 = vmatpush.msra.mxu3 %v5505_v9 }
  0x64   :  { %257 = vmatpush.msra.mxu0 %v5511_v10  ;;  %279 = vmatpush.msra.mxu1 %v5511_v10 }
  0x65   :  { %301 = vmatpush.msra.mxu2 %v5511_v10  ;;  %323 = vmatpush.msra.mxu3 %v5511_v10 }
  0x66   :  { %258 = vmatpush.msra.mxu0 %v5517_v11  ;;  %280 = vmatpush.msra.mxu1 %v5517_v11 }
  0x67   :  { %302 = vmatpush.msra.mxu2 %v5517_v11  ;;  %324 = vmatpush.msra.mxu3 %v5517_v11 }
  0x68   :  { %259 = vmatpush.msra.mxu0 %v5523_v12  ;;  %281 = vmatpush.msra.mxu1 %v5523_v12 }
  0x69   :  { %303 = vmatpush.msra.mxu2 %v5523_v12  ;;  %325 = vmatpush.msra.mxu3 %v5523_v12 }
  0x6a   :  { %260 = vmatpush.msra.mxu0 %v5529_v13  ;;  %282 = vmatpush.msra.mxu1 %v5529_v13 }
  0x6b   :  { %304 = vmatpush.msra.mxu2 %v5529_v13  ;;  %326 = vmatpush.msra.mxu3 %v5529_v13 }
  0x6c   :  { %261 = vmatpush.msra.mxu0 %v5535_v14  ;;  %283 = vmatpush.msra.mxu1 %v5535_v14 }
  0x6d   :  { %305 = vmatpush.msra.mxu2 %v5535_v14  ;;  %327 = vmatpush.msra.mxu3 %v5535_v14 }
  0x6e   :  { %262 = vmatpush.msra.mxu0 %v5541_v15  ;;  %284 = vmatpush.msra.mxu1 %v5541_v15 }
  0x6f   :  { %306 = vmatpush.msra.mxu2 %v5541_v15  ;;  %328 = vmatpush.msra.mxu3 %v5541_v15 }
  0x70   :  { %263 = vmatmul.f32.vlgmr.msra.gmra.mxu0 %v5156_v24  ;;  %307 = vmatmul.f32.vlgmr.msra.gmra.mxu2 %v5158_v25 }
  0x71   :  { %335 = vmatpush.msrb.mxu0 %v5455_v0  ;;  %357 = vmatpush.msrb.mxu1 %v5455_v0 }
  0x72   :  { %379 = vmatpush.msrb.mxu2 %v5455_v0  ;;  %401 = vmatpush.msrb.mxu3 %v5455_v0 }
  0x73   :  { %285 = vmatmul.f32.vlgmr.msra.gmra.mxu1 %v5157_v26  ;;  %329 = vmatmul.f32.vlgmr.msra.gmra.mxu3 %v5159_v27 }
  0x74   :  { %336 = vmatpush.msrb.mxu0 %v5457_v1  ;;  %358 = vmatpush.msrb.mxu1 %v5457_v1 }
  0x75   :  { %380 = vmatpush.msrb.mxu2 %v5457_v1  ;;  %402 = vmatpush.msrb.mxu3 %v5457_v1 }
  0x76   :  { %337 = vmatpush.msrb.mxu0 %v5463_v2  ;;  %359 = vmatpush.msrb.mxu1 %v5463_v2 }
  0x77   :  { %381 = vmatpush.msrb.mxu2 %v5463_v2  ;;  %403 = vmatpush.msrb.mxu3 %v5463_v2 }
  0x78   :  { %338 = vmatpush.msrb.mxu0 %v5469_v3  ;;  %360 = vmatpush.msrb.mxu1 %v5469_v3 }
  0x79   :  { %382 = vmatpush.msrb.mxu2 %v5469_v3  ;;  %404 = vmatpush.msrb.mxu3 %v5469_v3 }
  0x7a   :  { %339 = vmatpush.msrb.mxu0 %v5473_v4  ;;  %361 = vmatpush.msrb.mxu1 %v5473_v4 }
  0x7b   :  { %383 = vmatpush.msrb.mxu2 %v5473_v4  ;;  %405 = vmatpush.msrb.mxu3 %v5473_v4 }
  0x7c   :  { %340 = vmatpush.msrb.mxu0 %v5481_v5  ;;  %362 = vmatpush.msrb.mxu1 %v5481_v5 }
  0x7d   :  { %384 = vmatpush.msrb.mxu2 %v5481_v5  ;;  %406 = vmatpush.msrb.mxu3 %v5481_v5 }
  0x7e   :  { %341 = vmatpush.msrb.mxu0 %v5487_v6  ;;  %363 = vmatpush.msrb.mxu1 %v5487_v6 }
  0x7f   :  { %385 = vmatpush.msrb.mxu2 %v5487_v6  ;;  %407 = vmatpush.msrb.mxu3 %v5487_v6 }
  0x80   :  { %342 = vmatpush.msrb.mxu0 %v5493_v7  ;;  %364 = vmatpush.msrb.mxu1 %v5493_v7 }
  0x81   :  { %386 = vmatpush.msrb.mxu2 %v5493_v7  ;;  %408 = vmatpush.msrb.mxu3 %v5493_v7 }
  0x82   :  { %343 = vmatpush.msrb.mxu0 %v5499_v8  ;;  %365 = vmatpush.msrb.mxu1 %v5499_v8 }
  0x83   :  { %387 = vmatpush.msrb.mxu2 %v5499_v8  ;;  %409 = vmatpush.msrb.mxu3 %v5499_v8 }
  0x84   :  { %344 = vmatpush.msrb.mxu0 %v5505_v9  ;;  %366 = vmatpush.msrb.mxu1 %v5505_v9 }
  0x85   :  { %388 = vmatpush.msrb.mxu2 %v5505_v9  ;;  %410 = vmatpush.msrb.mxu3 %v5505_v9 }
  0x86   :  { %345 = vmatpush.msrb.mxu0 %v5511_v10  ;;  %367 = vmatpush.msrb.mxu1 %v5511_v10 }
  0x87   :  { %389 = vmatpush.msrb.mxu2 %v5511_v10  ;;  %411 = vmatpush.msrb.mxu3 %v5511_v10 }
  0x88   :  { %346 = vmatpush.msrb.mxu0 %v5517_v11  ;;  %368 = vmatpush.msrb.mxu1 %v5517_v11 }
  0x89   :  { %390 = vmatpush.msrb.mxu2 %v5517_v11  ;;  %412 = vmatpush.msrb.mxu3 %v5517_v11 }
  0x8a   :  { %347 = vmatpush.msrb.mxu0 %v5523_v12  ;;  %369 = vmatpush.msrb.mxu1 %v5523_v12 }
  0x8b   :  { %391 = vmatpush.msrb.mxu2 %v5523_v12  ;;  %413 = vmatpush.msrb.mxu3 %v5523_v12 }
  0x8c   :  { %348 = vmatpush.msrb.mxu0 %v5529_v13  ;;  %370 = vmatpush.msrb.mxu1 %v5529_v13 }
  0x8d   :  { %392 = vmatpush.msrb.mxu2 %v5529_v13  ;;  %414 = vmatpush.msrb.mxu3 %v5529_v13 }
  0x8e   :  { %349 = vmatpush.msrb.mxu0 %v5535_v14  ;;  %371 = vmatpush.msrb.mxu1 %v5535_v14 }
  0x8f   :  { %393 = vmatpush.msrb.mxu2 %v5535_v14  ;;  %415 = vmatpush.msrb.mxu3 %v5535_v14 }
  0x90   :  { %350 = vmatpush.msrb.mxu0 %v5541_v15  ;;  %372 = vmatpush.msrb.mxu1 %v5541_v15 }
  0x91   :  { %394 = vmatpush.msrb.mxu2 %v5541_v15  ;;  %416 = vmatpush.msrb.mxu3 %v5541_v15 }
  0x92   :  { %351 = vmatmul.f32.vlgmr.msrb.gmra.mxu0 %v5160_v28  ;;  %373 = vmatmul.f32.vlgmr.msrb.gmra.mxu1 %v5161_v29 }
  0x93   :  { %395 = vmatmul.f32.vlgmr.msrb.gmra.mxu2 %v5162_v30  ;;  %417 = vmatmul.f32.vlgmr.msrb.gmra.mxu3 %v5163_v31 }
  0xc3   :  { %v88_v34 = vpop.f32.mrf.mxu0 }
  0xc4   :  { %v5794_v35 = vadd.f32 %v5791_v32, %v88_v34 }
  0xc6   :  { %v110_v33 = vpop.f32.mrf.mxu1  ;;  %v429_v38 = vmul.f32 %v5794_v35, %v5794_v35  ;;  %v422_v41 = vsel %vm421_vm0, %v5794_v35, 0.0 }
  0xc7   :  { %v5797_v36 = vadd.f32 %v5791_v32, %v110_v33  ;;  %v132_v37 = vpop.f32.mrf.mxu2  ;;  %v423_v46 = vrot.slane %v422_v41, 4 }
  0xc8   :  { %v5802_v39 = vadd.f32 %v5791_v32, %v132_v37  ;;  %v430_v44 = vsel %vm421_vm0, %v429_v38, 0.0 }
  0xc9   :  { %v445_v40 = vmul.f32 %v5797_v36, %v5797_v36  ;;  %v437_v42 = vsel %vm421_vm0, %v5797_v36, 0.0  ;;  %v431_v51 = vrot.slane %v430_v44, 4  ;;  %v424_v55 = vadd.f32 %v423_v46, %v422_v41 }
  0xca   :  { %9531 = vst [vmem:[#allocation8_spill] sm:$0xff] %v5802_v39  ;;  %v154_v43 = vpop.f32.mrf.mxu3  ;;  %v462_v45 = vmul.f32 %v5802_v39, %v5802_v39  ;;  %v438_v48 = vrot.slane %v437_v42, 4  ;;  %v454_v49 = vsel %vm421_vm0, %v5802_v39, 0.0 }
  0xcb   :  { %v446_v47 = vsel %vm421_vm0, %v445_v40, 0.0  ;;  %v5817_v50 = vadd.f32 %v5791_v32, %v154_v43  ;;  %v455_v56 = vrot.slane %v454_v49, 4  ;;  %v432_v59 = vadd.f32 %v431_v51, %v430_v44 }
  0xcc   :  { %v447_v52 = vrot.slane %v446_v47, 4  ;;  %v463_v53 = vsel %vm421_vm0, %v462_v45, 0.0  ;;  %v439_v57 = vadd.f32 %v438_v48, %v437_v42  ;;  %v425_v63 = vrot.slane %v424_v55, 2 }
  0xcd   :  { %v176_v54 = vpop.f32.mrf.mxu0  ;;  %v479_v58 = vmul.f32 %v5817_v50, %v5817_v50  ;;  %v464_v60 = vrot.slane %v463_v53, 4  ;;  %v456_v0 = vadd.f32 %v455_v56, %v454_v49  ;;  %v471_v1 = vsel %vm421_vm0, %v5817_v50, 0.0 }
  0xce   :  { %v5823_v61 = vadd.f32 %v5791_v32, %v176_v54  ;;  %v448_v62 = vadd.f32 %v447_v52, %v446_v47  ;;  %v440_v3 = vrot.slane %v439_v57, 2  ;;  %v433_v5 = vrot.slane %v432_v59, 2 }
  0xcf   :  { %v480_v4 = vsel %vm421_vm0, %v479_v58, 0.0  ;;  %v465_v6 = vadd.f32 %v464_v60, %v463_v53  ;;  %v472_v9 = vrot.slane %v471_v1, 4  ;;  %v426_v11 = vadd.f32 %v425_v63, %v424_v55 }
  0xd0   :  { %9532 = vst [vmem:[#allocation9_spill] sm:$0xff] %v5823_v61  ;;  %v198_v2 = vpop.f32.mrf.mxu1  ;;  %v496_v7 = vmul.f32 %v5823_v61, %v5823_v61  ;;  %v449_v8 = vrot.slane %v448_v62, 2  ;;  %v457_v12 = vrot.slane %v456_v0, 2  ;;  %v481_v13 = vrot.slane %v480_v4, 4 }
  0xd1   :  { %v5831_v10 = vadd.f32 %v5791_v32, %v198_v2  ;;  %v488_v14 = vsel %vm421_vm0, %v5823_v61, 0.0  ;;  %v441_v15 = vadd.f32 %v440_v3, %v439_v57  ;;  %v220_v16 = vpop.f32.mrf.mxu2  ;;  %v434_v17 = vadd.f32 %v433_v5, %v432_v59 }
  0xd2   :  { %v466_v18 = vrot.slane %v465_v6, 2  ;;  %v497_v19 = vsel %vm421_vm0, %v496_v7, 0.0  ;;  %v450_v20 = vadd.f32 %v449_v8, %v448_v62  ;;  %v473_v21 = vadd.f32 %v472_v9, %v471_v1 }
  0xd3   :  { %9533 = vst [vmem:[#allocation10_spill] sm:$0xff] %v5831_v10  ;;  %v489_v22 = vrot.slane %v488_v14, 4  ;;  %v513_v23 = vmul.f32 %v5831_v10, %v5831_v10  ;;  %v427_v24 = vrot.slane %v426_v11, 1  ;;  %v458_v25 = vadd.f32 %v457_v12, %v456_v0 }
  0xd4   :  { %v482_v26 = vadd.f32 %v481_v13, %v480_v4  ;;  %v5839_v27 = vadd.f32 %v5791_v32, %v220_v16  ;;  %v442_v28 = vrot.slane %v441_v15, 1  ;;  %v498_v29 = vrot.slane %v497_v19, 4  ;;  %v242_v34 = vpop.f32.mrf.mxu3 }
  0xd5   :  { %v435_v30 = vrot.slane %v434_v17, 1  ;;  %v467_v31 = vadd.f32 %v466_v18, %v465_v6  ;;  %v505_v33 = vsel %vm421_vm0, %v5831_v10, 0.0  ;;  %v451_v37 = vrot.slane %v450_v20, 1 }
  0xd6   :  { %9534 = vst [vmem:[#allocation11_spill] sm:$0xff] %v5839_v27  ;;  %v474_v38 = vrot.slane %v473_v21, 2  ;;  %v490_v40 = vadd.f32 %v489_v22, %v488_v14  ;;  %v514_v41 = vsel %vm421_vm0, %v513_v23, 0.0  ;;  %v428_v42 = vadd.f32 %v427_v24, %v426_v11 }
  0xd7   :  { %v459_v43 = vrot.slane %v458_v25, 1  ;;  %v483_v44 = vrot.slane %v482_v26, 2  ;;  %v530_v45 = vmul.f32 %v5839_v27, %v5839_v27  ;;  %v443_v46 = vadd.f32 %v442_v28, %v441_v15 }
  0xd8   :  { %v499_v47 = vadd.f32 %v498_v29, %v497_v19  ;;  %v506_v48 = vrot.slane %v505_v33, 4  ;;  %v5847_v49 = vadd.f32 %v5791_v32, %v242_v34  ;;  %v436_v51 = vadd.f32 %v435_v30, %v434_v17 }
  0xd9   :  { %v468_v52 = vrot.slane %v467_v31, 1  ;;  %v515_v53 = vrot.slane %v514_v41, 4  ;;  %v452_v54 = vadd.f32 %v451_v37, %v450_v20  ;;  %v475_v55 = vadd.f32 %v474_v38, %v473_v21 }
  0xda   :  { %9535 = vst [vmem:[#allocation12_spill] sm:$0xff] %v5847_v49  ;;  %v491_v56 = vrot.slane %v490_v40, 2  ;;  %v522_v57 = vsel %vm421_vm0, %v5839_v27, 0.0  ;;  %v460_v58 = vadd.f32 %v459_v43, %v458_v25  ;;  %v484_v59 = vadd.f32 %v483_v44, %v482_v26 }
  0xdb   :  { %v531_v60 = vsel %vm421_vm0, %v530_v45, 0.0  ;;  %v444_v62 = vadd.f32 %v443_v46, %v428_v42  ;;  %v500_v63 = vrot.slane %v499_v47, 2  ;;  %v507_v0 = vadd.f32 %v506_v48, %v505_v33 }
  0xdc   :  { %v547_v1 = vmul.f32 %v5847_v49, %v5847_v49  ;;  %v469_v3 = vadd.f32 %v468_v52, %v467_v31  ;;  %v516_v4 = vadd.f32 %v515_v53, %v514_v41  ;;  %v523_v5 = vrot.slane %v522_v57, 4 }
  0xdd   :  { %v453_v7 = vadd.f32 %v452_v54, %v436_v51  ;;  %v476_v8 = vrot.slane %v475_v55, 1  ;;  %v492_v9 = vadd.f32 %v491_v56, %v490_v40  ;;  %v532_v11 = vrot.slane %v531_v60, 4 }
  0xde   :  { %v485_v12 = vrot.slane %v484_v59, 1  ;;  %v501_v15 = vadd.f32 %v500_v63, %v499_v47  ;;  %v508_v16 = vrot.slane %v507_v0, 2  ;;  %v539_v17 = vsel %vm421_vm0, %v5847_v49, 0.0 }
  0xdf   :  { %v548_v18 = vsel %vm421_vm0, %v547_v1, 0.0  ;;  %v461_v19 = vadd.f32 %v460_v58, %v444_v62  ;;  %v517_v20 = vrot.slane %v516_v4, 2  ;;  %v524_v21 = vadd.f32 %v523_v5, %v522_v57  ;;  %v5882_v5 = vld [vmem:[#allocation2 + $0xf8] sm:$0xff] }
  0xe0   :  { %v470_v23 = vadd.f32 %v469_v3, %v453_v7  ;;  %v477_v24 = vadd.f32 %v476_v8, %v475_v55  ;;  %v493_v25 = vrot.slane %v492_v9, 1  ;;  %v533_v26 = vadd.f32 %v532_v11, %v531_v60  ;;  %897 = vmatpush.msra.mxu1 %v5882_v5  ;;  %939 = vmatpush.msra.mxu3 %v5882_v5 }
  0xe1   :  { %v540_v29 = vrot.slane %v539_v17, 4  ;;  %v549_v30 = vrot.slane %v548_v18, 4  ;;  %v486_v34 = vadd.f32 %v485_v12, %v484_v59  ;;  %v502_v37 = vrot.slane %v501_v15, 1 }
  0xe2   :  { %v509_v38 = vadd.f32 %v508_v16, %v507_v0  ;;  %v518_v41 = vadd.f32 %v517_v20, %v516_v4  ;;  %v525_v42 = vrot.slane %v524_v21, 2  ;;  %v478_v44 = vadd.f32 %v477_v24, %v461_v19  ;;  %v5880_v4 = vld [vmem:[#allocation2 + $0x178] sm:$0xff]  ;;  %v5894_v16 = vld [vmem:[#allocation2 + $0xf0] sm:$0xff] }
  0xe3   :  { %v534_v45 = vrot.slane %v533_v26, 2  ;;  %v494_v48 = vadd.f32 %v493_v25, %v492_v9  ;;  %v541_v51 = vadd.f32 %v540_v29, %v539_v17  ;;  %v550_v52 = vadd.f32 %v549_v30, %v548_v18  ;;  %877 = vmatpush.msra.mxu0 %v5880_v4  ;;  %919 = vmatpush.msra.mxu2 %v5880_v4 }
  0xe4   :  { %v487_v54 = vadd.f32 %v486_v34, %v470_v23  ;;  %v503_v55 = vadd.f32 %v502_v37, %v501_v15  ;;  %v510_v56 = vrot.slane %v509_v38, 1  ;;  %v519_v58 = vrot.slane %v518_v41, 1  ;;  %v5892_v15 = vld [vmem:[#allocation2 + $0x170] sm:$0xff]  ;;  %898 = vmatpush.msra.mxu1 %v5894_v16  ;;  %940 = vmatpush.msra.mxu3 %v5894_v16 }
  0xe5   :  { %v526_v59 = vadd.f32 %v525_v42, %v524_v21  ;;  %v535_v0 = vadd.f32 %v534_v45, %v533_v26  ;;  %v495_v7 = vadd.f32 %v494_v48, %v478_v44  ;;  %v542_v8 = vrot.slane %v541_v51, 2  ;;  %878 = vmatpush.msra.mxu0 %v5892_v15  ;;  %920 = vmatpush.msra.mxu2 %v5892_v15  ;;  %v5900_v26 = vld [vmem:[#allocation2 + $0x168] sm:$0xff] }
  0xe6   :  { %v551_v9 = vrot.slane %v550_v52, 2  ;;  %v504_v17 = vadd.f32 %v503_v55, %v487_v54  ;;  %v511_v18 = vadd.f32 %v510_v56, %v509_v38  ;;  %v520_v19 = vadd.f32 %v519_v58, %v518_v41  ;;  %v5910_v38 = vld [vmem:[#allocation2 + $0x160] sm:$0xff] }
  0xe7   :  { %v527_v20 = vrot.slane %v526_v59, 1  ;;  %v536_v21 = vrot.slane %v535_v0, 1  ;;  %v543_v29 = vadd.f32 %v542_v8, %v541_v51  ;;  %879 = vmatpush.msra.mxu0 %v5900_v26  ;;  %921 = vmatpush.msra.mxu2 %v5900_v26  ;;  %v5912_v41 = vld [vmem:[#allocation2 + $0xe0] sm:$0xff]  ;;  %v5937_v8 = vld [vmem:[#allocation2 + $0x148] sm:$0xff] }
  0xe8   :  { %v552_v30 = vadd.f32 %v551_v9, %v550_v52  ;;  %v512_v42 = vadd.f32 %v511_v18, %v495_v7  ;;  %v5920_v52 = vld [vmem:[#allocation2 + $0x158] sm:$0xff]  ;;  %v5939_v9 = vld [vmem:[#allocation2 + $0xc8] sm:$0xff] }
  0xe9   :  { %v528_v44 = vadd.f32 %v527_v20, %v526_v59  ;;  %880 = vmatpush.msra.mxu0 %v5910_v38  ;;  %922 = vmatpush.msra.mxu2 %v5910_v38  ;;  %v544_v54 = vrot.slane %v543_v29, 1 }
  0xea   :  { %v553_v55 = vrot.slane %v552_v30, 1 }
  0xeb   :  { %881 = vmatpush.msra.mxu0 %v5920_v52  ;;  %923 = vmatpush.msra.mxu2 %v5920_v52 }
  0xed   :  { %v264_v2 = vpop.f32.mrf.mxu0 }
  0xee   :  { %v5855_v6 = vadd.f32 %v5791_v32, %v264_v2 }
  0xf0   :  { %9536 = vst [vmem:[#allocation13_spill] sm:$0xff] %v5855_v6  ;;  %v564_v13 = vmul.f32 %v5855_v6, %v5855_v6  ;;  %v286_v14 = vpop.f32.mrf.mxu1  ;;  %v556_v31 = vsel %vm421_vm0, %v5855_v6, 0.0  ;;  %v6034_v6 = vld [vmem:[#allocation2 + $0x100] sm:$0xff] }
  0xf1   :  { %v5863_v22 = vadd.f32 %v5791_v32, %v286_v14  ;;  %v557_v46 = vrot.slane %v556_v31, 4 }
  0xf2   :  { %v565_v33 = vsel %vm421_vm0, %v564_v13, 0.0 }
  0xf3   :  { %9537 = vst [vmem:[#allocation14_spill] sm:$0xff] %v5863_v22  ;;  %v308_v28 = vpop.f32.mrf.mxu2  ;;  %v581_v43 = vmul.f32 %v5863_v22, %v5863_v22  ;;  %v566_v47 = vrot.slane %v565_v33, 4  ;;  %v573_v53 = vsel %vm421_vm0, %v5863_v22, 0.0  ;;  %v558_v1 = vadd.f32 %v557_v46, %v556_v31 }
  0xf4   :  { %v5869_v40 = vadd.f32 %v5791_v32, %v308_v28  ;;  %v574_v3 = vrot.slane %v573_v53, 4  ;;  %v5902_v28 = vld [vmem:[#allocation2 + $0xe8] sm:$0xff]  ;;  %v537_v46 = vadd.f32 %v536_v21, %v535_v0  ;;  %v529_v0 = vadd.f32 %v528_v44, %v512_v42  ;;  %v5945_v21 = vld [vmem:[#allocation2 + $0x140] sm:$0xff] }
  0xf5   :  { %v582_v60 = vsel %vm421_vm0, %v581_v43, 0.0  ;;  %v567_v2 = vadd.f32 %v566_v47, %v565_v33  ;;  %v559_v23 = vrot.slane %v558_v1, 2  ;;  %899 = vmatpush.msra.mxu1 %v5902_v28  ;;  %941 = vmatpush.msra.mxu3 %v5902_v28  ;;  %v521_v43 = vadd.f32 %v520_v19, %v504_v17 }
  0xf6   :  { %9538 = vst [vmem:[#allocation15_spill] sm:$0xff] %v5869_v40  ;;  %v598_v57 = vmul.f32 %v5869_v40, %v5869_v40  ;;  %v590_v62 = vsel %vm421_vm0, %v5869_v40, 0.0  ;;  %v330_v63 = vpop.f32.mrf.mxu3  ;;  %v583_v11 = vrot.slane %v582_v60, 4  ;;  %v575_v25 = vadd.f32 %v574_v3, %v573_v53  ;;  %v5922_v53 = vld [vmem:[#allocation2 + $0xd8] sm:$0xff]  ;;  %v6011_v40 = vld [vmem:[#allocation2 + $0x110] sm:$0xff] }
  0xf7   :  { %v591_v12 = vrot.slane %v590_v62, 4  ;;  %v5888_v14 = vadd.f32 %v5791_v32, %v330_v63  ;;  %v568_v24 = vrot.slane %v567_v2, 2  ;;  %900 = vmatpush.msra.mxu1 %v5912_v41  ;;  %v560_v47 = vadd.f32 %v559_v23, %v558_v1  ;;  %942 = vmatpush.msra.mxu3 %v5912_v41  ;;  %v5931_v63 = vld [vmem:[#allocation2 + $0xd0] sm:$0xff]  ;;  %v5947_v23 = vld [vmem:[#allocation2 + $0xc0] sm:$0xff] }
  0xf8   :  { %v599_v13 = vsel %vm421_vm0, %v598_v57, 0.0  ;;  %v584_v33 = vadd.f32 %v583_v11, %v582_v60  ;;  %v576_v51 = vrot.slane %v575_v25, 2  ;;  %v538_v1 = vadd.f32 %v537_v46, %v521_v43  ;;  %v5961_v46 = vld [vmem:[#allocation2 + $0x130] sm:$0xff] }
  0xf9   :  { %9539 = vst [vmem:[#allocation16_spill] sm:$0xff] %v5888_v14  ;;  %v600_v31 = vrot.slane %v599_v13, 4  ;;  %v592_v34 = vadd.f32 %v591_v12, %v590_v62  ;;  %v615_v37 = vmul.f32 %v5888_v14, %v5888_v14  ;;  %v607_v45 = vsel %vm421_vm0, %v5888_v14, 0.0  ;;  %901 = vmatpush.msra.mxu1 %v5922_v53  ;;  %943 = vmatpush.msra.mxu3 %v5922_v53  ;;  %v5929_v62 = vld [vmem:[#allocation2 + $0x150] sm:$0xff]  ;;  %v6020_v14 = vld [vmem:[#allocation2 + $0x108] sm:$0xff] }
  0xfa   :  { %v569_v48 = vadd.f32 %v568_v24, %v567_v2  ;;  %v585_v57 = vrot.slane %v584_v33, 2  ;;  %v608_v59 = vrot.slane %v607_v45, 4  ;;  %882 = vmatpush.msra.mxu0 %v5929_v62  ;;  %v561_v2 = vrot.slane %v560_v47, 1  ;;  %924 = vmatpush.msra.mxu2 %v5929_v62 }
  0xfb   :  { %v601_v56 = vadd.f32 %v600_v31, %v599_v13  ;;  %v593_v58 = vrot.slane %v592_v34, 2  ;;  %v616_v60 = vsel %vm421_vm0, %v615_v37, 0.0  ;;  %902 = vmatpush.msra.mxu1 %v5931_v63  ;;  %v577_v7 = vadd.f32 %v576_v51, %v575_v25  ;;  %944 = vmatpush.msra.mxu3 %v5931_v63  ;;  %v5955_v31 = vld [vmem:[#allocation2 + $0xb8] sm:$0xff] }
  0xfc   :  { %v570_v3 = vrot.slane %v569_v48, 1  ;;  %v545_v11 = vadd.f32 %v544_v54, %v543_v29  ;;  %v554_v12 = vadd.f32 %v553_v55, %v552_v30  ;;  %v617_v17 = vrot.slane %v616_v60, 4  ;;  %883 = vmatpush.msra.mxu0 %v5937_v8  ;;  %925 = vmatpush.msra.mxu2 %v5937_v8  ;;  %v5953_v30 = vld [vmem:[#allocation2 + $0x138] sm:$0xff] }
  0xfd   :  { %v602_v13 = vrot.slane %v601_v56, 2  ;;  %903 = vmatpush.msra.mxu1 %v5939_v9  ;;  %v586_v18 = vadd.f32 %v585_v57, %v584_v33  ;;  %v594_v19 = vadd.f32 %v593_v58, %v592_v34  ;;  %v609_v20 = vadd.f32 %v608_v59, %v607_v45  ;;  %945 = vmatpush.msra.mxu3 %v5939_v9  ;;  %v5969_v57 = vld [vmem:[#allocation2 + $0x128] sm:$0xff] }
  0xfe   :  { %884 = vmatpush.msra.mxu0 %v5945_v21  ;;  %v562_v24 = vadd.f32 %v561_v2, %v560_v47  ;;  %v571_v25 = vadd.f32 %v570_v3, %v569_v48  ;;  %v578_v29 = vrot.slane %v577_v7, 1  ;;  %926 = vmatpush.msra.mxu2 %v5945_v21  ;;  %v546_v33 = vadd.f32 %v545_v11, %v529_v0  ;;  %v5963_v47 = vld [vmem:[#allocation2 + $0xb0] sm:$0xff]  ;;  %v5971_v58 = vld [vmem:[#allocation2 + $0xa8] sm:$0xff]  ;;  %v5985_v11 = vld [vmem:[#allocation2 + $0x120] sm:$0xff] }
  0xff   :  { %904 = vmatpush.msra.mxu1 %v5947_v23  ;;  %946 = vmatpush.msra.mxu3 %v5947_v23  ;;  %v603_v34 = vadd.f32 %v602_v13, %v601_v56  ;;  %v618_v37 = vadd.f32 %v617_v17, %v616_v60  ;;  %v555_v42 = vadd.f32 %v554_v12, %v538_v1  ;;  %v587_v43 = vrot.slane %v586_v18, 1  ;;  %v5987_v12 = vld [vmem:[#allocation2 + $0xa0] sm:$0xff] }
 0x100   :  { %885 = vmatpush.msra.mxu0 %v5953_v30  ;;  %v595_v44 = vrot.slane %v594_v19, 1  ;;  %v610_v45 = vrot.slane %v609_v20, 2  ;;  %927 = vmatpush.msra.mxu2 %v5953_v30  ;;  %v563_v48 = vadd.f32 %v562_v24, %v546_v33  ;;  %v579_v54 = vadd.f32 %v578_v29, %v577_v7  ;;  %v6001_v29 = vld [vmem:[#allocation2 + $0x118] sm:$0xff] }
 0x101   :  { %905 = vmatpush.msra.mxu1 %v5955_v31  ;;  %947 = vmatpush.msra.mxu3 %v5955_v31  ;;  %v572_v51 = vadd.f32 %v571_v25, %v555_v42  ;;  %v604_v59 = vrot.slane %v603_v34, 1  ;;  %v619_v60 = vrot.slane %v618_v37, 2  ;;  %v588_v2 = vadd.f32 %v587_v43, %v586_v18  ;;  %v6003_v33 = vld [vmem:[#allocation2 + $0x98] sm:$0xff] }
 0x102   :  { %886 = vmatpush.msra.mxu0 %v5961_v46  ;;  %928 = vmatpush.msra.mxu2 %v5961_v46  ;;  %v596_v3 = vadd.f32 %v595_v44, %v594_v19  ;;  %v5981_v7 = vadd.f32 %v610_v45, %v609_v20  ;;  %v580_v20 = vadd.f32 %v579_v54, %v563_v48 }
 0x103   :  { %906 = vmatpush.msra.mxu1 %v5963_v47  ;;  %948 = vmatpush.msra.mxu3 %v5963_v47  ;;  %v605_v42 = vadd.f32 %v604_v59, %v603_v34  ;;  %v620_v43 = vadd.f32 %v619_v60, %v618_v37  ;;  %v6013_v34 = vld [vmem:[#allocation2 + $0x90] sm:$0xff]  ;;  %v589_v37 = vadd.f32 %v588_v2, %v572_v51  ;;  %v6022_v51 = vld [vmem:[#allocation2 + $0x88] sm:$0xff] }
 0x104   :  { %887 = vmatpush.msra.mxu0 %v5969_v57  ;;  %929 = vmatpush.msra.mxu2 %v5969_v57  ;;  %v597_v59 = vadd.f32 %v596_v3, %v580_v20  ;;  %v612_v60 = vrot.slane %v5981_v7, 1 }
 0x105   :  { %907 = vmatpush.msra.mxu1 %v5971_v58  ;;  %949 = vmatpush.msra.mxu3 %v5971_v58  ;;  %v606_v2 = vadd.f32 %v605_v42, %v589_v37  ;;  %v6036_v42 = vld [vmem:[#allocation2 + $0x80] sm:$0xff] }
 0x106   :  { %888 = vmatpush.msra.mxu0 %v5985_v11  ;;  %930 = vmatpush.msra.mxu2 %v5985_v11 }
 0x107   :  { %908 = vmatpush.msra.mxu1 %v5987_v12  ;;  %950 = vmatpush.msra.mxu3 %v5987_v12 }
 0x108   :  { %889 = vmatpush.msra.mxu0 %v6001_v29  ;;  %931 = vmatpush.msra.mxu2 %v6001_v29 }
 0x109   :  { %909 = vmatpush.msra.mxu1 %v6003_v33  ;;  %951 = vmatpush.msra.mxu3 %v6003_v33 }
 0x10a   :  { %890 = vmatpush.msra.mxu0 %v6011_v40  ;;  %932 = vmatpush.msra.mxu2 %v6011_v40 }
 0x10b   :  { %910 = vmatpush.msra.mxu1 %v6013_v34  ;;  %952 = vmatpush.msra.mxu3 %v6013_v34 }
 0x10c   :  { %891 = vmatpush.msra.mxu0 %v6020_v14  ;;  %933 = vmatpush.msra.mxu2 %v6020_v14 }
 0x10d   :  { %911 = vmatpush.msra.mxu1 %v6022_v51  ;;  %953 = vmatpush.msra.mxu3 %v6022_v51 }
 0x10e   :  { %892 = vmatpush.msra.mxu0 %v6034_v6  ;;  %934 = vmatpush.msra.mxu2 %v6034_v6 }
 0x10f   :  { %v352_v55 = vpop.f32.mrf.mxu0  ;;  %v374_v56 = vpop.f32.mrf.mxu1  ;;  %912 = vmatpush.msra.mxu1 %v6036_v42  ;;  %954 = vmatpush.msra.mxu3 %v6036_v42 }
 0x110   :  { %v5974_v0 = vadd.f32 %v5791_v32, %v352_v55  ;;  %v5977_v1 = vadd.f32 %v5791_v32, %v374_v56  ;;  %960 = vmatpush.msrb.mxu0 %v5880_v4  ;;  %1001 = vmatpush.msrb.mxu2 %v5880_v4 }
 0x111   :  { %980 = vmatpush.msrb.mxu1 %v5882_v5  ;;  %1021 = vmatpush.msrb.mxu3 %v5882_v5 }
 0x112   :  { %9540 = vst [vmem:[#allocation17_spill] sm:$0xff] %v5974_v0  ;;  %v624_v13 = vsel %vm421_vm0, %v5974_v0, 0.0  ;;  %v632_v17 = vmul.f32 %v5974_v0, %v5974_v0  ;;  %v641_v18 = vsel %vm421_vm0, %v5977_v1, 0.0  ;;  %v649_v19 = vmul.f32 %v5977_v1, %v5977_v1  ;;  %961 = vmatpush.msrb.mxu0 %v5892_v15  ;;  %1002 = vmatpush.msrb.mxu2 %v5892_v15 }
 0x113   :  { %9541 = vst [vmem:[#allocation18_spill] sm:$0xff] %v5977_v1  ;;  %v625_v24 = vrot.slane %v624_v13, 4  ;;  %v642_v25 = vrot.slane %v641_v18, 4  ;;  %981 = vmatpush.msrb.mxu1 %v5894_v16  ;;  %1022 = vmatpush.msrb.mxu3 %v5894_v16 }
 0x114   :  { %v633_v44 = vsel %vm421_vm0, %v632_v17, 0.0  ;;  %v650_v45 = vsel %vm421_vm0, %v649_v19, 0.0  ;;  %962 = vmatpush.msrb.mxu0 %v5900_v26  ;;  %1003 = vmatpush.msrb.mxu2 %v5900_v26 }
 0x115   :  { %v626_v48 = vadd.f32 %v625_v24, %v624_v13  ;;  %v634_v54 = vrot.slane %v633_v44, 4  ;;  %v643_v55 = vadd.f32 %v642_v25, %v641_v18  ;;  %v651_v56 = vrot.slane %v650_v45, 4  ;;  %982 = vmatpush.msrb.mxu1 %v5902_v28  ;;  %1023 = vmatpush.msrb.mxu3 %v5902_v28 }
 0x116   :  { %v396_v17 = vpop.f32.mrf.mxu2  ;;  %v418_v19 = vpop.f32.mrf.mxu3  ;;  %963 = vmatpush.msrb.mxu0 %v5910_v38  ;;  %1004 = vmatpush.msrb.mxu2 %v5910_v38 }
 0x117   :  { %v627_v13 = vrot.slane %v626_v48, 2  ;;  %v635_v18 = vadd.f32 %v634_v54, %v633_v44  ;;  %v644_v24 = vrot.slane %v643_v55, 2  ;;  %v652_v25 = vadd.f32 %v651_v56, %v650_v45  ;;  %983 = vmatpush.msrb.mxu1 %v5912_v41  ;;  %1024 = vmatpush.msrb.mxu3 %v5912_v41 }
 0x118   :  { %v6025_v3 = vadd.f32 %v5791_v32, %v396_v17  ;;  %v6028_v20 = vadd.f32 %v5791_v32, %v418_v19  ;;  %v621_v44 = vrot.slane %v620_v43, 1  ;;  %v613_v19 = vadd.f32 %v612_v60, %v5981_v7  ;;  %964 = vmatpush.msrb.mxu0 %v5920_v52  ;;  %1005 = vmatpush.msrb.mxu2 %v5920_v52 }
 0x119   :  { %v628_v45 = vadd.f32 %v627_v13, %v626_v48  ;;  %v636_v54 = vrot.slane %v635_v18, 2  ;;  %v653_v56 = vrot.slane %v652_v25, 2  ;;  %v645_v0 = vadd.f32 %v644_v24, %v643_v55  ;;  %984 = vmatpush.msrb.mxu1 %v5922_v53  ;;  %1025 = vmatpush.msrb.mxu3 %v5922_v53 }
 0x11a   :  { %9542 = vst [vmem:[#allocation19_spill] sm:$0xff] %v6025_v3  ;;  %v658_v32 = vsel %vm421_vm0, %v6025_v3, 0.0  ;;  %v666_v37 = vmul.f32 %v6025_v3, %v6025_v3  ;;  %v675_v17 = vsel %vm421_vm0, %v6028_v20, 0.0  ;;  %v683_v48 = vmul.f32 %v6028_v20, %v6028_v20  ;;  %965 = vmatpush.msrb.mxu0 %v5929_v62  ;;  %1006 = vmatpush.msrb.mxu2 %v5929_v62 }
 0x11b   :  { %v629_v13 = vrot.slane %v628_v45, 1  ;;  %v637_v22 = vadd.f32 %v636_v54, %v635_v18  ;;  %v659_v3 = vrot.slane %v658_v32, 4  ;;  %v676_v49 = vrot.slane %v675_v17, 4  ;;  %985 = vmatpush.msrb.mxu1 %v5931_v63  ;;  %1026 = vmatpush.msrb.mxu3 %v5931_v63 }
 0x11c   :  { %v667_v27 = vsel %vm421_vm0, %v666_v37, 0.0  ;;  %v684_v61 = vsel %vm421_vm0, %v683_v48, 0.0  ;;  %v622_v10 = vadd.f32 %v621_v44, %v620_v43  ;;  %v654_v60 = vadd.f32 %v653_v56, %v652_v25  ;;  %966 = vmatpush.msrb.mxu0 %v5937_v8  ;;  %1007 = vmatpush.msrb.mxu2 %v5937_v8 }
 0x11d   :  { %v630_v1 = vadd.f32 %v629_v13, %v628_v45  ;;  %v638_v7 = vrot.slane %v637_v22, 1  ;;  %v660_v55 = vadd.f32 %v659_v3, %v658_v32  ;;  %v668_v18 = vrot.slane %v667_v27, 4  ;;  %986 = vmatpush.msrb.mxu1 %v5939_v9  ;;  %1027 = vmatpush.msrb.mxu3 %v5939_v9 }
 0x11e   :  { %v677_v24 = vadd.f32 %v676_v49, %v675_v17  ;;  %v685_v54 = vrot.slane %v684_v61, 4  ;;  %v614_v37 = vadd.f32 %v613_v19, %v597_v59  ;;  %v646_v39 = vrot.slane %v645_v0, 1  ;;  %967 = vmatpush.msrb.mxu0 %v5945_v21  ;;  %1008 = vmatpush.msrb.mxu2 %v5945_v21 }
 0x11f   :  { %v639_v48 = vadd.f32 %v638_v7, %v637_v22  ;;  %v661_v43 = vrot.slane %v660_v55, 2  ;;  %v669_v25 = vadd.f32 %v668_v18, %v667_v27  ;;  %v623_v49 = vadd.f32 %v622_v10, %v606_v2  ;;  %987 = vmatpush.msrb.mxu1 %v5947_v23  ;;  %1028 = vmatpush.msrb.mxu3 %v5947_v23 }
 0x120   :  { %v678_v44 = vrot.slane %v677_v24, 2  ;;  %v686_v45 = vadd.f32 %v685_v54, %v684_v61  ;;  %v631_v3 = vadd.f32 %v630_v1, %v614_v37  ;;  %v655_v56 = vrot.slane %v654_v60, 1  ;;  %968 = vmatpush.msrb.mxu0 %v5953_v30  ;;  %1009 = vmatpush.msrb.mxu2 %v5953_v30 }
 0x121   :  { %v662_v22 = vadd.f32 %v661_v43, %v660_v55  ;;  %v670_v59 = vrot.slane %v669_v25, 2  ;;  %v640_v61 = vadd.f32 %v639_v48, %v623_v49  ;;  %v647_v27 = vadd.f32 %v646_v39, %v645_v0  ;;  %988 = vmatpush.msrb.mxu1 %v5955_v31  ;;  %1029 = vmatpush.msrb.mxu3 %v5955_v31 }
 0x122   :  { %v679_v32 = vadd.f32 %v678_v44, %v677_v24  ;;  %v687_v17 = vrot.slane %v686_v45, 2  ;;  %v656_v13 = vadd.f32 %v655_v56, %v654_v60  ;;  %969 = vmatpush.msrb.mxu0 %v5961_v46  ;;  %1010 = vmatpush.msrb.mxu2 %v5961_v46 }
 0x123   :  { %v663_v10 = vrot.slane %v662_v22, 1  ;;  %v671_v1 = vadd.f32 %v670_v59, %v669_v25  ;;  %v648_v7 = vadd.f32 %v647_v27, %v631_v3  ;;  %989 = vmatpush.msrb.mxu1 %v5963_v47  ;;  %1030 = vmatpush.msrb.mxu3 %v5963_v47 }
 0x124   :  { %v680_v2 = vrot.slane %v679_v32, 1  ;;  %v688_v19 = vadd.f32 %v687_v17, %v686_v45  ;;  %v657_v18 = vadd.f32 %v656_v13, %v640_v61  ;;  %970 = vmatpush.msrb.mxu0 %v5969_v57  ;;  %1011 = vmatpush.msrb.mxu2 %v5969_v57  ;;  %v710_v13 = vld [vmem:[#allocation4 + $0x2] sm:$0x1] }
 0x125   :  { %v664_v55 = vadd.f32 %v663_v10, %v662_v22  ;;  %v672_v39 = vrot.slane %v671_v1, 1  ;;  %990 = vmatpush.msrb.mxu1 %v5971_v58  ;;  %1031 = vmatpush.msrb.mxu3 %v5971_v58 }
 0x126   :  { %v689_v0 = vrot.slane %v688_v19, 1  ;;  %v681_v60 = vadd.f32 %v680_v2, %v679_v32  ;;  %971 = vmatpush.msrb.mxu0 %v5985_v11  ;;  %1012 = vmatpush.msrb.mxu2 %v5985_v11 }
 0x127   :  { %v665_v24 = vadd.f32 %v664_v55, %v648_v7  ;;  %v673_v54 = vadd.f32 %v672_v39, %v671_v1  ;;  %991 = vmatpush.msrb.mxu1 %v5987_v12  ;;  %1032 = vmatpush.msrb.mxu3 %v5987_v12  ;;  %v708_v1 = vld [vmem:[#allocation4 + $0x1] sm:$0x1] }
 0x128   :  { %v690_v43 = vadd.f32 %v689_v0, %v688_v19  ;;  %972 = vmatpush.msrb.mxu0 %v6001_v29  ;;  %1013 = vmatpush.msrb.mxu2 %v6001_v29 }
 0x129   :  { %v674_v37 = vadd.f32 %v673_v54, %v657_v18  ;;  %v682_v48 = vadd.f32 %v681_v60, %v665_v24  ;;  %992 = vmatpush.msrb.mxu1 %v6003_v33  ;;  %1033 = vmatpush.msrb.mxu3 %v6003_v33 }
 0x12a   :  { %973 = vmatpush.msrb.mxu0 %v6011_v40  ;;  %1014 = vmatpush.msrb.mxu2 %v6011_v40 }
 0x12b   :  { %v691_v25 = vadd.f32 %v690_v43, %v674_v37  ;;  %v692_v44 = vmul.f32 0.03125, %v682_v48  ;;  %993 = vmatpush.msrb.mxu1 %v6013_v34  ;;  %1034 = vmatpush.msrb.mxu3 %v6013_v34  ;;  %v9543_v37 = vld [vmem:[#allocation8_spill] sm:$0xff]  ;;  %v9544_v43 = vld [vmem:[#allocation18_spill] sm:$0xff] }
 0x12c   :  { %974 = vmatpush.msrb.mxu0 %v6020_v14  ;;  %1015 = vmatpush.msrb.mxu2 %v6020_v14 }
 0x12d   :  { %v693_v45 = vmul.f32 0.03125, %v691_v25  ;;  %v694_v49 = vmul.f32 %v692_v44, %v692_v44  ;;  %994 = vmatpush.msrb.mxu1 %v6022_v51  ;;  %1035 = vmatpush.msrb.mxu3 %v6022_v51 }
 0x12e   :  { %975 = vmatpush.msrb.mxu0 %v6034_v6  ;;  %1016 = vmatpush.msrb.mxu2 %v6034_v6 }
 0x12f   :  { %v695_v3 = vsub.f32 %v693_v45, %v694_v49  ;;  %995 = vmatpush.msrb.mxu1 %v6036_v42  ;;  %1036 = vmatpush.msrb.mxu3 %v6036_v42 }
 0x131   :  { %v696_v56 = vmax.f32 %v695_v3, 0.0  ;;  %v9545_v3 = vld [vmem:[#allocation10_spill] sm:$0xff] }
 0x133   :  { %v697_v22 = vadd.f32 1e-05, %v696_v56 }
 0x135   :  { %5209 = vrsqrt.f32 %v697_v22  ;;  %vm704_vm2 = vweird.f32 %v697_v22 }
 0x13b   :  { %v5210_v59 = vpop.eup %5209 }
 0x13c   :  { %v699_v32 = vmul.f32 %v5210_v59, %v697_v22  ;;  %vm705_vm1 = vweird.f32 %v5210_v59  ;;  %v9546_v22 = vld [vmem:[#allocation9_spill] sm:$0xff] }
 0x13d   :  { %vm706_vm3 = vmor %vm704_vm2, %vm705_vm1 }
 0x13e   :  { %v700_v17 = vmul.f32 %v5210_v59, %v699_v32 }
 0x140   :  { %v701_v61 = vmul.f32 0.5, %v700_v17  ;;  %v5166_v17 = vld [vmem:[%s9374_s1 + $0x6] sm:$0x3] }
 0x142   :  { %v702_v27 = vsub.f32 1.5, %v701_v61  ;;  %v9547_v61 = vld [vmem:[#allocation12_spill] sm:$0xff] }
 0x144   :  { %v703_v10 = vmul.f32 %v5210_v59, %v702_v27 }
 0x146   :  { %v707_v2 = vsel %vm706_vm3, %v5210_v59, %v703_v10 }
 0x147   :  { %v709_v19 = vmul.f32 %v708_v1, %v707_v2 }
 0x149   :  { %v711_v7 = vmul.f32 %v709_v19, %v692_v44  ;;  %v6117_v55 = vperm.slane %v709_v19, 0 }
 0x14b   :  { %v712_v39 = vsub.f32 %v710_v13, %v711_v7  ;;  %v790_v0 = vmul.f32 %v6117_v55, %v6028_v20  ;;  %v720_v24 = vmul.f32 %v6117_v55, %v5797_v36  ;;  %v714_v54 = vmul.f32 %v6117_v55, %v5794_v35  ;;  %v5164_v35 = vld [vmem:[%s9374_s1 + $0x2] sm:$0x3]  ;;  %v5165_v13 = vld [vmem:[%s9374_s1 + $0x4] sm:$0x3] }
 0x14c   :  { %v730_v60 = vmul.f32 %v6117_v55, %v5817_v50  ;;  %v725_v48 = vmul.f32 %v6117_v55, %v9543_v37  ;;  %v6133_v25 = vmul.f32 %v6117_v55, %v9544_v43  ;;  %v795_v50 = vld [vmem:[%s9374_s1] sm:$0x3]  ;;  %v740_v56 = vmul.f32 %v6117_v55, %v9545_v3 }
 0x14d   :  { %v6121_v18 = vperm.slane %v712_v39, 0  ;;  %v735_v59 = vmul.f32 %v6117_v55, %v9546_v22  ;;  %v750_v27 = vmul.f32 %v6117_v55, %v9547_v61 }
 0x14f   :  { %v6136_v20 = vadd.f32 %v790_v0, %v6121_v18  ;;  %v721_v44 = vadd.f32 %v720_v24, %v6121_v18  ;;  %v716_v36 = vadd.f32 %v6121_v18, %v714_v54  ;;  %v731_v45 = vadd.f32 %v730_v60, %v6121_v18 }
 0x150   :  { %v726_v49 = vadd.f32 %v725_v48, %v6121_v18  ;;  %v741_v7 = vadd.f32 %v740_v56, %v6121_v18  ;;  %v736_v39 = vadd.f32 %v735_v59, %v6121_v18  ;;  %v751_v60 = vadd.f32 %v750_v27, %v6121_v18  ;;  %v5168_v59 = vld [vmem:[%s9374_s1 + $0xa] sm:$0x3]  ;;  %v5170_v27 = vld [vmem:[%s9374_s1 + $0xe] sm:$0x3] }
 0x151   :  { %vm722_vm4 = vcmp.ge.f32.partialorder %v721_v44, 0.0  ;;  %v723_v32 = vmul.f32 0.2, %v721_v44  ;;  %vm717_vm5 = vcmp.ge.f32.partialorder %v716_v36, 0.0  ;;  %v718_v10 = vmul.f32 0.2, %v716_v36 }
 0x152   :  { %vm732_vm6 = vcmp.ge.f32.partialorder %v731_v45, 0.0  ;;  %v733_v1 = vmul.f32 0.2, %v731_v45  ;;  %vm727_vm7 = vcmp.ge.f32.partialorder %v726_v49, 0.0  ;;  %v728_v19 = vmul.f32 0.2, %v726_v49 }
 0x153   :  { %v724_v2 = vsel %vm722_vm4, %v721_v44, %v723_v32  ;;  %v719_v24 = vsel %vm717_vm5, %v716_v36, %v718_v10  ;;  %v9551_v44 = vld [vmem:[#allocation11_spill] sm:$0xff]  ;;  %v743_v36 = vmul.f32 0.2, %v741_v7  ;;  %vm742_vm8 = vcmp.ge.f32.partialorder %v741_v7, 0.0 }
 0x154   :  { %v6162_v0 = vadd.f32 %v5164_v35, %v724_v2  ;;  %v734_v54 = vsel %vm732_vm6, %v731_v45, %v733_v1  ;;  %v6165_v37 = vadd.f32 %v795_v50, %v719_v24  ;;  %v729_v43 = vsel %vm727_vm7, %v726_v49, %v728_v19  ;;  %v5169_v1 = vld [vmem:[%s9374_s1 + $0xc] sm:$0x3] }
 0x155   :  { %v6167_v48 = vadd.f32 %v5166_v17, %v734_v54  ;;  %v745_v3 = vmul.f32 %v6117_v55, %v9551_v44  ;;  %v6172_v22 = vadd.f32 %v5165_v13, %v729_v43  ;;  %v738_v45 = vmul.f32 0.2, %v736_v39  ;;  %v5167_v17 = vld [vmem:[%s9374_s1 + $0x8] sm:$0x3] }
 0x156   :  { %9548 = vst [vmem:[#allocation8_spill] sm:$0xff] %v6162_v0  ;;  %893 = vmatmul.f32.vlgmr.msra.gmra.mxu0 %v6162_v0  ;;  %913 = vmatmul.f32.vlgmr.msra.gmra.mxu1 %v6165_v37  ;;  %vm737_vm9 = vcmp.ge.f32.partialorder %v736_v39, 0.0  ;;  %v753_v50 = vmul.f32 0.2, %v751_v60  ;;  %vm752_vm10 = vcmp.ge.f32.partialorder %v751_v60, 0.0  ;;  %v744_v56 = vsel %vm742_vm8, %v741_v7, %v743_v36  ;;  %v6924_v0 = vld [vmem:[#allocation2 + $0x618] sm:$0xff] }
 0x157   :  { %9549 = vst [vmem:[#allocation18_spill] sm:$0xff] %v6165_v37  ;;  %935 = vmatmul.f32.vlgmr.msra.gmra.mxu2 %v6167_v48  ;;  %v746_v35 = vadd.f32 %v745_v3, %v6121_v18  ;;  %955 = vmatmul.f32.vlgmr.msra.gmra.mxu3 %v6172_v22  ;;  %v739_v32 = vsel %vm737_vm9, %v736_v39, %v738_v45  ;;  %v9556_v39 = vld [vmem:[#allocation17_spill] sm:$0xff]  ;;  %v9559_v3 = vld [vmem:[#allocation14_spill] sm:$0xff]  ;;  %vm792_vm3 = vcmp.ge.f32.partialorder %v6136_v20, 0.0 }
 0x158   :  { %9550 = vst [vmem:[#allocation10_spill] sm:$0xff] %v6167_v48  ;;  %1042 = vmatpush.msra.mxu0 %v5880_v4  ;;  %1062 = vmatpush.msra.mxu1 %v5882_v5  ;;  %v754_v61 = vsel %vm752_vm10, %v751_v60, %v753_v50  ;;  %v6203_v2 = vadd.f32 %v5168_v59, %v744_v56  ;;  %v9558_v60 = vld [vmem:[#allocation19_spill] sm:$0xff]  ;;  %v9560_v45 = vld [vmem:[#allocation13_spill] sm:$0xff]  ;;  %v9561_v50 = vld [vmem:[#allocation16_spill] sm:$0xff] }
 0x159   :  { %9552 = vst [vmem:[#allocation9_spill] sm:$0xff] %v6172_v22  ;;  %1083 = vmatpush.msra.mxu2 %v5880_v4  ;;  %v748_v49 = vmul.f32 0.2, %v746_v35  ;;  %1103 = vmatpush.msra.mxu3 %v5882_v5  ;;  %vm747_vm11 = vcmp.ge.f32.partialorder %v746_v35, 0.0  ;;  %v6205_v19 = vadd.f32 %v5167_v17, %v739_v32  ;;  %v6209_v13 = vadd.f32 %v5170_v27, %v754_v61  ;;  %v9562_v59 = vld [vmem:[#allocation15_spill] sm:$0xff]  ;;  %v6922_v22 = vld [vmem:[#allocation2 + $0x4b0] sm:$0xff] }
 0x15a   :  { %1043 = vmatpush.msra.mxu0 %v5892_v15  ;;  %1063 = vmatpush.msra.mxu1 %v5894_v16  ;;  %9553 = vst [vmem:[#allocation12_spill] sm:$0xff] %v6203_v2  ;;  %v6213_v7 = vadd.f32 %v6133_v25, %v6121_v18  ;;  %v775_v24 = vmul.f32 %v6117_v55, %v9556_v39  ;;  %v6920_v48 = vld [vmem:[#allocation2 + $0x598] sm:$0xff] }
 0x15b   :  { %1084 = vmatpush.msra.mxu2 %v5892_v15  ;;  %1104 = vmatpush.msra.mxu3 %v5894_v16  ;;  %v749_v10 = vsel %vm747_vm11, %v746_v35, %v748_v49  ;;  %9554 = vst [vmem:[#allocation11_spill] sm:$0xff] %v6205_v19  ;;  %v785_v43 = vmul.f32 %v6117_v55, %v9558_v60 }
 0x15c   :  { %1044 = vmatpush.msra.mxu0 %v5900_v26  ;;  %1064 = vmatpush.msra.mxu1 %v5902_v28  ;;  %9555 = vst [vmem:[#allocation20_spill] sm:$0xff] %v6209_v13  ;;  %v6219_v54 = vadd.f32 %v5169_v1, %v749_v10  ;;  %v6226_v44 = vadd.f32 %v775_v24, %v6121_v18  ;;  %v5172_v24 = vld [vmem:[%s9374_s1 + $0x12] sm:$0x3]  ;;  %vm782_vm1 = vcmp.ge.f32.partialorder %v6213_v7, 0.0 }
 0x15d   :  { %1085 = vmatpush.msra.mxu2 %v5900_v26  ;;  %1105 = vmatpush.msra.mxu3 %v5902_v28  ;;  %v6231_v25 = vadd.f32 %v785_v43, %v6121_v18  ;;  %v760_v36 = vmul.f32 %v6117_v55, %v9559_v3  ;;  %v755_v35 = vmul.f32 %v6117_v55, %v9560_v45  ;;  %v5171_v43 = vld [vmem:[%s9374_s1 + $0x10] sm:$0x3] }
 0x15e   :  { %1045 = vmatpush.msra.mxu0 %v5910_v38  ;;  %1065 = vmatpush.msra.mxu1 %v5912_v41  ;;  %9557 = vst [vmem:[#allocation17_spill] sm:$0xff] %v6219_v54  ;;  %v770_v49 = vmul.f32 %v6117_v55, %v9561_v50  ;;  %v765_v32 = vmul.f32 %v6117_v55, %v9562_v59  ;;  %vm777_vm2 = vcmp.ge.f32.partialorder %v6226_v44, 0.0 }
 0x15f   :  { %1086 = vmatpush.msra.mxu2 %v5910_v38  ;;  %1106 = vmatpush.msra.mxu3 %v5912_v41  ;;  %v761_v56 = vadd.f32 %v760_v36, %v6121_v18  ;;  %v756_v17 = vadd.f32 %v755_v35, %v6121_v18  ;;  %v5174_v36 = vld [vmem:[%s9374_s1 + $0x16] sm:$0x3]  ;;  %v5173_v35 = vld [vmem:[%s9374_s1 + $0x14] sm:$0x3]  ;;  %vm787_vm4 = vcmp.ge.f32.partialorder %v6231_v25, 0.0  ;;  %9586 = vst [vmem:[#allocation39_spill] sm:$0xff] %v6920_v48 }
 0x160   :  { %976 = vmatmul.f32.vlgmr.msrb.gmra.mxu0 %v6203_v2  ;;  %996 = vmatmul.f32.vlgmr.msrb.gmra.mxu1 %v6205_v19  ;;  %v771_v61 = vadd.f32 %v770_v49, %v6121_v18  ;;  %v766_v27 = vadd.f32 %v765_v32, %v6121_v18  ;;  %9587 = vst [vmem:[#allocation40_spill] sm:$0xff] %v6922_v22 }
 0x161   :  { %1017 = vmatmul.f32.vlgmr.msrb.gmra.mxu2 %v6209_v13  ;;  %1037 = vmatmul.f32.vlgmr.msrb.gmra.mxu3 %v6219_v54  ;;  %v763_v55 = vmul.f32 0.2, %v761_v56  ;;  %vm762_vm12 = vcmp.ge.f32.partialorder %v761_v56, 0.0  ;;  %v758_v10 = vmul.f32 0.2, %v756_v17  ;;  %vm757_vm13 = vcmp.ge.f32.partialorder %v756_v17, 0.0 }
 0x162   :  { %1046 = vmatpush.msra.mxu0 %v5920_v52  ;;  %1066 = vmatpush.msra.mxu1 %v5922_v53  ;;  %v773_v1 = vmul.f32 0.2, %v771_v61  ;;  %vm772_vm14 = vcmp.ge.f32.partialorder %v771_v61, 0.0  ;;  %v768_v18 = vmul.f32 0.2, %v766_v27  ;;  %vm767_vm15 = vcmp.ge.f32.partialorder %v766_v27, 0.0 }
 0x163   :  { %1087 = vmatpush.msra.mxu2 %v5920_v52  ;;  %1107 = vmatpush.msra.mxu3 %v5922_v53  ;;  %v764_v39 = vsel %vm762_vm12, %v761_v56, %v763_v55  ;;  %v759_v60 = vsel %vm757_vm13, %v756_v17, %v758_v10  ;;  %v6587_v13 = vld [vmem:[#allocation2 + $0x1a0] sm:$0xff]  ;;  %9588 = vst [vmem:[#allocation41_spill] sm:$0xff] %v6924_v0 }
 0x164   :  { %1047 = vmatpush.msra.mxu0 %v5929_v62  ;;  %1067 = vmatpush.msra.mxu1 %v5931_v63  ;;  %v774_v3 = vsel %vm772_vm14, %v771_v61, %v773_v1  ;;  %v769_v45 = vsel %vm767_vm15, %v766_v27, %v768_v18  ;;  %v6301_v50 = vadd.f32 %v5172_v24, %v764_v39 }
 0x165   :  { %1088 = vmatpush.msra.mxu2 %v5929_v62  ;;  %1108 = vmatpush.msra.mxu3 %v5931_v63  ;;  %v6305_v49 = vadd.f32 %v5171_v43, %v759_v60  ;;  %v6307_v56 = vadd.f32 %v5174_v36, %v774_v3  ;;  %v6311_v59 = vadd.f32 %v5173_v35, %v769_v45 }
 0x166   :  { %1048 = vmatpush.msra.mxu0 %v5937_v8  ;;  %1068 = vmatpush.msra.mxu1 %v5939_v9  ;;  %9563 = vst [vmem:[#allocation19_spill] sm:$0xff] %v6301_v50 }
 0x167   :  { %1089 = vmatpush.msra.mxu2 %v5937_v8  ;;  %1109 = vmatpush.msra.mxu3 %v5939_v9  ;;  %9564 = vst [vmem:[#allocation14_spill] sm:$0xff] %v6305_v49 }
 0x168   :  { %1049 = vmatpush.msra.mxu0 %v5945_v21  ;;  %1069 = vmatpush.msra.mxu1 %v5947_v23  ;;  %9565 = vst [vmem:[#allocation13_spill] sm:$0xff] %v6307_v56 }
 0x169   :  { %1090 = vmatpush.msra.mxu2 %v5945_v21  ;;  %1110 = vmatpush.msra.mxu3 %v5947_v23  ;;  %9566 = vst [vmem:[#allocation16_spill] sm:$0xff] %v6311_v59 }
 0x16a   :  { %1050 = vmatpush.msra.mxu0 %v5953_v30  ;;  %1070 = vmatpush.msra.mxu1 %v5955_v31 }
 0x16b   :  { %1091 = vmatpush.msra.mxu2 %v5953_v30  ;;  %1111 = vmatpush.msra.mxu3 %v5955_v31 }
 0x16c   :  { %1051 = vmatpush.msra.mxu0 %v5961_v46  ;;  %1071 = vmatpush.msra.mxu1 %v5963_v47 }
 0x16d   :  { %1092 = vmatpush.msra.mxu2 %v5961_v46  ;;  %1112 = vmatpush.msra.mxu3 %v5963_v47 }
 0x16e   :  { %1052 = vmatpush.msra.mxu0 %v5969_v57  ;;  %1072 = vmatpush.msra.mxu1 %v5971_v58 }
 0x16f   :  { %1093 = vmatpush.msra.mxu2 %v5969_v57  ;;  %1113 = vmatpush.msra.mxu3 %v5971_v58 }
 0x170   :  { %1053 = vmatpush.msra.mxu0 %v5985_v11  ;;  %1073 = vmatpush.msra.mxu1 %v5987_v12 }
 0x171   :  { %1094 = vmatpush.msra.mxu2 %v5985_v11  ;;  %1114 = vmatpush.msra.mxu3 %v5987_v12 }
 0x172   :  { %1054 = vmatpush.msra.mxu0 %v6001_v29  ;;  %1074 = vmatpush.msra.mxu1 %v6003_v33 }
 0x173   :  { %1095 = vmatpush.msra.mxu2 %v6001_v29  ;;  %1115 = vmatpush.msra.mxu3 %v6003_v33 }
 0x174   :  { %1055 = vmatpush.msra.mxu0 %v6011_v40  ;;  %1075 = vmatpush.msra.mxu1 %v6013_v34 }
 0x175   :  { %1096 = vmatpush.msra.mxu2 %v6011_v40  ;;  %1116 = vmatpush.msra.mxu3 %v6013_v34 }
 0x176   :  { %1056 = vmatpush.msra.mxu0 %v6020_v14  ;;  %1076 = vmatpush.msra.mxu1 %v6022_v51 }
 0x177   :  { %1097 = vmatpush.msra.mxu2 %v6020_v14  ;;  %1117 = vmatpush.msra.mxu3 %v6022_v51 }
 0x178   :  { %1057 = vmatpush.msra.mxu0 %v6034_v6  ;;  %1077 = vmatpush.msra.mxu1 %v6036_v42 }
 0x179   :  { %1098 = vmatpush.msra.mxu2 %v6034_v6  ;;  %1118 = vmatpush.msra.mxu3 %v6036_v42 }
 0x17a   :  { %1058 = vmatmul.f32.vlgmr.msra.gmra.mxu0 %v6301_v50  ;;  %1078 = vmatmul.f32.vlgmr.msra.gmra.mxu1 %v6305_v49 }
 0x17b   :  { %1099 = vmatmul.f32.vlgmr.msra.gmra.mxu2 %v6307_v56  ;;  %1119 = vmatmul.f32.vlgmr.msra.gmra.mxu3 %v6311_v59  ;;  %v6548_v59 = vld [vmem:[#allocation2 + $0x238] sm:$0xff] }
 0x17c   :  { %1124 = vmatpush.msrb.mxu0 %v5880_v4  ;;  %1144 = vmatpush.msrb.mxu1 %v5882_v5 }
 0x17d   :  { %1165 = vmatpush.msrb.mxu2 %v5880_v4  ;;  %1185 = vmatpush.msrb.mxu3 %v5882_v5  ;;  %v783_v4 = vmul.f32 0.2, %v6213_v7  ;;  %v793_v5 = vmul.f32 0.2, %v6136_v20 }
 0x17e   :  { %1125 = vmatpush.msrb.mxu0 %v5892_v15  ;;  %1145 = vmatpush.msrb.mxu1 %v5894_v16 }
 0x17f   :  { %1166 = vmatpush.msrb.mxu2 %v5892_v15  ;;  %1186 = vmatpush.msrb.mxu3 %v5894_v16  ;;  %v778_v15 = vmul.f32 0.2, %v6226_v44  ;;  %v788_v16 = vmul.f32 0.2, %v6231_v25 }
 0x180   :  { %1126 = vmatpush.msrb.mxu0 %v5900_v26  ;;  %1146 = vmatpush.msrb.mxu1 %v5902_v28 }
 0x181   :  { %1167 = vmatpush.msrb.mxu2 %v5900_v26  ;;  %1187 = vmatpush.msrb.mxu3 %v5902_v28  ;;  %v784_v26 = vsel %vm782_vm1, %v6213_v7, %v783_v4  ;;  %v5176_v28 = vld [vmem:[%s9374_s1 + $0x1a] sm:$0x3] }
 0x182   :  { %1127 = vmatpush.msrb.mxu0 %v5910_v38  ;;  %1147 = vmatpush.msrb.mxu1 %v5912_v41 }
 0x183   :  { %1168 = vmatpush.msrb.mxu2 %v5910_v38  ;;  %1188 = vmatpush.msrb.mxu3 %v5912_v41  ;;  %v779_v38 = vsel %vm777_vm2, %v6226_v44, %v778_v15  ;;  %v5175_v41 = vld [vmem:[%s9374_s1 + $0x18] sm:$0x3] }
 0x184   :  { %1128 = vmatpush.msrb.mxu0 %v5920_v52  ;;  %1148 = vmatpush.msrb.mxu1 %v5922_v53 }
 0x185   :  { %1169 = vmatpush.msrb.mxu2 %v5920_v52  ;;  %1189 = vmatpush.msrb.mxu3 %v5922_v53  ;;  %v794_v52 = vsel %vm792_vm3, %v6136_v20, %v793_v5  ;;  %v789_v53 = vsel %vm787_vm4, %v6231_v25, %v788_v16 }
 0x186   :  { %1129 = vmatpush.msrb.mxu0 %v5929_v62  ;;  %1149 = vmatpush.msrb.mxu1 %v5931_v63 }
 0x187   :  { %1170 = vmatpush.msrb.mxu2 %v5929_v62  ;;  %1190 = vmatpush.msrb.mxu3 %v5931_v63  ;;  %v5177_v62 = vld [vmem:[%s9374_s1 + $0x1c] sm:$0x3]  ;;  %v6401_v63 = vadd.f32 %v5176_v28, %v784_v26 }
 0x188   :  { %1130 = vmatpush.msrb.mxu0 %v5937_v8  ;;  %1150 = vmatpush.msrb.mxu1 %v5939_v9 }
 0x189   :  { %1171 = vmatpush.msrb.mxu2 %v5937_v8  ;;  %1191 = vmatpush.msrb.mxu3 %v5939_v9  ;;  %9567 = vst [vmem:[#allocation15_spill] sm:$0xff] %v6401_v63  ;;  %v6405_v8 = vadd.f32 %v5175_v41, %v779_v38 }
 0x18a   :  { %1131 = vmatpush.msrb.mxu0 %v5945_v21  ;;  %1151 = vmatpush.msrb.mxu1 %v5947_v23 }
 0x18b   :  { %1172 = vmatpush.msrb.mxu2 %v5945_v21  ;;  %1192 = vmatpush.msrb.mxu3 %v5947_v23  ;;  %9568 = vst [vmem:[#allocation21_spill] sm:$0xff] %v6405_v8 }
 0x18c   :  { %1132 = vmatpush.msrb.mxu0 %v5953_v30  ;;  %1152 = vmatpush.msrb.mxu1 %v5955_v31 }
 0x18d   :  { %1173 = vmatpush.msrb.mxu2 %v5953_v30  ;;  %1193 = vmatpush.msrb.mxu3 %v5955_v31 }
 0x18e   :  { %1133 = vmatpush.msrb.mxu0 %v5961_v46  ;;  %1153 = vmatpush.msrb.mxu1 %v5963_v47 }
 0x18f   :  { %1174 = vmatpush.msrb.mxu2 %v5961_v46  ;;  %1194 = vmatpush.msrb.mxu3 %v5963_v47 }
 0x190   :  { %1134 = vmatpush.msrb.mxu0 %v5969_v57  ;;  %1154 = vmatpush.msrb.mxu1 %v5971_v58 }
 0x191   :  { %1175 = vmatpush.msrb.mxu2 %v5969_v57  ;;  %1195 = vmatpush.msrb.mxu3 %v5971_v58  ;;  %v6416_v58 = vld [vmem:[#allocation4 + $0x3] ss:$0 sm:$0xff] }
 0x192   :  { %1135 = vmatpush.msrb.mxu0 %v5985_v11  ;;  %1155 = vmatpush.msrb.mxu1 %v5987_v12 }
 0x193   :  { %1176 = vmatpush.msrb.mxu2 %v5985_v11  ;;  %1196 = vmatpush.msrb.mxu3 %v5987_v12 }
 0x194   :  { %1136 = vmatpush.msrb.mxu0 %v6001_v29  ;;  %1156 = vmatpush.msrb.mxu1 %v6003_v33 }
 0x195   :  { %1177 = vmatpush.msrb.mxu2 %v6001_v29  ;;  %1197 = vmatpush.msrb.mxu3 %v6003_v33 }
 0x196   :  { %1137 = vmatpush.msrb.mxu0 %v6011_v40  ;;  %1157 = vmatpush.msrb.mxu1 %v6013_v34 }
 0x197   :  { %1178 = vmatpush.msrb.mxu2 %v6011_v40  ;;  %1198 = vmatpush.msrb.mxu3 %v6013_v34  ;;  %v5178_v40 = vld [vmem:[%s9374_s1 + $0x1e] sm:$0x3] }
 0x198   :  { %1138 = vmatpush.msrb.mxu0 %v6020_v14  ;;  %1158 = vmatpush.msrb.mxu1 %v6022_v51  ;;  %v6407_v9 = vadd.f32 %v5178_v40, %v794_v52 }
 0x199   :  { %1179 = vmatpush.msrb.mxu2 %v6020_v14  ;;  %1199 = vmatpush.msrb.mxu3 %v6022_v51  ;;  %v6411_v14 = vadd.f32 %v5177_v62, %v789_v53 }
 0x19a   :  { %1139 = vmatpush.msrb.mxu0 %v6034_v6  ;;  %1159 = vmatpush.msrb.mxu1 %v6036_v42  ;;  %9569 = vst [vmem:[#allocation22_spill] sm:$0xff] %v6407_v9 }
 0x19b   :  { %1180 = vmatpush.msrb.mxu2 %v6034_v6  ;;  %1200 = vmatpush.msrb.mxu3 %v6036_v42  ;;  %9570 = vst [vmem:[#allocation23_spill] sm:$0xff] %v6411_v14 }
 0x19c   :  { %1140 = vmatmul.f32.vlgmr.msrb.gmra.mxu0 %v6401_v63  ;;  %1160 = vmatmul.f32.vlgmr.msrb.gmra.mxu1 %v6405_v8 }
 0x19d   :  { %1181 = vmatmul.f32.vlgmr.msrb.gmra.mxu2 %v6407_v9  ;;  %1201 = vmatmul.f32.vlgmr.msrb.gmra.mxu3 %v6411_v14  ;;  %v6522_v9 = vld [vmem:[#allocation2 + $0x248] sm:$0xff] }
 0x1d3   :  { %v894_v21 = vpop.f32.mrf.mxu0  ;;  %v914_v23 = vpop.f32.mrf.mxu1 }
 0x1d4   :  { %v915_v57 = vadd.f32 %v914_v23, %v894_v21 }
 0x1d6   :  { %v6422_v33 = vadd.f32 %v6416_v58, %v915_v57 }
 0x1d8   :  { %v1213_v44 = vmul.f32 %v6422_v33, %v6422_v33  ;;  %v1206_v32 = vsel %vm421_vm0, %v6422_v33, 0.0 }
 0x1d9   :  { %v1207_v18 = vrot.slane %v1206_v32, 4 }
 0x1da   :  { %v936_v30 = vpop.f32.mrf.mxu2  ;;  %v956_v6 = vpop.f32.mrf.mxu3  ;;  %v1214_v39 = vsel %vm421_vm0, %v1213_v44, 0.0  ;;  %v6473_v44 = vld [vmem:[#allocation2 + $0x270] sm:$0xff] }
 0x1db   :  { %v957_v31 = vadd.f32 %v956_v6, %v936_v30  ;;  %v1215_v35 = vrot.slane %v1214_v39, 4  ;;  %v1208_v5 = vadd.f32 %v1207_v18, %v1206_v32  ;;  %v6475_v32 = vld [vmem:[#allocation2 + $0x1f0] sm:$0xff] }
 0x1dd   :  { %v977_v46 = vpop.f32.mrf.mxu0  ;;  %v997_v47 = vpop.f32.mrf.mxu1  ;;  %v6419_v11 = vadd.f32 %v6416_v58, %v957_v31  ;;  %v1216_v40 = vadd.f32 %v1215_v35, %v1214_v39  ;;  %v1209_v21 = vrot.slane %v1208_v5, 2 }
 0x1de   :  { %v998_v34 = vadd.f32 %v997_v47, %v977_v46 }
 0x1df   :  { %v1229_v51 = vmul.f32 %v6419_v11, %v6419_v11  ;;  %v1221_v17 = vsel %vm421_vm0, %v6419_v11, 0.0 }
 0x1e0   :  { %v6429_v25 = vadd.f32 %v6416_v58, %v998_v34  ;;  %v1222_v24 = vrot.slane %v1221_v17, 4 }
 0x1e1   :  { %v1230_v27 = vsel %vm421_vm0, %v1229_v51, 0.0  ;;  %v1217_v51 = vrot.slane %v1216_v40, 2 }
 0x1e2   :  { %v1246_v60 = vmul.f32 %v6429_v25, %v6429_v25  ;;  %v1231_v43 = vrot.slane %v1230_v27, 4  ;;  %v1238_v3 = vsel %vm421_vm0, %v6429_v25, 0.0  ;;  %v1223_v15 = vadd.f32 %v1222_v24, %v1221_v17  ;;  %v6482_v24 = vld [vmem:[#allocation2 + $0x268] sm:$0xff] }
 0x1e3   :  { %v1239_v16 = vrot.slane %v1238_v3, 4  ;;  %v1210_v17 = vadd.f32 %v1209_v21, %v1208_v5  ;;  %v6490_v5 = vld [vmem:[#allocation2 + $0x260] sm:$0xff] }
 0x1e4   :  { %v1018_v12 = vpop.f32.mrf.mxu2  ;;  %v1038_v29 = vpop.f32.mrf.mxu3  ;;  %v1247_v26 = vsel %vm421_vm0, %v1246_v60, 0.0  ;;  %v1232_v28 = vadd.f32 %v1231_v43, %v1230_v27  ;;  %v1224_v23 = vrot.slane %v1223_v15, 2  ;;  %v6484_v60 = vld [vmem:[#allocation2 + $0x1e8] sm:$0xff] }
 0x1e5   :  { %v1039_v7 = vadd.f32 %v1038_v29, %v1018_v12  ;;  %v1248_v53 = vrot.slane %v1247_v26, 4  ;;  %v1240_v46 = vadd.f32 %v1239_v16, %v1238_v3  ;;  %v6463_v12 = vld [vmem:[#allocation2 + $0x278] sm:$0xff] }
 0x1e6   :  { %v1233_v31 = vrot.slane %v1232_v28, 2  ;;  %v6465_v29 = vld [vmem:[#allocation2 + $0x1f8] sm:$0xff]  ;;  %1438 = vmatpush.msra.mxu0 %v6463_v12  ;;  %1480 = vmatpush.msra.mxu2 %v6463_v12 }
 0x1e7   :  { %v6437_v1 = vadd.f32 %v6416_v58, %v1039_v7  ;;  %1458 = vmatpush.msra.mxu1 %v6465_v29  ;;  %1500 = vmatpush.msra.mxu3 %v6465_v29  ;;  %v1241_v18 = vrot.slane %v1240_v46, 2 }
 0x1e8   :  { %1439 = vmatpush.msra.mxu0 %v6473_v44  ;;  %1481 = vmatpush.msra.mxu2 %v6473_v44 }
 0x1e9   :  { %v1263_v4 = vmul.f32 %v6437_v1, %v6437_v1  ;;  %v1255_v38 = vsel %vm421_vm0, %v6437_v1, 0.0  ;;  %1459 = vmatpush.msra.mxu1 %v6475_v32  ;;  %1501 = vmatpush.msra.mxu3 %v6475_v32 }
 0x1ea   :  { %v1256_v30 = vrot.slane %v1255_v38, 4  ;;  %1440 = vmatpush.msra.mxu0 %v6482_v24  ;;  %1482 = vmatpush.msra.mxu2 %v6482_v24 }
 0x1eb   :  { %v1264_v62 = vsel %vm421_vm0, %v1263_v4, 0.0  ;;  %1460 = vmatpush.msra.mxu1 %v6484_v60  ;;  %1502 = vmatpush.msra.mxu3 %v6484_v60 }
 0x1ec   :  { %v1265_v34 = vrot.slane %v1264_v62, 4  ;;  %1441 = vmatpush.msra.mxu0 %v6490_v5  ;;  %1483 = vmatpush.msra.mxu2 %v6490_v5 }
 0x1ee   :  { %v1266_v43 = vadd.f32 %v1265_v34, %v1264_v62  ;;  %v6496_v62 = vadd.f32 %v1241_v18, %v1240_v46 }
 0x1f7   :  { %v1059_v42 = vpop.f32.mrf.mxu0  ;;  %v1079_v20 = vpop.f32.mrf.mxu1 }
 0x1f8   :  { %v1080_v61 = vadd.f32 %v1079_v20, %v1059_v42  ;;  %v1249_v42 = vadd.f32 %v1248_v53, %v1247_v26 }
 0x1fa   :  { %v6445_v36 = vadd.f32 %v6416_v58, %v1080_v61  ;;  %v1257_v61 = vadd.f32 %v1256_v30, %v1255_v38  ;;  %v1250_v35 = vrot.slane %v1249_v42, 2  ;;  %v6502_v30 = vld [vmem:[#allocation2 + $0x1d8] sm:$0xff] }
 0x1fc   :  { %v1280_v41 = vmul.f32 %v6445_v36, %v6445_v36  ;;  %v1272_v6 = vsel %vm421_vm0, %v6445_v36, 0.0  ;;  %v1258_v16 = vrot.slane %v1257_v61, 2  ;;  %v6506_v34 = vadd.f32 %v1250_v35, %v1249_v42 }
 0x1fd   :  { %v1273_v20 = vrot.slane %v1272_v6, 4 }
 0x1fe   :  { %v1100_v55 = vpop.f32.mrf.mxu2  ;;  %v1120_v10 = vpop.f32.mrf.mxu3  ;;  %v1281_v47 = vsel %vm421_vm0, %v1280_v41, 0.0  ;;  %v1211_v41 = vrot.slane %v1210_v17, 1 }
 0x1ff   :  { %v1121_v45 = vadd.f32 %v1120_v10, %v1100_v55  ;;  %v1282_v27 = vrot.slane %v1281_v47, 4  ;;  %v1225_v55 = vadd.f32 %v1224_v23, %v1223_v15  ;;  %v1234_v10 = vadd.f32 %v1233_v31, %v1232_v28  ;;  %v6492_v15 = vld [vmem:[#allocation2 + $0x1e0] sm:$0xff]  ;;  %v6500_v23 = vld [vmem:[#allocation2 + $0x258] sm:$0xff] }
 0x200   :  { %v1274_v4 = vadd.f32 %v1273_v20, %v1272_v6  ;;  %1461 = vmatpush.msra.mxu1 %v6492_v15  ;;  %1503 = vmatpush.msra.mxu3 %v6492_v15  ;;  %v1267_v6 = vrot.slane %v1266_v43, 2  ;;  %v6512_v20 = vld [vmem:[#allocation2 + $0x1d0] sm:$0xff]  ;;  %v1212_v42 = vadd.f32 %v1211_v41, %v1210_v17 }
 0x201   :  { %v6455_v52 = vadd.f32 %v6416_v58, %v1121_v45  ;;  %v1218_v45 = vadd.f32 %v1217_v51, %v1216_v40  ;;  %v1283_v26 = vadd.f32 %v1282_v27, %v1281_v47  ;;  %v1226_v40 = vrot.slane %v1225_v55, 1  ;;  %1442 = vmatpush.msra.mxu0 %v6500_v23  ;;  %1484 = vmatpush.msra.mxu2 %v6500_v23  ;;  %v6510_v51 = vld [vmem:[#allocation2 + $0x250] sm:$0xff] }
 0x202   :  { %v1235_v53 = vrot.slane %v1234_v10, 1  ;;  %1462 = vmatpush.msra.mxu1 %v6502_v30  ;;  %v1275_v46 = vrot.slane %v1274_v4, 2  ;;  %1504 = vmatpush.msra.mxu3 %v6502_v30  ;;  %v1259_v27 = vadd.f32 %v1258_v16, %v1257_v61  ;;  %v6524_v61 = vld [vmem:[#allocation2 + $0x1c8] sm:$0xff] }
 0x203   :  { %v1297_v57 = vmul.f32 %v6455_v52, %v6455_v52  ;;  %v1289_v7 = vsel %vm421_vm0, %v6455_v52, 0.0  ;;  %v1284_v18 = vrot.slane %v1283_v26, 2  ;;  %1443 = vmatpush.msra.mxu0 %v6510_v51  ;;  %v1227_v35 = vadd.f32 %v1226_v40, %v1225_v55  ;;  %1485 = vmatpush.msra.mxu2 %v6510_v51 }
 0x204   :  { %v1290_v3 = vrot.slane %v1289_v7, 4  ;;  %1463 = vmatpush.msra.mxu1 %v6512_v20  ;;  %1505 = vmatpush.msra.mxu3 %v6512_v20  ;;  %v1276_v41 = vadd.f32 %v1275_v46, %v1274_v4 }
 0x205   :  { %v1298_v39 = vsel %vm421_vm0, %v1297_v57, 0.0  ;;  %v1219_v57 = vrot.slane %v1218_v45, 1  ;;  %1444 = vmatpush.msra.mxu0 %v6522_v9  ;;  %1486 = vmatpush.msra.mxu2 %v6522_v9  ;;  %v6541_v14 = vadd.f32 %v1284_v18, %v1283_v26  ;;  %v1228_v4 = vadd.f32 %v1227_v35, %v1212_v42  ;;  %v6550_v26 = vld [vmem:[#allocation2 + $0x1b8] sm:$0xff] }
 0x206   :  { %v1299_v28 = vrot.slane %v1298_v39, 4  ;;  %v1291_v31 = vadd.f32 %v1290_v3, %v1289_v7  ;;  %1464 = vmatpush.msra.mxu1 %v6524_v61  ;;  %1506 = vmatpush.msra.mxu3 %v6524_v61  ;;  %v1277_v42 = vrot.slane %v1276_v41, 1 }
 0x207   :  { %v1220_v55 = vadd.f32 %v1219_v57, %v1218_v45 }
 0x208   :  { %v1300_v7 = vadd.f32 %v1299_v28, %v1298_v39  ;;  %v6526_v39 = vadd.f32 %v1267_v6, %v1266_v43  ;;  %v1292_v16 = vrot.slane %v1291_v31, 2  ;;  %v6537_v43 = vld [vmem:[#allocation2 + $0x240] sm:$0xff] }
 0x209   :  { %v6539_v6 = vld [vmem:[#allocation2 + $0x1c0] sm:$0xff]  ;;  %1445 = vmatpush.msra.mxu0 %v6537_v43  ;;  %1487 = vmatpush.msra.mxu2 %v6537_v43 }
 0x20a   :  { %v1301_v63 = vrot.slane %v1300_v7, 2  ;;  %1465 = vmatpush.msra.mxu1 %v6539_v6  ;;  %1507 = vmatpush.msra.mxu3 %v6539_v6  ;;  %v1269_v50 = vrot.slane %v6526_v39, 1  ;;  %v1293_v49 = vadd.f32 %v1292_v16, %v1291_v31  ;;  %v1286_v16 = vrot.slane %v6541_v14, 1 }
 0x20b   :  { %1446 = vmatpush.msra.mxu0 %v6548_v59  ;;  %1488 = vmatpush.msra.mxu2 %v6548_v59 }
 0x20c   :  { %1466 = vmatpush.msra.mxu1 %v6550_v26  ;;  %1508 = vmatpush.msra.mxu3 %v6550_v26 }
 0x219   :  { %v1141_v38 = vpop.f32.mrf.mxu0  ;;  %v1161_v21 = vpop.f32.mrf.mxu1 }
 0x21a   :  { %v1162_v47 = vadd.f32 %v1161_v21, %v1141_v38  ;;  %v1236_v38 = vadd.f32 %v1235_v53, %v1234_v10  ;;  %v1243_v21 = vrot.slane %v6496_v62, 1  ;;  %v1252_v10 = vrot.slane %v6506_v34, 1 }
 0x21c   :  { %v6515_v3 = vadd.f32 %v6416_v58, %v1162_v47  ;;  %v1260_v47 = vrot.slane %v1259_v27, 1  ;;  %v1237_v18 = vadd.f32 %v1236_v38, %v1220_v55  ;;  %v6561_v38 = vld [vmem:[#allocation2 + $0x230] sm:$0xff]  ;;  %v1253_v31 = vadd.f32 %v1252_v10, %v6506_v34  ;;  %v6575_v34 = vld [vmem:[#allocation2 + $0x228] sm:$0xff] }
 0x21d   :  { %v1302_v55 = vadd.f32 %v1301_v63, %v1300_v7  ;;  %1447 = vmatpush.msra.mxu0 %v6561_v38  ;;  %1489 = vmatpush.msra.mxu2 %v6561_v38  ;;  %v1294_v7 = vrot.slane %v1293_v49, 1 }
 0x21e   :  { %v1306_v28 = vsel %vm421_vm0, %v6515_v3, 0.0  ;;  %v1314_v17 = vmul.f32 %v6515_v3, %v6515_v3 }
 0x21f   :  { %v1307_v40 = vrot.slane %v1306_v28, 4  ;;  %1448 = vmatpush.msra.mxu0 %v6575_v34  ;;  %1490 = vmatpush.msra.mxu2 %v6575_v34 }
 0x220   :  { %v1182_v53 = vpop.f32.mrf.mxu2  ;;  %v1315_v8 = vsel %vm421_vm0, %v1314_v17, 0.0  ;;  %v1202_v45 = vpop.f32.mrf.mxu3  ;;  %v1244_v17 = vadd.f32 %v1243_v21, %v6496_v62  ;;  %v6563_v62 = vld [vmem:[#allocation2 + $0x1b0] sm:$0xff]  ;;  %v1261_v21 = vadd.f32 %v1260_v47, %v1259_v27  ;;  %v6577_v27 = vld [vmem:[#allocation2 + $0x1a8] sm:$0xff]  ;;  %v1270_v47 = vadd.f32 %v1269_v50, %v6526_v39 }
 0x221   :  { %v1308_v57 = vadd.f32 %v1307_v40, %v1306_v28  ;;  %v1316_v46 = vrot.slane %v1315_v8, 4  ;;  %v1203_v56 = vadd.f32 %v1202_v45, %v1182_v53  ;;  %1467 = vmatpush.msra.mxu1 %v6563_v62  ;;  %1509 = vmatpush.msra.mxu3 %v6563_v62  ;;  %v1278_v45 = vadd.f32 %v1277_v42, %v1276_v41  ;;  %v6594_v42 = vld [vmem:[#allocation2 + $0x218] sm:$0xff] }
 0x222   :  { %v1245_v63 = vadd.f32 %v1244_v17, %v1228_v4  ;;  %v1303_v4 = vrot.slane %v1302_v55, 1  ;;  %v1254_v50 = vadd.f32 %v1253_v31, %v1237_v18  ;;  %v1287_v41 = vadd.f32 %v1286_v16, %v6541_v14  ;;  %v6602_v14 = vld [vmem:[#allocation2 + $0x210] sm:$0xff] }
 0x223   :  { %v1309_v35 = vrot.slane %v1308_v57, 2  ;;  %v1317_v28 = vadd.f32 %v1316_v46, %v1315_v8  ;;  %v6557_v40 = vadd.f32 %v6416_v58, %v1203_v56  ;;  %1468 = vmatpush.msra.mxu1 %v6577_v27  ;;  %1510 = vmatpush.msra.mxu3 %v6577_v27 }
 0x224   :  { %v1262_v39 = vadd.f32 %v1261_v21, %v1245_v63  ;;  %v1271_v18 = vadd.f32 %v1270_v47, %v1254_v50  ;;  %v6604_v21 = vld [vmem:[#allocation2 + $0x190] sm:$0xff]  ;;  %v1304_v16 = vadd.f32 %v1303_v4, %v1302_v55  ;;  %v6610_v47 = vld [vmem:[#allocation2 + $0x208] sm:$0xff] }
 0x225   :  { %v1310_v56 = vadd.f32 %v1309_v35, %v1308_v57  ;;  %v1318_v8 = vrot.slane %v1317_v28, 2  ;;  %v1323_v58 = vsel %vm421_vm0, %v6557_v40, 0.0  ;;  %v1331_v53 = vmul.f32 %v6557_v40, %v6557_v40  ;;  %v6585_v35 = vld [vmem:[#allocation2 + $0x220] sm:$0xff]  ;;  %1469 = vmatpush.msra.mxu1 %v6587_v13  ;;  %1511 = vmatpush.msra.mxu3 %v6587_v13 }
 0x226   :  { %v1324_v10 = vrot.slane %v1323_v58, 4  ;;  %1449 = vmatpush.msra.mxu0 %v6585_v35  ;;  %1491 = vmatpush.msra.mxu2 %v6585_v35  ;;  %v1279_v31 = vadd.f32 %v1278_v45, %v1262_v39  ;;  %v6612_v45 = vld [vmem:[#allocation2 + $0x188] sm:$0xff] }
 0x227   :  { %v1319_v57 = vadd.f32 %v1318_v8, %v1317_v28  ;;  %v1332_v46 = vsel %vm421_vm0, %v1331_v53, 0.0  ;;  %v1311_v17 = vrot.slane %v1310_v56, 1  ;;  %v6596_v28 = vld [vmem:[#allocation2 + $0x198] sm:$0xff]  ;;  %v1295_v8 = vadd.f32 %v1294_v7, %v1293_v49 }
 0x228   :  { %v1325_v54 = vadd.f32 %v1324_v10, %v1323_v58  ;;  %v1333_v2 = vrot.slane %v1332_v46, 4  ;;  %1450 = vmatpush.msra.mxu0 %v6594_v42  ;;  %1470 = vmatpush.msra.mxu1 %v6596_v28 }
 0x229   :  { %v1320_v53 = vrot.slane %v1319_v57, 1  ;;  %1492 = vmatpush.msra.mxu2 %v6594_v42  ;;  %1512 = vmatpush.msra.mxu3 %v6596_v28  ;;  %v1312_v63 = vadd.f32 %v1311_v17, %v1310_v56  ;;  %v6620_v56 = vld [vmem:[#allocation2 + $0x180] sm:$0xff] }
 0x22a   :  { %v1326_v58 = vrot.slane %v1325_v54, 2  ;;  %v1334_v10 = vadd.f32 %v1333_v2, %v1332_v46  ;;  %1451 = vmatpush.msra.mxu0 %v6602_v14  ;;  %1471 = vmatpush.msra.mxu1 %v6604_v21  ;;  %v1288_v2 = vadd.f32 %v1287_v41, %v1271_v18  ;;  %v1296_v46 = vadd.f32 %v1295_v8, %v1279_v31 }
 0x22b   :  { %1493 = vmatpush.msra.mxu2 %v6602_v14  ;;  %1513 = vmatpush.msra.mxu3 %v6604_v21  ;;  %v1321_v50 = vadd.f32 %v1320_v53, %v1319_v57 }
 0x22c   :  { %v1327_v49 = vadd.f32 %v1326_v58, %v1325_v54  ;;  %v1335_v7 = vrot.slane %v1334_v10, 2  ;;  %1452 = vmatpush.msra.mxu0 %v6610_v47  ;;  %1472 = vmatpush.msra.mxu1 %v6612_v45  ;;  %v6618_v54 = vld [vmem:[#allocation2 + $0x200] sm:$0xff]  ;;  %v1305_v4 = vadd.f32 %v1304_v16, %v1288_v2  ;;  %v1313_v17 = vadd.f32 %v1312_v63, %v1296_v46 }
 0x22d   :  { %1494 = vmatpush.msra.mxu2 %v6610_v47  ;;  %1514 = vmatpush.msra.mxu3 %v6612_v45 }
 0x22e   :  { %v1328_v39 = vrot.slane %v1327_v49, 1  ;;  %v1336_v55 = vadd.f32 %v1335_v7, %v1334_v10  ;;  %1453 = vmatpush.msra.mxu0 %v6618_v54  ;;  %1473 = vmatpush.msra.mxu1 %v6620_v56  ;;  %v1322_v57 = vadd.f32 %v1321_v50, %v1305_v4 }
 0x22f   :  { %1495 = vmatpush.msra.mxu2 %v6618_v54  ;;  %1515 = vmatpush.msra.mxu3 %v6620_v56 }
 0x230   :  { %v1329_v41 = vadd.f32 %v1328_v39, %v1327_v49  ;;  %v1337_v58 = vrot.slane %v1336_v55, 1  ;;  %1521 = vmatpush.msrb.mxu0 %v6463_v12  ;;  %1541 = vmatpush.msrb.mxu1 %v6465_v29 }
 0x231   :  { %1562 = vmatpush.msrb.mxu2 %v6463_v12  ;;  %1582 = vmatpush.msrb.mxu3 %v6465_v29 }
 0x232   :  { %v1330_v8 = vadd.f32 %v1329_v41, %v1313_v17  ;;  %v1338_v53 = vadd.f32 %v1337_v58, %v1336_v55  ;;  %1522 = vmatpush.msrb.mxu0 %v6473_v44  ;;  %1542 = vmatpush.msrb.mxu1 %v6475_v32  ;;  %v6727_v17 = vld [vmem:[#allocation4 + $0x6] ss:$0 sm:$0xff]  ;;  %v1745_v41 = vld [vmem:[#allocation2 + $0x378] sm:$0xff] }
 0x233   :  { %1563 = vmatpush.msrb.mxu2 %v6473_v44  ;;  %1583 = vmatpush.msrb.mxu3 %v6475_v32  ;;  %v1728_v58 = vld [vmem:[#allocation2 + $0x2f8] sm:$0xff] }
 0x234   :  { %v1339_v10 = vadd.f32 %v1338_v53, %v1322_v57  ;;  %v6630_v18 = vmul.f32 0.0625, %v1330_v8  ;;  %1523 = vmatpush.msrb.mxu0 %v6482_v24  ;;  %1543 = vmatpush.msrb.mxu1 %v6484_v60 }
 0x235   :  { %1564 = vmatpush.msrb.mxu2 %v6482_v24  ;;  %1584 = vmatpush.msrb.mxu3 %v6484_v60 }
 0x236   :  { %v1341_v31 = vmul.f32 0.0625, %v1339_v10  ;;  %v1342_v16 = vmul.f32 %v6630_v18, %v6630_v18  ;;  %1524 = vmatpush.msrb.mxu0 %v6490_v5  ;;  %1544 = vmatpush.msrb.mxu1 %v6492_v15  ;;  %v1744_v10 = vld [vmem:[#allocation2 + $0x370] sm:$0xff] }
 0x237   :  { %1565 = vmatpush.msrb.mxu2 %v6490_v5  ;;  %1585 = vmatpush.msrb.mxu3 %v6492_v15  ;;  %v1356_v15 = vld [vmem:[#allocation4 + $0x4] sm:$0x1] }
 0x238   :  { %v1343_v12 = vsub.f32 %v1341_v31, %v1342_v16  ;;  %1525 = vmatpush.msrb.mxu0 %v6500_v23  ;;  %1545 = vmatpush.msrb.mxu1 %v6502_v30  ;;  %v1743_v16 = vld [vmem:[#allocation2 + $0x368] sm:$0xff] }
 0x239   :  { %1566 = vmatpush.msrb.mxu2 %v6500_v23  ;;  %1586 = vmatpush.msrb.mxu3 %v6502_v30  ;;  %v1358_v30 = vld [vmem:[#allocation4 + $0x5] sm:$0x1] }
 0x23a   :  { %v1344_v29 = vmax.f32 %v1343_v12, 0.0  ;;  %1526 = vmatpush.msrb.mxu0 %v6510_v51  ;;  %1546 = vmatpush.msrb.mxu1 %v6512_v20  ;;  %v1726_v12 = vld [vmem:[#allocation2 + $0x2e8] sm:$0xff] }
 0x23b   :  { %1567 = vmatpush.msrb.mxu2 %v6510_v51  ;;  %1587 = vmatpush.msrb.mxu3 %v6512_v20 }
 0x23c   :  { %v1345_v44 = vadd.f32 1e-05, %v1344_v29  ;;  %1527 = vmatpush.msrb.mxu0 %v6522_v9  ;;  %1547 = vmatpush.msrb.mxu1 %v6524_v61 }
 0x23d   :  { %1568 = vmatpush.msrb.mxu2 %v6522_v9  ;;  %1588 = vmatpush.msrb.mxu3 %v6524_v61 }
 0x23e   :  { %5211 = vrsqrt.f32 %v1345_v44  ;;  %1528 = vmatpush.msrb.mxu0 %v6537_v43  ;;  %1548 = vmatpush.msrb.mxu1 %v6539_v6  ;;  %vm1352_vm6 = vweird.f32 %v1345_v44 }
 0x23f   :  { %1569 = vmatpush.msrb.mxu2 %v6537_v43  ;;  %1589 = vmatpush.msrb.mxu3 %v6539_v6 }
 0x240   :  { %1529 = vmatpush.msrb.mxu0 %v6548_v59  ;;  %1549 = vmatpush.msrb.mxu1 %v6550_v26 }
 0x241   :  { %1570 = vmatpush.msrb.mxu2 %v6548_v59  ;;  %1590 = vmatpush.msrb.mxu3 %v6550_v26 }
 0x242   :  { %1530 = vmatpush.msrb.mxu0 %v6561_v38  ;;  %1550 = vmatpush.msrb.mxu1 %v6563_v62 }
 0x243   :  { %1571 = vmatpush.msrb.mxu2 %v6561_v38  ;;  %1591 = vmatpush.msrb.mxu3 %v6563_v62 }
 0x244   :  { %v5212_v32 = vpop.eup %5211  ;;  %1531 = vmatpush.msrb.mxu0 %v6575_v34  ;;  %1551 = vmatpush.msrb.mxu1 %v6577_v27 }
 0x245   :  { %v1347_v9 = vmul.f32 %v5212_v32, %v1345_v44  ;;  %1572 = vmatpush.msrb.mxu2 %v6575_v34  ;;  %1592 = vmatpush.msrb.mxu3 %v6577_v27  ;;  %vm1353_vm5 = vweird.f32 %v5212_v32 }
 0x246   :  { %1532 = vmatpush.msrb.mxu0 %v6585_v35  ;;  %1552 = vmatpush.msrb.mxu1 %v6587_v13  ;;  %vm1354_vm7 = vmor %vm1352_vm6, %vm1353_vm5 }
 0x247   :  { %v1348_v24 = vmul.f32 %v5212_v32, %v1347_v9  ;;  %1573 = vmatpush.msrb.mxu2 %v6585_v35  ;;  %1593 = vmatpush.msrb.mxu3 %v6587_v13  ;;  %v1725_v9 = vld [vmem:[#allocation2 + $0x2e0] sm:$0xff] }
 0x248   :  { %1533 = vmatpush.msrb.mxu0 %v6594_v42  ;;  %1553 = vmatpush.msrb.mxu1 %v6596_v28 }
 0x249   :  { %v1349_v59 = vmul.f32 0.5, %v1348_v24  ;;  %1574 = vmatpush.msrb.mxu2 %v6594_v42  ;;  %1594 = vmatpush.msrb.mxu3 %v6596_v28 }
 0x24a   :  { %1534 = vmatpush.msrb.mxu0 %v6602_v14  ;;  %1554 = vmatpush.msrb.mxu1 %v6604_v21 }
 0x24b   :  { %v1350_v60 = vsub.f32 1.5, %v1349_v59  ;;  %1575 = vmatpush.msrb.mxu2 %v6602_v14  ;;  %1595 = vmatpush.msrb.mxu3 %v6604_v21 }
 0x24c   :  { %1535 = vmatpush.msrb.mxu0 %v6610_v47  ;;  %1555 = vmatpush.msrb.mxu1 %v6612_v45 }
 0x24d   :  { %v1351_v5 = vmul.f32 %v5212_v32, %v1350_v60  ;;  %1576 = vmatpush.msrb.mxu2 %v6610_v47  ;;  %1596 = vmatpush.msrb.mxu3 %v6612_v45 }
 0x24e   :  { %1536 = vmatpush.msrb.mxu0 %v6618_v54  ;;  %1556 = vmatpush.msrb.mxu1 %v6620_v56 }
 0x24f   :  { %v1355_v13 = vsel %vm1354_vm7, %v5212_v32, %v1351_v5  ;;  %1577 = vmatpush.msrb.mxu2 %v6618_v54  ;;  %1597 = vmatpush.msrb.mxu3 %v6620_v56  ;;  %v1742_v32 = vld [vmem:[#allocation2 + $0x360] sm:$0xff] }
 0x250   :  { %v1357_v23 = vmul.f32 %v1356_v15, %v1355_v13  ;;  %v1741_v15 = vld [vmem:[#allocation2 + $0x358] sm:$0xff] }
 0x251   :  { %v1724_v13 = vld [vmem:[#allocation2 + $0x2d8] sm:$0xff] }
 0x252   :  { %v1359_v51 = vmul.f32 %v1357_v23, %v6630_v18  ;;  %v1361_v20 = vperm.slane %v1357_v23, 0  ;;  %v1727_v18 = vld [vmem:[#allocation2 + $0x2f0] sm:$0xff] }
 0x254   :  { %v1360_v61 = vsub.f32 %v1358_v30, %v1359_v51  ;;  %v1368_v43 = vmul.f32 %v1361_v20, %v6419_v11  ;;  %v1362_v26 = vmul.f32 %v1361_v20, %v6422_v33  ;;  %v1378_v38 = vmul.f32 %v1361_v20, %v6437_v1 }
 0x255   :  { %v1373_v62 = vmul.f32 %v1361_v20, %v6429_v25  ;;  %v1388_v34 = vmul.f32 %v1361_v20, %v6455_v52  ;;  %v1398_v14 = vmul.f32 %v1361_v20, %v6557_v40  ;;  %v1383_v63 = vmul.f32 %v1361_v20, %v6445_v36 }
 0x256   :  { %v1363_v6 = vperm.slane %v1360_v61, 0  ;;  %v1393_v11 = vmul.f32 %v1361_v20, %v6515_v3 }
 0x258   :  { %v1369_v27 = vadd.f32 %v1368_v43, %v1363_v6  ;;  %v1364_v35 = vadd.f32 %v1363_v6, %v1362_v26  ;;  %v1379_v42 = vadd.f32 %v1378_v38, %v1363_v6  ;;  %v1374_v28 = vadd.f32 %v1373_v62, %v1363_v6  ;;  %v1723_v26 = vld [vmem:[#allocation2 + $0x2d0] sm:$0xff] }
 0x259   :  { %v1389_v21 = vadd.f32 %v1388_v34, %v1363_v6  ;;  %v1384_v2 = vadd.f32 %v1383_v63, %v1363_v6  ;;  %v1399_v47 = vadd.f32 %v1398_v14, %v1363_v6  ;;  %v1394_v40 = vadd.f32 %v1393_v11, %v1363_v6  ;;  %v1740_v6 = vld [vmem:[#allocation2 + $0x350] sm:$0xff] }
 0x25a   :  { %vm1370_vm8 = vcmp.ge.f32.partialorder %v1369_v27, 0.0  ;;  %v1371_v49 = vmul.f32 0.2, %v1369_v27  ;;  %vm1365_vm9 = vcmp.ge.f32.partialorder %v1364_v35, 0.0  ;;  %v1366_v33 = vmul.f32 0.2, %v1364_v35 }
 0x25b   :  { %vm1380_vm10 = vcmp.ge.f32.partialorder %v1379_v42, 0.0  ;;  %v1381_v1 = vmul.f32 0.2, %v1379_v42  ;;  %vm1375_vm11 = vcmp.ge.f32.partialorder %v1374_v28, 0.0  ;;  %v1376_v25 = vmul.f32 0.2, %v1374_v28 }
 0x25c   :  { %v6703_v52 = vsel %vm1370_vm8, %v1369_v27, %v1371_v49  ;;  %v6705_v7 = vsel %vm1365_vm9, %v1364_v35, %v1366_v33  ;;  %v1391_v45 = vmul.f32 0.2, %v1389_v21  ;;  %v1386_v46 = vmul.f32 0.2, %v1384_v2  ;;  %v1739_v27 = vld [vmem:[#allocation2 + $0x348] sm:$0xff]  ;;  %v1738_v49 = vld [vmem:[#allocation2 + $0x340] sm:$0xff] }
 0x25d   :  { %9571 = vst [vmem:[#allocation24_spill] sm:$0xff] %v6703_v52  ;;  %1454 = vmatmul.f32.vlgmr.msra.gmra.mxu0 %v6703_v52  ;;  %1474 = vmatmul.f32.vlgmr.msra.gmra.mxu1 %v6705_v7  ;;  %v6709_v36 = vsel %vm1380_vm10, %v1379_v42, %v1381_v1  ;;  %v6711_v3 = vsel %vm1375_vm11, %v1374_v28, %v1376_v25  ;;  %vm1390_vm12 = vcmp.ge.f32.partialorder %v1389_v21, 0.0  ;;  %vm1385_vm13 = vcmp.ge.f32.partialorder %v1384_v2, 0.0  ;;  %v1722_v35 = vld [vmem:[#allocation2 + $0x2c8] sm:$0xff]  ;;  %v1721_v33 = vld [vmem:[#allocation2 + $0x2c0] sm:$0xff]  ;;  %v6937_v52 = vld [vmem:[#allocation2 + $0x610] sm:$0xff] }
 0x25e   :  { %9572 = vst [vmem:[#allocation25_spill] sm:$0xff] %v6705_v7  ;;  %1496 = vmatmul.f32.vlgmr.msra.gmra.mxu2 %v6709_v36  ;;  %1516 = vmatmul.f32.vlgmr.msra.gmra.mxu3 %v6711_v3  ;;  %v1401_v50 = vmul.f32 0.2, %v1399_v47  ;;  %v1396_v39 = vmul.f32 0.2, %v1394_v40  ;;  %vm1400_vm14 = vcmp.ge.f32.partialorder %v1399_v47, 0.0  ;;  %v6715_v55 = vsel %vm1390_vm12, %v1389_v21, %v1391_v45 }
 0x25f   :  { %9573 = vst [vmem:[#allocation26_spill] sm:$0xff] %v6709_v36  ;;  %vm1395_vm15 = vcmp.ge.f32.partialorder %v1394_v40, 0.0  ;;  %v6717_v54 = vsel %vm1385_vm13, %v1384_v2, %v1386_v46  ;;  %1747 = vmatpush.msra.mxu0 %v1745_v41  ;;  %1767 = vmatpush.msra.mxu1 %v1728_v58  ;;  %v6933_v36 = vld [vmem:[#allocation2 + $0x590] sm:$0xff] }
 0x260   :  { %9574 = vst [vmem:[#allocation27_spill] sm:$0xff] %v6711_v3  ;;  %v6721_v56 = vsel %vm1400_vm14, %v1399_v47, %v1401_v50  ;;  %v6723_v4 = vsel %vm1395_vm15, %v1394_v40, %v1396_v39  ;;  %1789 = vmatpush.msra.mxu2 %v1745_v41  ;;  %1809 = vmatpush.msra.mxu3 %v1728_v58  ;;  %v1737_v39 = vld [vmem:[#allocation2 + $0x338] sm:$0xff]  ;;  %v6935_v3 = vld [vmem:[#allocation2 + $0x4a8] sm:$0xff] }
 0x261   :  { %9575 = vst [vmem:[#allocation28_spill] sm:$0xff] %v6715_v55  ;;  %1748 = vmatpush.msra.mxu0 %v1744_v10  ;;  %1768 = vmatpush.msra.mxu1 %v1727_v18  ;;  %v1720_v41 = vld [vmem:[#allocation2 + $0x2b8] sm:$0xff] }
 0x262   :  { %9576 = vst [vmem:[#allocation29_spill] sm:$0xff] %v6717_v54  ;;  %1790 = vmatpush.msra.mxu2 %v1744_v10  ;;  %1810 = vmatpush.msra.mxu3 %v1727_v18 }
 0x263   :  { %9577 = vst [vmem:[#allocation30_spill] sm:$0xff] %v6721_v56  ;;  %1749 = vmatpush.msra.mxu0 %v1743_v16  ;;  %1769 = vmatpush.msra.mxu1 %v1726_v12 }
 0x264   :  { %9578 = vst [vmem:[#allocation31_spill] sm:$0xff] %v6723_v4  ;;  %1791 = vmatpush.msra.mxu2 %v1743_v16  ;;  %1811 = vmatpush.msra.mxu3 %v1726_v12  ;;  %v1736_v16 = vld [vmem:[#allocation2 + $0x330] sm:$0xff] }
 0x265   :  { %1537 = vmatmul.f32.vlgmr.msrb.gmra.mxu0 %v6715_v55  ;;  %1557 = vmatmul.f32.vlgmr.msrb.gmra.mxu1 %v6717_v54  ;;  %v1719_v12 = vld [vmem:[#allocation2 + $0x2b0] sm:$0xff]  ;;  %9590 = vst [vmem:[#allocation43_spill] sm:$0xff] %v6933_v36 }
 0x266   :  { %1578 = vmatmul.f32.vlgmr.msrb.gmra.mxu2 %v6721_v56  ;;  %1598 = vmatmul.f32.vlgmr.msrb.gmra.mxu3 %v6723_v4  ;;  %v6928_v56 = vld [vmem:[#allocation2 + $0x530] sm:$0xff]  ;;  %9591 = vst [vmem:[#allocation44_spill] sm:$0xff] %v6935_v3 }
 0x267   :  { %1750 = vmatpush.msra.mxu0 %v1742_v32  ;;  %1770 = vmatpush.msra.mxu1 %v1725_v9  ;;  %9589 = vst [vmem:[#allocation42_spill] sm:$0xff] %v6928_v56 }
 0x268   :  { %1792 = vmatpush.msra.mxu2 %v1742_v32  ;;  %1812 = vmatpush.msra.mxu3 %v1725_v9  ;;  %9592 = vst [vmem:[#allocation45_spill] sm:$0xff] %v6937_v52 }
 0x269   :  { %1751 = vmatpush.msra.mxu0 %v1741_v15  ;;  %1771 = vmatpush.msra.mxu1 %v1724_v13 }
 0x26a   :  { %1793 = vmatpush.msra.mxu2 %v1741_v15  ;;  %1813 = vmatpush.msra.mxu3 %v1724_v13 }
 0x26b   :  { %1752 = vmatpush.msra.mxu0 %v1740_v6  ;;  %1772 = vmatpush.msra.mxu1 %v1723_v26 }
 0x26c   :  { %1794 = vmatpush.msra.mxu2 %v1740_v6  ;;  %1814 = vmatpush.msra.mxu3 %v1723_v26 }
 0x26d   :  { %1753 = vmatpush.msra.mxu0 %v1739_v27  ;;  %1773 = vmatpush.msra.mxu1 %v1722_v35 }
 0x26e   :  { %1795 = vmatpush.msra.mxu2 %v1739_v27  ;;  %1815 = vmatpush.msra.mxu3 %v1722_v35 }
 0x26f   :  { %1754 = vmatpush.msra.mxu0 %v1738_v49  ;;  %1774 = vmatpush.msra.mxu1 %v1721_v33 }
 0x270   :  { %1796 = vmatpush.msra.mxu2 %v1738_v49  ;;  %1816 = vmatpush.msra.mxu3 %v1721_v33  ;;  %v1732_v33 = vld [vmem:[#allocation2 + $0x310] sm:$0xff] }
 0x271   :  { %1755 = vmatpush.msra.mxu0 %v1737_v39  ;;  %1775 = vmatpush.msra.mxu1 %v1720_v41 }
 0x272   :  { %1797 = vmatpush.msra.mxu2 %v1737_v39  ;;  %1817 = vmatpush.msra.mxu3 %v1720_v41 }
 0x273   :  { %1756 = vmatpush.msra.mxu0 %v1736_v16  ;;  %1776 = vmatpush.msra.mxu1 %v1719_v12 }
 0x274   :  { %1798 = vmatpush.msra.mxu2 %v1736_v16  ;;  %1818 = vmatpush.msra.mxu3 %v1719_v12 }
 0x2da   :  { %v1455_v57 = vpop.f32.mrf.mxu0  ;;  %v1475_v8 = vpop.f32.mrf.mxu1 }
 0x2db   :  { %v1476_v53 = vadd.f32 %v1475_v8, %v1455_v57 }
 0x2dd   :  { %v6730_v31 = vadd.f32 %v6727_v17, %v1476_v53 }
 0x2df   :  { %v1603_v29 = vsel %vm421_vm0, %v6730_v31, 0.0  ;;  %v1610_v44 = vmul.f32 %v6730_v31, %v6730_v31 }
 0x2e0   :  { %v1604_v24 = vrot.slane %v1603_v29, 4 }
 0x2e1   :  { %v1611_v59 = vsel %vm421_vm0, %v1610_v44, 0.0  ;;  %v1497_v60 = vpop.f32.mrf.mxu2  ;;  %v1517_v5 = vpop.f32.mrf.mxu3 }
 0x2e2   :  { %v1605_v23 = vadd.f32 %v1604_v24, %v1603_v29  ;;  %v1612_v30 = vrot.slane %v1611_v59, 4  ;;  %v1518_v51 = vadd.f32 %v1517_v5, %v1497_v60  ;;  %v1538_v20 = vpop.f32.mrf.mxu0  ;;  %v1558_v61 = vpop.f32.mrf.mxu1  ;;  %v1735_v60 = vld [vmem:[#allocation2 + $0x328] sm:$0xff] }
 0x2e3   :  { %v1559_v43 = vadd.f32 %v1558_v61, %v1538_v20  ;;  %v1718_v5 = vld [vmem:[#allocation2 + $0x2a8] sm:$0xff]  ;;  %1757 = vmatpush.msra.mxu0 %v1735_v60  ;;  %1799 = vmatpush.msra.mxu2 %v1735_v60  ;;  %v1911_v60 = vld [vmem:[#allocation2 + $0x3f0] sm:$0xff] }
 0x2e4   :  { %v6738_v38 = vadd.f32 %v6727_v17, %v1518_v51  ;;  %v1613_v62 = vadd.f32 %v1612_v30, %v1611_v59  ;;  %v1606_v42 = vrot.slane %v1605_v23, 2  ;;  %1777 = vmatpush.msra.mxu1 %v1718_v5  ;;  %1819 = vmatpush.msra.mxu3 %v1718_v5  ;;  %v1993_v5 = vld [vmem:[#allocation2 + $0x470] sm:$0xff] }
 0x2e5   :  { %v6741_v34 = vadd.f32 %v6727_v17, %v1559_v43  ;;  %v1734_v43 = vld [vmem:[#allocation2 + $0x320] sm:$0xff] }
 0x2e6   :  { %v1618_v28 = vsel %vm421_vm0, %v6738_v38, 0.0  ;;  %v1626_v14 = vmul.f32 %v6738_v38, %v6738_v38  ;;  %v1614_v2 = vrot.slane %v1613_v62, 2  ;;  %v1607_v58 = vadd.f32 %v1606_v42, %v1605_v23  ;;  %1758 = vmatpush.msra.mxu0 %v1734_v43  ;;  %v1733_v42 = vld [vmem:[#allocation2 + $0x318] sm:$0xff]  ;;  %1800 = vmatpush.msra.mxu2 %v1734_v43  ;;  %v1909_v43 = vld [vmem:[#allocation2 + $0x3e0] sm:$0xff] }
 0x2e7   :  { %v1619_v21 = vrot.slane %v1618_v28, 4  ;;  %v1635_v63 = vsel %vm421_vm0, %v6741_v34, 0.0  ;;  %v1643_v11 = vmul.f32 %v6741_v34, %v6741_v34 }
 0x2e8   :  { %v1627_v1 = vsel %vm421_vm0, %v1626_v14, 0.0  ;;  %v1636_v25 = vrot.slane %v1635_v63, 4  ;;  %v1615_v32 = vadd.f32 %v1614_v2, %v1613_v62  ;;  %v1608_v15 = vrot.slane %v1607_v58, 1  ;;  %1759 = vmatpush.msra.mxu0 %v1733_v42  ;;  %1801 = vmatpush.msra.mxu2 %v1733_v42  ;;  %v1989_v42 = vld [vmem:[#allocation2 + $0x450] sm:$0xff] }
 0x2e9   :  { %v1620_v47 = vadd.f32 %v1619_v21, %v1618_v28  ;;  %v1628_v40 = vrot.slane %v1627_v1, 4  ;;  %v1644_v45 = vsel %vm421_vm0, %v1643_v11, 0.0  ;;  %v1579_v46 = vpop.f32.mrf.mxu2  ;;  %v1599_v50 = vpop.f32.mrf.mxu3  ;;  %v1716_v28 = vld [vmem:[#allocation2 + $0x298] sm:$0xff] }
 0x2ea   :  { %v1637_v57 = vadd.f32 %v1636_v25, %v1635_v63  ;;  %v1645_v8 = vrot.slane %v1644_v45, 4  ;;  %v1600_v18 = vadd.f32 %v1599_v50, %v1579_v46  ;;  %v1616_v62 = vrot.slane %v1615_v32, 1  ;;  %1760 = vmatpush.msra.mxu0 %v1732_v33  ;;  %v1731_v46 = vld [vmem:[#allocation2 + $0x308] sm:$0xff]  ;;  %1802 = vmatpush.msra.mxu2 %v1732_v33 }
 0x2eb   :  { %v1621_v53 = vrot.slane %v1620_v47, 2  ;;  %v1629_v10 = vadd.f32 %v1628_v40, %v1627_v1  ;;  %v1609_v49 = vadd.f32 %v1608_v15, %v1607_v58  ;;  %v1715_v1 = vld [vmem:[#allocation2 + $0x290] sm:$0xff]  ;;  %v1714_v50 = vld [vmem:[#allocation2 + $0x288] sm:$0xff]  ;;  %v1730_v58 = vld [vmem:[#allocation2 + $0x300] sm:$0xff] }
 0x2ec   :  { %v1638_v29 = vrot.slane %v1637_v57, 2  ;;  %v1646_v44 = vadd.f32 %v1645_v8, %v1644_v45  ;;  %v6754_v59 = vadd.f32 %v6727_v17, %v1600_v18  ;;  %v1717_v17 = vld [vmem:[#allocation2 + $0x2a0] sm:$0xff]  ;;  %v1617_v45 = vadd.f32 %v1616_v62, %v1615_v32  ;;  %1761 = vmatpush.msra.mxu0 %v1731_v46  ;;  %1803 = vmatpush.msra.mxu2 %v1731_v46 }
 0x2ed   :  { %v1622_v9 = vadd.f32 %v1621_v53, %v1620_v47  ;;  %v1630_v24 = vrot.slane %v1629_v10, 2  ;;  %1778 = vmatpush.msra.mxu1 %v1717_v17  ;;  %1820 = vmatpush.msra.mxu3 %v1717_v17  ;;  %v1713_v53 = vld [vmem:[#allocation2 + $0x280] sm:$0xff] }
 0x2ee   :  { %v1639_v13 = vadd.f32 %v1638_v29, %v1637_v57  ;;  %v1647_v23 = vrot.slane %v1646_v44, 2  ;;  %v1652_v20 = vsel %vm421_vm0, %v6754_v59, 0.0  ;;  %v1660_v61 = vmul.f32 %v6754_v59, %v6754_v59  ;;  %1762 = vmatpush.msra.mxu0 %v1730_v58  ;;  %v1912_v29 = vld [vmem:[#allocation2 + $0x3f8] sm:$0xff]  ;;  %1804 = vmatpush.msra.mxu2 %v1730_v58  ;;  %v1991_v17 = vld [vmem:[#allocation2 + $0x460] sm:$0xff]  ;;  %v1899_v58 = vld [vmem:[#allocation2 + $0x390] sm:$0xff] }
 0x2ef   :  { %v1623_v30 = vrot.slane %v1622_v9, 1  ;;  %v1631_v51 = vadd.f32 %v1630_v24, %v1629_v10  ;;  %v1653_v26 = vrot.slane %v1652_v20, 4  ;;  %1779 = vmatpush.msra.mxu1 %v1716_v28  ;;  %1821 = vmatpush.msra.mxu3 %v1716_v28  ;;  %v1901_v46 = vld [vmem:[#allocation2 + $0x3a0] sm:$0xff] }
 0x2f0   :  { %v1648_v6 = vadd.f32 %v1647_v23, %v1646_v44  ;;  %v1661_v35 = vsel %vm421_vm0, %v1660_v61, 0.0  ;;  %v1640_v21 = vrot.slane %v1639_v13, 1  ;;  %v1994_v44 = vld [vmem:[#allocation2 + $0x478] sm:$0xff]  ;;  %1915 = vmatpush.msrb.mxu0 %v1912_v29  ;;  %v1897_v29 = vld [vmem:[#allocation2 + $0x380] sm:$0xff] }
 0x2f1   :  { %v1632_v27 = vrot.slane %v1631_v51, 1  ;;  %v1624_v14 = vadd.f32 %v1623_v30, %v1622_v9  ;;  %v1654_v63 = vadd.f32 %v1653_v26, %v1652_v20  ;;  %v1662_v11 = vrot.slane %v1661_v35, 4  ;;  %1780 = vmatpush.msra.mxu1 %v1715_v1  ;;  %1822 = vmatpush.msra.mxu3 %v1715_v1  ;;  %v1910_v30 = vld [vmem:[#allocation2 + $0x3e8] sm:$0xff]  ;;  %v1990_v26 = vld [vmem:[#allocation2 + $0x458] sm:$0xff] }
 0x2f2   :  { %v1649_v2 = vrot.slane %v1648_v6, 1  ;;  %v1641_v41 = vadd.f32 %v1640_v21, %v1639_v13  ;;  %1916 = vmatpush.msrb.mxu0 %v1911_v60  ;;  %v1988_v21 = vld [vmem:[#allocation2 + $0x448] sm:$0xff]  ;;  %v1904_v1 = vld [vmem:[#allocation2 + $0x3b8] sm:$0xff] }
 0x2f3   :  { %v1633_v25 = vadd.f32 %v1632_v27, %v1631_v51  ;;  %v1655_v47 = vrot.slane %v1654_v63, 2  ;;  %v1663_v40 = vadd.f32 %v1662_v11, %v1661_v35  ;;  %v1625_v39 = vadd.f32 %v1624_v14, %v1609_v49  ;;  %1781 = vmatpush.msra.mxu1 %v1714_v50  ;;  %1823 = vmatpush.msra.mxu3 %v1714_v50  ;;  %v1992_v51 = vld [vmem:[#allocation2 + $0x468] sm:$0xff]  ;;  %v1907_v35 = vld [vmem:[#allocation2 + $0x3d0] sm:$0xff]  ;;  %v1905_v11 = vld [vmem:[#allocation2 + $0x3c0] sm:$0xff] }
 0x2f4   :  { %v1650_v18 = vadd.f32 %v1649_v2, %v1648_v6  ;;  %1917 = vmatpush.msrb.mxu0 %v1910_v30  ;;  %v1908_v6 = vld [vmem:[#allocation2 + $0x3d8] sm:$0xff]  ;;  %v1906_v14 = vld [vmem:[#allocation2 + $0x3c8] sm:$0xff]  ;;  %v1987_v49 = vld [vmem:[#allocation2 + $0x440] sm:$0xff] }
 0x2f5   :  { %v1656_v57 = vadd.f32 %v1655_v47, %v1654_v63  ;;  %v1664_v8 = vrot.slane %v1663_v40, 2  ;;  %v1634_v10 = vadd.f32 %v1633_v25, %v1617_v45  ;;  %1782 = vmatpush.msra.mxu1 %v1713_v53  ;;  %v1642_v32 = vadd.f32 %v1641_v41, %v1625_v39  ;;  %1824 = vmatpush.msra.mxu3 %v1713_v53  ;;  %v1986_v25 = vld [vmem:[#allocation2 + $0x438] sm:$0xff]  ;;  %v1903_v2 = vld [vmem:[#allocation2 + $0x3b0] sm:$0xff]  ;;  %v1984_v45 = vld [vmem:[#allocation2 + $0x428] sm:$0xff] }
 0x2f6   :  { %1918 = vmatpush.msrb.mxu0 %v1909_v43  ;;  %v1985_v47 = vld [vmem:[#allocation2 + $0x430] sm:$0xff]  ;;  %v1983_v50 = vld [vmem:[#allocation2 + $0x420] sm:$0xff]  ;;  %v1900_v41 = vld [vmem:[#allocation2 + $0x398] sm:$0xff] }
 0x2f7   :  { %v1657_v16 = vrot.slane %v1656_v57, 1  ;;  %v1665_v12 = vadd.f32 %v1664_v8, %v1663_v40  ;;  %1997 = vmatpush.msrb.mxu1 %v1994_v44  ;;  %v1651_v15 = vadd.f32 %v1650_v18, %v1634_v10  ;;  %v1902_v40 = vld [vmem:[#allocation2 + $0x3a8] sm:$0xff]  ;;  %v1981_v53 = vld [vmem:[#allocation2 + $0x410] sm:$0xff]  ;;  %v1979_v44 = vld [vmem:[#allocation2 + $0x400] sm:$0xff] }
 0x2f8   :  { %1919 = vmatpush.msrb.mxu0 %v1908_v6  ;;  %v1898_v18 = vld [vmem:[#allocation2 + $0x388] sm:$0xff] }
 0x2f9   :  { %v1658_v9 = vadd.f32 %v1657_v16, %v1656_v57  ;;  %v1666_v24 = vrot.slane %v1665_v12, 1  ;;  %1998 = vmatpush.msrb.mxu1 %v1993_v5  ;;  %v1982_v57 = vld [vmem:[#allocation2 + $0x418] sm:$0xff]  ;;  %v1980_v16 = vld [vmem:[#allocation2 + $0x408] sm:$0xff] }
 0x2fa   :  { %1920 = vmatpush.msrb.mxu0 %v1907_v35 }
 0x2fb   :  { %v1659_v13 = vadd.f32 %v1658_v9, %v1642_v32  ;;  %v1667_v23 = vadd.f32 %v1666_v24, %v1665_v12  ;;  %1999 = vmatpush.msrb.mxu1 %v1992_v51  ;;  %v1685_v24 = vld [vmem:[#allocation4 + $0x7] sm:$0x1] }
 0x2fc   :  { %1921 = vmatpush.msrb.mxu0 %v1906_v14 }
 0x2fd   :  { %v1668_v20 = vadd.f32 %v1667_v23, %v1651_v15  ;;  %v6761_v61 = vmul.f32 0.125, %v1659_v13  ;;  %2000 = vmatpush.msrb.mxu1 %v1991_v17  ;;  %v1687_v15 = vld [vmem:[#allocation4 + $0x8] sm:$0x1] }
 0x2fe   :  { %1922 = vmatpush.msrb.mxu0 %v1905_v11  ;;  %v6787_v11 = vld [vmem:[#allocation2 + $0x678] sm:$0xff] }
 0x2ff   :  { %v1670_v62 = vmul.f32 0.125, %v1668_v20  ;;  %v1671_v27 = vmul.f32 %v6761_v61, %v6761_v61  ;;  %2001 = vmatpush.msrb.mxu1 %v1990_v26 }
 0x300   :  { %1923 = vmatpush.msrb.mxu0 %v1904_v1  ;;  %v6797_v1 = vld [vmem:[#allocation2 + $0x5e8] sm:$0xff] }
 0x301   :  { %v1672_v28 = vsub.f32 %v1670_v62, %v1671_v27  ;;  %2002 = vmatpush.msrb.mxu1 %v1989_v42 }
 0x302   :  { %1924 = vmatpush.msrb.mxu0 %v1903_v2  ;;  %v6803_v2 = vld [vmem:[#allocation2 + $0x5e0] sm:$0xff] }
 0x303   :  { %v1673_v63 = vmax.f32 %v1672_v28, 0.0  ;;  %2003 = vmatpush.msrb.mxu1 %v1988_v21 }
 0x304   :  { %1925 = vmatpush.msrb.mxu0 %v1902_v40  ;;  %v6807_v40 = vld [vmem:[#allocation2 + $0x660] sm:$0xff] }
 0x305   :  { %v1674_v33 = vadd.f32 1e-05, %v1673_v63  ;;  %2004 = vmatpush.msrb.mxu1 %v1987_v49  ;;  %v6785_v63 = vld [vmem:[#allocation2 + $0x5f8] sm:$0xff]  ;;  %v6791_v49 = vld [vmem:[#allocation2 + $0x5f0] sm:$0xff] }
 0x306   :  { %1926 = vmatpush.msrb.mxu0 %v1901_v46  ;;  %2129 = vmatpush.msrb.mxu2 %v6785_v63  ;;  %v6815_v46 = vld [vmem:[#allocation2 + $0x5d8] sm:$0xff] }
 0x307   :  { %5213 = vrsqrt.f32 %v1674_v33  ;;  %2005 = vmatpush.msrb.mxu1 %v1986_v25  ;;  %vm1681_vm2 = vweird.f32 %v1674_v33  ;;  %v6799_v25 = vld [vmem:[#allocation2 + $0x668] sm:$0xff] }
 0x308   :  { %1927 = vmatpush.msrb.mxu0 %v1900_v41  ;;  %2130 = vmatpush.msrb.mxu2 %v6791_v49  ;;  %v6823_v41 = vld [vmem:[#allocation2 + $0x570] sm:$0xff] }
 0x309   :  { %2006 = vmatpush.msrb.mxu1 %v1985_v47  ;;  %v6805_v47 = vld [vmem:[#allocation2 + $0x4f8] sm:$0xff] }
 0x30a   :  { %1928 = vmatpush.msrb.mxu0 %v1899_v58  ;;  %2131 = vmatpush.msrb.mxu2 %v6797_v1  ;;  %v6831_v58 = vld [vmem:[#allocation2 + $0x650] sm:$0xff] }
 0x30b   :  { %2007 = vmatpush.msrb.mxu1 %v1984_v45  ;;  %2149 = vmatpush.msrb.mxu3 %v6805_v47  ;;  %v6811_v45 = vld [vmem:[#allocation2 + $0x578] sm:$0xff] }
 0x30c   :  { %1929 = vmatpush.msrb.mxu0 %v1898_v18  ;;  %2132 = vmatpush.msrb.mxu2 %v6803_v2  ;;  %v6841_v18 = vld [vmem:[#allocation2 + $0x4e0] sm:$0xff] }
 0x30d   :  { %v5214_v39 = vpop.eup %5213  ;;  %2008 = vmatpush.msrb.mxu1 %v1983_v50  ;;  %v6817_v50 = vld [vmem:[#allocation2 + $0x4f0] sm:$0xff] }
 0x30e   :  { %v1676_v8 = vmul.f32 %v5214_v39, %v1674_v33  ;;  %vm1682_vm1 = vweird.f32 %v5214_v39  ;;  %1930 = vmatpush.msrb.mxu0 %v1897_v29  ;;  %v6793_v33 = vld [vmem:[#allocation2 + $0x670] sm:$0xff]  ;;  %2133 = vmatpush.msrb.mxu2 %v6815_v46  ;;  %v6851_v29 = vld [vmem:[#allocation2 + $0x5c0] sm:$0xff] }
 0x30f   :  { %2009 = vmatpush.msrb.mxu1 %v1982_v57  ;;  %vm1683_vm3 = vmor %vm1681_vm2, %vm1682_vm1  ;;  %2150 = vmatpush.msrb.mxu3 %v6817_v50  ;;  %v6827_v57 = vld [vmem:[#allocation2 + $0x5d0] sm:$0xff] }
 0x310   :  { %v1677_v10 = vmul.f32 %v5214_v39, %v1676_v8  ;;  %v6829_v8 = vld [vmem:[#allocation2 + $0x4e8] sm:$0xff]  ;;  %2134 = vmatpush.msrb.mxu2 %v6827_v57 }
 0x311   :  { %2010 = vmatpush.msrb.mxu1 %v1981_v53  ;;  %2151 = vmatpush.msrb.mxu3 %v6829_v8  ;;  %v6835_v53 = vld [vmem:[#allocation2 + $0x568] sm:$0xff] }
 0x312   :  { %v1678_v12 = vmul.f32 0.5, %v1677_v10  ;;  %v6839_v10 = vld [vmem:[#allocation2 + $0x5c8] sm:$0xff] }
 0x313   :  { %2011 = vmatpush.msrb.mxu1 %v1980_v16  ;;  %v6843_v16 = vld [vmem:[#allocation2 + $0x648] sm:$0xff]  ;;  %2135 = vmatpush.msrb.mxu2 %v6839_v10 }
 0x314   :  { %v1679_v32 = vsub.f32 1.5, %v1678_v12  ;;  %2152 = vmatpush.msrb.mxu3 %v6841_v18  ;;  %v6847_v12 = vld [vmem:[#allocation2 + $0x560] sm:$0xff] }
 0x315   :  { %2012 = vmatpush.msrb.mxu1 %v1979_v44  ;;  %v6853_v44 = vld [vmem:[#allocation2 + $0x4d8] sm:$0xff]  ;;  %2136 = vmatpush.msrb.mxu2 %v6851_v29 }
 0x316   :  { %v1680_v9 = vmul.f32 %v5214_v39, %v1679_v32  ;;  %v6855_v32 = vld [vmem:[#allocation2 + $0x640] sm:$0xff]  ;;  %2153 = vmatpush.msrb.mxu3 %v6853_v44 }
 0x318   :  { %v1684_v60 = vsel %vm1683_vm3, %v5214_v39, %v1680_v9  ;;  %v6819_v39 = vld [vmem:[#allocation2 + $0x658] sm:$0xff] }
 0x319   :  { %v1686_v5 = vmul.f32 %v1685_v24, %v1684_v60  ;;  %v6859_v9 = vld [vmem:[#allocation2 + $0x558] sm:$0xff]  ;;  %v6865_v60 = vld [vmem:[#allocation2 + $0x4d0] sm:$0xff] }
 0x31a   :  { %v6863_v24 = vld [vmem:[#allocation2 + $0x5b8] sm:$0xff]  ;;  %2154 = vmatpush.msrb.mxu3 %v6865_v60 }
 0x31b   :  { %v1688_v13 = vmul.f32 %v1686_v5, %v6761_v61  ;;  %v1690_v23 = vperm.slane %v1686_v5, 0  ;;  %v6867_v5 = vld [vmem:[#allocation2 + $0x638] sm:$0xff]  ;;  %2137 = vmatpush.msrb.mxu2 %v6863_v24 }
 0x31d   :  { %v1689_v30 = vsub.f32 %v1687_v15, %v1688_v13  ;;  %v1707_v51 = vmul.f32 %v1690_v23, %v6754_v59  ;;  %v1697_v43 = vmul.f32 %v1690_v23, %v6738_v38  ;;  %v1691_v17 = vmul.f32 %v1690_v23, %v6730_v31  ;;  %v6869_v15 = vld [vmem:[#allocation4 + $0x9] ss:$0 sm:$0xff]  ;;  %v6873_v13 = vld [vmem:[#allocation2 + $0x550] sm:$0xff] }
 0x31e   :  { %v1702_v6 = vmul.f32 %v1690_v23, %v6741_v34  ;;  %v1895_v34 = vld [vmem:[%s9375_s2] sm:$0x3]  ;;  %v6877_v23 = vld [vmem:[#allocation2 + $0x5b0] sm:$0xff] }
 0x31f   :  { %v1692_v20 = vperm.slane %v1689_v30, 0  ;;  %v6879_v30 = vld [vmem:[#allocation2 + $0x4c8] sm:$0xff]  ;;  %2138 = vmatpush.msrb.mxu2 %v6877_v23 }
 0x320   :  { %2155 = vmatpush.msrb.mxu3 %v6879_v30 }
 0x321   :  { %v1698_v26 = vadd.f32 %v1697_v43, %v1692_v20  ;;  %v1693_v62 = vadd.f32 %v1692_v20, %v1691_v17  ;;  %v1708_v27 = vadd.f32 %v1707_v51, %v1692_v20  ;;  %v1703_v35 = vadd.f32 %v1702_v6, %v1692_v20  ;;  %v6881_v51 = vld [vmem:[#allocation2 + $0x630] sm:$0xff]  ;;  %v6885_v17 = vld [vmem:[#allocation2 + $0x548] sm:$0xff] }
 0x323   :  { %vm1699_vm4 = vcmp.ge.f32.partialorder %v1698_v26, 0.0  ;;  %v1700_v42 = vmul.f32 0.2, %v1698_v26  ;;  %vm1694_vm5 = vcmp.ge.f32.partialorder %v1693_v62, 0.0  ;;  %v1695_v28 = vmul.f32 0.2, %v1693_v62 }
 0x324   :  { %vm1709_vm6 = vcmp.ge.f32.partialorder %v1708_v27, 0.0  ;;  %v1710_v61 = vmul.f32 0.2, %v1708_v27  ;;  %vm1704_vm7 = vcmp.ge.f32.partialorder %v1703_v35, 0.0  ;;  %v1705_v14 = vmul.f32 0.2, %v1703_v35 }
 0x325   :  { %v6770_v59 = vsel %vm1699_vm4, %v1698_v26, %v1700_v42  ;;  %v6772_v21 = vsel %vm1694_vm5, %v1693_v62, %v1695_v28  ;;  %v6889_v26 = vld [vmem:[#allocation2 + $0x5a8] sm:$0xff]  ;;  %v6891_v62 = vld [vmem:[#allocation2 + $0x4c0] sm:$0xff] }
 0x326   :  { %9579 = vst [vmem:[#allocation32_spill] sm:$0xff] %v6770_v59  ;;  %1763 = vmatmul.f32.vlgmr.msra.gmra.mxu0 %v6770_v59  ;;  %1783 = vmatmul.f32.vlgmr.msra.gmra.mxu1 %v6772_v21  ;;  %v6776_v31 = vsel %vm1709_vm6, %v1708_v27, %v1710_v61  ;;  %v6778_v38 = vsel %vm1704_vm7, %v1703_v35, %v1705_v14  ;;  %v6893_v27 = vld [vmem:[#allocation2 + $0x628] sm:$0xff]  ;;  %v6897_v35 = vld [vmem:[#allocation2 + $0x540] sm:$0xff]  ;;  %v6906_v61 = vld [vmem:[#allocation2 + $0x4b8] sm:$0xff] }
 0x327   :  { %9580 = vst [vmem:[#allocation33_spill] sm:$0xff] %v6772_v21  ;;  %1805 = vmatmul.f32.vlgmr.msra.gmra.mxu2 %v6776_v31  ;;  %1825 = vmatmul.f32.vlgmr.msra.gmra.mxu3 %v6778_v38  ;;  %v6904_v28 = vld [vmem:[#allocation2 + $0x5a0] sm:$0xff] }
 0x328   :  { %9581 = vst [vmem:[#allocation34_spill] sm:$0xff] %v6776_v31  ;;  %2171 = vmatpush.msra.mxu0 %v6787_v11  ;;  %2191 = vmatpush.msra.mxu1 %v6811_v45  ;;  %v6908_v14 = vld [vmem:[#allocation2 + $0x620] sm:$0xff] }
 0x329   :  { %9582 = vst [vmem:[#allocation35_spill] sm:$0xff] %v6778_v38  ;;  %2139 = vmatpush.msrb.mxu2 %v6889_v26  ;;  %2156 = vmatpush.msrb.mxu3 %v6891_v62 }
 0x32a   :  { %2172 = vmatpush.msra.mxu0 %v6793_v33  ;;  %2192 = vmatpush.msra.mxu1 %v6823_v41  ;;  %9584 = vst [vmem:[#allocation37_spill] sm:$0xff] %v6908_v14 }
 0x32b   :  { %2140 = vmatpush.msrb.mxu2 %v6904_v28  ;;  %2157 = vmatpush.msrb.mxu3 %v6906_v61 }
 0x32c   :  { %2173 = vmatpush.msra.mxu0 %v6799_v25  ;;  %2193 = vmatpush.msra.mxu1 %v6835_v53 }
 0x32d   :  { %2141 = vmatpush.msrb.mxu2 %v6920_v48  ;;  %2158 = vmatpush.msrb.mxu3 %v6922_v22  ;;  %v6989_v22 = vld [vmem:[#allocation2 + $0x490] sm:$0xff] }
 0x32e   :  { %1931 = vmatmul.f32.vlgmr.msrb.gmra.mxu0 %v1895_v34  ;;  %2013 = vmatmul.f32.vlgmr.msrb.gmra.mxu1 %v1895_v34  ;;  %v5203_v34 = vld [vmem:[#allocation4 + $0xc] ss:$0 sm:$0xff] }
 0x32f   :  { %2174 = vmatpush.msra.mxu0 %v6807_v40  ;;  %2194 = vmatpush.msra.mxu1 %v6847_v12 }
 0x330   :  { %2142 = vmatpush.msrb.mxu2 %v6933_v36  ;;  %2159 = vmatpush.msrb.mxu3 %v6935_v3 }
 0x331   :  { %2175 = vmatpush.msra.mxu0 %v6819_v39  ;;  %2195 = vmatpush.msra.mxu1 %v6859_v9 }
 0x333   :  { %2176 = vmatpush.msra.mxu0 %v6831_v58  ;;  %2196 = vmatpush.msra.mxu1 %v6873_v13 }
 0x335   :  { %2177 = vmatpush.msra.mxu0 %v6843_v16  ;;  %2197 = vmatpush.msra.mxu1 %v6885_v17 }
 0x337   :  { %2178 = vmatpush.msra.mxu0 %v6855_v32  ;;  %2198 = vmatpush.msra.mxu1 %v6897_v35 }
 0x339   :  { %2179 = vmatpush.msra.mxu0 %v6867_v5 }
 0x33b   :  { %2180 = vmatpush.msra.mxu0 %v6881_v51 }
 0x33d   :  { %2181 = vmatpush.msra.mxu0 %v6893_v27 }
 0x33f   :  { %2182 = vmatpush.msra.mxu0 %v6908_v14 }
 0x341   :  { %2183 = vmatpush.msra.mxu0 %v6924_v0  ;;  %v6949_v0 = vld [vmem:[#allocation2 + $0x588] sm:$0xff] }
 0x342   :  { %9596 = vst [vmem:[#allocation49_spill] sm:$0xff] %v6949_v0  ;;  %2143 = vmatpush.msrb.mxu2 %v6949_v0 }
 0x343   :  { %2184 = vmatpush.msra.mxu0 %v6937_v52 }
 0x3a3   :  { %v1764_v20 = vpop.f32.mrf.mxu0  ;;  %v1784_v43 = vpop.f32.mrf.mxu1 }
 0x3a4   :  { %v1785_v6 = vadd.f32 %v1784_v43, %v1764_v20  ;;  %v5204_v20 = vld [vmem:[#allocation4 + $0xd] ss:$0 sm:$0xff]  ;;  %v6912_v43 = vld [vmem:[#allocation2 + $0x538] sm:$0xff] }
 0x3a5   :  { %9585 = vst [vmem:[#allocation38_spill] sm:$0xff] %v6912_v43  ;;  %2199 = vmatpush.msra.mxu1 %v6912_v43 }
 0x3a6   :  { %v6900_v42 = vadd.f32 %v6869_v15, %v1785_v6 }
 0x3a7   :  { %2200 = vmatpush.msra.mxu1 %v6928_v56 }
 0x3a8   :  { %9583 = vst [vmem:[#allocation36_spill] sm:$0xff] %v6900_v42  ;;  %v1830_v6 = vsel %vm421_vm0, %v6900_v42, 0.0  ;;  %v1837_v19 = vmul.f32 %v6900_v42, %v6900_v42 }
 0x3a9   :  { %v1831_v37 = vrot.slane %v1830_v6, 4 }
 0x3aa   :  { %v1838_v4 = vsel %vm421_vm0, %v1837_v19, 0.0  ;;  %v1806_v55 = vpop.f32.mrf.mxu2  ;;  %v1826_v54 = vpop.f32.mrf.mxu3  ;;  %v6941_v19 = vld [vmem:[#allocation2 + $0x528] sm:$0xff] }
 0x3ab   :  { %v1832_v7 = vadd.f32 %v1831_v37, %v1830_v6  ;;  %v1839_v31 = vrot.slane %v1838_v4, 4  ;;  %v1827_v38 = vadd.f32 %v1826_v54, %v1806_v55  ;;  %v1932_v59 = vpop.f32.mrf.mxu0  ;;  %v2014_v21 = vpop.f32.mrf.mxu1  ;;  %9593 = vst [vmem:[#allocation46_spill] sm:$0xff] %v6941_v19  ;;  %2201 = vmatpush.msra.mxu1 %v6941_v19  ;;  %v6951_v37 = vld [vmem:[#allocation2 + $0x4a0] sm:$0xff]  ;;  %v6953_v55 = vld [vmem:[#allocation2 + $0x608] sm:$0xff] }
 0x3ac   :  { %v6943_v42 = vadd.f32 %v5203_v34, %v1932_v59  ;;  %v6945_v56 = vadd.f32 %v5204_v20, %v2014_v21  ;;  %9597 = vst [vmem:[#allocation50_spill] sm:$0xff] %v6951_v37  ;;  %2160 = vmatpush.msrb.mxu3 %v6951_v37  ;;  %v6960_v59 = vld [vmem:[#allocation2 + $0x520] sm:$0xff]  ;;  %2185 = vmatpush.msra.mxu0 %v6953_v55 }
 0x3ad   :  { %9598 = vst [vmem:[#allocation51_spill] sm:$0xff] %v6953_v55  ;;  %v1833_v54 = vrot.slane %v1832_v7, 2  ;;  %v1840_v6 = vadd.f32 %v1839_v31, %v1838_v4  ;;  %v6956_v3 = vadd.f32 %v6869_v15, %v1827_v38  ;;  %2202 = vmatpush.msra.mxu1 %v6960_v59  ;;  %v6970_v4 = vld [vmem:[#allocation2 + $0x580] sm:$0xff]  ;;  %v6972_v31 = vld [vmem:[#allocation2 + $0x498] sm:$0xff] }
 0x3ae   :  { %9594 = vst [vmem:[#allocation47_spill] sm:$0xff] %v6943_v42  ;;  %v1935_v21 = vsel %vm421_vm0, %v6943_v42, 0.0  ;;  %v1942_v34 = vmul.f32 %v6943_v42, %v6943_v42  ;;  %v2017_v20 = vsel %vm421_vm0, %v6945_v56, 0.0  ;;  %v6974_v38 = vld [vmem:[#allocation2 + $0x600] sm:$0xff]  ;;  %v2024_v0 = vmul.f32 %v6945_v56, %v6945_v56  ;;  %2144 = vmatpush.msrb.mxu2 %v6970_v4  ;;  %2161 = vmatpush.msrb.mxu3 %v6972_v31 }
 0x3af   :  { %9595 = vst [vmem:[#allocation48_spill] sm:$0xff] %v6945_v56  ;;  %v1841_v15 = vrot.slane %v1840_v6, 2  ;;  %v1845_v37 = vsel %vm421_vm0, %v6956_v3, 0.0  ;;  %v1853_v42 = vmul.f32 %v6956_v3, %v6956_v3  ;;  %v1936_v19 = vrot.slane %v1935_v21, 4  ;;  %2186 = vmatpush.msra.mxu0 %v6974_v38 }
 0x3b0   :  { %9599 = vst [vmem:[#allocation52_spill] sm:$0xff] %v6956_v3  ;;  %v1846_v55 = vrot.slane %v1845_v37, 4  ;;  %v1943_v52 = vsel %vm421_vm0, %v1942_v34, 0.0  ;;  %v2018_v36 = vrot.slane %v2017_v20, 4  ;;  %v6991_v3 = vld [vmem:[#allocation2 + $0x510] sm:$0xff]  ;;  %v1834_v56 = vadd.f32 %v1833_v54, %v1832_v7  ;;  %2212 = vmatpush.msra.mxu2 %v6785_v63  ;;  %2162 = vmatpush.msrb.mxu3 %v6989_v22 }
 0x3b1   :  { %9600 = vst [vmem:[#allocation53_spill] sm:$0xff] %v6960_v59  ;;  %v6984_v59 = vld [vmem:[#allocation2 + $0x518] sm:$0xff]  ;;  %v1944_v48 = vrot.slane %v1943_v52, 4  ;;  %2253 = vmatpush.msrb.mxu0 %v6787_v11  ;;  %v1937_v34 = vadd.f32 %v1936_v19, %v1935_v21  ;;  %v1842_v7 = vadd.f32 %v1841_v15, %v1840_v6 }
 0x3b2   :  { %9601 = vst [vmem:[#allocation54_spill] sm:$0xff] %v6970_v4  ;;  %2203 = vmatpush.msra.mxu1 %v6984_v59  ;;  %v1854_v4 = vsel %vm421_vm0, %v1853_v42, 0.0  ;;  %v2019_v14 = vadd.f32 %v2018_v36, %v2017_v20  ;;  %v2025_v42 = vsel %vm421_vm0, %v2024_v0, 0.0  ;;  %2213 = vmatpush.msra.mxu2 %v6791_v49  ;;  %v1835_v6 = vrot.slane %v1834_v56, 1 }
 0x3b3   :  { %9602 = vst [vmem:[#allocation55_spill] sm:$0xff] %v6972_v31  ;;  %v1847_v31 = vadd.f32 %v1846_v55, %v1845_v37  ;;  %v1855_v43 = vrot.slane %v1854_v4, 4  ;;  %v1945_v54 = vadd.f32 %v1944_v48, %v1943_v52  ;;  %2254 = vmatpush.msrb.mxu0 %v6793_v33  ;;  %v1938_v19 = vrot.slane %v1937_v34, 2  ;;  %v7007_v37 = vld [vmem:[#allocation2 + $0x480] sm:$0xff] }
 0x3b4   :  { %9603 = vst [vmem:[#allocation56_spill] sm:$0xff] %v6974_v38  ;;  %2204 = vmatpush.msra.mxu1 %v6991_v3  ;;  %v7000_v38 = vld [vmem:[#allocation2 + $0x508] sm:$0xff]  ;;  %v2020_v36 = vrot.slane %v2019_v14, 2  ;;  %v7009_v55 = vld [vmem:[#allocation2 + $0x500] sm:$0xff]  ;;  %v2026_v52 = vrot.slane %v2025_v42, 4  ;;  %2214 = vmatpush.msra.mxu2 %v6797_v1  ;;  %v1843_v21 = vrot.slane %v1842_v7, 1 }
 0x3b5   :  { %9604 = vst [vmem:[#allocation57_spill] sm:$0xff] %v6984_v59  ;;  %v6998_v59 = vld [vmem:[#allocation2 + $0x488] sm:$0xff]  ;;  %v1848_v63 = vrot.slane %v1847_v31, 2  ;;  %v1856_v11 = vadd.f32 %v1855_v43, %v1854_v4  ;;  %v1946_v48 = vrot.slane %v1945_v54, 2  ;;  %2255 = vmatpush.msrb.mxu0 %v6799_v25  ;;  %v1939_v33 = vadd.f32 %v1938_v19, %v1937_v34  ;;  %v9618_v19 = vld [vmem:[#allocation50_spill] sm:$0xff] }
 0x3b6   :  { %9605 = vst [vmem:[#allocation58_spill] sm:$0xff] %v6998_v59  ;;  %2163 = vmatpush.msrb.mxu3 %v6998_v59  ;;  %2205 = vmatpush.msra.mxu1 %v7000_v38  ;;  %v2021_v43 = vadd.f32 %v2020_v36, %v2019_v14  ;;  %v2027_v4 = vadd.f32 %v2026_v52, %v2025_v42 }
 0x3b7   :  { %9606 = vst [vmem:[#allocation59_spill] sm:$0xff] %v7000_v38  ;;  %v1849_v0 = vadd.f32 %v1848_v63, %v1847_v31  ;;  %v1857_v49 = vrot.slane %v1856_v11, 2  ;;  %v1947_v20 = vadd.f32 %v1946_v48, %v1945_v54  ;;  %2215 = vmatpush.msra.mxu2 %v6803_v2  ;;  %v1940_v1 = vrot.slane %v1939_v33, 1  ;;  %2256 = vmatpush.msrb.mxu0 %v6807_v40 }
 0x3b8   :  { %2164 = vmatpush.msrb.mxu3 %v7007_v37  ;;  %2206 = vmatpush.msra.mxu1 %v7009_v55  ;;  %v2022_v59 = vrot.slane %v2021_v43, 1  ;;  %v1836_v25 = vadd.f32 %v1835_v6, %v1834_v56  ;;  %v2028_v31 = vrot.slane %v2027_v4, 2  ;;  %v9619_v6 = vld [vmem:[#allocation51_spill] sm:$0xff]  ;;  %v9620_v48 = vld [vmem:[#allocation53_spill] sm:$0xff] }
 0x3b9   :  { %v1850_v15 = vrot.slane %v1849_v0, 1  ;;  %v1858_v38 = vadd.f32 %v1857_v49, %v1856_v11  ;;  %v1948_v14 = vrot.slane %v1947_v20, 1  ;;  %2216 = vmatpush.msra.mxu2 %v6815_v46  ;;  %v1941_v2 = vadd.f32 %v1940_v1, %v1939_v33  ;;  %2257 = vmatpush.msrb.mxu0 %v6819_v39  ;;  %v9617_v11 = vld [vmem:[#allocation49_spill] sm:$0xff]  ;;  %v9621_v33 = vld [vmem:[#allocation54_spill] sm:$0xff] }
 0x3ba   :  { %2232 = vmatpush.msra.mxu3 %v6805_v47  ;;  %2273 = vmatpush.msrb.mxu1 %v6811_v45  ;;  %v2023_v42 = vadd.f32 %v2022_v59, %v2021_v43  ;;  %v1844_v47 = vadd.f32 %v1843_v21, %v1842_v7  ;;  %v2029_v40 = vadd.f32 %v2028_v31, %v2027_v4  ;;  %v9622_v43 = vld [vmem:[#allocation55_spill] sm:$0xff] }
 0x3bb   :  { %v1851_v34 = vadd.f32 %v1850_v15, %v1849_v0  ;;  %v1859_v54 = vrot.slane %v1858_v38, 1  ;;  %v1949_v63 = vadd.f32 %v1948_v14, %v1947_v20  ;;  %2217 = vmatpush.msra.mxu2 %v6827_v57  ;;  %v7025_v46 = vmul.f32 0.5, %v1941_v2  ;;  %2258 = vmatpush.msrb.mxu0 %v6831_v58  ;;  %v9623_v20 = vld [vmem:[#allocation56_spill] sm:$0xff] }
 0x3bc   :  { %2233 = vmatpush.msra.mxu3 %v6817_v50  ;;  %2274 = vmatpush.msrb.mxu1 %v6823_v41  ;;  %v7027_v50 = vmul.f32 0.5, %v2023_v42  ;;  %v2030_v59 = vrot.slane %v2029_v40, 1  ;;  %v9624_v4 = vld [vmem:[#allocation57_spill] sm:$0xff] }
 0x3bd   :  { %v1852_v56 = vadd.f32 %v1851_v34, %v1836_v25  ;;  %v1860_v45 = vadd.f32 %v1859_v54, %v1858_v38  ;;  %v1951_v39 = vmul.f32 0.5, %v1949_v63  ;;  %2218 = vmatpush.msra.mxu2 %v6839_v10  ;;  %2259 = vmatpush.msrb.mxu0 %v6843_v16  ;;  %v9625_v34 = vld [vmem:[#allocation58_spill] sm:$0xff]  ;;  %v1966_v63 = vld [vmem:[#allocation4 + $0xe] sm:$0x1] }
 0x3be   :  { %2234 = vmatpush.msra.mxu3 %v6829_v8  ;;  %2275 = vmatpush.msrb.mxu1 %v6835_v53  ;;  %v1952_v8 = vmul.f32 %v7025_v46, %v7025_v46  ;;  %v2031_v38 = vadd.f32 %v2030_v59, %v2029_v40  ;;  %v2034_v58 = vmul.f32 %v7027_v50, %v7027_v50  ;;  %v9626_v2 = vld [vmem:[#allocation59_spill] sm:$0xff]  ;;  %v1878_v40 = vld [vmem:[#allocation4 + $0xa] sm:$0x1]  ;;  %v2048_v59 = vld [vmem:[#allocation4 + $0x10] sm:$0x1] }
 0x3bf   :  { %v1861_v41 = vadd.f32 %v1860_v45, %v1844_v47  ;;  %v7033_v57 = vmul.f32 0.25, %v1852_v56  ;;  %2219 = vmatpush.msra.mxu2 %v6851_v29  ;;  %2260 = vmatpush.msrb.mxu0 %v6855_v32 }
 0x3c0   :  { %2235 = vmatpush.msra.mxu3 %v6841_v18  ;;  %2276 = vmatpush.msrb.mxu1 %v6847_v12  ;;  %v1953_v18 = vsub.f32 %v1951_v39, %v1952_v8  ;;  %v2033_v16 = vmul.f32 0.5, %v2031_v38  ;;  %v1968_v8 = vld [vmem:[#allocation4 + $0xf] sm:$0x1] }
 0x3c1   :  { %v1863_v53 = vmul.f32 0.25, %v1861_v41  ;;  %v1864_v10 = vmul.f32 %v7033_v57, %v7033_v57  ;;  %2220 = vmatpush.msra.mxu2 %v6863_v24  ;;  %2261 = vmatpush.msrb.mxu0 %v6867_v5  ;;  %v9607_v5 = vld [vmem:[#allocation37_spill] sm:$0xff] }
 0x3c2   :  { %2236 = vmatpush.msra.mxu3 %v6853_v44  ;;  %2277 = vmatpush.msrb.mxu1 %v6859_v9  ;;  %v1954_v7 = vmax.f32 %v1953_v18, 0.0  ;;  %v2035_v29 = vsub.f32 %v2033_v16, %v2034_v58  ;;  %v1880_v18 = vld [vmem:[#allocation4 + $0xb] sm:$0x1] }
 0x3c3   :  { %v1865_v12 = vsub.f32 %v1863_v53, %v1864_v10  ;;  %2221 = vmatpush.msra.mxu2 %v6877_v23  ;;  %2262 = vmatpush.msrb.mxu0 %v6881_v51  ;;  %v9609_v23 = vld [vmem:[#allocation39_spill] sm:$0xff]  ;;  %v9611_v51 = vld [vmem:[#allocation41_spill] sm:$0xff] }
 0x3c4   :  { %2237 = vmatpush.msra.mxu3 %v6865_v60  ;;  %2278 = vmatpush.msrb.mxu1 %v6873_v13  ;;  %v1955_v32 = vadd.f32 1e-05, %v1954_v7  ;;  %v2036_v9 = vmax.f32 %v2035_v29, 0.0  ;;  %v9608_v13 = vld [vmem:[#allocation38_spill] sm:$0xff] }
 0x3c5   :  { %v1866_v44 = vmax.f32 %v1865_v12, 0.0  ;;  %2222 = vmatpush.msra.mxu2 %v6889_v26  ;;  %2263 = vmatpush.msrb.mxu0 %v6893_v27  ;;  %v9613_v26 = vld [vmem:[#allocation43_spill] sm:$0xff]  ;;  %v2050_v12 = vld [vmem:[#allocation4 + $0x11] sm:$0x1] }
 0x3c6   :  { %2238 = vmatpush.msra.mxu3 %v6879_v30  ;;  %2279 = vmatpush.msrb.mxu1 %v6885_v17  ;;  %5215 = vrsqrt.f32 %v1955_v32  ;;  %v2037_v60 = vadd.f32 1e-05, %v2036_v9  ;;  %v9610_v30 = vld [vmem:[#allocation40_spill] sm:$0xff]  ;;  %v9612_v17 = vld [vmem:[#allocation42_spill] sm:$0xff]  ;;  %vm1962_vm10 = vweird.f32 %v1955_v32 }
 0x3c7   :  { %v1867_v24 = vadd.f32 1e-05, %v1866_v44  ;;  %2223 = vmatpush.msra.mxu2 %v6904_v28  ;;  %2264 = vmatpush.msrb.mxu0 %v9607_v5  ;;  %v9616_v28 = vld [vmem:[#allocation46_spill] sm:$0xff]  ;;  %v9627_v44 = vld [vmem:[#allocation47_spill] sm:$0xff] }
 0x3c8   :  { %2239 = vmatpush.msra.mxu3 %v6891_v62  ;;  %2280 = vmatpush.msrb.mxu1 %v6897_v35  ;;  %v9614_v62 = vld [vmem:[#allocation44_spill] sm:$0xff]  ;;  %v9615_v35 = vld [vmem:[#allocation45_spill] sm:$0xff]  ;;  %vm2044_vm15 = vweird.f32 %v2037_v60 }
 0x3c9   :  { %5217 = vrsqrt.f32 %v1867_v24  ;;  %2224 = vmatpush.msra.mxu2 %v9609_v23  ;;  %2265 = vmatpush.msrb.mxu0 %v9611_v51  ;;  %vm1874_vm13 = vweird.f32 %v1867_v24  ;;  %v9628_v23 = vld [vmem:[#allocation36_spill] sm:$0xff] }
 0x3ca   :  { %2240 = vmatpush.msra.mxu3 %v6906_v61  ;;  %2281 = vmatpush.msrb.mxu1 %v9608_v13  ;;  %5219 = vrsqrt.f32 %v2037_v60 }
 0x3cb   :  { %2225 = vmatpush.msra.mxu2 %v9613_v26  ;;  %2266 = vmatpush.msrb.mxu0 %v9615_v35  ;;  %v9630_v35 = vld [vmem:[#allocation52_spill] sm:$0xff] }
 0x3cc   :  { %2241 = vmatpush.msra.mxu3 %v9610_v30  ;;  %2282 = vmatpush.msrb.mxu1 %v9612_v17  ;;  %v5216_v27 = vpop.eup %5215  ;;  %v9629_v17 = vld [vmem:[#allocation48_spill] sm:$0xff] }
 0x3cd   :  { %v1957_v61 = vmul.f32 %v5216_v27, %v1955_v32  ;;  %2226 = vmatpush.msra.mxu2 %v9617_v11  ;;  %2267 = vmatpush.msrb.mxu0 %v9619_v6  ;;  %vm1963_vm8 = vweird.f32 %v5216_v27  ;;  %v7092_v11 = vld [vmem:[#allocation2 + $0x7f8] sm:$0xff] }
 0x3ce   :  { %2242 = vmatpush.msra.mxu3 %v9614_v62  ;;  %2283 = vmatpush.msrb.mxu1 %v9616_v28  ;;  %vm1964_vm11 = vmor %vm1962_vm10, %vm1963_vm8 }
 0x3cf   :  { %v5218_v36 = vpop.eup %5217  ;;  %v1958_v49 = vmul.f32 %v5216_v27, %v1957_v61  ;;  %2227 = vmatpush.msra.mxu2 %v9621_v33  ;;  %2268 = vmatpush.msrb.mxu0 %v9623_v20  ;;  %v7104_v33 = vld [vmem:[#allocation2 + $0x868] sm:$0xff]  ;;  %v7110_v20 = vld [vmem:[#allocation2 + $0x860] sm:$0xff] }
 0x3d0   :  { %2243 = vmatpush.msra.mxu3 %v9618_v19  ;;  %2284 = vmatpush.msrb.mxu1 %v9620_v48  ;;  %v5220_v52 = vpop.eup %5219  ;;  %v1869_v0 = vmul.f32 %v5218_v36, %v1867_v24  ;;  %vm1875_vm9 = vweird.f32 %v5218_v36  ;;  %v7094_v19 = vld [vmem:[#allocation2 + $0x878] sm:$0xff]  ;;  %v7096_v48 = vld [vmem:[#allocation2 + $0x7f0] sm:$0xff] }
 0x3d1   :  { %v2039_v21 = vmul.f32 %v5220_v52, %v2037_v60  ;;  %v1959_v1 = vmul.f32 0.5, %v1958_v49  ;;  %vm2045_vm12 = vweird.f32 %v5220_v52  ;;  %vm1876_vm14 = vmor %vm1874_vm13, %vm1875_vm9  ;;  %v7102_v49 = vld [vmem:[#allocation2 + $0x7e8] sm:$0xff] }
 0x3d2   :  { %2244 = vmatpush.msra.mxu3 %v9622_v43  ;;  %2285 = vmatpush.msrb.mxu1 %v9624_v4  ;;  %v1870_v15 = vmul.f32 %v5218_v36, %v1869_v0  ;;  %vm2046_vm1 = vmor %vm2044_vm15, %vm2045_vm12 }
 0x3d3   :  { %v2040_v25 = vmul.f32 %v5220_v52, %v2039_v21  ;;  %v1960_v31 = vsub.f32 1.5, %v1959_v1  ;;  %v7108_v21 = vld [vmem:[#allocation2 + $0x7e0] sm:$0xff]  ;;  %v7116_v1 = vld [vmem:[#allocation2 + $0x858] sm:$0xff] }
 0x3d4   :  { %2245 = vmatpush.msra.mxu3 %v6989_v22  ;;  %2286 = vmatpush.msrb.mxu1 %v6991_v3  ;;  %v1871_v14 = vmul.f32 0.5, %v1870_v15  ;;  %v7114_v15 = vld [vmem:[#allocation2 + $0x7d8] sm:$0xff] }
 0x3d5   :  { %v2041_v54 = vmul.f32 0.5, %v2040_v25  ;;  %v1961_v47 = vmul.f32 %v5216_v27, %v1960_v31  ;;  %v7122_v31 = vld [vmem:[#allocation2 + $0x850] sm:$0xff] }
 0x3d6   :  { %2246 = vmatpush.msra.mxu3 %v9625_v34  ;;  %2287 = vmatpush.msrb.mxu1 %v9626_v2  ;;  %v1872_v42 = vsub.f32 1.5, %v1871_v14  ;;  %v7120_v14 = vld [vmem:[#allocation2 + $0x7d0] sm:$0xff]  ;;  %v7126_v34 = vld [vmem:[#allocation2 + $0x7c8] sm:$0xff]  ;;  %v7132_v2 = vld [vmem:[#allocation2 + $0x7c0] sm:$0xff] }
 0x3d7   :  { %v2042_v22 = vsub.f32 1.5, %v2041_v54  ;;  %v1965_v56 = vsel %vm1964_vm11, %v5216_v27, %v1961_v47  ;;  %v7128_v54 = vld [vmem:[#allocation2 + $0x848] sm:$0xff]  ;;  %v7138_v47 = vld [vmem:[#allocation2 + $0x7b8] sm:$0xff] }
 0x3d8   :  { %2247 = vmatpush.msra.mxu3 %v7007_v37  ;;  %2288 = vmatpush.msrb.mxu1 %v7009_v55  ;;  %v1873_v3 = vmul.f32 %v5218_v36, %v1872_v42  ;;  %v1967_v45 = vmul.f32 %v1966_v63, %v1965_v56  ;;  %v7134_v42 = vld [vmem:[#allocation2 + $0x840] sm:$0xff]  ;;  %v7140_v63 = vld [vmem:[#allocation2 + $0x838] sm:$0xff]  ;;  %v7152_v56 = vld [vmem:[#allocation2 + $0x828] sm:$0xff] }
 0x3d9   :  { %v2043_v39 = vmul.f32 %v5220_v52, %v2042_v22  ;;  %v7144_v22 = vld [vmem:[#allocation2 + $0x7b0] sm:$0xff] }
 0x3da   :  { %v1877_v41 = vsel %vm1876_vm14, %v5218_v36, %v1873_v3  ;;  %v1969_v37 = vmul.f32 %v1967_v45, %v7025_v46  ;;  %v1971_v58 = vperm.slane %v1967_v45, 0  ;;  %v7146_v3 = vld [vmem:[#allocation2 + $0x830] sm:$0xff]  ;;  %v7156_v45 = vld [vmem:[#allocation2 + $0x7a0] sm:$0xff] }
 0x3db   :  { %v1879_v38 = vmul.f32 %v1878_v40, %v1877_v41  ;;  %v2047_v53 = vsel %vm2046_vm1, %v5220_v52, %v2043_v39  ;;  %v7098_v52 = vld [vmem:[#allocation2 + $0x870] sm:$0xff]  ;;  %v7150_v40 = vld [vmem:[#allocation2 + $0x7a8] sm:$0xff]  ;;  %v7158_v39 = vld [vmem:[#allocation2 + $0x820] sm:$0xff] }
 0x3dc   :  { %v2049_v10 = vmul.f32 %v2048_v59, %v2047_v53  ;;  %v1970_v16 = vsub.f32 %v1968_v8, %v1969_v37  ;;  %v1972_v32 = vmul.f32 %v1971_v58, %v9627_v44  ;;  %v7162_v59 = vld [vmem:[#allocation2 + $0x798] sm:$0xff]  ;;  %v7168_v8 = vld [vmem:[#allocation2 + $0x790] sm:$0xff]  ;;  %v7174_v37 = vld [vmem:[#allocation2 + $0x788] sm:$0xff] }
 0x3dd   :  { %v1883_v55 = vperm.slane %v1879_v38, 0  ;;  %v1881_v7 = vmul.f32 %v1879_v38, %v7033_v57  ;;  %v7164_v41 = vld [vmem:[#allocation2 + $0x818] sm:$0xff]  ;;  %v7170_v38 = vld [vmem:[#allocation2 + $0x810] sm:$0xff]  ;;  %v7176_v58 = vld [vmem:[#allocation2 + $0x808] sm:$0xff] }
 0x3de   :  { %v2051_v29 = vmul.f32 %v2049_v10, %v7027_v50  ;;  %v1973_v9 = vperm.slane %v1970_v16, 0  ;;  %v2053_v24 = vperm.slane %v2049_v10, 0  ;;  %v7180_v53 = vld [vmem:[#allocation2 + $0x780] sm:$0xff]  ;;  %v9633_v16 = vld [vmem:[#allocation35_spill] sm:$0xff]  ;;  %v7288_v44 = vld [vmem:[#allocation2 + $0x770] sm:$0xff] }
 0x3df   :  { %v1882_v60 = vsub.f32 %v1880_v18, %v1881_v7  ;;  %v1884_v46 = vmul.f32 %v1883_v55, %v9628_v23  ;;  %v1890_v57 = vmul.f32 %v1883_v55, %v9630_v35  ;;  %v7182_v10 = vld [vmem:[#allocation2 + $0x800] sm:$0xff]  ;;  %v9631_v18 = vld [vmem:[#allocation33_spill] sm:$0xff]  ;;  %v7280_v7 = vld [vmem:[#allocation2 + $0x778] sm:$0xff]  ;;  %9636 = vst [vmem:[#allocation39_spill] sm:$0xff] %v7288_v44 }
 0x3e0   :  { %v2052_v5 = vsub.f32 %v2050_v12, %v2051_v29  ;;  %v1974_v13 = vadd.f32 %v1973_v9, %v1972_v32  ;;  %v2054_v26 = vmul.f32 %v2053_v24, %v9629_v17  ;;  %v9632_v55 = vld [vmem:[#allocation32_spill] sm:$0xff]  ;;  %v7278_v12 = vld [vmem:[#allocation2 + $0x6f8] sm:$0xff]  ;;  %9635 = vst [vmem:[#allocation38_spill] sm:$0xff] %v7280_v7  ;;  %v7286_v29 = vld [vmem:[#allocation2 + $0x6f0] sm:$0xff] }
 0x3e1   :  { %v1885_v30 = vperm.slane %v1882_v60, 0  ;;  %9634 = vst [vmem:[#allocation37_spill] sm:$0xff] %v7278_v12  ;;  %v7294_v32 = vld [vmem:[#allocation2 + $0x6e8] sm:$0xff]  ;;  %v7302_v24 = vld [vmem:[#allocation2 + $0x6e0] sm:$0xff]  ;;  %v7312_v23 = vld [vmem:[#allocation2 + $0x758] sm:$0xff] }
 0x3e2   :  { %v2055_v51 = vperm.slane %v2052_v5, 0  ;;  %vm1975_vm2 = vcmp.ge.f32.partialorder %v1974_v13, 0.0  ;;  %v1976_v62 = vmul.f32 0.2, %v1974_v13  ;;  %v7296_v9 = vld [vmem:[#allocation2 + $0x768] sm:$0xff]  ;;  %v7304_v60 = vld [vmem:[#allocation2 + $0x760] sm:$0xff] }
 0x3e3   :  { %v1886_v27 = vadd.f32 %v1885_v30, %v1884_v46  ;;  %v1891_v6 = vadd.f32 %v1890_v57, %v1885_v30  ;;  %v7314_v46 = vld [vmem:[#allocation4 + $0x12] ss:$0 sm:$0xff]  ;;  %v7332_v35 = vld [vmem:[#allocation2 + $0x6c8] sm:$0xff] }
 0x3e4   :  { %v2056_v28 = vadd.f32 %v2055_v51, %v2054_v26  ;;  %v1977_v50 = vsel %vm1975_vm2, %v1974_v13, %v1976_v62  ;;  %v7310_v13 = vld [vmem:[#allocation2 + $0x6d8] sm:$0xff]  ;;  %v7320_v51 = vld [vmem:[#allocation2 + $0x6d0] sm:$0xff]  ;;  %v7334_v57 = vld [vmem:[#allocation2 + $0x748] sm:$0xff] }
 0x3e5   :  { %vm1887_vm3 = vcmp.ge.f32.partialorder %v1886_v27, 0.0  ;;  %v1888_v61 = vmul.f32 0.2, %v1886_v27  ;;  %2165 = vmatmul.f32.vlgmr.msrb.gmra.mxu3 %v1977_v50  ;;  %2207 = vmatmul.f32.vlgmr.msra.gmra.mxu1 %v1977_v50  ;;  %v1893_v43 = vmul.f32 0.2, %v1891_v6  ;;  %vm1892_vm5 = vcmp.ge.f32.partialorder %v1891_v6, 0.0 }
 0x3e6   :  { %v2058_v0 = vmul.f32 0.2, %v2056_v28  ;;  %vm2057_vm4 = vcmp.ge.f32.partialorder %v2056_v28, 0.0  ;;  %2492 = vmatpush.msrb.mxu3 %v7278_v12  ;;  %2534 = vmatpush.msra.mxu1 %v7280_v7  ;;  %v7322_v17 = vld [vmem:[#allocation2 + $0x750] sm:$0xff]  ;;  %v7324_v26 = vld [vmem:[#allocation2 + $0x9f8] sm:$0xff] }
 0x3e7   :  { %v1889_v36 = vsel %vm1887_vm3, %v1886_v27, %v1888_v61  ;;  %v1894_v25 = vsel %vm1892_vm5, %v1891_v6, %v1893_v43  ;;  %v7326_v62 = vld [vmem:[#allocation2 + $0xa78] sm:$0xff]  ;;  %v7341_v61 = vld [vmem:[#allocation2 + $0x9f0] sm:$0xff]  ;;  %v7349_v6 = vld [vmem:[#allocation2 + $0x740] sm:$0xff] }
 0x3e8   :  { %2145 = vmatmul.f32.vlgmr.msrb.gmra.mxu2 %v1889_v36  ;;  %2187 = vmatmul.f32.vlgmr.msra.gmra.mxu0 %v1889_v36  ;;  %v2059_v4 = vsel %vm2057_vm4, %v2056_v28, %v2058_v0  ;;  %v9637_v28 = vld [vmem:[#allocation34_spill] sm:$0xff]  ;;  %v7347_v36 = vld [vmem:[#allocation2 + $0x6c0] sm:$0xff]  ;;  %v7355_v0 = vld [vmem:[#allocation2 + $0x9e8] sm:$0xff] }
 0x3e9   :  { %2472 = vmatpush.msrb.mxu2 %v7092_v11  ;;  %2514 = vmatpush.msra.mxu0 %v7094_v19  ;;  %v7363_v43 = vld [vmem:[#allocation2 + $0x6b8] sm:$0xff] }
 0x3ea   :  { %2493 = vmatpush.msrb.mxu3 %v7286_v29  ;;  %2535 = vmatpush.msra.mxu1 %v7288_v44 }
 0x3eb   :  { %2473 = vmatpush.msrb.mxu2 %v7096_v48  ;;  %2515 = vmatpush.msra.mxu0 %v7098_v52 }
 0x3ec   :  { %2494 = vmatpush.msrb.mxu3 %v7294_v32  ;;  %2536 = vmatpush.msra.mxu1 %v7296_v9 }
 0x3ed   :  { %2474 = vmatpush.msrb.mxu2 %v7102_v49  ;;  %2516 = vmatpush.msra.mxu0 %v7104_v33 }
 0x3ee   :  { %2248 = vmatmul.f32.vlgmr.msra.gmra.mxu3 %v2059_v4  ;;  %2289 = vmatmul.f32.vlgmr.msrb.gmra.mxu1 %v2059_v4  ;;  %v7368_v4 = vld [vmem:[#allocation2 + $0x9e0] sm:$0xff] }
 0x3ef   :  { %2475 = vmatpush.msrb.mxu2 %v7108_v21  ;;  %2517 = vmatpush.msra.mxu0 %v7110_v20 }
 0x3f0   :  { %2228 = vmatmul.f32.vlgmr.msra.gmra.mxu2 %v1894_v25  ;;  %2269 = vmatmul.f32.vlgmr.msrb.gmra.mxu0 %v1894_v25 }
 0x3f1   :  { %2476 = vmatpush.msrb.mxu2 %v7114_v15  ;;  %2518 = vmatpush.msra.mxu0 %v7116_v1 }
 0x3f2   :  { %2495 = vmatpush.msrb.mxu3 %v7302_v24  ;;  %2537 = vmatpush.msra.mxu1 %v7304_v60 }
 0x3f3   :  { %2477 = vmatpush.msrb.mxu2 %v7120_v14  ;;  %2519 = vmatpush.msra.mxu0 %v7122_v31 }
 0x3f4   :  { %2496 = vmatpush.msrb.mxu3 %v7310_v13  ;;  %2538 = vmatpush.msra.mxu1 %v7312_v23 }
 0x3f5   :  { %2478 = vmatpush.msrb.mxu2 %v7126_v34  ;;  %2520 = vmatpush.msra.mxu0 %v7128_v54 }
 0x3f6   :  { %2497 = vmatpush.msrb.mxu3 %v7320_v51  ;;  %2539 = vmatpush.msra.mxu1 %v7322_v17 }
 0x3f7   :  { %2479 = vmatpush.msrb.mxu2 %v7132_v2  ;;  %2521 = vmatpush.msra.mxu0 %v7134_v42 }
 0x3f8   :  { %2498 = vmatpush.msrb.mxu3 %v7332_v35  ;;  %2540 = vmatpush.msra.mxu1 %v7334_v57 }
 0x3f9   :  { %2480 = vmatpush.msrb.mxu2 %v7138_v47  ;;  %2522 = vmatpush.msra.mxu0 %v7140_v63 }
 0x3fa   :  { %2499 = vmatpush.msrb.mxu3 %v7347_v36  ;;  %2541 = vmatpush.msra.mxu1 %v7349_v6 }
 0x3fb   :  { %2481 = vmatpush.msrb.mxu2 %v7144_v22  ;;  %2523 = vmatpush.msra.mxu0 %v7146_v3 }
 0x3fc   :  { %2500 = vmatpush.msrb.mxu3 %v7363_v43 }
 0x3fd   :  { %2482 = vmatpush.msrb.mxu2 %v7150_v40  ;;  %2524 = vmatpush.msra.mxu0 %v7152_v56 }
 0x3ff   :  { %2483 = vmatpush.msrb.mxu2 %v7156_v45  ;;  %2525 = vmatpush.msra.mxu0 %v7158_v39 }
 0x401   :  { %2484 = vmatpush.msrb.mxu2 %v7162_v59  ;;  %2526 = vmatpush.msra.mxu0 %v7164_v41 }
 0x403   :  { %2485 = vmatpush.msrb.mxu2 %v7168_v8  ;;  %2527 = vmatpush.msra.mxu0 %v7170_v38 }
 0x405   :  { %2486 = vmatpush.msrb.mxu2 %v7174_v37  ;;  %2528 = vmatpush.msra.mxu0 %v7176_v58 }
 0x407   :  { %2487 = vmatpush.msrb.mxu2 %v7180_v53  ;;  %2529 = vmatpush.msra.mxu0 %v7182_v10 }
 0x408   :  { %2488 = vmatmul.f32.vlgmr.msrb.gmra.mxu2 %v9631_v18  ;;  %2530 = vmatmul.f32.vlgmr.msra.gmra.mxu0 %v9631_v18 }
 0x409   :  { %2555 = vmatpush.msra.mxu2 %v7092_v11  ;;  %2596 = vmatpush.msrb.mxu0 %v7094_v19 }
 0x40b   :  { %2556 = vmatpush.msra.mxu2 %v7096_v48  ;;  %2597 = vmatpush.msrb.mxu0 %v7098_v52 }
 0x40d   :  { %2557 = vmatpush.msra.mxu2 %v7102_v49  ;;  %2598 = vmatpush.msrb.mxu0 %v7104_v33 }
 0x40f   :  { %2558 = vmatpush.msra.mxu2 %v7108_v21  ;;  %2599 = vmatpush.msrb.mxu0 %v7110_v20 }
 0x411   :  { %2559 = vmatpush.msra.mxu2 %v7114_v15  ;;  %2600 = vmatpush.msrb.mxu0 %v7116_v1 }
 0x413   :  { %2560 = vmatpush.msra.mxu2 %v7120_v14  ;;  %2601 = vmatpush.msrb.mxu0 %v7122_v31 }
 0x415   :  { %2561 = vmatpush.msra.mxu2 %v7126_v34  ;;  %2602 = vmatpush.msrb.mxu0 %v7128_v54 }
 0x417   :  { %2562 = vmatpush.msra.mxu2 %v7132_v2  ;;  %2603 = vmatpush.msrb.mxu0 %v7134_v42 }
 0x419   :  { %2563 = vmatpush.msra.mxu2 %v7138_v47  ;;  %2604 = vmatpush.msrb.mxu0 %v7140_v63 }
 0x41b   :  { %2564 = vmatpush.msra.mxu2 %v7144_v22  ;;  %2605 = vmatpush.msrb.mxu0 %v7146_v3 }
 0x41d   :  { %2565 = vmatpush.msra.mxu2 %v7150_v40  ;;  %2606 = vmatpush.msrb.mxu0 %v7152_v56 }
 0x41f   :  { %2566 = vmatpush.msra.mxu2 %v7156_v45  ;;  %2607 = vmatpush.msrb.mxu0 %v7158_v39 }
 0x421   :  { %2567 = vmatpush.msra.mxu2 %v7162_v59  ;;  %2608 = vmatpush.msrb.mxu0 %v7164_v41 }
 0x423   :  { %2568 = vmatpush.msra.mxu2 %v7168_v8  ;;  %2609 = vmatpush.msrb.mxu0 %v7170_v38 }
 0x425   :  { %2569 = vmatpush.msra.mxu2 %v7174_v37  ;;  %2610 = vmatpush.msrb.mxu0 %v7176_v58 }
 0x427   :  { %2570 = vmatpush.msra.mxu2 %v7180_v53  ;;  %2611 = vmatpush.msrb.mxu0 %v7182_v10 }
 0x428   :  { %2571 = vmatmul.f32.vlgmr.msra.gmra.mxu2 %v9632_v55  ;;  %2612 = vmatmul.f32.vlgmr.msrb.gmra.mxu0 %v9632_v55 }
 0x429   :  { %2637 = vmatpush.msrb.mxu2 %v7092_v11  ;;  %2678 = vmatpush.msra.mxu0 %v7094_v19 }
 0x42b   :  { %2638 = vmatpush.msrb.mxu2 %v7096_v48  ;;  %2679 = vmatpush.msra.mxu0 %v7098_v52 }
 0x42d   :  { %2639 = vmatpush.msrb.mxu2 %v7102_v49  ;;  %2680 = vmatpush.msra.mxu0 %v7104_v33 }
 0x42f   :  { %2640 = vmatpush.msrb.mxu2 %v7108_v21  ;;  %2681 = vmatpush.msra.mxu0 %v7110_v20 }
 0x431   :  { %2641 = vmatpush.msrb.mxu2 %v7114_v15  ;;  %2682 = vmatpush.msra.mxu0 %v7116_v1 }
 0x433   :  { %2642 = vmatpush.msrb.mxu2 %v7120_v14  ;;  %2683 = vmatpush.msra.mxu0 %v7122_v31 }
 0x435   :  { %2643 = vmatpush.msrb.mxu2 %v7126_v34  ;;  %2684 = vmatpush.msra.mxu0 %v7128_v54 }
 0x437   :  { %2644 = vmatpush.msrb.mxu2 %v7132_v2  ;;  %2685 = vmatpush.msra.mxu0 %v7134_v42 }
 0x439   :  { %2645 = vmatpush.msrb.mxu2 %v7138_v47  ;;  %2686 = vmatpush.msra.mxu0 %v7140_v63 }
 0x43b   :  { %2646 = vmatpush.msrb.mxu2 %v7144_v22  ;;  %2687 = vmatpush.msra.mxu0 %v7146_v3 }
 0x43d   :  { %2647 = vmatpush.msrb.mxu2 %v7150_v40  ;;  %2688 = vmatpush.msra.mxu0 %v7152_v56 }
 0x43f   :  { %2648 = vmatpush.msrb.mxu2 %v7156_v45  ;;  %2689 = vmatpush.msra.mxu0 %v7158_v39 }
 0x441   :  { %2649 = vmatpush.msrb.mxu2 %v7162_v59  ;;  %2690 = vmatpush.msra.mxu0 %v7164_v41 }
 0x443   :  { %2650 = vmatpush.msrb.mxu2 %v7168_v8  ;;  %2691 = vmatpush.msra.mxu0 %v7170_v38 }
 0x445   :  { %2651 = vmatpush.msrb.mxu2 %v7174_v37  ;;  %2692 = vmatpush.msra.mxu0 %v7176_v58 }
 0x447   :  { %2652 = vmatpush.msrb.mxu2 %v7180_v53  ;;  %2693 = vmatpush.msra.mxu0 %v7182_v10 }
 0x448   :  { %2653 = vmatmul.f32.vlgmr.msrb.gmra.mxu2 %v9633_v16  ;;  %2694 = vmatmul.f32.vlgmr.msra.gmra.mxu0 %v9633_v16  ;;  %v7419_v16 = vld [vmem:[#allocation2 + $0x9c8] sm:$0xff] }
 0x449   :  { %2719 = vmatpush.msra.mxu2 %v7092_v11  ;;  %2760 = vmatpush.msrb.mxu0 %v7094_v19  ;;  %v7343_v11 = vld [vmem:[#allocation2 + $0xa70] sm:$0xff] }
 0x44b   :  { %2720 = vmatpush.msra.mxu2 %v7096_v48  ;;  %2761 = vmatpush.msrb.mxu0 %v7098_v52 }
 0x44d   :  { %2721 = vmatpush.msra.mxu2 %v7102_v49  ;;  %2762 = vmatpush.msrb.mxu0 %v7104_v33  ;;  %v7357_v49 = vld [vmem:[#allocation2 + $0xa68] sm:$0xff] }
 0x44f   :  { %2722 = vmatpush.msra.mxu2 %v7108_v21  ;;  %2763 = vmatpush.msrb.mxu0 %v7110_v20  ;;  %v7365_v21 = vld [vmem:[#allocation2 + $0x738] sm:$0xff] }
 0x450   :  { %2542 = vmatpush.msra.mxu1 %v7365_v21 }
 0x451   :  { %2723 = vmatpush.msra.mxu2 %v7114_v15  ;;  %2764 = vmatpush.msrb.mxu0 %v7116_v1  ;;  %v7370_v15 = vld [vmem:[#allocation2 + $0xa60] sm:$0xff] }
 0x453   :  { %2724 = vmatpush.msra.mxu2 %v7120_v14  ;;  %2765 = vmatpush.msrb.mxu0 %v7122_v31 }
 0x455   :  { %2725 = vmatpush.msra.mxu2 %v7126_v34  ;;  %2766 = vmatpush.msrb.mxu0 %v7128_v54  ;;  %v7376_v34 = vld [vmem:[#allocation2 + $0x6b0] sm:$0xff] }
 0x456   :  { %v7378_v54 = vld [vmem:[#allocation2 + $0x730] sm:$0xff]  ;;  %2501 = vmatpush.msrb.mxu3 %v7376_v34 }
 0x457   :  { %2726 = vmatpush.msra.mxu2 %v7132_v2  ;;  %2767 = vmatpush.msrb.mxu0 %v7134_v42 }
 0x458   :  { %2543 = vmatpush.msra.mxu1 %v7378_v54 }
 0x459   :  { %2727 = vmatpush.msra.mxu2 %v7138_v47  ;;  %2768 = vmatpush.msrb.mxu0 %v7140_v63  ;;  %v7383_v47 = vld [vmem:[#allocation2 + $0x9d8] sm:$0xff] }
 0x45a   :  { %v7385_v63 = vld [vmem:[#allocation2 + $0xa58] sm:$0xff] }
 0x45b   :  { %2728 = vmatpush.msra.mxu2 %v7144_v22  ;;  %2769 = vmatpush.msrb.mxu0 %v7146_v3  ;;  %v7391_v3 = vld [vmem:[#allocation2 + $0x6a8] sm:$0xff] }
 0x45c   :  { %2502 = vmatpush.msrb.mxu3 %v7391_v3 }
 0x45d   :  { %2729 = vmatpush.msra.mxu2 %v7150_v40  ;;  %2770 = vmatpush.msrb.mxu0 %v7152_v56  ;;  %v7393_v40 = vld [vmem:[#allocation2 + $0x728] sm:$0xff] }
 0x45e   :  { %2544 = vmatpush.msra.mxu1 %v7393_v40 }
 0x45f   :  { %2730 = vmatpush.msra.mxu2 %v7156_v45  ;;  %2771 = vmatpush.msrb.mxu0 %v7158_v39 }
 0x461   :  { %2731 = vmatpush.msra.mxu2 %v7162_v59  ;;  %2772 = vmatpush.msrb.mxu0 %v7164_v41  ;;  %v7402_v59 = vld [vmem:[#allocation2 + $0x9d0] sm:$0xff] }
 0x462   :  { %v2208_v5 = vpop.f32.mrf.mxu1  ;;  %v7404_v41 = vld [vmem:[#allocation2 + $0xa50] sm:$0xff] }
 0x463   :  { %2732 = vmatpush.msra.mxu2 %v7168_v8  ;;  %2773 = vmatpush.msrb.mxu0 %v7170_v38 }
 0x465   :  { %2733 = vmatpush.msra.mxu2 %v7174_v37  ;;  %2774 = vmatpush.msrb.mxu0 %v7176_v58  ;;  %v2188_v30 = vpop.f32.mrf.mxu0  ;;  %v7410_v37 = vld [vmem:[#allocation2 + $0x6a0] sm:$0xff] }
 0x466   :  { %v2209_v27 = vadd.f32 %v2208_v5, %v2188_v30  ;;  %9641 = vst [vmem:[#allocation43_spill] sm:$0xff] %v7410_v37  ;;  %v7412_v58 = vld [vmem:[#allocation2 + $0x720] sm:$0xff]  ;;  %v7421_v5 = vld [vmem:[#allocation2 + $0xa48] sm:$0xff]  ;;  %2503 = vmatpush.msrb.mxu3 %v7410_v37 }
 0x467   :  { %2734 = vmatpush.msra.mxu2 %v7180_v53  ;;  %2775 = vmatpush.msrb.mxu0 %v7182_v10  ;;  %9642 = vst [vmem:[#allocation44_spill] sm:$0xff] %v7412_v58  ;;  %v7476_v37 = vld [vmem:[#allocation2 + $0x9a8] sm:$0xff] }
 0x468   :  { %2735 = vmatmul.f32.vlgmr.msra.gmra.mxu2 %v9637_v28  ;;  %2776 = vmatmul.f32.vlgmr.msrb.gmra.mxu0 %v9637_v28  ;;  %v7339_v50 = vadd.f32 %v7314_v46, %v2209_v27  ;;  %v2166_v19 = vpop.f32.mrf.mxu3  ;;  %9643 = vst [vmem:[#allocation45_spill] sm:$0xff] %v7421_v5 }
 0x469   :  { %3067 = vmatpush.msrb.mxu2 %v7324_v26  ;;  %3109 = vmatpush.msra.mxu0 %v7326_v62  ;;  %9656 = vst [vmem:[#allocation36_spill] sm:$0xff] %v7476_v37 }
 0x46a   :  { %9638 = vst [vmem:[#allocation40_spill] sm:$0xff] %v7339_v50  ;;  %v2309_v48 = vsel %vm421_vm0, %v7339_v50, 0.0  ;;  %v2317_v52 = vmul.f32 %v7339_v50, %v7339_v50  ;;  %2545 = vmatpush.msra.mxu1 %v7412_v58  ;;  %v7463_v58 = vld [vmem:[#allocation2 + $0x9b0] sm:$0xff] }
 0x46b   :  { %3068 = vmatpush.msrb.mxu2 %v7341_v61  ;;  %3110 = vmatpush.msra.mxu0 %v7343_v11  ;;  %v2146_v33 = vpop.f32.mrf.mxu2  ;;  %v2310_v25 = vrot.slane %v2309_v48, 4  ;;  %v2290_v14 = vpop.f32.mrf.mxu1 }
 0x46c   :  { %v2318_v20 = vsel %vm421_vm0, %v2317_v52, 0.0  ;;  %v2167_v1 = vadd.f32 %v2166_v19, %v2146_v33  ;;  %v7429_v52 = vld [vmem:[#allocation2 + $0x718] sm:$0xff] }
 0x46d   :  { %3069 = vmatpush.msrb.mxu2 %v7355_v0  ;;  %3111 = vmatpush.msra.mxu0 %v7357_v49  ;;  %v2270_v31 = vpop.f32.mrf.mxu0  ;;  %v2319_v2 = vrot.slane %v2318_v20, 4  ;;  %v2311_v8 = vadd.f32 %v2310_v25, %v2309_v48  ;;  %v7427_v48 = vld [vmem:[#allocation2 + $0x698] sm:$0xff]  ;;  %9645 = vst [vmem:[#allocation49_spill] sm:$0xff] %v7429_v52  ;;  %v7434_v25 = vld [vmem:[#allocation2 + $0xa40] sm:$0xff] }
 0x46e   :  { %v7381_v42 = vadd.f32 %v7314_v46, %v2167_v1  ;;  %v2291_v22 = vadd.f32 %v2290_v14, %v2270_v31  ;;  %9644 = vst [vmem:[#allocation46_spill] sm:$0xff] %v7427_v48  ;;  %v7432_v1 = vld [vmem:[#allocation2 + $0x9c0] sm:$0xff]  ;;  %2504 = vmatpush.msrb.mxu3 %v7427_v48  ;;  %2546 = vmatpush.msra.mxu1 %v7429_v52 }
 0x46f   :  { %3070 = vmatpush.msrb.mxu2 %v7368_v4  ;;  %3112 = vmatpush.msra.mxu0 %v7370_v15  ;;  %v2320_v53 = vadd.f32 %v2319_v2, %v2318_v20  ;;  %9646 = vst [vmem:[#allocation50_spill] sm:$0xff] %v7432_v1  ;;  %v2312_v31 = vrot.slane %v2311_v8, 2 }
 0x470   :  { %9639 = vst [vmem:[#allocation41_spill] sm:$0xff] %v7381_v42  ;;  %v2294_v56 = vsel %vm421_vm0, %v7381_v42, 0.0  ;;  %v2301_v45 = vmul.f32 %v7381_v42, %v7381_v42  ;;  %v7400_v39 = vadd.f32 %v7314_v46, %v2291_v22  ;;  %v7449_v42 = vld [vmem:[#allocation2 + $0xa38] sm:$0xff] }
 0x471   :  { %v2295_v38 = vrot.slane %v2294_v56, 4  ;;  %3071 = vmatpush.msrb.mxu2 %v7383_v47  ;;  %3113 = vmatpush.msra.mxu0 %v7385_v63  ;;  %v2249_v28 = vpop.f32.mrf.mxu3  ;;  %9647 = vst [vmem:[#allocation51_spill] sm:$0xff] %v7434_v25 }
 0x472   :  { %9640 = vst [vmem:[#allocation42_spill] sm:$0xff] %v7400_v39  ;;  %v2302_v10 = vsel %vm421_vm0, %v2301_v45, 0.0  ;;  %v2343_v18 = vsel %vm421_vm0, %v7400_v39, 0.0  ;;  %v2351_v55 = vmul.f32 %v7400_v39, %v7400_v39  ;;  %v7442_v45 = vld [vmem:[#allocation2 + $0x710] sm:$0xff]  ;;  %v7455_v39 = vld [vmem:[#allocation2 + $0x688] sm:$0xff] }
 0x473   :  { %v2296_v30 = vadd.f32 %v2295_v38, %v2294_v56  ;;  %v2303_v27 = vrot.slane %v2302_v10, 4  ;;  %3072 = vmatpush.msrb.mxu2 %v7402_v59  ;;  %3114 = vmatpush.msra.mxu0 %v7404_v41  ;;  %v2229_v19 = vpop.f32.mrf.mxu2  ;;  %v2344_v33 = vrot.slane %v2343_v18, 4  ;;  %v7440_v56 = vld [vmem:[#allocation2 + $0x690] sm:$0xff]  ;;  %9649 = vst [vmem:[#allocation54_spill] sm:$0xff] %v7442_v45  ;;  %v2321_v38 = vrot.slane %v2320_v53, 2 }
 0x474   :  { %v2352_v20 = vsel %vm421_vm0, %v2351_v55, 0.0  ;;  %v2250_v14 = vadd.f32 %v2249_v28, %v2229_v19  ;;  %9648 = vst [vmem:[#allocation53_spill] sm:$0xff] %v7440_v56  ;;  %v7447_v19 = vld [vmem:[#allocation2 + $0x9b8] sm:$0xff]  ;;  %2505 = vmatpush.msrb.mxu3 %v7440_v56  ;;  %2547 = vmatpush.msra.mxu1 %v7442_v45 }
 0x475   :  { %v2297_v2 = vrot.slane %v2296_v30, 2  ;;  %v2304_v22 = vadd.f32 %v2303_v27, %v2302_v10  ;;  %3073 = vmatpush.msrb.mxu2 %v7419_v16  ;;  %3115 = vmatpush.msra.mxu0 %v7421_v5  ;;  %v2345_v55 = vadd.f32 %v2344_v33, %v2343_v18  ;;  %v2353_v50 = vrot.slane %v2352_v20, 4  ;;  %9651 = vst [vmem:[#allocation56_spill] sm:$0xff] %v7455_v39  ;;  %v7457_v18 = vld [vmem:[#allocation2 + $0x708] sm:$0xff] }
 0x476   :  { %v7445_v28 = vadd.f32 %v7314_v46, %v2250_v14  ;;  %9652 = vst [vmem:[#allocation57_spill] sm:$0xff] %v7457_v18  ;;  %v7478_v5 = vld [vmem:[#allocation2 + $0xa28] sm:$0xff]  ;;  %2506 = vmatpush.msrb.mxu3 %v7455_v39  ;;  %2548 = vmatpush.msra.mxu1 %v7457_v18 }
 0x477   :  { %v2298_v10 = vadd.f32 %v2297_v2, %v2296_v30  ;;  %v2305_v27 = vrot.slane %v2304_v22, 2  ;;  %3074 = vmatpush.msrb.mxu2 %v7432_v1  ;;  %3116 = vmatpush.msra.mxu0 %v7434_v25  ;;  %v2346_v46 = vrot.slane %v2345_v55, 2  ;;  %v2354_v33 = vadd.f32 %v2353_v50, %v2352_v20  ;;  %v7465_v30 = vld [vmem:[#allocation2 + $0xa30] sm:$0xff]  ;;  %v7471_v50 = vld [vmem:[#allocation2 + $0x680] sm:$0xff]  ;;  %9657 = vst [vmem:[#allocation48_spill] sm:$0xff] %v7478_v5 }
 0x478   :  { %9650 = vst [vmem:[#allocation55_spill] sm:$0xff] %v7445_v28  ;;  %v2326_v14 = vsel %vm421_vm0, %v7445_v28, 0.0  ;;  %v2334_v48 = vmul.f32 %v7445_v28, %v7445_v28  ;;  %v2313_v2 = vadd.f32 %v2312_v31, %v2311_v8  ;;  %v7473_v20 = vld [vmem:[#allocation2 + $0x700] sm:$0xff]  ;;  %v2322_v28 = vadd.f32 %v2321_v38, %v2320_v53  ;;  %2507 = vmatpush.msrb.mxu3 %v7471_v50 }
 0x479   :  { %9653 = vst [vmem:[#allocation58_spill] sm:$0xff] %v7465_v30  ;;  %v2306_v52 = vadd.f32 %v2305_v27, %v2304_v22  ;;  %v2327_v25 = vrot.slane %v2326_v14, 4  ;;  %3075 = vmatpush.msrb.mxu2 %v7447_v19  ;;  %3117 = vmatpush.msra.mxu0 %v7449_v42  ;;  %v2299_v8 = vrot.slane %v2298_v10, 1  ;;  %v2355_v31 = vrot.slane %v2354_v33, 2  ;;  %v7484_v53 = vld [vmem:[#allocation2 + $0x9a0] sm:$0xff] }
 0x47a   :  { %9654 = vst [vmem:[#allocation59_spill] sm:$0xff] %v7471_v50  ;;  %v2335_v1 = vsel %vm421_vm0, %v2334_v48, 0.0  ;;  %v2347_v45 = vadd.f32 %v2346_v46, %v2345_v55  ;;  %v7486_v48 = vld [vmem:[#allocation2 + $0xa20] sm:$0xff]  ;;  %2549 = vmatpush.msra.mxu1 %v7473_v20  ;;  %v2314_v38 = vrot.slane %v2313_v2, 1  ;;  %v7494_v55 = vld [vmem:[#allocation2 + $0xa18] sm:$0xff]  ;;  %2575 = vmatpush.msra.mxu3 %v7278_v12 }
 0x47b   :  { %9655 = vst [vmem:[#allocation47_spill] sm:$0xff] %v7473_v20  ;;  %v2328_v22 = vadd.f32 %v2327_v25, %v2326_v14  ;;  %v2336_v27 = vrot.slane %v2335_v1, 4  ;;  %3076 = vmatpush.msrb.mxu2 %v7463_v58  ;;  %3118 = vmatpush.msra.mxu0 %v7465_v30  ;;  %v2307_v39 = vrot.slane %v2306_v52, 1  ;;  %v2323_v25 = vrot.slane %v2322_v28, 1  ;;  %v7492_v14 = vld [vmem:[#allocation2 + $0x998] sm:$0xff] }
 0x47c   :  { %2616 = vmatpush.msrb.mxu1 %v7280_v7  ;;  %v2300_v46 = vadd.f32 %v2299_v8, %v2298_v10  ;;  %v2356_v50 = vadd.f32 %v2355_v31, %v2354_v33  ;;  %2576 = vmatpush.msra.mxu3 %v7286_v29  ;;  %v2315_v12 = vadd.f32 %v2314_v38, %v2313_v2  ;;  %v7508_v33 = vld [vmem:[#allocation2 + $0x988] sm:$0xff] }
 0x47d   :  { %v2329_v18 = vrot.slane %v2328_v22, 2  ;;  %v2337_v56 = vadd.f32 %v2336_v27, %v2335_v1  ;;  %3077 = vmatpush.msrb.mxu2 %v7476_v37  ;;  %3119 = vmatpush.msra.mxu0 %v7478_v5  ;;  %v2348_v1 = vrot.slane %v2347_v45, 1  ;;  %v7500_v27 = vld [vmem:[#allocation2 + $0x990] sm:$0xff]  ;;  %v2308_v37 = vadd.f32 %v2307_v39, %v2306_v52  ;;  %v7510_v8 = vld [vmem:[#allocation2 + $0xa08] sm:$0xff]  ;;  %v7516_v52 = vld [vmem:[#allocation2 + $0x980] sm:$0xff] }
 0x47e   :  { %v7502_v5 = vld [vmem:[#allocation2 + $0xa10] sm:$0xff]  ;;  %2617 = vmatpush.msrb.mxu1 %v7288_v44  ;;  %2577 = vmatpush.msra.mxu3 %v7294_v32  ;;  %v2316_v31 = vadd.f32 %v2315_v12, %v2300_v46 }
 0x47f   :  { %v2330_v20 = vadd.f32 %v2329_v18, %v2328_v22  ;;  %v2338_v30 = vrot.slane %v2337_v56, 2  ;;  %3078 = vmatpush.msrb.mxu2 %v7484_v53  ;;  %3120 = vmatpush.msra.mxu0 %v7486_v48  ;;  %v2324_v18 = vadd.f32 %v2323_v25, %v2322_v28  ;;  %v2357_v22 = vrot.slane %v2356_v50, 1 }
 0x480   :  { %2618 = vmatpush.msrb.mxu1 %v7296_v9  ;;  %v2349_v39 = vadd.f32 %v2348_v1, %v2347_v45  ;;  %2578 = vmatpush.msra.mxu3 %v7302_v24 }
 0x481   :  { %v2331_v7 = vrot.slane %v2330_v20, 1  ;;  %v2339_v10 = vadd.f32 %v2338_v30, %v2337_v56  ;;  %3079 = vmatpush.msrb.mxu2 %v7492_v14  ;;  %3121 = vmatpush.msra.mxu0 %v7494_v55  ;;  %v7518_v56 = vld [vmem:[#allocation2 + $0xa00] sm:$0xff]  ;;  %v2325_v28 = vadd.f32 %v2324_v18, %v2308_v37  ;;  %v2358_v12 = vadd.f32 %v2357_v22, %v2356_v50  ;;  %v9659_v18 = vld [vmem:[#allocation45_spill] sm:$0xff] }
 0x482   :  { %2619 = vmatpush.msrb.mxu1 %v7304_v60  ;;  %2579 = vmatpush.msra.mxu3 %v7310_v13  ;;  %v9661_v22 = vld [vmem:[#allocation44_spill] sm:$0xff] }
 0x483   :  { %v2332_v44 = vadd.f32 %v2331_v7, %v2330_v20  ;;  %v2340_v2 = vrot.slane %v2339_v10, 1  ;;  %3080 = vmatpush.msrb.mxu2 %v7500_v27  ;;  %3122 = vmatpush.msra.mxu0 %v7502_v5  ;;  %v9658_v20 = vld [vmem:[#allocation25_spill] sm:$0xff] }
 0x484   :  { %2620 = vmatpush.msrb.mxu1 %v7312_v23  ;;  %2580 = vmatpush.msra.mxu3 %v7320_v51 }
 0x485   :  { %v2333_v30 = vadd.f32 %v2332_v44, %v2316_v31  ;;  %v2341_v38 = vadd.f32 %v2340_v2, %v2339_v10  ;;  %3081 = vmatpush.msrb.mxu2 %v7508_v33  ;;  %3123 = vmatpush.msra.mxu0 %v7510_v8  ;;  %v9660_v31 = vld [vmem:[#allocation43_spill] sm:$0xff]  ;;  %v9662_v2 = vld [vmem:[#allocation50_spill] sm:$0xff] }
 0x486   :  { %2621 = vmatpush.msrb.mxu1 %v7322_v17  ;;  %2581 = vmatpush.msra.mxu3 %v7332_v35 }
 0x487   :  { %v2342_v7 = vadd.f32 %v2341_v38, %v2325_v28  ;;  %v2350_v45 = vadd.f32 %v2349_v39, %v2333_v30  ;;  %3082 = vmatpush.msrb.mxu2 %v7516_v52  ;;  %3124 = vmatpush.msra.mxu0 %v7518_v56  ;;  %v9663_v39 = vld [vmem:[#allocation51_spill] sm:$0xff]  ;;  %v9664_v28 = vld [vmem:[#allocation46_spill] sm:$0xff]  ;;  %v9665_v30 = vld [vmem:[#allocation49_spill] sm:$0xff] }
 0x488   :  { %3083 = vmatmul.f32.vlgmr.msrb.gmra.mxu2 %v9658_v20  ;;  %3125 = vmatmul.f32.vlgmr.msra.gmra.mxu0 %v9658_v20  ;;  %v9668_v20 = vld [vmem:[#allocation58_spill] sm:$0xff] }
 0x489   :  { %v2359_v44 = vadd.f32 %v2358_v12, %v2342_v7  ;;  %v7530_v37 = vmul.f32 0.125, %v2350_v45  ;;  %3150 = vmatpush.msra.mxu2 %v7324_v26  ;;  %3191 = vmatpush.msrb.mxu0 %v7326_v62  ;;  %v9666_v7 = vld [vmem:[#allocation53_spill] sm:$0xff]  ;;  %v9667_v45 = vld [vmem:[#allocation54_spill] sm:$0xff] }
 0x48a   :  { %2622 = vmatpush.msrb.mxu1 %v7334_v57  ;;  %2582 = vmatpush.msra.mxu3 %v7347_v36 }
 0x48b   :  { %v2361_v50 = vmul.f32 0.125, %v2359_v44  ;;  %v2362_v25 = vmul.f32 %v7530_v37, %v7530_v37  ;;  %3151 = vmatpush.msra.mxu2 %v7341_v61  ;;  %3192 = vmatpush.msrb.mxu0 %v7343_v11 }
 0x48c   :  { %2623 = vmatpush.msrb.mxu1 %v7349_v6  ;;  %2583 = vmatpush.msra.mxu3 %v7363_v43 }
 0x48d   :  { %v2363_v46 = vsub.f32 %v2361_v50, %v2362_v25  ;;  %3152 = vmatpush.msra.mxu2 %v7355_v0  ;;  %3193 = vmatpush.msrb.mxu0 %v7357_v49  ;;  %v9669_v50 = vld [vmem:[#allocation56_spill] sm:$0xff]  ;;  %v9670_v25 = vld [vmem:[#allocation57_spill] sm:$0xff] }
 0x48e   :  { %2624 = vmatpush.msrb.mxu1 %v7365_v21  ;;  %2584 = vmatpush.msra.mxu3 %v7376_v34 }
 0x48f   :  { %v2364_v1 = vmax.f32 %v2363_v46, 0.0  ;;  %3153 = vmatpush.msra.mxu2 %v7368_v4  ;;  %3194 = vmatpush.msrb.mxu0 %v7370_v15  ;;  %v9671_v46 = vld [vmem:[#allocation36_spill] sm:$0xff] }
 0x490   :  { %2625 = vmatpush.msrb.mxu1 %v7378_v54  ;;  %2585 = vmatpush.msra.mxu3 %v7391_v3 }
 0x491   :  { %v2365_v10 = vadd.f32 1e-05, %v2364_v1  ;;  %3154 = vmatpush.msra.mxu2 %v7383_v47  ;;  %3195 = vmatpush.msrb.mxu0 %v7385_v63  ;;  %v9672_v1 = vld [vmem:[#allocation48_spill] sm:$0xff] }
 0x492   :  { %2626 = vmatpush.msrb.mxu1 %v7393_v40  ;;  %2586 = vmatpush.msra.mxu3 %v9660_v31 }
 0x493   :  { %5221 = vrsqrt.f32 %v2365_v10  ;;  %3155 = vmatpush.msra.mxu2 %v7402_v59  ;;  %3196 = vmatpush.msrb.mxu0 %v7404_v41  ;;  %vm2372_vm7 = vweird.f32 %v2365_v10 }
 0x494   :  { %2627 = vmatpush.msrb.mxu1 %v9661_v22  ;;  %2587 = vmatpush.msra.mxu3 %v9664_v28  ;;  %v9673_v28 = vld [vmem:[#allocation59_spill] sm:$0xff] }
 0x495   :  { %3156 = vmatpush.msra.mxu2 %v7419_v16  ;;  %3197 = vmatpush.msrb.mxu0 %v9659_v18  ;;  %v9674_v22 = vld [vmem:[#allocation47_spill] sm:$0xff] }
 0x496   :  { %2628 = vmatpush.msrb.mxu1 %v9665_v30  ;;  %2588 = vmatpush.msra.mxu3 %v9666_v7 }
 0x497   :  { %3157 = vmatpush.msra.mxu2 %v9662_v2  ;;  %3198 = vmatpush.msrb.mxu0 %v9663_v39 }
 0x498   :  { %2629 = vmatpush.msrb.mxu1 %v9667_v45  ;;  %2589 = vmatpush.msra.mxu3 %v9669_v50 }
 0x499   :  { %v5222_v38 = vpop.eup %5221  ;;  %3158 = vmatpush.msra.mxu2 %v7447_v19  ;;  %3199 = vmatpush.msrb.mxu0 %v7449_v42 }
 0x49a   :  { %v2367_v12 = vmul.f32 %v5222_v38, %v2365_v10  ;;  %2630 = vmatpush.msrb.mxu1 %v9670_v25  ;;  %2590 = vmatpush.msra.mxu3 %v9673_v28  ;;  %vm2373_vm6 = vweird.f32 %v5222_v38  ;;  %v2376_v25 = vld [vmem:[#allocation4 + $0x13] sm:$0x1] }
 0x49b   :  { %3159 = vmatpush.msra.mxu2 %v7463_v58  ;;  %3200 = vmatpush.msrb.mxu0 %v9668_v20  ;;  %vm2374_vm8 = vmor %vm2372_vm7, %vm2373_vm6 }
 0x49c   :  { %v2368_v44 = vmul.f32 %v5222_v38, %v2367_v12  ;;  %2631 = vmatpush.msrb.mxu1 %v9674_v22 }
 0x49d   :  { %3160 = vmatpush.msra.mxu2 %v9671_v46  ;;  %3201 = vmatpush.msrb.mxu0 %v9672_v1 }
 0x49e   :  { %v2369_v30 = vmul.f32 0.5, %v2368_v44 }
 0x49f   :  { %3161 = vmatpush.msra.mxu2 %v7484_v53  ;;  %3202 = vmatpush.msrb.mxu0 %v7486_v48 }
 0x4a0   :  { %v2370_v45 = vsub.f32 1.5, %v2369_v30  ;;  %v2378_v30 = vld [vmem:[#allocation4 + $0x14] sm:$0x1] }
 0x4a1   :  { %3162 = vmatpush.msra.mxu2 %v7492_v14  ;;  %3203 = vmatpush.msrb.mxu0 %v7494_v55 }
 0x4a2   :  { %v2371_v12 = vmul.f32 %v5222_v38, %v2370_v45  ;;  %v9675_v45 = vld [vmem:[#allocation24_spill] sm:$0xff] }
 0x4a3   :  { %3163 = vmatpush.msra.mxu2 %v7500_v27  ;;  %3204 = vmatpush.msrb.mxu0 %v7502_v5 }
 0x4a4   :  { %v2375_v44 = vsel %vm2374_vm8, %v5222_v38, %v2371_v12 }
 0x4a5   :  { %v2377_v22 = vmul.f32 %v2376_v25, %v2375_v44  ;;  %3164 = vmatpush.msra.mxu2 %v7508_v33  ;;  %3205 = vmatpush.msrb.mxu0 %v7510_v8  ;;  %v9676_v25 = vld [vmem:[#allocation42_spill] sm:$0xff]  ;;  %v9677_v44 = vld [vmem:[#allocation41_spill] sm:$0xff] }
 0x4a7   :  { %v7586_v28 = vperm.slane %v2377_v22, 0  ;;  %3165 = vmatpush.msra.mxu2 %v7516_v52  ;;  %3206 = vmatpush.msrb.mxu0 %v7518_v56  ;;  %v2379_v10 = vmul.f32 %v2377_v22, %v7530_v37 }
 0x4a8   :  { %3166 = vmatmul.f32.vlgmr.msra.gmra.mxu2 %v9675_v45  ;;  %3207 = vmatmul.f32.vlgmr.msrb.gmra.mxu0 %v9675_v45 }
 0x4a9   :  { %3232 = vmatpush.msrb.mxu2 %v7324_v26  ;;  %3273 = vmatpush.msra.mxu0 %v7326_v62  ;;  %v2380_v38 = vsub.f32 %v2378_v30, %v2379_v10  ;;  %v2398_v12 = vmul.f32 %v7586_v28, %v9676_v25  ;;  %v2382_v50 = vmul.f32 %v7586_v28, %v9677_v44  ;;  %v9681_v44 = vld [vmem:[#allocation38_spill] sm:$0xff] }
 0x4ab   :  { %3233 = vmatpush.msrb.mxu2 %v7341_v61  ;;  %3274 = vmatpush.msra.mxu0 %v7343_v11  ;;  %v7601_v37 = vperm.slane %v2380_v38, 0  ;;  %v9679_v38 = vld [vmem:[#allocation40_spill] sm:$0xff] }
 0x4ac   :  { %v2388_v25 = vmul.f32 %v7586_v28, %v9679_v38  ;;  %v9683_v38 = vld [vmem:[#allocation27_spill] sm:$0xff] }
 0x4ad   :  { %3234 = vmatpush.msrb.mxu2 %v7355_v0  ;;  %3275 = vmatpush.msra.mxu0 %v7357_v49  ;;  %v2384_v22 = vadd.f32 %v7601_v37, %v2382_v50  ;;  %v7607_v30 = vadd.f32 %v2398_v12, %v7601_v37  ;;  %v9680_v12 = vld [vmem:[#allocation37_spill] sm:$0xff] }
 0x4ae   :  { %v2389_v50 = vadd.f32 %v2388_v25, %v7601_v37  ;;  %v9684_v25 = vld [vmem:[#allocation55_spill] sm:$0xff] }
 0x4af   :  { %9678 = vst [vmem:[#allocation52_spill] sm:$0xff] %v7607_v30  ;;  %3235 = vmatpush.msrb.mxu2 %v7368_v4  ;;  %3276 = vmatpush.msra.mxu0 %v7370_v15  ;;  %vm2385_vm9 = vcmp.ge.f32.partialorder %v2384_v22, 0.0  ;;  %v2386_v10 = vmul.f32 0.2, %v2384_v22  ;;  %v9687_v30 = vld [vmem:[#allocation49_spill] sm:$0xff] }
 0x4b0   :  { %vm2390_vm10 = vcmp.ge.f32.partialorder %v2389_v50, 0.0 }
 0x4b1   :  { %3236 = vmatpush.msrb.mxu2 %v7383_v47  ;;  %3277 = vmatpush.msra.mxu0 %v7385_v63  ;;  %v2387_v45 = vsel %vm2385_vm9, %v2384_v22, %v2386_v10  ;;  %v9682_v22 = vld [vmem:[#allocation39_spill] sm:$0xff]  ;;  %v2391_v10 = vmul.f32 0.2, %v2389_v50 }
 0x4b2   :  { %2508 = vmatmul.f32.vlgmr.msrb.gmra.mxu3 %v2387_v45  ;;  %2550 = vmatmul.f32.vlgmr.msra.gmra.mxu1 %v2387_v45 }
 0x4b3   :  { %3237 = vmatpush.msrb.mxu2 %v7402_v59  ;;  %3278 = vmatpush.msra.mxu0 %v7404_v41  ;;  %v2392_v45 = vsel %vm2390_vm10, %v2389_v50, %v2391_v10  ;;  %v2393_v50 = vmul.f32 %v7586_v28, %v9684_v25  ;;  %v9685_v10 = vld [vmem:[#allocation44_spill] sm:$0xff]  ;;  %v9688_v28 = vld [vmem:[#allocation54_spill] sm:$0xff] }
 0x4b4   :  { %2657 = vmatpush.msrb.mxu3 %v9680_v12  ;;  %2698 = vmatpush.msra.mxu1 %v9681_v44 }
 0x4b5   :  { %3238 = vmatpush.msrb.mxu2 %v7419_v16  ;;  %3279 = vmatpush.msra.mxu0 %v9659_v18 }
 0x4b6   :  { %2658 = vmatpush.msrb.mxu3 %v7286_v29  ;;  %2699 = vmatpush.msra.mxu1 %v9682_v22 }
 0x4b7   :  { %3239 = vmatpush.msrb.mxu2 %v9662_v2  ;;  %3280 = vmatpush.msra.mxu0 %v9663_v39 }
 0x4b8   :  { %2659 = vmatpush.msrb.mxu3 %v7294_v32  ;;  %2700 = vmatpush.msra.mxu1 %v7296_v9 }
 0x4b9   :  { %3240 = vmatpush.msrb.mxu2 %v7447_v19  ;;  %3281 = vmatpush.msra.mxu0 %v7449_v42 }
 0x4ba   :  { %2660 = vmatpush.msrb.mxu3 %v7302_v24  ;;  %2701 = vmatpush.msra.mxu1 %v7304_v60 }
 0x4bb   :  { %3241 = vmatpush.msrb.mxu2 %v7463_v58  ;;  %3282 = vmatpush.msra.mxu0 %v9668_v20 }
 0x4bc   :  { %2591 = vmatmul.f32.vlgmr.msra.gmra.mxu3 %v2392_v45  ;;  %2632 = vmatmul.f32.vlgmr.msrb.gmra.mxu1 %v2392_v45  ;;  %v2394_v45 = vadd.f32 %v2393_v50, %v7601_v37  ;;  %v9690_v37 = vld [vmem:[#allocation57_spill] sm:$0xff]  ;;  %v9691_v50 = vld [vmem:[#allocation59_spill] sm:$0xff] }
 0x4bd   :  { %3242 = vmatpush.msrb.mxu2 %v9671_v46  ;;  %3283 = vmatpush.msra.mxu0 %v9672_v1 }
 0x4be   :  { %2661 = vmatpush.msrb.mxu3 %v7310_v13  ;;  %2702 = vmatpush.msra.mxu1 %v7312_v23  ;;  %v2396_v25 = vmul.f32 0.2, %v2394_v45  ;;  %vm2395_vm11 = vcmp.ge.f32.partialorder %v2394_v45, 0.0 }
 0x4bf   :  { %3243 = vmatpush.msrb.mxu2 %v7484_v53  ;;  %3284 = vmatpush.msra.mxu0 %v7486_v48 }
 0x4c0   :  { %2662 = vmatpush.msrb.mxu3 %v7320_v51  ;;  %2703 = vmatpush.msra.mxu1 %v7322_v17 }
 0x4c1   :  { %3244 = vmatpush.msrb.mxu2 %v7492_v14  ;;  %3285 = vmatpush.msra.mxu0 %v7494_v55 }
 0x4c2   :  { %2663 = vmatpush.msrb.mxu3 %v7332_v35  ;;  %2704 = vmatpush.msra.mxu1 %v7334_v57 }
 0x4c3   :  { %3245 = vmatpush.msrb.mxu2 %v7500_v27  ;;  %3286 = vmatpush.msra.mxu0 %v7502_v5 }
 0x4c4   :  { %2664 = vmatpush.msrb.mxu3 %v7347_v36  ;;  %2705 = vmatpush.msra.mxu1 %v7349_v6 }
 0x4c5   :  { %3246 = vmatpush.msrb.mxu2 %v7508_v33  ;;  %3287 = vmatpush.msra.mxu0 %v7510_v8 }
 0x4c6   :  { %2665 = vmatpush.msrb.mxu3 %v7363_v43  ;;  %2706 = vmatpush.msra.mxu1 %v7365_v21 }
 0x4c7   :  { %3247 = vmatpush.msrb.mxu2 %v7516_v52  ;;  %3288 = vmatpush.msra.mxu0 %v7518_v56 }
 0x4c8   :  { %3248 = vmatmul.f32.vlgmr.msrb.gmra.mxu2 %v9683_v38  ;;  %3289 = vmatmul.f32.vlgmr.msra.gmra.mxu0 %v9683_v38  ;;  %v9686_v38 = vld [vmem:[#allocation46_spill] sm:$0xff] }
 0x4c9   :  { %3314 = vmatpush.msra.mxu2 %v7324_v26  ;;  %3355 = vmatpush.msrb.mxu0 %v7326_v62 }
 0x4ca   :  { %2666 = vmatpush.msrb.mxu3 %v7376_v34  ;;  %2707 = vmatpush.msra.mxu1 %v7378_v54 }
 0x4cb   :  { %3315 = vmatpush.msra.mxu2 %v7341_v61  ;;  %3356 = vmatpush.msrb.mxu0 %v7343_v11 }
 0x4cc   :  { %2667 = vmatpush.msrb.mxu3 %v7391_v3  ;;  %2708 = vmatpush.msra.mxu1 %v7393_v40 }
 0x4cd   :  { %3316 = vmatpush.msra.mxu2 %v7355_v0  ;;  %3357 = vmatpush.msrb.mxu0 %v7357_v49 }
 0x4ce   :  { %2668 = vmatpush.msrb.mxu3 %v9660_v31  ;;  %2709 = vmatpush.msra.mxu1 %v9685_v10  ;;  %v9689_v10 = vld [vmem:[#allocation56_spill] sm:$0xff] }
 0x4cf   :  { %3317 = vmatpush.msra.mxu2 %v7368_v4  ;;  %3358 = vmatpush.msrb.mxu0 %v7370_v15 }
 0x4d0   :  { %2669 = vmatpush.msrb.mxu3 %v9686_v38  ;;  %2710 = vmatpush.msra.mxu1 %v9687_v30  ;;  %v9692_v30 = vld [vmem:[#allocation47_spill] sm:$0xff] }
 0x4d1   :  { %3318 = vmatpush.msra.mxu2 %v7383_v47  ;;  %3359 = vmatpush.msrb.mxu0 %v7385_v63 }
 0x4d2   :  { %2670 = vmatpush.msrb.mxu3 %v9666_v7  ;;  %2711 = vmatpush.msra.mxu1 %v9688_v28  ;;  %v2397_v28 = vsel %vm2395_vm11, %v2394_v45, %v2396_v25  ;;  %v7904_v45 = vld [vmem:[#allocation2 + $0x8e8] sm:$0xff] }
 0x4d3   :  { %3319 = vmatpush.msra.mxu2 %v7402_v59  ;;  %3360 = vmatpush.msrb.mxu0 %v7404_v41 }
 0x4d4   :  { %2671 = vmatpush.msrb.mxu3 %v9689_v10  ;;  %2712 = vmatpush.msra.mxu1 %v9690_v37 }
 0x4d5   :  { %3320 = vmatpush.msra.mxu2 %v7419_v16  ;;  %3361 = vmatpush.msrb.mxu0 %v9659_v18 }
 0x4d6   :  { %2672 = vmatpush.msrb.mxu3 %v9691_v50  ;;  %2713 = vmatpush.msra.mxu1 %v9692_v30 }
 0x4d7   :  { %3321 = vmatpush.msra.mxu2 %v9662_v2  ;;  %3362 = vmatpush.msrb.mxu0 %v9663_v39 }
 0x4d8   :  { %2673 = vmatmul.f32.vlgmr.msrb.gmra.mxu3 %v2397_v28  ;;  %2714 = vmatmul.f32.vlgmr.msra.gmra.mxu1 %v2397_v28 }
 0x4d9   :  { %2739 = vmatpush.msra.mxu3 %v9680_v12  ;;  %2780 = vmatpush.msrb.mxu1 %v9681_v44  ;;  %v7892_v12 = vld [vmem:[#allocation2 + $0x970] sm:$0xff] }
 0x4da   :  { %3322 = vmatpush.msra.mxu2 %v7447_v19  ;;  %3363 = vmatpush.msrb.mxu0 %v7449_v42 }
 0x4db   :  { %2740 = vmatpush.msra.mxu3 %v7286_v29  ;;  %2781 = vmatpush.msrb.mxu1 %v9682_v22  ;;  %v9693_v29 = vld [vmem:[#allocation26_spill] sm:$0xff] }
 0x4dc   :  { %3323 = vmatpush.msra.mxu2 %v7463_v58  ;;  %3364 = vmatpush.msrb.mxu0 %v9668_v20 }
 0x4dd   :  { %2741 = vmatpush.msra.mxu3 %v7294_v32  ;;  %2782 = vmatpush.msrb.mxu1 %v7296_v9  ;;  %v9694_v32 = vld [vmem:[#allocation44_spill] sm:$0xff]  ;;  %v9695_v9 = vld [vmem:[#allocation49_spill] sm:$0xff] }
 0x4de   :  { %3324 = vmatpush.msra.mxu2 %v9671_v46  ;;  %3365 = vmatpush.msrb.mxu0 %v9672_v1 }
 0x4df   :  { %2742 = vmatpush.msra.mxu3 %v7302_v24  ;;  %2783 = vmatpush.msrb.mxu1 %v7304_v60  ;;  %v9696_v24 = vld [vmem:[#allocation54_spill] sm:$0xff]  ;;  %v9697_v60 = vld [vmem:[#allocation52_spill] sm:$0xff] }
 0x4e0   :  { %3325 = vmatpush.msra.mxu2 %v7484_v53  ;;  %3366 = vmatpush.msrb.mxu0 %v7486_v48  ;;  %vm2400_vm12 = vcmp.ge.f32.partialorder %v9697_v60, 0.0 }
 0x4e1   :  { %2743 = vmatpush.msra.mxu3 %v7310_v13  ;;  %2784 = vmatpush.msrb.mxu1 %v7312_v23  ;;  %v2401_v13 = vmul.f32 0.2, %v9697_v60 }
 0x4e2   :  { %3326 = vmatpush.msra.mxu2 %v7492_v14  ;;  %3367 = vmatpush.msrb.mxu0 %v7494_v55 }
 0x4e3   :  { %2744 = vmatpush.msra.mxu3 %v7320_v51  ;;  %2785 = vmatpush.msrb.mxu1 %v7322_v17  ;;  %v2402_v23 = vsel %vm2400_vm12, %v9697_v60, %v2401_v13  ;;  %v9698_v51 = vld [vmem:[#allocation29_spill] sm:$0xff]  ;;  %v9699_v17 = vld [vmem:[#allocation28_spill] sm:$0xff] }
 0x4e4   :  { %3327 = vmatpush.msra.mxu2 %v7500_v27  ;;  %3368 = vmatpush.msrb.mxu0 %v7502_v5 }
 0x4e5   :  { %2745 = vmatpush.msra.mxu3 %v7332_v35  ;;  %2786 = vmatpush.msrb.mxu1 %v7334_v57  ;;  %v5292_v35 = vld [vmem:[#allocation2 + $0xa78] sm:$0xff]  ;;  %v5293_v57 = vld [vmem:[#allocation2 + $0x9f0] sm:$0xff] }
 0x4e6   :  { %3328 = vmatpush.msra.mxu2 %v7508_v33  ;;  %3369 = vmatpush.msrb.mxu0 %v7510_v8 }
 0x4e7   :  { %2746 = vmatpush.msra.mxu3 %v7347_v36  ;;  %2787 = vmatpush.msrb.mxu1 %v7349_v6  ;;  %v5295_v36 = vld [vmem:[#allocation2 + $0x9e8] sm:$0xff] }
 0x4e8   :  { %3329 = vmatpush.msra.mxu2 %v7516_v52  ;;  %3370 = vmatpush.msrb.mxu0 %v7518_v56  ;;  %v5296_v6 = vld [vmem:[#allocation2 + $0xa68] sm:$0xff] }
 0x4e9   :  { %3330 = vmatmul.f32.vlgmr.msra.gmra.mxu2 %v9693_v29  ;;  %3371 = vmatmul.f32.vlgmr.msrb.gmra.mxu0 %v9693_v29 }
 0x4ea   :  { %3396 = vmatpush.msrb.mxu2 %v7324_v26  ;;  %3437 = vmatpush.msra.mxu0 %v7326_v62 }
 0x4eb   :  { %2747 = vmatpush.msra.mxu3 %v7363_v43  ;;  %2788 = vmatpush.msrb.mxu1 %v7365_v21  ;;  %v2489_v43 = vpop.f32.mrf.mxu2 }
 0x4ec   :  { %3397 = vmatpush.msrb.mxu2 %v7341_v61  ;;  %3438 = vmatpush.msra.mxu0 %v7343_v11 }
 0x4ed   :  { %2748 = vmatpush.msra.mxu3 %v7376_v34  ;;  %2789 = vmatpush.msrb.mxu1 %v7378_v54 }
 0x4ee   :  { %3398 = vmatpush.msrb.mxu2 %v7355_v0  ;;  %3439 = vmatpush.msra.mxu0 %v7357_v49 }
 0x4ef   :  { %2749 = vmatpush.msra.mxu3 %v7391_v3  ;;  %2790 = vmatpush.msrb.mxu1 %v7393_v40 }
 0x4f0   :  { %3399 = vmatpush.msrb.mxu2 %v7368_v4  ;;  %3440 = vmatpush.msra.mxu0 %v7370_v15 }
 0x4f1   :  { %2750 = vmatpush.msra.mxu3 %v9660_v31  ;;  %2791 = vmatpush.msrb.mxu1 %v9694_v32 }
 0x4f2   :  { %3400 = vmatpush.msrb.mxu2 %v7383_v47  ;;  %3441 = vmatpush.msra.mxu0 %v7385_v63 }
 0x4f3   :  { %2751 = vmatpush.msra.mxu3 %v9686_v38  ;;  %2792 = vmatpush.msrb.mxu1 %v9695_v9  ;;  %v7906_v38 = vld [vmem:[#allocation2 + $0x968] sm:$0xff] }
 0x4f4   :  { %3401 = vmatpush.msrb.mxu2 %v7402_v59  ;;  %3442 = vmatpush.msra.mxu0 %v7404_v41 }
 0x4f5   :  { %2752 = vmatpush.msra.mxu3 %v9666_v7  ;;  %2793 = vmatpush.msrb.mxu1 %v9696_v24  ;;  %v7879_v7 = vld [vmem:[#allocation2 + $0x8f8] sm:$0xff]  ;;  %v7922_v24 = vld [vmem:[#allocation2 + $0x8e0] sm:$0xff] }
 0x4f6   :  { %3402 = vmatpush.msrb.mxu2 %v7419_v16  ;;  %3443 = vmatpush.msra.mxu0 %v9659_v18 }
 0x4f7   :  { %2753 = vmatpush.msra.mxu3 %v9689_v10  ;;  %2794 = vmatpush.msrb.mxu1 %v9690_v37 }
 0x4f8   :  { %3403 = vmatpush.msrb.mxu2 %v9662_v2  ;;  %3444 = vmatpush.msra.mxu0 %v9663_v39 }
 0x4f9   :  { %2754 = vmatpush.msra.mxu3 %v9691_v50  ;;  %2795 = vmatpush.msrb.mxu1 %v9692_v30  ;;  %v7915_v50 = vld [vmem:[#allocation2 + $0xb78] sm:$0xff] }
 0x4fa   :  { %2755 = vmatmul.f32.vlgmr.msra.gmra.mxu3 %v2402_v23  ;;  %2796 = vmatmul.f32.vlgmr.msrb.gmra.mxu1 %v2402_v23  ;;  %v9706_v23 = vld [vmem:[#allocation30_spill] sm:$0xff] }
 0x4fb   :  { %3404 = vmatpush.msrb.mxu2 %v7447_v19  ;;  %3445 = vmatpush.msra.mxu0 %v7449_v42 }
 0x4fc   :  { %3087 = vmatpush.msrb.mxu3 %v7879_v7 }
 0x4fd   :  { %3405 = vmatpush.msrb.mxu2 %v7463_v58  ;;  %3446 = vmatpush.msra.mxu0 %v9668_v20 }
 0x4ff   :  { %3406 = vmatpush.msrb.mxu2 %v9671_v46  ;;  %3447 = vmatpush.msra.mxu0 %v9672_v1 }
 0x501   :  { %3407 = vmatpush.msrb.mxu2 %v7484_v53  ;;  %3448 = vmatpush.msra.mxu0 %v7486_v48 }
 0x503   :  { %3408 = vmatpush.msrb.mxu2 %v7492_v14  ;;  %3449 = vmatpush.msra.mxu0 %v7494_v55 }
 0x505   :  { %3409 = vmatpush.msrb.mxu2 %v7500_v27  ;;  %3450 = vmatpush.msra.mxu0 %v7502_v5 }
 0x507   :  { %3410 = vmatpush.msrb.mxu2 %v7508_v33  ;;  %3451 = vmatpush.msra.mxu0 %v7510_v8 }
 0x509   :  { %3411 = vmatpush.msrb.mxu2 %v7516_v52  ;;  %3452 = vmatpush.msra.mxu0 %v7518_v56 }
 0x50a   :  { %3412 = vmatmul.f32.vlgmr.msrb.gmra.mxu2 %v9698_v51  ;;  %3453 = vmatmul.f32.vlgmr.msra.gmra.mxu0 %v9698_v51  ;;  %v7930_v51 = vld [vmem:[#allocation2 + $0xb70] sm:$0xff] }
 0x50b   :  { %3478 = vmatpush.msra.mxu2 %v7324_v26  ;;  %3519 = vmatpush.msrb.mxu0 %v7326_v62 }
 0x50d   :  { %3479 = vmatpush.msra.mxu2 %v7341_v61  ;;  %3520 = vmatpush.msrb.mxu0 %v7343_v11 }
 0x50f   :  { %3480 = vmatpush.msra.mxu2 %v7355_v0  ;;  %3521 = vmatpush.msrb.mxu0 %v7357_v49 }
 0x511   :  { %3481 = vmatpush.msra.mxu2 %v7368_v4  ;;  %3522 = vmatpush.msrb.mxu0 %v7370_v15 }
 0x513   :  { %3482 = vmatpush.msra.mxu2 %v7383_v47  ;;  %3523 = vmatpush.msrb.mxu0 %v7385_v63 }
 0x515   :  { %3483 = vmatpush.msra.mxu2 %v7402_v59  ;;  %3524 = vmatpush.msrb.mxu0 %v7404_v41 }
 0x517   :  { %3484 = vmatpush.msra.mxu2 %v7419_v16  ;;  %3525 = vmatpush.msrb.mxu0 %v9659_v18 }
 0x519   :  { %3485 = vmatpush.msra.mxu2 %v9662_v2  ;;  %3526 = vmatpush.msrb.mxu0 %v9663_v39 }
 0x51b   :  { %3486 = vmatpush.msra.mxu2 %v7447_v19  ;;  %3527 = vmatpush.msrb.mxu0 %v7449_v42 }
 0x51d   :  { %3487 = vmatpush.msra.mxu2 %v7463_v58  ;;  %3528 = vmatpush.msrb.mxu0 %v9668_v20 }
 0x51f   :  { %3488 = vmatpush.msra.mxu2 %v9671_v46  ;;  %3529 = vmatpush.msrb.mxu0 %v9672_v1 }
 0x521   :  { %3489 = vmatpush.msra.mxu2 %v7484_v53  ;;  %3530 = vmatpush.msrb.mxu0 %v7486_v48 }
 0x523   :  { %3490 = vmatpush.msra.mxu2 %v7492_v14  ;;  %3531 = vmatpush.msrb.mxu0 %v7494_v55 }
 0x525   :  { %3491 = vmatpush.msra.mxu2 %v7500_v27  ;;  %3532 = vmatpush.msrb.mxu0 %v7502_v5 }
 0x527   :  { %3492 = vmatpush.msra.mxu2 %v7508_v33  ;;  %3533 = vmatpush.msrb.mxu0 %v7510_v8 }
 0x529   :  { %3493 = vmatpush.msra.mxu2 %v7516_v52  ;;  %3534 = vmatpush.msrb.mxu0 %v7518_v56 }
 0x52a   :  { %3494 = vmatmul.f32.vlgmr.msra.gmra.mxu2 %v9699_v17  ;;  %3535 = vmatmul.f32.vlgmr.msrb.gmra.mxu0 %v9699_v17 }
 0x52b   :  { %3560 = vmatpush.msrb.mxu2 %v7324_v26  ;;  %3601 = vmatpush.msra.mxu0 %v7326_v62  ;;  %v9700_v26 = vld [vmem:[#allocation31_spill] sm:$0xff] }
 0x52c   :  { %v5291_v62 = vld [vmem:[#allocation2 + $0x9f8] sm:$0xff] }
 0x52d   :  { %3561 = vmatpush.msrb.mxu2 %v7341_v61  ;;  %3602 = vmatpush.msra.mxu0 %v7343_v11  ;;  %v5294_v61 = vld [vmem:[#allocation2 + $0xa70] sm:$0xff] }
 0x52f   :  { %3562 = vmatpush.msrb.mxu2 %v7355_v0  ;;  %3603 = vmatpush.msra.mxu0 %v7357_v49  ;;  %v5297_v0 = vld [vmem:[#allocation2 + $0x9e0] sm:$0xff]  ;;  %v2551_v21 = vpop.f32.mrf.mxu1 }
 0x530   :  { %v5298_v49 = vld [vmem:[#allocation2 + $0xa60] sm:$0xff] }
 0x531   :  { %3563 = vmatpush.msrb.mxu2 %v7368_v4  ;;  %3604 = vmatpush.msra.mxu0 %v7370_v15  ;;  %v2531_v4 = vpop.f32.mrf.mxu0  ;;  %v7850_v15 = vld [vmem:[#allocation4 + $0x15] ss:$0 sm:$0xff] }
 0x532   :  { %v2552_v34 = vadd.f32 %v2551_v21, %v2531_v4 }
 0x533   :  { %3564 = vmatpush.msrb.mxu2 %v7383_v47  ;;  %3605 = vmatpush.msra.mxu0 %v7385_v63 }
 0x534   :  { %v7857_v3 = vadd.f32 %v7850_v15, %v2552_v34  ;;  %v7958_v34 = vld [vmem:[#allocation2 + $0xb60] sm:$0xff] }
 0x535   :  { %3565 = vmatpush.msrb.mxu2 %v7402_v59  ;;  %3606 = vmatpush.msra.mxu0 %v7404_v41  ;;  %v2509_v11 = vpop.f32.mrf.mxu3 }
 0x536   :  { %9701 = vst [vmem:[#allocation33_spill] sm:$0xff] %v7857_v3 }
 0x537   :  { %3566 = vmatpush.msrb.mxu2 %v7419_v16  ;;  %3607 = vmatpush.msra.mxu0 %v9659_v18 }
 0x539   :  { %3567 = vmatpush.msrb.mxu2 %v9662_v2  ;;  %3608 = vmatpush.msra.mxu0 %v9663_v39 }
 0x53b   :  { %3568 = vmatpush.msrb.mxu2 %v7447_v19  ;;  %3609 = vmatpush.msra.mxu0 %v7449_v42 }
 0x53d   :  { %3569 = vmatpush.msrb.mxu2 %v7463_v58  ;;  %3610 = vmatpush.msra.mxu0 %v9668_v20 }
 0x53f   :  { %3570 = vmatpush.msrb.mxu2 %v9671_v46  ;;  %3611 = vmatpush.msra.mxu0 %v9672_v1  ;;  %v2592_v54 = vpop.f32.mrf.mxu3 }
 0x541   :  { %3571 = vmatpush.msrb.mxu2 %v7484_v53  ;;  %3612 = vmatpush.msra.mxu0 %v7486_v48 }
 0x543   :  { %3572 = vmatpush.msrb.mxu2 %v7492_v14  ;;  %3613 = vmatpush.msra.mxu0 %v7494_v55 }
 0x545   :  { %3573 = vmatpush.msrb.mxu2 %v7500_v27  ;;  %3614 = vmatpush.msra.mxu0 %v7502_v5 }
 0x547   :  { %3574 = vmatpush.msrb.mxu2 %v7508_v33  ;;  %3615 = vmatpush.msra.mxu0 %v7510_v8 }
 0x549   :  { %3575 = vmatpush.msrb.mxu2 %v7516_v52  ;;  %3616 = vmatpush.msra.mxu0 %v7518_v56 }
 0x54a   :  { %3576 = vmatmul.f32.vlgmr.msrb.gmra.mxu2 %v9700_v26  ;;  %3617 = vmatmul.f32.vlgmr.msra.gmra.mxu0 %v9700_v26  ;;  %v7938_v26 = vld [vmem:[#allocation2 + $0x958] sm:$0xff] }
 0x54b   :  { %3642 = vmatpush.msra.mxu2 %v5291_v62  ;;  %3683 = vmatpush.msrb.mxu0 %v5292_v35 }
 0x54d   :  { %3643 = vmatpush.msra.mxu2 %v5293_v57  ;;  %3684 = vmatpush.msrb.mxu0 %v5294_v61  ;;  %v7942_v61 = vld [vmem:[#allocation2 + $0xb68] sm:$0xff] }
 0x54f   :  { %3644 = vmatpush.msra.mxu2 %v5295_v36  ;;  %3685 = vmatpush.msrb.mxu0 %v5296_v6  ;;  %v7951_v6 = vld [vmem:[#allocation2 + $0x8d0] sm:$0xff] }
 0x551   :  { %3645 = vmatpush.msra.mxu2 %v5297_v0  ;;  %3686 = vmatpush.msrb.mxu0 %v5298_v49  ;;  %v7953_v0 = vld [vmem:[#allocation2 + $0x950] sm:$0xff] }
 0x553   :  { %3646 = vmatpush.msra.mxu2 %v7383_v47  ;;  %3687 = vmatpush.msrb.mxu0 %v7385_v63  ;;  %v2572_v47 = vpop.f32.mrf.mxu2  ;;  %v2510_v63 = vadd.f32 %v2509_v11, %v2489_v43 }
 0x554   :  { %v2593_v40 = vadd.f32 %v2592_v54, %v2572_v47 }
 0x555   :  { %3647 = vmatpush.msra.mxu2 %v7402_v59  ;;  %3688 = vmatpush.msrb.mxu0 %v7404_v41  ;;  %v7864_v59 = vadd.f32 %v7850_v15, %v2510_v63  ;;  %v2633_v41 = vpop.f32.mrf.mxu1 }
 0x557   :  { %3648 = vmatpush.msra.mxu2 %v7419_v16  ;;  %3689 = vmatpush.msrb.mxu0 %v9659_v18  ;;  %9702 = vst [vmem:[#allocation32_spill] sm:$0xff] %v7864_v59  ;;  %v2824_v16 = vmul.f32 %v7857_v3, %v7857_v3  ;;  %v2613_v18 = vpop.f32.mrf.mxu0 }
 0x559   :  { %3649 = vmatpush.msra.mxu2 %v9662_v2  ;;  %3690 = vmatpush.msrb.mxu0 %v9663_v39  ;;  %v2808_v2 = vmul.f32 %v7864_v59, %v7864_v59  ;;  %v2634_v39 = vadd.f32 %v2633_v41, %v2613_v18  ;;  %v7967_v41 = vld [vmem:[#allocation2 + $0x948] sm:$0xff] }
 0x55b   :  { %3650 = vmatpush.msra.mxu2 %v7447_v19  ;;  %3691 = vmatpush.msrb.mxu0 %v7449_v42  ;;  %v2674_v19 = vpop.f32.mrf.mxu3  ;;  %v2816_v42 = vsel %vm421_vm0, %v7857_v3, 0.0  ;;  %v2654_v31 = vpop.f32.mrf.mxu2  ;;  %v7900_v22 = vadd.f32 %v7850_v15, %v2634_v39  ;;  %v8020_v3 = vld [vmem:[#allocation2 + $0x8a0] sm:$0xff] }
 0x55c   :  { %v2817_v30 = vrot.slane %v2816_v42, 4  ;;  %9712 = vst [vmem:[#allocation58_spill] sm:$0xff] %v8020_v3 }
 0x55d   :  { %3651 = vmatpush.msra.mxu2 %v7463_v58  ;;  %3692 = vmatpush.msrb.mxu0 %v9668_v20  ;;  %v7873_v58 = vadd.f32 %v7850_v15, %v2593_v40  ;;  %v7881_v20 = vld [vmem:[#allocation2 + $0x978] sm:$0xff]  ;;  %9704 = vst [vmem:[#allocation34_spill] sm:$0xff] %v7900_v22  ;;  %v2715_v10 = vpop.f32.mrf.mxu1  ;;  %v2858_v60 = vmul.f32 %v7900_v22, %v7900_v22  ;;  %v2850_v35 = vsel %vm421_vm0, %v7900_v22, 0.0  ;;  %v7965_v40 = vld [vmem:[#allocation2 + $0x8c8] sm:$0xff] }
 0x55e   :  { %3129 = vmatpush.msra.mxu1 %v7881_v20  ;;  %v2818_v37 = vadd.f32 %v2817_v30, %v2816_v42  ;;  %v2851_v47 = vrot.slane %v2850_v35, 4 }
 0x55f   :  { %3652 = vmatpush.msra.mxu2 %v9671_v46  ;;  %3693 = vmatpush.msrb.mxu0 %v9672_v1  ;;  %9703 = vst [vmem:[#allocation35_spill] sm:$0xff] %v7873_v58  ;;  %v2825_v46 = vsel %vm421_vm0, %v2824_v16, 0.0  ;;  %v2675_v1 = vadd.f32 %v2674_v19, %v2654_v31  ;;  %v2841_v44 = vmul.f32 %v7873_v58, %v7873_v58  ;;  %v2695_v25 = vpop.f32.mrf.mxu0  ;;  %v2859_v43 = vsel %vm421_vm0, %v2858_v60, 0.0  ;;  %v7969_v19 = vld [vmem:[#allocation2 + $0xb58] sm:$0xff] }
 0x560   :  { %3130 = vmatpush.msra.mxu1 %v7892_v12  ;;  %v2716_v9 = vadd.f32 %v2715_v10, %v2695_v25  ;;  %v2819_v62 = vrot.slane %v2818_v37, 2  ;;  %v2860_v31 = vrot.slane %v2859_v43, 4  ;;  %v2852_v10 = vadd.f32 %v2851_v47, %v2850_v35  ;;  %v8010_v47 = vld [vmem:[#allocation2 + $0x8a8] sm:$0xff] }
 0x561   :  { %3653 = vmatpush.msra.mxu2 %v7484_v53  ;;  %3694 = vmatpush.msrb.mxu0 %v7486_v48  ;;  %v2801_v53 = vsel %vm421_vm0, %v7864_v59, 0.0  ;;  %v7890_v48 = vld [vmem:[#allocation2 + $0x8f0] sm:$0xff]  ;;  %v2842_v32 = vsel %vm421_vm0, %v2841_v44, 0.0  ;;  %9709 = vst [vmem:[#allocation50_spill] sm:$0xff] %v8010_v47 }
 0x562   :  { %3088 = vmatpush.msrb.mxu3 %v7890_v48  ;;  %v2802_v28 = vrot.slane %v2801_v53, 4  ;;  %3131 = vmatpush.msra.mxu1 %v7906_v38  ;;  %v2843_v57 = vrot.slane %v2842_v32, 4  ;;  %v7947_v36 = vadd.f32 %v7850_v15, %v2716_v9  ;;  %v2820_v16 = vadd.f32 %v2819_v62, %v2818_v37 }
 0x563   :  { %3654 = vmatpush.msra.mxu2 %v7492_v14  ;;  %3695 = vmatpush.msrb.mxu0 %v7494_v55  ;;  %v2826_v14 = vrot.slane %v2825_v46, 4  ;;  %v2809_v55 = vsel %vm421_vm0, %v2808_v2, 0.0 }
 0x564   :  { %3089 = vmatpush.msrb.mxu3 %v7904_v45  ;;  %v2810_v29 = vrot.slane %v2809_v55, 4  ;;  %v2803_v17 = vadd.f32 %v2802_v28, %v2801_v53  ;;  %9707 = vst [vmem:[#allocation45_spill] sm:$0xff] %v7947_v36  ;;  %v2844_v18 = vadd.f32 %v2843_v57, %v2842_v32  ;;  %v2892_v2 = vmul.f32 %v7947_v36, %v7947_v36  ;;  %v7987_v28 = vld [vmem:[#allocation2 + $0x8b8] sm:$0xff]  ;;  %v7993_v32 = vld [vmem:[#allocation2 + $0xb48] sm:$0xff]  ;;  %v8004_v57 = vld [vmem:[#allocation2 + $0xb40] sm:$0xff] }
 0x565   :  { %3655 = vmatpush.msra.mxu2 %v7500_v27  ;;  %3696 = vmatpush.msrb.mxu0 %v7502_v5  ;;  %v2833_v27 = vsel %vm421_vm0, %v7873_v58, 0.0  ;;  %v7911_v5 = vadd.f32 %v7850_v15, %v2675_v1  ;;  %v7979_v1 = vld [vmem:[#allocation2 + $0x940] sm:$0xff]  ;;  %v2821_v25 = vrot.slane %v2820_v16, 1 }
 0x566   :  { %v2834_v13 = vrot.slane %v2833_v27, 4  ;;  %3090 = vmatpush.msrb.mxu3 %v7922_v24  ;;  %v2811_v11 = vadd.f32 %v2810_v29, %v2809_v55  ;;  %v2804_v54 = vrot.slane %v2803_v17, 2  ;;  %v2845_v37 = vrot.slane %v2844_v18, 2 }
 0x567   :  { %9705 = vst [vmem:[#allocation25_spill] sm:$0xff] %v7911_v5  ;;  %3656 = vmatpush.msra.mxu2 %v7508_v33  ;;  %3697 = vmatpush.msrb.mxu0 %v7510_v8  ;;  %v7924_v33 = vld [vmem:[#allocation2 + $0x960] sm:$0xff]  ;;  %v2827_v8 = vadd.f32 %v2826_v14, %v2825_v46  ;;  %v2867_v4 = vsel %vm421_vm0, %v7911_v5, 0.0  ;;  %v7981_v14 = vld [vmem:[#allocation2 + $0xb50] sm:$0xff]  ;;  %v2884_v29 = vsel %vm421_vm0, %v7947_v36, 0.0  ;;  %v2893_v60 = vsel %vm421_vm0, %v2892_v2, 0.0 }
 0x568   :  { %3132 = vmatpush.msra.mxu1 %v7924_v33  ;;  %v2835_v21 = vadd.f32 %v2834_v13, %v2833_v27  ;;  %v2812_v42 = vrot.slane %v2811_v11, 2  ;;  %v2868_v39 = vrot.slane %v2867_v4, 4  ;;  %v7977_v46 = vld [vmem:[#allocation2 + $0x8c0] sm:$0xff]  ;;  %v2805_v55 = vadd.f32 %v2804_v54, %v2803_v17  ;;  %v7989_v27 = vld [vmem:[#allocation2 + $0x938] sm:$0xff]  ;;  %v8002_v17 = vld [vmem:[#allocation2 + $0x930] sm:$0xff] }
 0x569   :  { %3657 = vmatpush.msra.mxu2 %v7516_v52  ;;  %3698 = vmatpush.msrb.mxu0 %v7518_v56  ;;  %v2875_v52 = vmul.f32 %v7911_v5, %v7911_v5  ;;  %v7936_v56 = vld [vmem:[#allocation2 + $0x8d8] sm:$0xff]  ;;  %v2828_v49 = vrot.slane %v2827_v8, 2  ;;  %9708 = vst [vmem:[#allocation43_spill] sm:$0xff] %v8002_v17  ;;  %v8022_v36 = vld [vmem:[#allocation2 + $0x920] sm:$0xff] }
 0x56a   :  { %3658 = vmatmul.f32.vlgmr.msra.gmra.mxu2 %v9706_v23  ;;  %3699 = vmatmul.f32.vlgmr.msrb.gmra.mxu0 %v9706_v23  ;;  %v2836_v53 = vrot.slane %v2835_v21, 2  ;;  %v2813_v9 = vadd.f32 %v2812_v42, %v2811_v11  ;;  %v2869_v13 = vadd.f32 %v2868_v39, %v2867_v4  ;;  %v8000_v23 = vld [vmem:[#allocation2 + $0x8b0] sm:$0xff]  ;;  %v2777_v11 = vpop.f32.mrf.mxu0  ;;  %v2885_v4 = vrot.slane %v2884_v29, 4  ;;  %v8012_v42 = vld [vmem:[#allocation2 + $0x928] sm:$0xff]  ;;  %9713 = vst [vmem:[#allocation36_spill] sm:$0xff] %v8022_v36 }
 0x56b   :  { %4132 = vmatpush.msrb.mxu2 %v7915_v50  ;;  %4193 = vmatpush.msra.mxu0 %v7915_v50  ;;  %v2876_v63 = vsel %vm421_vm0, %v2875_v52, 0.0  ;;  %v2829_v30 = vadd.f32 %v2828_v49, %v2827_v8  ;;  %v2861_v8 = vadd.f32 %v2860_v31, %v2859_v43  ;;  %v2806_v49 = vrot.slane %v2805_v55, 1  ;;  %9710 = vst [vmem:[#allocation51_spill] sm:$0xff] %v8012_v42  ;;  %v8014_v31 = vld [vmem:[#allocation2 + $0xb38] sm:$0xff] }
 0x56c   :  { %3091 = vmatpush.msrb.mxu3 %v7936_v56  ;;  %3133 = vmatpush.msra.mxu1 %v7938_v26  ;;  %v2877_v44 = vrot.slane %v2876_v63, 4  ;;  %v2837_v62 = vadd.f32 %v2836_v53, %v2835_v21  ;;  %v2853_v43 = vrot.slane %v2852_v10, 2  ;;  %v2846_v21 = vadd.f32 %v2845_v37, %v2844_v18  ;;  %9711 = vst [vmem:[#allocation53_spill] sm:$0xff] %v8014_v31 }
 0x56d   :  { %4133 = vmatpush.msrb.mxu2 %v7930_v51  ;;  %4194 = vmatpush.msra.mxu0 %v7930_v51  ;;  %v2830_v52 = vrot.slane %v2829_v30, 1  ;;  %v2822_v39 = vadd.f32 %v2821_v25, %v2820_v16  ;;  %v2814_v53 = vrot.slane %v2813_v9, 1  ;;  %v2870_v58 = vrot.slane %v2869_v13, 2 }
 0x56e   :  { %3092 = vmatpush.msrb.mxu3 %v7951_v6  ;;  %3134 = vmatpush.msra.mxu1 %v7953_v0  ;;  %v2878_v35 = vadd.f32 %v2877_v44, %v2876_v63  ;;  %v2894_v63 = vrot.slane %v2893_v60, 4  ;;  %v2862_v44 = vrot.slane %v2861_v8, 2  ;;  %v2838_v37 = vrot.slane %v2837_v62, 1 }
 0x56f   :  { %4134 = vmatpush.msrb.mxu2 %v7942_v61  ;;  %4195 = vmatpush.msra.mxu0 %v7942_v61  ;;  %v2831_v18 = vadd.f32 %v2830_v52, %v2829_v30  ;;  %v2807_v16 = vadd.f32 %v2806_v49, %v2805_v55  ;;  %v8031_v25 = vadd.f32 %v2853_v43, %v2852_v10  ;;  %v8035_v30 = vld [vmem:[#allocation2 + $0x898] sm:$0xff]  ;;  %v8043_v55 = vld [vmem:[#allocation2 + $0xb28] sm:$0xff]  ;;  %v2736_v10 = vpop.f32.mrf.mxu2 }
 0x570   :  { %3093 = vmatpush.msrb.mxu3 %v7965_v40  ;;  %3135 = vmatpush.msra.mxu1 %v7967_v41  ;;  %v2879_v5 = vrot.slane %v2878_v35, 2  ;;  %v2886_v22 = vadd.f32 %v2885_v4, %v2884_v29  ;;  %v8037_v52 = vld [vmem:[#allocation2 + $0x918] sm:$0xff]  ;;  %v2895_v59 = vadd.f32 %v2894_v63, %v2893_v60  ;;  %v2815_v29 = vadd.f32 %v2814_v53, %v2813_v9  ;;  %v8051_v63 = vld [vmem:[#allocation2 + $0x890] sm:$0xff] }
 0x571   :  { %4135 = vmatpush.msrb.mxu2 %v7958_v34  ;;  %4196 = vmatpush.msra.mxu0 %v7958_v34  ;;  %v8047_v49 = vadd.f32 %v2862_v44, %v2861_v8  ;;  %v2871_v43 = vadd.f32 %v2870_v58, %v2869_v13  ;;  %9715 = vst [vmem:[#allocation24_spill] sm:$0xff] %v8051_v63  ;;  %v8062_v44 = vld [vmem:[#allocation2 + $0x888] sm:$0xff] }
 0x572   :  { %3094 = vmatpush.msrb.mxu3 %v7977_v46  ;;  %3136 = vmatpush.msra.mxu1 %v7979_v1  ;;  %v2823_v58 = vadd.f32 %v2822_v39, %v2807_v16  ;;  %v2887_v8 = vrot.slane %v2886_v22, 2  ;;  %9718 = vst [vmem:[#allocation40_spill] sm:$0xff] %v8062_v44 }
 0x573   :  { %4136 = vmatpush.msrb.mxu2 %v7969_v19  ;;  %4197 = vmatpush.msra.mxu0 %v7969_v19  ;;  %v2864_v39 = vrot.slane %v8047_v49, 1  ;;  %v2872_v16 = vrot.slane %v2871_v43, 1 }
 0x574   :  { %3095 = vmatpush.msrb.mxu3 %v7987_v28  ;;  %3137 = vmatpush.msra.mxu1 %v7989_v27 }
 0x575   :  { %4137 = vmatpush.msrb.mxu2 %v7981_v14  ;;  %4198 = vmatpush.msra.mxu0 %v7981_v14 }
 0x576   :  { %3096 = vmatpush.msrb.mxu3 %v8000_v23  ;;  %3138 = vmatpush.msra.mxu1 %v8002_v17 }
 0x577   :  { %4138 = vmatpush.msrb.mxu2 %v7993_v32  ;;  %4199 = vmatpush.msra.mxu0 %v7993_v32  ;;  %v2797_v54 = vpop.f32.mrf.mxu1 }
 0x578   :  { %v2798_v2 = vadd.f32 %v2797_v54, %v2777_v11  ;;  %v8027_v54 = vld [vmem:[#allocation2 + $0xb30] sm:$0xff]  ;;  %3097 = vmatpush.msrb.mxu3 %v8010_v47  ;;  %3139 = vmatpush.msra.mxu1 %v8012_v42  ;;  %v2839_v47 = vadd.f32 %v2838_v37, %v2837_v62  ;;  %v2855_v62 = vrot.slane %v8031_v25, 1 }
 0x579   :  { %4139 = vmatpush.msrb.mxu2 %v8004_v57  ;;  %4200 = vmatpush.msra.mxu0 %v8004_v57 }
 0x57a   :  { %v8025_v11 = vadd.f32 %v7850_v15, %v2798_v2  ;;  %v2847_v2 = vrot.slane %v2846_v21, 1  ;;  %3098 = vmatpush.msrb.mxu3 %v8020_v3  ;;  %3140 = vmatpush.msra.mxu1 %v8022_v36  ;;  %v8056_v36 = vld [vmem:[#allocation2 + $0xb20] sm:$0xff] }
 0x57b   :  { %4140 = vmatpush.msrb.mxu2 %v8014_v31  ;;  %4201 = vmatpush.msra.mxu0 %v8014_v31  ;;  %v2880_v31 = vadd.f32 %v2879_v5, %v2878_v35  ;;  %9717 = vst [vmem:[#allocation41_spill] sm:$0xff] %v8056_v36  ;;  %v8064_v5 = vld [vmem:[#allocation2 + $0x908] sm:$0xff] }
 0x57c   :  { %9714 = vst [vmem:[#allocation48_spill] sm:$0xff] %v8025_v11  ;;  %v2918_v17 = vsel %vm421_vm0, %v8025_v11, 0.0  ;;  %v2926_v42 = vmul.f32 %v8025_v11, %v8025_v11  ;;  %v8053_v11 = vld [vmem:[#allocation2 + $0x910] sm:$0xff]  ;;  %3099 = vmatpush.msrb.mxu3 %v8035_v30  ;;  %3141 = vmatpush.msra.mxu1 %v8037_v52  ;;  %v2848_v35 = vadd.f32 %v2847_v2, %v2846_v21  ;;  %v8077_v21 = vld [vmem:[#allocation2 + $0x880] sm:$0xff] }
 0x57d   :  { %v2919_v4 = vrot.slane %v2918_v17, 4  ;;  %4141 = vmatpush.msrb.mxu2 %v8027_v54  ;;  %4202 = vmatpush.msra.mxu0 %v8027_v54  ;;  %v2756_v60 = vpop.f32.mrf.mxu3  ;;  %9716 = vst [vmem:[#allocation42_spill] sm:$0xff] %v8053_v11  ;;  %v8079_v2 = vld [vmem:[#allocation2 + $0x900] sm:$0xff] }
 0x57e   :  { %v2927_v3 = vsel %vm421_vm0, %v2926_v42, 0.0  ;;  %v2757_v9 = vadd.f32 %v2756_v60, %v2736_v10  ;;  %9719 = vst [vmem:[#allocation37_spill] sm:$0xff] %v8064_v5  ;;  %v2896_v42 = vrot.slane %v2895_v59, 2  ;;  %v8070_v10 = vld [vmem:[#allocation2 + $0xb18] sm:$0xff]  ;;  %3100 = vmatpush.msrb.mxu3 %v8051_v63  ;;  %3142 = vmatpush.msra.mxu1 %v8053_v11  ;;  %v2881_v60 = vrot.slane %v2880_v31, 1 }
 0x57f   :  { %v2920_v13 = vadd.f32 %v2919_v4, %v2918_v17  ;;  %v2928_v53 = vrot.slane %v2927_v3, 4  ;;  %4142 = vmatpush.msrb.mxu2 %v8043_v55  ;;  %4203 = vmatpush.msra.mxu0 %v8043_v55  ;;  %v2832_v17 = vadd.f32 %v2831_v18, %v2815_v29  ;;  %v8085_v29 = vld [vmem:[#allocation2 + $0xb10] sm:$0xff] }
 0x580   :  { %v8068_v37 = vadd.f32 %v7850_v15, %v2757_v9  ;;  %v2840_v15 = vadd.f32 %v2839_v47, %v2823_v58  ;;  %3101 = vmatpush.msrb.mxu3 %v8062_v44  ;;  %3143 = vmatpush.msra.mxu1 %v8064_v5  ;;  %v2856_v47 = vadd.f32 %v2855_v62, %v8031_v25 }
 0x581   :  { %v2929_v4 = vadd.f32 %v2928_v53, %v2927_v3  ;;  %4143 = vmatpush.msrb.mxu2 %v8056_v36  ;;  %4204 = vmatpush.msra.mxu0 %v8056_v36  ;;  %v2888_v3 = vadd.f32 %v2887_v8, %v2886_v22  ;;  %v2921_v53 = vrot.slane %v2920_v13, 2  ;;  %v2849_v58 = vadd.f32 %v2848_v35, %v2832_v17  ;;  %v8100_v35 = vld [vmem:[#allocation2 + $0xb00] sm:$0xff] }
 0x582   :  { %9720 = vst [vmem:[#allocation38_spill] sm:$0xff] %v8068_v37  ;;  %v2901_v9 = vsel %vm421_vm0, %v8068_v37, 0.0  ;;  %v2909_v18 = vmul.f32 %v8068_v37, %v8068_v37  ;;  %v2897_v63 = vadd.f32 %v2896_v42, %v2895_v59  ;;  %v8093_v37 = vld [vmem:[#allocation2 + $0xb08] sm:$0xff]  ;;  %3102 = vmatpush.msrb.mxu3 %v8077_v21  ;;  %3144 = vmatpush.msra.mxu1 %v8079_v2 }
 0x583   :  { %v2902_v11 = vrot.slane %v2901_v9, 4  ;;  %4144 = vmatpush.msrb.mxu2 %v8070_v10  ;;  %4205 = vmatpush.msra.mxu0 %v8070_v10  ;;  %v2873_v5 = vadd.f32 %v2872_v16, %v2871_v43  ;;  %v2930_v22 = vrot.slane %v2929_v4, 2  ;;  %v2865_v25 = vadd.f32 %v2864_v39, %v8047_v49 }
 0x584   :  { %v2910_v36 = vsel %vm421_vm0, %v2909_v18, 0.0  ;;  %v2857_v62 = vadd.f32 %v2856_v47, %v2840_v15  ;;  %v2882_v59 = vadd.f32 %v2881_v60, %v2880_v31  ;;  %3170 = vmatpush.msra.mxu3 %v7879_v7  ;;  %3211 = vmatpush.msrb.mxu1 %v7881_v20  ;;  %v2889_v42 = vrot.slane %v2888_v3, 1 }
 0x585   :  { %v2903_v8 = vadd.f32 %v2902_v11, %v2901_v9  ;;  %v2911_v44 = vrot.slane %v2910_v36, 4  ;;  %4145 = vmatpush.msrb.mxu2 %v8085_v29  ;;  %4206 = vmatpush.msra.mxu0 %v8085_v29  ;;  %v2922_v17 = vadd.f32 %v2921_v53, %v2920_v13  ;;  %v2898_v11 = vrot.slane %v2897_v63, 1 }
 0x586   :  { %v2866_v9 = vadd.f32 %v2865_v25, %v2849_v58  ;;  %3171 = vmatpush.msra.mxu3 %v7890_v48  ;;  %3212 = vmatpush.msrb.mxu1 %v7892_v12  ;;  %v2874_v31 = vadd.f32 %v2873_v5, %v2857_v62  ;;  %v2931_v49 = vadd.f32 %v2930_v22, %v2929_v4 }
 0x587   :  { %v2904_v43 = vrot.slane %v2903_v8, 2  ;;  %v2912_v16 = vadd.f32 %v2911_v44, %v2910_v36  ;;  %4146 = vmatpush.msrb.mxu2 %v8093_v37  ;;  %4207 = vmatpush.msra.mxu0 %v8093_v37  ;;  %v9721_v36 = vld [vmem:[#allocation18_spill] sm:$0xff]  ;;  %v9722_v44 = vld [vmem:[#allocation8_spill] sm:$0xff]  ;;  %v2890_v60 = vadd.f32 %v2889_v42, %v2888_v3  ;;  %v2923_v18 = vrot.slane %v2922_v17, 1 }
 0x588   :  { %v2883_v13 = vadd.f32 %v2882_v59, %v2866_v9  ;;  %v2899_v5 = vadd.f32 %v2898_v11, %v2897_v63  ;;  %3172 = vmatpush.msra.mxu3 %v7904_v45  ;;  %3213 = vmatpush.msrb.mxu1 %v7906_v38  ;;  %v2932_v4 = vrot.slane %v2931_v49, 1 }
 0x589   :  { %v2905_v39 = vadd.f32 %v2904_v43, %v2903_v8  ;;  %v2913_v15 = vrot.slane %v2912_v16, 2  ;;  %4147 = vmatpush.msrb.mxu2 %v8100_v35  ;;  %4208 = vmatpush.msra.mxu0 %v8100_v35  ;;  %v2891_v58 = vadd.f32 %v2890_v60, %v2874_v31  ;;  %v2924_v25 = vadd.f32 %v2923_v18, %v2922_v17  ;;  %v9727_v60 = vld [vmem:[#allocation58_spill] sm:$0xff]  ;;  %v9728_v18 = vld [vmem:[#allocation36_spill] sm:$0xff] }
 0x58a   :  { %4148 = vmatmul.f32.vlgmr.msrb.gmra.mxu2 %v9721_v36  ;;  %4209 = vmatmul.f32.vlgmr.msra.gmra.mxu0 %v9722_v44  ;;  %v2900_v3 = vadd.f32 %v2899_v5, %v2883_v13  ;;  %v2933_v59 = vadd.f32 %v2932_v4, %v2931_v49  ;;  %v9724_v13 = vld [vmem:[#allocation53_spill] sm:$0xff]  ;;  %v9725_v36 = vld [vmem:[#allocation50_spill] sm:$0xff]  ;;  %v9726_v44 = vld [vmem:[#allocation51_spill] sm:$0xff] }
 0x58b   :  { %v2906_v53 = vrot.slane %v2905_v39, 1  ;;  %v2914_v47 = vadd.f32 %v2913_v15, %v2912_v16  ;;  %4253 = vmatpush.msra.mxu2 %v7915_v50  ;;  %4313 = vmatpush.msrb.mxu0 %v7915_v50  ;;  %v9731_v5 = vld [vmem:[#allocation42_spill] sm:$0xff] }
 0x58c   :  { %3173 = vmatpush.msra.mxu3 %v7922_v24  ;;  %3214 = vmatpush.msrb.mxu1 %v7924_v33 }
 0x58d   :  { %v2907_v22 = vadd.f32 %v2906_v53, %v2905_v39  ;;  %v2915_v8 = vrot.slane %v2914_v47, 1  ;;  %4254 = vmatpush.msra.mxu2 %v7930_v51  ;;  %4314 = vmatpush.msrb.mxu0 %v7930_v51  ;;  %v9723_v39 = vld [vmem:[#allocation43_spill] sm:$0xff]  ;;  %v9729_v53 = vld [vmem:[#allocation41_spill] sm:$0xff] }
 0x58e   :  { %3174 = vmatpush.msra.mxu3 %v7936_v56  ;;  %3215 = vmatpush.msrb.mxu1 %v7938_v26 }
 0x58f   :  { %v2908_v62 = vadd.f32 %v2907_v22, %v2891_v58  ;;  %v2916_v63 = vadd.f32 %v2915_v8, %v2914_v47  ;;  %4255 = vmatpush.msra.mxu2 %v7942_v61  ;;  %4315 = vmatpush.msrb.mxu0 %v7942_v61  ;;  %v9730_v47 = vld [vmem:[#allocation24_spill] sm:$0xff]  ;;  %v9733_v8 = vld [vmem:[#allocation37_spill] sm:$0xff] }
 0x590   :  { %3175 = vmatpush.msra.mxu3 %v7951_v6  ;;  %3216 = vmatpush.msrb.mxu1 %v7953_v0  ;;  %v9732_v22 = vld [vmem:[#allocation40_spill] sm:$0xff] }
 0x591   :  { %v2917_v42 = vadd.f32 %v2916_v63, %v2900_v3  ;;  %v2925_v43 = vadd.f32 %v2924_v25, %v2908_v62  ;;  %4256 = vmatpush.msra.mxu2 %v7958_v34  ;;  %4316 = vmatpush.msrb.mxu0 %v7958_v34  ;;  %v9734_v63 = vld [vmem:[#allocation9_spill] sm:$0xff] }
 0x592   :  { %3176 = vmatpush.msra.mxu3 %v7965_v40  ;;  %3217 = vmatpush.msrb.mxu1 %v7967_v41 }
 0x593   :  { %v2934_v17 = vadd.f32 %v2933_v59, %v2917_v42  ;;  %v8128_v16 = vmul.f32 0.0625, %v2925_v43  ;;  %4257 = vmatpush.msra.mxu2 %v7969_v19  ;;  %4317 = vmatpush.msrb.mxu0 %v7969_v19  ;;  %v9735_v59 = vld [vmem:[#allocation10_spill] sm:$0xff] }
 0x594   :  { %3177 = vmatpush.msra.mxu3 %v7977_v46  ;;  %3218 = vmatpush.msrb.mxu1 %v7979_v1  ;;  %v2951_v43 = vld [vmem:[#allocation4 + $0x16] sm:$0x1] }
 0x595   :  { %v2936_v11 = vmul.f32 0.0625, %v2934_v17  ;;  %v2937_v9 = vmul.f32 %v8128_v16, %v8128_v16  ;;  %4258 = vmatpush.msra.mxu2 %v7981_v14  ;;  %4318 = vmatpush.msrb.mxu0 %v7981_v14 }
 0x596   :  { %3178 = vmatpush.msra.mxu3 %v7987_v28  ;;  %3219 = vmatpush.msrb.mxu1 %v7989_v27 }
 0x597   :  { %v2938_v31 = vsub.f32 %v2936_v11, %v2937_v9  ;;  %4259 = vmatpush.msra.mxu2 %v7993_v32  ;;  %4319 = vmatpush.msrb.mxu0 %v7993_v32  ;;  %v2953_v9 = vld [vmem:[#allocation4 + $0x17] sm:$0x1] }
 0x598   :  { %3179 = vmatpush.msra.mxu3 %v8000_v23  ;;  %3220 = vmatpush.msrb.mxu1 %v9723_v39 }
 0x599   :  { %v2939_v49 = vmax.f32 %v2938_v31, 0.0  ;;  %4260 = vmatpush.msra.mxu2 %v8004_v57  ;;  %4320 = vmatpush.msrb.mxu0 %v8004_v57 }
 0x59a   :  { %3180 = vmatpush.msra.mxu3 %v9725_v36  ;;  %3221 = vmatpush.msrb.mxu1 %v9726_v44 }
 0x59b   :  { %v2940_v15 = vadd.f32 1e-05, %v2939_v49  ;;  %4261 = vmatpush.msra.mxu2 %v9724_v13  ;;  %4321 = vmatpush.msrb.mxu0 %v9724_v13 }
 0x59c   :  { %3181 = vmatpush.msra.mxu3 %v9727_v60  ;;  %3222 = vmatpush.msrb.mxu1 %v9728_v18 }
 0x59d   :  { %5223 = vrsqrt.f32 %v2940_v15  ;;  %4262 = vmatpush.msra.mxu2 %v8027_v54  ;;  %4322 = vmatpush.msrb.mxu0 %v8027_v54  ;;  %vm2947_vm14 = vweird.f32 %v2940_v15 }
 0x59e   :  { %3182 = vmatpush.msra.mxu3 %v8035_v30  ;;  %3223 = vmatpush.msrb.mxu1 %v8037_v52 }
 0x59f   :  { %4263 = vmatpush.msra.mxu2 %v8043_v55  ;;  %4323 = vmatpush.msrb.mxu0 %v8043_v55 }
 0x5a0   :  { %3183 = vmatpush.msra.mxu3 %v9730_v47  ;;  %3224 = vmatpush.msrb.mxu1 %v9731_v5 }
 0x5a1   :  { %4264 = vmatpush.msra.mxu2 %v9729_v53  ;;  %4324 = vmatpush.msrb.mxu0 %v9729_v53 }
 0x5a2   :  { %3184 = vmatpush.msra.mxu3 %v9732_v22  ;;  %3225 = vmatpush.msrb.mxu1 %v9733_v8 }
 0x5a3   :  { %v5224_v4 = vpop.eup %5223  ;;  %4265 = vmatpush.msra.mxu2 %v8070_v10  ;;  %4325 = vmatpush.msrb.mxu0 %v8070_v10 }
 0x5a4   :  { %v2942_v58 = vmul.f32 %v5224_v4, %v2940_v15  ;;  %3185 = vmatpush.msra.mxu3 %v8077_v21  ;;  %3226 = vmatpush.msrb.mxu1 %v8079_v2  ;;  %vm2948_vm13 = vweird.f32 %v5224_v4 }
 0x5a5   :  { %4266 = vmatpush.msra.mxu2 %v8085_v29  ;;  %4326 = vmatpush.msrb.mxu0 %v8085_v29  ;;  %vm2949_vm15 = vmor %vm2947_vm14, %vm2948_vm13 }
 0x5a6   :  { %v2943_v3 = vmul.f32 %v5224_v4, %v2942_v58  ;;  %v9736_v58 = vld [vmem:[#allocation38_spill] sm:$0xff] }
 0x5a7   :  { %4267 = vmatpush.msra.mxu2 %v8093_v37  ;;  %4327 = vmatpush.msrb.mxu0 %v8093_v37 }
 0x5a8   :  { %v2944_v25 = vmul.f32 0.5, %v2943_v3 }
 0x5a9   :  { %4268 = vmatpush.msra.mxu2 %v8100_v35  ;;  %4328 = vmatpush.msrb.mxu0 %v8100_v35 }
 0x5aa   :  { %v2945_v62 = vsub.f32 1.5, %v2944_v25  ;;  %4269 = vmatmul.f32.vlgmr.msra.gmra.mxu2 %v9734_v63  ;;  %4329 = vmatmul.f32.vlgmr.msrb.gmra.mxu0 %v9735_v59  ;;  %v9739_v59 = vld [vmem:[#allocation34_spill] sm:$0xff] }
 0x5ab   :  { %4373 = vmatpush.msrb.mxu2 %v7915_v50  ;;  %4433 = vmatpush.msra.mxu0 %v7915_v50 }
 0x5ac   :  { %v2946_v42 = vmul.f32 %v5224_v4, %v2945_v62  ;;  %v9738_v62 = vld [vmem:[#allocation48_spill] sm:$0xff] }
 0x5ad   :  { %4374 = vmatpush.msrb.mxu2 %v7930_v51  ;;  %4434 = vmatpush.msra.mxu0 %v7930_v51 }
 0x5ae   :  { %v2950_v17 = vsel %vm2949_vm15, %v5224_v4, %v2946_v42 }
 0x5af   :  { %v2952_v11 = vmul.f32 %v2951_v43, %v2950_v17  ;;  %4375 = vmatpush.msrb.mxu2 %v7942_v61  ;;  %4435 = vmatpush.msra.mxu0 %v7942_v61  ;;  %v9740_v43 = vld [vmem:[#allocation25_spill] sm:$0xff] }
 0x5b1   :  { %v2954_v31 = vmul.f32 %v2952_v11, %v8128_v16  ;;  %v8185_v49 = vperm.slane %v2952_v11, 0  ;;  %4376 = vmatpush.msrb.mxu2 %v7958_v34  ;;  %4436 = vmatpush.msra.mxu0 %v7958_v34  ;;  %v9737_v16 = vld [vmem:[#allocation32_spill] sm:$0xff]  ;;  %v9741_v11 = vld [vmem:[#allocation45_spill] sm:$0xff] }
 0x5b3   :  { %v2955_v15 = vsub.f32 %v2953_v9, %v2954_v31  ;;  %v2988_v3 = vmul.f32 %v8185_v49, %v9736_v58  ;;  %4377 = vmatpush.msrb.mxu2 %v7969_v19  ;;  %4437 = vmatpush.msra.mxu0 %v7969_v19  ;;  %v2957_v25 = vmul.f32 %v8185_v49, %v9737_v16 }
 0x5b4   :  { %v2993_v63 = vmul.f32 %v8185_v49, %v9738_v62  ;;  %v2973_v42 = vmul.f32 %v8185_v49, %v9739_v59  ;;  %v2978_v17 = vmul.f32 %v8185_v49, %v9740_v43  ;;  %v2983_v9 = vmul.f32 %v8185_v49, %v9741_v11 }
 0x5b5   :  { %v8193_v4 = vperm.slane %v2955_v15, 0  ;;  %4378 = vmatpush.msrb.mxu2 %v7981_v14  ;;  %4438 = vmatpush.msra.mxu0 %v7981_v14 }
 0x5b7   :  { %4379 = vmatpush.msrb.mxu2 %v7993_v32  ;;  %4439 = vmatpush.msra.mxu0 %v7993_v32  ;;  %v2959_v31 = vadd.f32 %v8193_v4, %v2957_v25  ;;  %v8211_v15 = vadd.f32 %v2973_v42, %v8193_v4  ;;  %v8214_v58 = vadd.f32 %v2978_v17, %v8193_v4  ;;  %v9742_v42 = vld [vmem:[#allocation33_spill] sm:$0xff] }
 0x5b8   :  { %v8217_v16 = vadd.f32 %v2983_v9, %v8193_v4  ;;  %v8220_v62 = vadd.f32 %v2988_v3, %v8193_v4  ;;  %v2963_v43 = vmul.f32 %v8185_v49, %v9742_v42  ;;  %v8232_v17 = vadd.f32 %v2993_v63, %v8193_v4  ;;  %v9743_v9 = vld [vmem:[#allocation11_spill] sm:$0xff] }
 0x5b9   :  { %4380 = vmatpush.msrb.mxu2 %v8004_v57  ;;  %4440 = vmatpush.msra.mxu0 %v8004_v57  ;;  %vm2960_vm1 = vcmp.ge.f32.partialorder %v2959_v31, 0.0  ;;  %v2961_v59 = vmul.f32 0.2, %v2959_v31  ;;  %vm2975_vm4 = vcmp.ge.f32.partialorder %v8211_v15, 0.0  ;;  %vm2980_vm5 = vcmp.ge.f32.partialorder %v8214_v58, 0.0 }
 0x5ba   :  { %v2964_v3 = vadd.f32 %v2963_v43, %v8193_v4  ;;  %v8420_v43 = vld [vmem:[#allocation2 + $0xb70] sm:$0xff]  ;;  %vm2985_vm6 = vcmp.ge.f32.partialorder %v8217_v16, 0.0  ;;  %vm2990_vm7 = vcmp.ge.f32.partialorder %v8220_v62, 0.0  ;;  %vm2995_vm8 = vcmp.ge.f32.partialorder %v8232_v17, 0.0 }
 0x5bb   :  { %4381 = vmatpush.msrb.mxu2 %v9724_v13  ;;  %4441 = vmatpush.msra.mxu0 %v9724_v13  ;;  %v2962_v25 = vsel %vm2960_vm1, %v2959_v31, %v2961_v59  ;;  %v9744_v31 = vld [vmem:[#allocation12_spill] sm:$0xff]  ;;  %v9745_v59 = vld [vmem:[#allocation35_spill] sm:$0xff] }
 0x5bc   :  { %3103 = vmatmul.f32.vlgmr.msrb.gmra.mxu3 %v2962_v25  ;;  %3145 = vmatmul.f32.vlgmr.msra.gmra.mxu1 %v2962_v25  ;;  %v2966_v11 = vmul.f32 0.2, %v2964_v3  ;;  %vm2965_vm2 = vcmp.ge.f32.partialorder %v2964_v3, 0.0  ;;  %v2968_v25 = vmul.f32 %v8185_v49, %v9745_v59  ;;  %v8569_v59 = vld [vmem:[#allocation2 + $0xb30] sm:$0xff] }
 0x5bd   :  { %4382 = vmatpush.msrb.mxu2 %v8027_v54  ;;  %4442 = vmatpush.msra.mxu0 %v8027_v54 }
 0x5be   :  { %3252 = vmatpush.msrb.mxu3 %v7879_v7  ;;  %3293 = vmatpush.msra.mxu1 %v7881_v20  ;;  %v2967_v63 = vsel %vm2965_vm2, %v2964_v3, %v2966_v11  ;;  %v2969_v42 = vadd.f32 %v2968_v25, %v8193_v4  ;;  %v8424_v3 = vld [vmem:[#allocation2 + $0x8d0] sm:$0xff]  ;;  %v2986_v25 = vmul.f32 0.2, %v8217_v16 }
 0x5bf   :  { %4383 = vmatpush.msrb.mxu2 %v8043_v55  ;;  %4443 = vmatpush.msra.mxu0 %v8043_v55  ;;  %v8427_v11 = vld [vmem:[#allocation2 + $0x950] sm:$0xff] }
 0x5c0   :  { %3253 = vmatpush.msrb.mxu3 %v7890_v48  ;;  %3294 = vmatpush.msra.mxu1 %v7892_v12  ;;  %v2971_v49 = vmul.f32 0.2, %v2969_v42  ;;  %vm2970_vm3 = vcmp.ge.f32.partialorder %v2969_v42, 0.0 }
 0x5c1   :  { %4384 = vmatpush.msrb.mxu2 %v9729_v53  ;;  %4444 = vmatpush.msra.mxu0 %v9729_v53 }
 0x5c2   :  { %3254 = vmatpush.msrb.mxu3 %v7904_v45  ;;  %3295 = vmatpush.msra.mxu1 %v7906_v38  ;;  %v2972_v4 = vsel %vm2970_vm3, %v2969_v42, %v2971_v49  ;;  %v8576_v42 = vld [vmem:[#allocation2 + $0xb28] sm:$0xff]  ;;  %v5343_v49 = vld [vmem:[#allocation2 + $0xb18] sm:$0xff] }
 0x5c3   :  { %4385 = vmatpush.msrb.mxu2 %v8070_v10  ;;  %4445 = vmatpush.msra.mxu0 %v8070_v10 }
 0x5c4   :  { %3255 = vmatpush.msrb.mxu3 %v7922_v24  ;;  %3296 = vmatpush.msra.mxu1 %v7924_v33 }
 0x5c5   :  { %4386 = vmatpush.msrb.mxu2 %v8085_v29  ;;  %4446 = vmatpush.msra.mxu0 %v8085_v29 }
 0x5c6   :  { %3186 = vmatmul.f32.vlgmr.msra.gmra.mxu3 %v2967_v63  ;;  %3227 = vmatmul.f32.vlgmr.msrb.gmra.mxu1 %v2967_v63  ;;  %v8430_v63 = vld [vmem:[#allocation2 + $0xb68] sm:$0xff] }
 0x5c7   :  { %4387 = vmatpush.msrb.mxu2 %v8093_v37  ;;  %4447 = vmatpush.msra.mxu0 %v8093_v37 }
 0x5c8   :  { %3256 = vmatpush.msrb.mxu3 %v7936_v56  ;;  %3297 = vmatpush.msra.mxu1 %v7938_v26 }
 0x5c9   :  { %4388 = vmatpush.msrb.mxu2 %v8100_v35  ;;  %4448 = vmatpush.msra.mxu0 %v8100_v35 }
 0x5ca   :  { %4389 = vmatmul.f32.vlgmr.msrb.gmra.mxu2 %v9743_v9  ;;  %4449 = vmatmul.f32.vlgmr.msra.gmra.mxu0 %v9744_v31  ;;  %v8436_v9 = vld [vmem:[#allocation2 + $0xb60] sm:$0xff]  ;;  %v8566_v31 = vld [vmem:[#allocation2 + $0x918] sm:$0xff] }
 0x5cb   :  { %4493 = vmatpush.msra.mxu2 %v7915_v50  ;;  %4553 = vmatpush.msrb.mxu0 %v7915_v50 }
 0x5cc   :  { %3257 = vmatpush.msrb.mxu3 %v7951_v6  ;;  %3298 = vmatpush.msra.mxu1 %v7953_v0 }
 0x5cd   :  { %4494 = vmatpush.msra.mxu2 %v7930_v51  ;;  %4554 = vmatpush.msrb.mxu0 %v7930_v51 }
 0x5ce   :  { %3258 = vmatpush.msrb.mxu3 %v7965_v40  ;;  %3299 = vmatpush.msra.mxu1 %v7967_v41 }
 0x5cf   :  { %4495 = vmatpush.msra.mxu2 %v7942_v61  ;;  %4555 = vmatpush.msrb.mxu0 %v7942_v61 }
 0x5d0   :  { %3259 = vmatpush.msrb.mxu3 %v7977_v46  ;;  %3300 = vmatpush.msra.mxu1 %v7979_v1 }
 0x5d1   :  { %4496 = vmatpush.msra.mxu2 %v7958_v34  ;;  %4556 = vmatpush.msrb.mxu0 %v7958_v34 }
 0x5d2   :  { %3260 = vmatpush.msrb.mxu3 %v7987_v28  ;;  %3301 = vmatpush.msra.mxu1 %v7989_v27 }
 0x5d3   :  { %4497 = vmatpush.msra.mxu2 %v7969_v19  ;;  %4557 = vmatpush.msrb.mxu0 %v7969_v19 }
 0x5d4   :  { %3261 = vmatpush.msrb.mxu3 %v8000_v23  ;;  %3302 = vmatpush.msra.mxu1 %v9723_v39 }
 0x5d5   :  { %4498 = vmatpush.msra.mxu2 %v7981_v14  ;;  %4558 = vmatpush.msrb.mxu0 %v7981_v14 }
 0x5d6   :  { %3262 = vmatpush.msrb.mxu3 %v9725_v36  ;;  %3303 = vmatpush.msra.mxu1 %v9726_v44 }
 0x5d7   :  { %4499 = vmatpush.msra.mxu2 %v7993_v32  ;;  %4559 = vmatpush.msrb.mxu0 %v7993_v32 }
 0x5d8   :  { %3263 = vmatpush.msrb.mxu3 %v9727_v60  ;;  %3304 = vmatpush.msra.mxu1 %v9728_v18 }
 0x5d9   :  { %4500 = vmatpush.msra.mxu2 %v8004_v57  ;;  %4560 = vmatpush.msrb.mxu0 %v8004_v57 }
 0x5da   :  { %3264 = vmatpush.msrb.mxu3 %v8035_v30  ;;  %3305 = vmatpush.msra.mxu1 %v8037_v52 }
 0x5db   :  { %4501 = vmatpush.msra.mxu2 %v9724_v13  ;;  %4561 = vmatpush.msrb.mxu0 %v9724_v13 }
 0x5dc   :  { %3265 = vmatpush.msrb.mxu3 %v9730_v47  ;;  %3306 = vmatpush.msra.mxu1 %v9731_v5 }
 0x5dd   :  { %4502 = vmatpush.msra.mxu2 %v8027_v54  ;;  %4562 = vmatpush.msrb.mxu0 %v8027_v54 }
 0x5de   :  { %3266 = vmatpush.msrb.mxu3 %v9732_v22  ;;  %3307 = vmatpush.msra.mxu1 %v9733_v8 }
 0x5df   :  { %4503 = vmatpush.msra.mxu2 %v8043_v55  ;;  %4563 = vmatpush.msrb.mxu0 %v8043_v55 }
 0x5e0   :  { %3267 = vmatpush.msrb.mxu3 %v8077_v21  ;;  %3308 = vmatpush.msra.mxu1 %v8079_v2 }
 0x5e1   :  { %4504 = vmatpush.msra.mxu2 %v9729_v53  ;;  %4564 = vmatpush.msrb.mxu0 %v9729_v53 }
 0x5e2   :  { %3268 = vmatmul.f32.vlgmr.msrb.gmra.mxu3 %v2972_v4  ;;  %3309 = vmatmul.f32.vlgmr.msra.gmra.mxu1 %v2972_v4  ;;  %v5344_v4 = vld [vmem:[#allocation2 + $0xb10] sm:$0xff] }
 0x5e3   :  { %3334 = vmatpush.msra.mxu3 %v7879_v7  ;;  %3375 = vmatpush.msrb.mxu1 %v7881_v20  ;;  %v9746_v7 = vld [vmem:[#allocation17_spill] sm:$0xff]  ;;  %v9747_v20 = vld [vmem:[#allocation20_spill] sm:$0xff] }
 0x5e4   :  { %4505 = vmatpush.msra.mxu2 %v8070_v10  ;;  %4565 = vmatpush.msrb.mxu0 %v8070_v10 }
 0x5e5   :  { %3335 = vmatpush.msra.mxu3 %v7890_v48  ;;  %3376 = vmatpush.msrb.mxu1 %v7892_v12  ;;  %v2976_v48 = vmul.f32 0.2, %v8211_v15 }
 0x5e6   :  { %4506 = vmatpush.msra.mxu2 %v8085_v29  ;;  %4566 = vmatpush.msrb.mxu0 %v8085_v29 }
 0x5e7   :  { %3336 = vmatpush.msra.mxu3 %v7904_v45  ;;  %3377 = vmatpush.msrb.mxu1 %v7906_v38  ;;  %v2977_v12 = vsel %vm2975_vm4, %v8211_v15, %v2976_v48  ;;  %v8376_v45 = vld [vmem:[#allocation2 + $0x8f8] sm:$0xff]  ;;  %v9755_v48 = vld [vmem:[#allocation22_spill] sm:$0xff] }
 0x5e8   :  { %4507 = vmatpush.msra.mxu2 %v8093_v37  ;;  %4567 = vmatpush.msrb.mxu0 %v8093_v37  ;;  %v8379_v38 = vld [vmem:[#allocation2 + $0x978] sm:$0xff] }
 0x5e9   :  { %3337 = vmatpush.msra.mxu3 %v7922_v24  ;;  %3378 = vmatpush.msrb.mxu1 %v7924_v33  ;;  %v8387_v24 = vld [vmem:[#allocation2 + $0x970] sm:$0xff]  ;;  %v8392_v33 = vld [vmem:[#allocation2 + $0x8e8] sm:$0xff]  ;;  %v8417_v15 = vld [vmem:[#allocation2 + $0x958] sm:$0xff] }
 0x5ea   :  { %4508 = vmatpush.msra.mxu2 %v8100_v35  ;;  %4568 = vmatpush.msrb.mxu0 %v8100_v35 }
 0x5eb   :  { %4509 = vmatmul.f32.vlgmr.msra.gmra.mxu2 %v9746_v7  ;;  %4569 = vmatmul.f32.vlgmr.msrb.gmra.mxu0 %v9747_v20  ;;  %v5346_v7 = vld [vmem:[#allocation2 + $0xb00] sm:$0xff]  ;;  %v9754_v20 = vld [vmem:[#allocation23_spill] sm:$0xff] }
 0x5ec   :  { %4613 = vmatpush.msrb.mxu2 %v7915_v50  ;;  %4673 = vmatpush.msra.mxu0 %v7915_v50  ;;  %v8384_v50 = vld [vmem:[#allocation2 + $0x8f0] sm:$0xff] }
 0x5ed   :  { %3338 = vmatpush.msra.mxu3 %v7936_v56  ;;  %3379 = vmatpush.msrb.mxu1 %v7938_v26  ;;  %v8400_v56 = vld [vmem:[#allocation2 + $0x8e0] sm:$0xff] }
 0x5ee   :  { %4614 = vmatpush.msrb.mxu2 %v7930_v51  ;;  %4674 = vmatpush.msra.mxu0 %v7930_v51  ;;  %v8395_v51 = vld [vmem:[#allocation2 + $0x968] sm:$0xff]  ;;  %v8403_v26 = vld [vmem:[#allocation2 + $0x960] sm:$0xff] }
 0x5ef   :  { %3339 = vmatpush.msra.mxu3 %v7951_v6  ;;  %3380 = vmatpush.msrb.mxu1 %v7953_v0  ;;  %v9749_v6 = vld [vmem:[#allocation19_spill] sm:$0xff] }
 0x5f0   :  { %4615 = vmatpush.msrb.mxu2 %v7942_v61  ;;  %4675 = vmatpush.msra.mxu0 %v7942_v61  ;;  %v9748_v61 = vld [vmem:[#allocation14_spill] sm:$0xff]  ;;  %v8410_v0 = vld [vmem:[#allocation2 + $0xb78] sm:$0xff] }
 0x5f1   :  { %3340 = vmatpush.msra.mxu3 %v7965_v40  ;;  %3381 = vmatpush.msrb.mxu1 %v7967_v41 }
 0x5f2   :  { %4616 = vmatpush.msrb.mxu2 %v7958_v34  ;;  %4676 = vmatpush.msra.mxu0 %v7958_v34  ;;  %v8414_v34 = vld [vmem:[#allocation2 + $0x8d8] sm:$0xff] }
 0x5f3   :  { %3341 = vmatpush.msra.mxu3 %v7977_v46  ;;  %3382 = vmatpush.msrb.mxu1 %v7979_v1 }
 0x5f4   :  { %4617 = vmatpush.msrb.mxu2 %v7969_v19  ;;  %4677 = vmatpush.msra.mxu0 %v7969_v19 }
 0x5f5   :  { %3342 = vmatpush.msra.mxu3 %v7987_v28  ;;  %3383 = vmatpush.msrb.mxu1 %v7989_v27 }
 0x5f6   :  { %4618 = vmatpush.msrb.mxu2 %v7981_v14  ;;  %4678 = vmatpush.msra.mxu0 %v7981_v14 }
 0x5f7   :  { %3343 = vmatpush.msra.mxu3 %v8000_v23  ;;  %3384 = vmatpush.msrb.mxu1 %v9723_v39 }
 0x5f8   :  { %4619 = vmatpush.msrb.mxu2 %v7993_v32  ;;  %4679 = vmatpush.msra.mxu0 %v7993_v32 }
 0x5f9   :  { %3344 = vmatpush.msra.mxu3 %v9725_v36  ;;  %3385 = vmatpush.msrb.mxu1 %v9726_v44 }
 0x5fa   :  { %4620 = vmatpush.msrb.mxu2 %v8004_v57  ;;  %4680 = vmatpush.msra.mxu0 %v8004_v57 }
 0x5fb   :  { %3345 = vmatpush.msra.mxu3 %v9727_v60  ;;  %3386 = vmatpush.msrb.mxu1 %v9728_v18 }
 0x5fc   :  { %4621 = vmatpush.msrb.mxu2 %v9724_v13  ;;  %4681 = vmatpush.msra.mxu0 %v9724_v13 }
 0x5fd   :  { %3346 = vmatpush.msra.mxu3 %v8035_v30  ;;  %3387 = vmatpush.msrb.mxu1 %v8037_v52 }
 0x5fe   :  { %4622 = vmatpush.msrb.mxu2 %v8027_v54  ;;  %4682 = vmatpush.msra.mxu0 %v8027_v54 }
 0x5ff   :  { %3347 = vmatpush.msra.mxu3 %v9730_v47  ;;  %3388 = vmatpush.msrb.mxu1 %v9731_v5 }
 0x600   :  { %4623 = vmatpush.msrb.mxu2 %v8043_v55  ;;  %4683 = vmatpush.msra.mxu0 %v8043_v55 }
 0x601   :  { %3348 = vmatpush.msra.mxu3 %v9732_v22  ;;  %3389 = vmatpush.msrb.mxu1 %v9733_v8 }
 0x602   :  { %4624 = vmatpush.msrb.mxu2 %v9729_v53  ;;  %4684 = vmatpush.msra.mxu0 %v9729_v53 }
 0x603   :  { %3349 = vmatpush.msra.mxu3 %v8077_v21  ;;  %3390 = vmatpush.msrb.mxu1 %v8079_v2 }
 0x604   :  { %3350 = vmatmul.f32.vlgmr.msra.gmra.mxu3 %v2977_v12  ;;  %3391 = vmatmul.f32.vlgmr.msrb.gmra.mxu1 %v2977_v12  ;;  %v2996_v12 = vmul.f32 0.2, %v8232_v17 }
 0x605   :  { %3416 = vmatpush.msrb.mxu3 %v8376_v45  ;;  %3457 = vmatpush.msra.mxu1 %v8379_v38 }
 0x606   :  { %4625 = vmatpush.msrb.mxu2 %v8070_v10  ;;  %4685 = vmatpush.msra.mxu0 %v8070_v10 }
 0x607   :  { %3417 = vmatpush.msrb.mxu3 %v8384_v50  ;;  %3458 = vmatpush.msra.mxu1 %v8387_v24 }
 0x608   :  { %4626 = vmatpush.msrb.mxu2 %v8085_v29  ;;  %4686 = vmatpush.msra.mxu0 %v8085_v29 }
 0x609   :  { %3418 = vmatpush.msrb.mxu3 %v8392_v33  ;;  %3459 = vmatpush.msra.mxu1 %v8395_v51 }
 0x60a   :  { %4627 = vmatpush.msrb.mxu2 %v8093_v37  ;;  %4687 = vmatpush.msra.mxu0 %v8093_v37 }
 0x60b   :  { %3419 = vmatpush.msrb.mxu3 %v8400_v56  ;;  %3460 = vmatpush.msra.mxu1 %v8403_v26 }
 0x60c   :  { %4628 = vmatpush.msrb.mxu2 %v8100_v35  ;;  %4688 = vmatpush.msra.mxu0 %v8100_v35 }
 0x60d   :  { %4629 = vmatmul.f32.vlgmr.msrb.gmra.mxu2 %v9748_v61  ;;  %4689 = vmatmul.f32.vlgmr.msra.gmra.mxu0 %v9749_v6 }
 0x60e   :  { %4733 = vmatpush.msra.mxu2 %v8410_v0  ;;  %4793 = vmatpush.msrb.mxu0 %v8410_v0 }
 0x60f   :  { %3420 = vmatpush.msrb.mxu3 %v8414_v34  ;;  %3461 = vmatpush.msra.mxu1 %v8417_v15 }
 0x610   :  { %4734 = vmatpush.msra.mxu2 %v8420_v43  ;;  %4794 = vmatpush.msrb.mxu0 %v8420_v43 }
 0x611   :  { %3421 = vmatpush.msrb.mxu3 %v8424_v3  ;;  %3462 = vmatpush.msra.mxu1 %v8427_v11 }
 0x612   :  { %4735 = vmatpush.msra.mxu2 %v8430_v63  ;;  %4795 = vmatpush.msrb.mxu0 %v8430_v63 }
 0x613   :  { %3422 = vmatpush.msrb.mxu3 %v7965_v40  ;;  %3463 = vmatpush.msra.mxu1 %v7967_v41  ;;  %v2981_v40 = vmul.f32 0.2, %v8214_v58 }
 0x614   :  { %4736 = vmatpush.msra.mxu2 %v8436_v9  ;;  %4796 = vmatpush.msrb.mxu0 %v8436_v9 }
 0x615   :  { %3423 = vmatpush.msrb.mxu3 %v7977_v46  ;;  %3464 = vmatpush.msra.mxu1 %v7979_v1  ;;  %v2982_v41 = vsel %vm2980_vm5, %v8214_v58, %v2981_v40  ;;  %v9751_v46 = vld [vmem:[#allocation13_spill] sm:$0xff]  ;;  %v8563_v58 = vld [vmem:[#allocation2 + $0x898] sm:$0xff] }
 0x616   :  { %4737 = vmatpush.msra.mxu2 %v7969_v19  ;;  %4797 = vmatpush.msrb.mxu0 %v7969_v19  ;;  %v9750_v19 = vld [vmem:[#allocation16_spill] sm:$0xff]  ;;  %v8505_v1 = vld [vmem:[#allocation2 + $0x8c8] sm:$0xff] }
 0x617   :  { %3424 = vmatpush.msrb.mxu3 %v7987_v28  ;;  %3465 = vmatpush.msra.mxu1 %v7989_v27  ;;  %v8513_v28 = vld [vmem:[#allocation2 + $0x8c0] sm:$0xff] }
 0x618   :  { %4738 = vmatpush.msra.mxu2 %v7981_v14  ;;  %4798 = vmatpush.msrb.mxu0 %v7981_v14  ;;  %v8508_v14 = vld [vmem:[#allocation2 + $0x948] sm:$0xff]  ;;  %v8516_v27 = vld [vmem:[#allocation2 + $0x940] sm:$0xff] }
 0x619   :  { %3425 = vmatpush.msrb.mxu3 %v8000_v23  ;;  %3466 = vmatpush.msra.mxu1 %v9723_v39  ;;  %v8523_v23 = vld [vmem:[#allocation2 + $0x8b8] sm:$0xff]  ;;  %v8543_v39 = vld [vmem:[#allocation2 + $0x8a8] sm:$0xff] }
 0x61a   :  { %4739 = vmatpush.msra.mxu2 %v7993_v32  ;;  %4799 = vmatpush.msrb.mxu0 %v7993_v32  ;;  %v8519_v32 = vld [vmem:[#allocation2 + $0xb58] sm:$0xff] }
 0x61b   :  { %3426 = vmatpush.msrb.mxu3 %v9725_v36  ;;  %3467 = vmatpush.msra.mxu1 %v9726_v44  ;;  %v8549_v36 = vld [vmem:[#allocation2 + $0xb40] sm:$0xff] }
 0x61c   :  { %4740 = vmatpush.msra.mxu2 %v8004_v57  ;;  %4800 = vmatpush.msrb.mxu0 %v8004_v57  ;;  %v8526_v57 = vld [vmem:[#allocation2 + $0x938] sm:$0xff]  ;;  %v8553_v44 = vld [vmem:[#allocation2 + $0x8a0] sm:$0xff] }
 0x61d   :  { %3427 = vmatpush.msrb.mxu3 %v9727_v60  ;;  %3468 = vmatpush.msra.mxu1 %v9728_v18  ;;  %v8556_v60 = vld [vmem:[#allocation2 + $0x920] sm:$0xff]  ;;  %v8559_v18 = vld [vmem:[#allocation2 + $0xb38] sm:$0xff] }
 0x61e   :  { %4741 = vmatpush.msra.mxu2 %v9724_v13  ;;  %4801 = vmatpush.msrb.mxu0 %v9724_v13  ;;  %v8546_v13 = vld [vmem:[#allocation2 + $0x928] sm:$0xff] }
 0x61f   :  { %3428 = vmatpush.msrb.mxu3 %v8035_v30  ;;  %3469 = vmatpush.msra.mxu1 %v8037_v52  ;;  %v8533_v30 = vld [vmem:[#allocation2 + $0x8b0] sm:$0xff] }
 0x620   :  { %4742 = vmatpush.msra.mxu2 %v8027_v54  ;;  %4802 = vmatpush.msrb.mxu0 %v8027_v54  ;;  %v8529_v54 = vld [vmem:[#allocation2 + $0xb50] sm:$0xff] }
 0x621   :  { %3429 = vmatpush.msrb.mxu3 %v9730_v47  ;;  %3470 = vmatpush.msra.mxu1 %v9731_v5  ;;  %v8536_v52 = vld [vmem:[#allocation2 + $0x930] sm:$0xff] }
 0x622   :  { %4743 = vmatpush.msra.mxu2 %v8043_v55  ;;  %4803 = vmatpush.msrb.mxu0 %v8043_v55  ;;  %v8539_v55 = vld [vmem:[#allocation2 + $0xb48] sm:$0xff] }
 0x623   :  { %3430 = vmatpush.msrb.mxu3 %v9732_v22  ;;  %3471 = vmatpush.msra.mxu1 %v9733_v8 }
 0x624   :  { %4744 = vmatpush.msra.mxu2 %v9729_v53  ;;  %4804 = vmatpush.msrb.mxu0 %v9729_v53 }
 0x625   :  { %3431 = vmatpush.msrb.mxu3 %v8077_v21  ;;  %3472 = vmatpush.msra.mxu1 %v8079_v2 }
 0x626   :  { %3432 = vmatmul.f32.vlgmr.msrb.gmra.mxu3 %v2982_v41  ;;  %3473 = vmatmul.f32.vlgmr.msra.gmra.mxu1 %v2982_v41 }
 0x627   :  { %3498 = vmatpush.msra.mxu3 %v8376_v45  ;;  %3539 = vmatpush.msrb.mxu1 %v8379_v38 }
 0x628   :  { %4745 = vmatpush.msra.mxu2 %v8070_v10  ;;  %4805 = vmatpush.msrb.mxu0 %v8070_v10 }
 0x629   :  { %3499 = vmatpush.msra.mxu3 %v8384_v50  ;;  %3540 = vmatpush.msrb.mxu1 %v8387_v24 }
 0x62a   :  { %4746 = vmatpush.msra.mxu2 %v8085_v29  ;;  %4806 = vmatpush.msrb.mxu0 %v8085_v29 }
 0x62b   :  { %3500 = vmatpush.msra.mxu3 %v8392_v33  ;;  %3541 = vmatpush.msrb.mxu1 %v8395_v51 }
 0x62c   :  { %4747 = vmatpush.msra.mxu2 %v8093_v37  ;;  %4807 = vmatpush.msrb.mxu0 %v8093_v37 }
 0x62d   :  { %3501 = vmatpush.msra.mxu3 %v8400_v56  ;;  %3542 = vmatpush.msrb.mxu1 %v8403_v26 }
 0x62e   :  { %4748 = vmatpush.msra.mxu2 %v8100_v35  ;;  %4808 = vmatpush.msrb.mxu0 %v8100_v35 }
 0x62f   :  { %4749 = vmatmul.f32.vlgmr.msra.gmra.mxu2 %v9750_v19  ;;  %4809 = vmatmul.f32.vlgmr.msrb.gmra.mxu0 %v9751_v46 }
 0x630   :  { %4853 = vmatpush.msrb.mxu2 %v8410_v0  ;;  %4913 = vmatpush.msra.mxu0 %v8410_v0 }
 0x631   :  { %3502 = vmatpush.msra.mxu3 %v8414_v34  ;;  %3543 = vmatpush.msrb.mxu1 %v8417_v15 }
 0x632   :  { %4854 = vmatpush.msrb.mxu2 %v8420_v43  ;;  %4914 = vmatpush.msra.mxu0 %v8420_v43 }
 0x633   :  { %3503 = vmatpush.msra.mxu3 %v8424_v3  ;;  %3544 = vmatpush.msrb.mxu1 %v8427_v11 }
 0x634   :  { %4855 = vmatpush.msrb.mxu2 %v8430_v63  ;;  %4915 = vmatpush.msra.mxu0 %v8430_v63 }
 0x635   :  { %3504 = vmatpush.msra.mxu3 %v8505_v1  ;;  %3545 = vmatpush.msrb.mxu1 %v8508_v14 }
 0x636   :  { %4856 = vmatpush.msrb.mxu2 %v8436_v9  ;;  %4916 = vmatpush.msra.mxu0 %v8436_v9 }
 0x637   :  { %3505 = vmatpush.msra.mxu3 %v8513_v28  ;;  %3546 = vmatpush.msrb.mxu1 %v8516_v27 }
 0x638   :  { %4857 = vmatpush.msrb.mxu2 %v8519_v32  ;;  %4917 = vmatpush.msra.mxu0 %v8519_v32 }
 0x639   :  { %3506 = vmatpush.msra.mxu3 %v8523_v23  ;;  %3547 = vmatpush.msrb.mxu1 %v8526_v57 }
 0x63a   :  { %4858 = vmatpush.msrb.mxu2 %v8529_v54  ;;  %4918 = vmatpush.msra.mxu0 %v8529_v54 }
 0x63b   :  { %3507 = vmatpush.msra.mxu3 %v8533_v30  ;;  %3548 = vmatpush.msrb.mxu1 %v8536_v52 }
 0x63c   :  { %4859 = vmatpush.msrb.mxu2 %v8539_v55  ;;  %4919 = vmatpush.msra.mxu0 %v8539_v55 }
 0x63d   :  { %3508 = vmatpush.msra.mxu3 %v8543_v39  ;;  %3549 = vmatpush.msrb.mxu1 %v8546_v13 }
 0x63e   :  { %4860 = vmatpush.msrb.mxu2 %v8549_v36  ;;  %4920 = vmatpush.msra.mxu0 %v8549_v36 }
 0x63f   :  { %3509 = vmatpush.msra.mxu3 %v8553_v44  ;;  %3550 = vmatpush.msrb.mxu1 %v8556_v60 }
 0x640   :  { %4861 = vmatpush.msrb.mxu2 %v8559_v18  ;;  %4921 = vmatpush.msra.mxu0 %v8559_v18 }
 0x641   :  { %3510 = vmatpush.msra.mxu3 %v8563_v58  ;;  %3551 = vmatpush.msrb.mxu1 %v8566_v31 }
 0x642   :  { %4862 = vmatpush.msrb.mxu2 %v8569_v59  ;;  %4922 = vmatpush.msra.mxu0 %v8569_v59 }
 0x643   :  { %3511 = vmatpush.msra.mxu3 %v9730_v47  ;;  %3552 = vmatpush.msrb.mxu1 %v9731_v5  ;;  %v2987_v47 = vsel %vm2985_vm6, %v8217_v16, %v2986_v25  ;;  %v5340_v5 = vld [vmem:[#allocation2 + $0xb20] sm:$0xff] }
 0x644   :  { %4863 = vmatpush.msrb.mxu2 %v8576_v42  ;;  %4923 = vmatpush.msra.mxu0 %v8576_v42 }
 0x645   :  { %3512 = vmatpush.msra.mxu3 %v9732_v22  ;;  %3553 = vmatpush.msrb.mxu1 %v9733_v8  ;;  %v5341_v22 = vld [vmem:[#allocation2 + $0x880] sm:$0xff] }
 0x646   :  { %4864 = vmatpush.msrb.mxu2 %v9729_v53  ;;  %4924 = vmatpush.msra.mxu0 %v9729_v53  ;;  %v5339_v53 = vld [vmem:[#allocation2 + $0x908] sm:$0xff]  ;;  %v5342_v8 = vld [vmem:[#allocation2 + $0x900] sm:$0xff] }
 0x647   :  { %3513 = vmatpush.msra.mxu3 %v8077_v21  ;;  %3554 = vmatpush.msrb.mxu1 %v8079_v2  ;;  %v9753_v21 = vld [vmem:[#allocation15_spill] sm:$0xff]  ;;  %v5337_v2 = vld [vmem:[#allocation2 + $0x910] sm:$0xff] }
 0x648   :  { %3514 = vmatmul.f32.vlgmr.msra.gmra.mxu3 %v2987_v47  ;;  %3555 = vmatmul.f32.vlgmr.msrb.gmra.mxu1 %v2987_v47 }
 0x649   :  { %3580 = vmatpush.msrb.mxu3 %v8376_v45  ;;  %3621 = vmatpush.msra.mxu1 %v8379_v38 }
 0x64a   :  { %4865 = vmatpush.msrb.mxu2 %v8070_v10  ;;  %4925 = vmatpush.msra.mxu0 %v8070_v10  ;;  %v9752_v10 = vld [vmem:[#allocation21_spill] sm:$0xff] }
 0x64b   :  { %3581 = vmatpush.msrb.mxu3 %v8384_v50  ;;  %3622 = vmatpush.msra.mxu1 %v8387_v24 }
 0x64c   :  { %4866 = vmatpush.msrb.mxu2 %v8085_v29  ;;  %4926 = vmatpush.msra.mxu0 %v8085_v29  ;;  %v2991_v29 = vmul.f32 0.2, %v8220_v62 }
 0x64d   :  { %3582 = vmatpush.msrb.mxu3 %v8392_v33  ;;  %3623 = vmatpush.msra.mxu1 %v8395_v51 }
 0x64e   :  { %4867 = vmatpush.msrb.mxu2 %v8093_v37  ;;  %4927 = vmatpush.msra.mxu0 %v8093_v37  ;;  %v5336_v37 = vld [vmem:[#allocation2 + $0x890] sm:$0xff]  ;;  %v2992_v16 = vsel %vm2990_vm7, %v8220_v62, %v2991_v29  ;;  %v5345_v62 = vld [vmem:[#allocation2 + $0xb08] sm:$0xff] }
 0x64f   :  { %3583 = vmatpush.msrb.mxu3 %v8400_v56  ;;  %3624 = vmatpush.msra.mxu1 %v8403_v26 }
 0x650   :  { %4868 = vmatpush.msrb.mxu2 %v8100_v35  ;;  %4928 = vmatpush.msra.mxu0 %v8100_v35  ;;  %v5338_v35 = vld [vmem:[#allocation2 + $0x888] sm:$0xff] }
 0x651   :  { %4869 = vmatmul.f32.vlgmr.msrb.gmra.mxu2 %v9752_v10  ;;  %4929 = vmatmul.f32.vlgmr.msra.gmra.mxu0 %v9753_v21 }
 0x652   :  { %4973 = vmatpush.msra.mxu2 %v8410_v0  ;;  %5033 = vmatpush.msrb.mxu0 %v8410_v0 }
 0x653   :  { %3584 = vmatpush.msrb.mxu3 %v8414_v34  ;;  %3625 = vmatpush.msra.mxu1 %v8417_v15 }
 0x654   :  { %4974 = vmatpush.msra.mxu2 %v8420_v43  ;;  %5034 = vmatpush.msrb.mxu0 %v8420_v43 }
 0x655   :  { %3585 = vmatpush.msrb.mxu3 %v8424_v3  ;;  %3626 = vmatpush.msra.mxu1 %v8427_v11 }
 0x656   :  { %4975 = vmatpush.msra.mxu2 %v8430_v63  ;;  %5035 = vmatpush.msrb.mxu0 %v8430_v63 }
 0x657   :  { %3586 = vmatpush.msrb.mxu3 %v8505_v1  ;;  %3627 = vmatpush.msra.mxu1 %v8508_v14 }
 0x658   :  { %4976 = vmatpush.msra.mxu2 %v8436_v9  ;;  %5036 = vmatpush.msrb.mxu0 %v8436_v9 }
 0x659   :  { %3587 = vmatpush.msrb.mxu3 %v8513_v28  ;;  %3628 = vmatpush.msra.mxu1 %v8516_v27 }
 0x65a   :  { %4977 = vmatpush.msra.mxu2 %v8519_v32  ;;  %5037 = vmatpush.msrb.mxu0 %v8519_v32 }
 0x65b   :  { %3588 = vmatpush.msrb.mxu3 %v8523_v23  ;;  %3629 = vmatpush.msra.mxu1 %v8526_v57 }
 0x65c   :  { %4978 = vmatpush.msra.mxu2 %v8529_v54  ;;  %5038 = vmatpush.msrb.mxu0 %v8529_v54 }
 0x65d   :  { %3589 = vmatpush.msrb.mxu3 %v8533_v30  ;;  %3630 = vmatpush.msra.mxu1 %v8536_v52 }
 0x65e   :  { %4979 = vmatpush.msra.mxu2 %v8539_v55  ;;  %5039 = vmatpush.msrb.mxu0 %v8539_v55 }
 0x65f   :  { %3590 = vmatpush.msrb.mxu3 %v8543_v39  ;;  %3631 = vmatpush.msra.mxu1 %v8546_v13 }
 0x660   :  { %4980 = vmatpush.msra.mxu2 %v8549_v36  ;;  %5040 = vmatpush.msrb.mxu0 %v8549_v36 }
 0x661   :  { %3591 = vmatpush.msrb.mxu3 %v8553_v44  ;;  %3632 = vmatpush.msra.mxu1 %v8556_v60 }
 0x662   :  { %4981 = vmatpush.msra.mxu2 %v8559_v18  ;;  %5041 = vmatpush.msrb.mxu0 %v8559_v18 }
 0x663   :  { %3592 = vmatpush.msrb.mxu3 %v8563_v58  ;;  %3633 = vmatpush.msra.mxu1 %v8566_v31 }
 0x664   :  { %4982 = vmatpush.msra.mxu2 %v8569_v59  ;;  %5042 = vmatpush.msrb.mxu0 %v8569_v59 }
 0x665   :  { %3593 = vmatpush.msrb.mxu3 %v5336_v37  ;;  %3634 = vmatpush.msra.mxu1 %v5337_v2 }
 0x666   :  { %4983 = vmatpush.msra.mxu2 %v8576_v42  ;;  %5043 = vmatpush.msrb.mxu0 %v8576_v42 }
 0x667   :  { %3594 = vmatpush.msrb.mxu3 %v5338_v35  ;;  %3635 = vmatpush.msra.mxu1 %v5339_v53 }
 0x668   :  { %4984 = vmatpush.msra.mxu2 %v5340_v5  ;;  %5044 = vmatpush.msrb.mxu0 %v5340_v5 }
 0x669   :  { %3595 = vmatpush.msrb.mxu3 %v5341_v22  ;;  %3636 = vmatpush.msra.mxu1 %v5342_v8 }
 0x66a   :  { %3596 = vmatmul.f32.vlgmr.msrb.gmra.mxu3 %v2992_v16  ;;  %3637 = vmatmul.f32.vlgmr.msra.gmra.mxu1 %v2992_v16 }
 0x66b   :  { %3662 = vmatpush.msra.mxu3 %v8376_v45  ;;  %3703 = vmatpush.msrb.mxu1 %v8379_v38  ;;  %v2997_v45 = vsel %vm2995_vm8, %v8232_v17, %v2996_v12  ;;  %v3104_v38 = vpop.f32.mrf.mxu3 }
 0x66c   :  { %4985 = vmatpush.msra.mxu2 %v5343_v49  ;;  %5045 = vmatpush.msrb.mxu0 %v5343_v49 }
 0x66d   :  { %3663 = vmatpush.msra.mxu3 %v8384_v50  ;;  %3704 = vmatpush.msrb.mxu1 %v8387_v24  ;;  %v3084_v50 = vpop.f32.mrf.mxu2  ;;  %v3146_v24 = vpop.f32.mrf.mxu1 }
 0x66e   :  { %4986 = vmatpush.msra.mxu2 %v5344_v4  ;;  %5046 = vmatpush.msrb.mxu0 %v5344_v4 }
 0x66f   :  { %3664 = vmatpush.msra.mxu3 %v8392_v33  ;;  %3705 = vmatpush.msrb.mxu1 %v8395_v51  ;;  %v3126_v33 = vpop.f32.mrf.mxu0  ;;  %v3105_v51 = vadd.f32 %v3104_v38, %v3084_v50 }
 0x670   :  { %4987 = vmatpush.msra.mxu2 %v5345_v62  ;;  %5047 = vmatpush.msrb.mxu0 %v5345_v62 }
 0x671   :  { %3665 = vmatpush.msra.mxu3 %v8400_v56  ;;  %3706 = vmatpush.msrb.mxu1 %v8403_v26  ;;  %v8680_v56 = vld [vmem:[#allocation4 + $0x18] ss:$0 sm:$0xff]  ;;  %v3147_v26 = vadd.f32 %v3146_v24, %v3126_v33 }
 0x672   :  { %4988 = vmatpush.msra.mxu2 %v5346_v7  ;;  %5048 = vmatpush.msrb.mxu0 %v5346_v7  ;;  %v8683_v0 = vadd.f32 %v8680_v56, %v3105_v51 }
 0x673   :  { %4989 = vmatmul.f32.vlgmr.msra.gmra.mxu2 %v9754_v20  ;;  %5049 = vmatmul.f32.vlgmr.msrb.gmra.mxu0 %v9755_v48  ;;  %v3187_v61 = vpop.f32.mrf.mxu3 }
 0x674   :  { %3666 = vmatpush.msra.mxu3 %v8414_v34  ;;  %3707 = vmatpush.msrb.mxu1 %v8417_v15  ;;  %v8686_v15 = vadd.f32 %v8680_v56, %v3147_v26  ;;  %v3724_v9 = vsel %vm421_vm0, %v8683_v0, 0.0 }
 0x675   :  { %v3167_v6 = vpop.f32.mrf.mxu2  ;;  %v3228_v17 = vpop.f32.mrf.mxu1 }
 0x676   :  { %3667 = vmatpush.msra.mxu3 %v8424_v3  ;;  %3708 = vmatpush.msrb.mxu1 %v8427_v11  ;;  %v3188_v34 = vadd.f32 %v3187_v61, %v3167_v6  ;;  %v3731_v3 = vmul.f32 %v8683_v0, %v8683_v0  ;;  %v3747_v63 = vmul.f32 %v8686_v15, %v8686_v15 }
 0x677   :  { %v3208_v43 = vpop.f32.mrf.mxu0 }
 0x678   :  { %3668 = vmatpush.msra.mxu3 %v8505_v1  ;;  %3709 = vmatpush.msrb.mxu1 %v8508_v14  ;;  %v8691_v11 = vadd.f32 %v8680_v56, %v3188_v34  ;;  %v3229_v40 = vadd.f32 %v3228_v17, %v3208_v43  ;;  %v3732_v19 = vsel %vm421_vm0, %v3731_v3, 0.0  ;;  %v3739_v1 = vsel %vm421_vm0, %v8686_v15, 0.0 }
 0x679   :  { %v3725_v14 = vrot.slane %v3724_v9, 4  ;;  %v3740_v55 = vrot.slane %v3739_v1, 4 }
 0x67a   :  { %3669 = vmatpush.msra.mxu3 %v8513_v28  ;;  %3710 = vmatpush.msrb.mxu1 %v8516_v27  ;;  %v3764_v28 = vmul.f32 %v8691_v11, %v8691_v11  ;;  %v3748_v27 = vsel %vm421_vm0, %v3747_v63, 0.0  ;;  %v8704_v54 = vadd.f32 %v8680_v56, %v3229_v40 }
 0x67b   :  { %v3269_v41 = vpop.f32.mrf.mxu3  ;;  %v3741_v59 = vadd.f32 %v3740_v55, %v3739_v1 }
 0x67c   :  { %3670 = vmatpush.msra.mxu3 %v8523_v23  ;;  %3711 = vmatpush.msrb.mxu1 %v8526_v57  ;;  %v3733_v57 = vrot.slane %v3732_v19, 4  ;;  %v3765_v36 = vsel %vm421_vm0, %v3764_v28, 0.0  ;;  %v3773_v25 = vsel %vm421_vm0, %v8704_v54, 0.0 }
 0x67d   :  { %v3249_v46 = vpop.f32.mrf.mxu2  ;;  %v3310_v32 = vpop.f32.mrf.mxu1  ;;  %v3766_v42 = vrot.slane %v3765_v36, 4 }
 0x67e   :  { %3671 = vmatpush.msra.mxu3 %v8533_v30  ;;  %3712 = vmatpush.msrb.mxu1 %v8536_v52  ;;  %v3270_v23 = vadd.f32 %v3269_v41, %v3249_v46  ;;  %v3756_v30 = vsel %vm421_vm0, %v8691_v11, 0.0 }
 0x67f   :  { %v3290_v52 = vpop.f32.mrf.mxu0 }
 0x680   :  { %3672 = vmatpush.msra.mxu3 %v8543_v39  ;;  %3713 = vmatpush.msrb.mxu1 %v8546_v13  ;;  %v3749_v39 = vrot.slane %v3748_v27, 4  ;;  %v3726_v13 = vadd.f32 %v3725_v14, %v3724_v9  ;;  %v8710_v18 = vadd.f32 %v8680_v56, %v3270_v23 }
 0x682   :  { %3673 = vmatpush.msra.mxu3 %v8553_v44  ;;  %3714 = vmatpush.msrb.mxu1 %v8556_v60  ;;  %v3311_v44 = vadd.f32 %v3310_v32, %v3290_v52  ;;  %v3757_v60 = vrot.slane %v3756_v30, 4  ;;  %9756 = vst [vmem:[#allocation39_spill] sm:$0xff] %v8710_v18  ;;  %v3750_v47 = vadd.f32 %v3749_v39, %v3748_v27  ;;  %v3727_v10 = vrot.slane %v3726_v13, 2 }
 0x683   :  { %v3790_v48 = vsel %vm421_vm0, %v8710_v18, 0.0 }
 0x684   :  { %3674 = vmatpush.msra.mxu3 %v8563_v58  ;;  %3715 = vmatpush.msrb.mxu1 %v8566_v31  ;;  %v3734_v58 = vadd.f32 %v3733_v57, %v3732_v19  ;;  %v3781_v31 = vmul.f32 %v8704_v54, %v8704_v54  ;;  %v8717_v21 = vadd.f32 %v8680_v56, %v3311_v44  ;;  %v3751_v49 = vrot.slane %v3750_v47, 2 }
 0x685   :  { %v3331_v16 = vpop.f32.mrf.mxu2  ;;  %v3728_v4 = vadd.f32 %v3727_v10, %v3726_v13  ;;  %v3392_v51 = vpop.f32.mrf.mxu1  ;;  %v3791_v34 = vrot.slane %v3790_v48, 4 }
 0x686   :  { %3675 = vmatpush.msra.mxu3 %v5336_v37  ;;  %3716 = vmatpush.msrb.mxu1 %v5337_v2  ;;  %9757 = vst [vmem:[#allocation27_spill] sm:$0xff] %v8717_v21  ;;  %v3758_v37 = vadd.f32 %v3757_v60, %v3756_v30  ;;  %v3798_v2 = vmul.f32 %v8710_v18, %v8710_v18  ;;  %v3735_v29 = vrot.slane %v3734_v58, 2  ;;  %v3807_v50 = vsel %vm421_vm0, %v8717_v21, 0.0 }
 0x687   :  { %v3351_v5 = vpop.f32.mrf.mxu3  ;;  %v3815_v62 = vmul.f32 %v8717_v21, %v8717_v21  ;;  %v3752_v61 = vadd.f32 %v3751_v49, %v3750_v47  ;;  %v3372_v43 = vpop.f32.mrf.mxu0  ;;  %v3729_v3 = vrot.slane %v3728_v4, 1  ;;  %v3808_v40 = vrot.slane %v3807_v50, 4 }
 0x688   :  { %3676 = vmatpush.msra.mxu3 %v5338_v35  ;;  %3717 = vmatpush.msrb.mxu1 %v5339_v53  ;;  %v3774_v35 = vrot.slane %v3773_v25, 4  ;;  %v3782_v53 = vsel %vm421_vm0, %v3781_v31, 0.0  ;;  %v3759_v20 = vrot.slane %v3758_v37, 2  ;;  %v3799_v12 = vsel %vm421_vm0, %v3798_v2, 0.0 }
 0x689   :  { %v3783_v7 = vrot.slane %v3782_v53, 4  ;;  %v3352_v26 = vadd.f32 %v3351_v5, %v3331_v16  ;;  %v3816_v6 = vsel %vm421_vm0, %v3815_v62, 0.0  ;;  %v3800_v17 = vrot.slane %v3799_v12, 4 }
 0x68a   :  { %3677 = vmatpush.msra.mxu3 %v5341_v22  ;;  %3718 = vmatpush.msrb.mxu1 %v5342_v8  ;;  %v3742_v22 = vrot.slane %v3741_v59, 2  ;;  %v3767_v8 = vadd.f32 %v3766_v42, %v3765_v36  ;;  %v3775_v38 = vadd.f32 %v3774_v35, %v3773_v25  ;;  %v3760_v9 = vadd.f32 %v3759_v20, %v3758_v37 }
 0x68b   :  { %3678 = vmatmul.f32.vlgmr.msra.gmra.mxu3 %v2997_v45  ;;  %3719 = vmatmul.f32.vlgmr.msrb.gmra.mxu1 %v2997_v45  ;;  %v3736_v45 = vadd.f32 %v3735_v29, %v3734_v58  ;;  %v3784_v63 = vadd.f32 %v3783_v7, %v3782_v53  ;;  %v3393_v46 = vadd.f32 %v3392_v51, %v3372_v43  ;;  %v3817_v27 = vrot.slane %v3816_v6, 4 }
 0x68c   :  { %v3743_v24 = vadd.f32 %v3742_v22, %v3741_v59  ;;  %v3768_v33 = vrot.slane %v3767_v8, 2  ;;  %v3776_v19 = vrot.slane %v3775_v38, 2  ;;  %v8731_v32 = vadd.f32 %v8680_v56, %v3352_v26 }
 0x68d   :  { %v3737_v41 = vrot.slane %v3736_v45, 1  ;;  %v3413_v23 = vpop.f32.mrf.mxu2  ;;  %v3753_v57 = vrot.slane %v3752_v61, 1  ;;  %v3792_v30 = vadd.f32 %v3791_v34, %v3790_v48  ;;  %v3801_v52 = vadd.f32 %v3800_v17, %v3799_v12 }
 0x68e   :  { %v3744_v14 = vrot.slane %v3743_v24, 1  ;;  %v3769_v28 = vadd.f32 %v3768_v33, %v3767_v8  ;;  %v3730_v55 = vadd.f32 %v3729_v3, %v3728_v4  ;;  %v3785_v39 = vrot.slane %v3784_v63, 2 }
 0x68f   :  { %v3761_v13 = vrot.slane %v3760_v9, 1  ;;  %v3809_v36 = vadd.f32 %v3808_v40, %v3807_v50  ;;  %v3738_v44 = vadd.f32 %v3737_v41, %v3736_v45  ;;  %v3777_v60 = vadd.f32 %v3776_v19, %v3775_v38  ;;  %v3454_v35 = vpop.f32.mrf.mxu0  ;;  %v8751_v19 = vld [vmem:[#allocation2 + $0xaf8] sm:$0xff] }
 0x690   :  { %v8734_v58 = vadd.f32 %v8680_v56, %v3393_v46  ;;  %v3745_v31 = vadd.f32 %v3744_v14, %v3743_v24  ;;  %v3770_v59 = vrot.slane %v3769_v28, 1  ;;  %v3818_v25 = vadd.f32 %v3817_v27, %v3816_v6  ;;  %4152 = vmatpush.msrb.mxu3 %v8751_v19  ;;  %4213 = vmatpush.msra.mxu1 %v8751_v19 }
 0x691   :  { %v3832_v42 = vmul.f32 %v8731_v32, %v8731_v32  ;;  %v3754_v10 = vadd.f32 %v3753_v57, %v3752_v61  ;;  %v3793_v37 = vrot.slane %v3792_v30, 2  ;;  %v3802_v2 = vrot.slane %v3801_v52, 2 }
 0x692   :  { %v3746_v53 = vadd.f32 %v3745_v31, %v3730_v55  ;;  %v3786_v5 = vadd.f32 %v3785_v39, %v3784_v63  ;;  %v3762_v22 = vadd.f32 %v3761_v13, %v3760_v9  ;;  %v3810_v8 = vrot.slane %v3809_v36, 2  ;;  %v8758_v55 = vld [vmem:[#allocation2 + $0xaf0] sm:$0xff] }
 0x693   :  { %v3755_v16 = vadd.f32 %v3754_v10, %v3738_v44  ;;  %v3778_v49 = vrot.slane %v3777_v60, 1  ;;  %v3841_v4 = vsel %vm421_vm0, %v8734_v58, 0.0  ;;  %v3771_v20 = vadd.f32 %v3770_v59, %v3769_v28  ;;  %4153 = vmatpush.msrb.mxu3 %v8758_v55  ;;  %4214 = vmatpush.msra.mxu1 %v8758_v55  ;;  %v8769_v10 = vld [vmem:[#allocation2 + $0xae8] sm:$0xff] }
 0x694   :  { %v3819_v48 = vrot.slane %v3818_v25, 2  ;;  %v3824_v12 = vsel %vm421_vm0, %v8731_v32, 0.0  ;;  %v3833_v45 = vsel %vm421_vm0, %v3832_v42, 0.0  ;;  %v3794_v50 = vadd.f32 %v3793_v37, %v3792_v30 }
 0x695   :  { %v3495_v38 = vpop.f32.mrf.mxu2  ;;  %v3803_v24 = vadd.f32 %v3802_v2, %v3801_v52  ;;  %v3849_v33 = vmul.f32 %v8734_v58, %v8734_v58  ;;  %v3787_v26 = vrot.slane %v3786_v5, 1  ;;  %v3763_v61 = vadd.f32 %v3762_v22, %v3746_v53  ;;  %4154 = vmatpush.msrb.mxu3 %v8769_v10  ;;  %4215 = vmatpush.msra.mxu1 %v8769_v10 }
 0x696   :  { %v3811_v6 = vadd.f32 %v3810_v8, %v3809_v36  ;;  %v3842_v34 = vrot.slane %v3841_v4, 4  ;;  %v3825_v17 = vrot.slane %v3824_v12, 4  ;;  %v3834_v43 = vrot.slane %v3833_v45, 4 }
 0x697   :  { %v3779_v63 = vadd.f32 %v3778_v49, %v3777_v60  ;;  %v3772_v9 = vadd.f32 %v3771_v20, %v3755_v16  ;;  %v3820_v40 = vadd.f32 %v3819_v48, %v3818_v25  ;;  %v3795_v46 = vrot.slane %v3794_v50, 1  ;;  %v3536_v39 = vpop.f32.mrf.mxu0  ;;  %v8776_v49 = vld [vmem:[#allocation2 + $0xae0] sm:$0xff] }
 0x698   :  { %v3850_v14 = vsel %vm421_vm0, %v3849_v33, 0.0  ;;  %v3812_v57 = vrot.slane %v3811_v6, 1  ;;  %v3843_v52 = vadd.f32 %v3842_v34, %v3841_v4  ;;  %v3826_v13 = vadd.f32 %v3825_v17, %v3824_v12  ;;  %4155 = vmatpush.msrb.mxu3 %v8776_v49  ;;  %4216 = vmatpush.msra.mxu1 %v8776_v49 }
 0x699   :  { %v3780_v30 = vadd.f32 %v3779_v63, %v3763_v61  ;;  %v3835_v36 = vadd.f32 %v3834_v43, %v3833_v45  ;;  %v3821_v59 = vrot.slane %v3820_v40, 1  ;;  %v3851_v42 = vrot.slane %v3850_v14, 4 }
 0x69a   :  { %v3796_v2 = vadd.f32 %v3795_v46, %v3794_v50  ;;  %v3844_v4 = vrot.slane %v3843_v52, 2  ;;  %v8783_v50 = vld [vmem:[#allocation2 + $0xad8] sm:$0xff] }
 0x69b   :  { %v3822_v48 = vadd.f32 %v3821_v59, %v3820_v40  ;;  %v3852_v12 = vadd.f32 %v3851_v42, %v3850_v14  ;;  %4156 = vmatpush.msrb.mxu3 %v8783_v50  ;;  %4217 = vmatpush.msra.mxu1 %v8783_v50  ;;  %v8808_v59 = vld [vmem:[#allocation2 + $0xac0] sm:$0xff] }
 0x69d   :  { %v3577_v37 = vpop.f32.mrf.mxu2  ;;  %v3853_v14 = vrot.slane %v3852_v12, 2 }
 0x69f   :  { %v3618_v40 = vpop.f32.mrf.mxu0 }
 0x6a3   :  { %v3474_v47 = vpop.f32.mrf.mxu1 }
 0x6a4   :  { %v3475_v62 = vadd.f32 %v3474_v47, %v3454_v35 }
 0x6a6   :  { %v8749_v3 = vadd.f32 %v8680_v56, %v3475_v62  ;;  %v3827_v62 = vrot.slane %v3826_v13, 2 }
 0x6a8   :  { %v3883_v44 = vmul.f32 %v8749_v3, %v8749_v3  ;;  %v3875_v22 = vsel %vm421_vm0, %v8749_v3, 0.0  ;;  %v3828_v46 = vadd.f32 %v3827_v62, %v3826_v13 }
 0x6a9   :  { %v3433_v1 = vpop.f32.mrf.mxu3 }
 0x6aa   :  { %v3434_v29 = vadd.f32 %v3433_v1, %v3413_v23  ;;  %v3804_v1 = vrot.slane %v3803_v24, 1  ;;  %v3788_v23 = vadd.f32 %v3787_v26, %v3786_v5  ;;  %v3813_v5 = vadd.f32 %v3812_v57, %v3811_v6  ;;  %v8800_v57 = vld [vmem:[#allocation2 + $0xac8] sm:$0xff] }
 0x6ab   :  { %v3884_v20 = vsel %vm421_vm0, %v3883_v44, 0.0  ;;  %v3876_v26 = vrot.slane %v3875_v22, 4 }
 0x6ac   :  { %v8746_v51 = vadd.f32 %v8680_v56, %v3434_v29  ;;  %v3789_v25 = vadd.f32 %v3788_v23, %v3772_v9  ;;  %v3805_v29 = vadd.f32 %v3804_v1, %v3803_v24  ;;  %v3797_v24 = vadd.f32 %v3796_v2, %v3780_v30  ;;  %v8795_v9 = vld [vmem:[#allocation2 + $0xad0] sm:$0xff] }
 0x6ad   :  { %v3885_v34 = vrot.slane %v3884_v20, 4  ;;  %4157 = vmatpush.msrb.mxu3 %v8795_v9  ;;  %4218 = vmatpush.msra.mxu1 %v8795_v9 }
 0x6ae   :  { %v3866_v28 = vmul.f32 %v8746_v51, %v8746_v51  ;;  %v3858_v60 = vsel %vm421_vm0, %v8746_v51, 0.0  ;;  %v3806_v33 = vadd.f32 %v3805_v29, %v3789_v25  ;;  %v3814_v30 = vadd.f32 %v3813_v5, %v3797_v24 }
 0x6af   :  { %v3859_v8 = vrot.slane %v3858_v60, 4  ;;  %4158 = vmatpush.msrb.mxu3 %v8800_v57  ;;  %4219 = vmatpush.msra.mxu1 %v8800_v57  ;;  %v3886_v13 = vadd.f32 %v3885_v34, %v3884_v20  ;;  %v3829_v25 = vrot.slane %v3828_v46, 1 }
 0x6b0   :  { %v3867_v35 = vsel %vm421_vm0, %v3866_v28, 0.0 }
 0x6b1   :  { %v3868_v45 = vrot.slane %v3867_v35, 4  ;;  %v3860_v17 = vadd.f32 %v3859_v8, %v3858_v60  ;;  %4159 = vmatpush.msrb.mxu3 %v8808_v59  ;;  %4220 = vmatpush.msra.mxu1 %v8808_v59 }
 0x6b3   :  { %v3869_v28 = vadd.f32 %v3868_v45, %v3867_v35  ;;  %v3854_v35 = vadd.f32 %v3853_v14, %v3852_v12  ;;  %v8825_v45 = vld [vmem:[#allocation2 + $0xab0] sm:$0xff] }
 0x6c5   :  { %v3556_v27 = vpop.f32.mrf.mxu1 }
 0x6c6   :  { %v3557_v53 = vadd.f32 %v3556_v27, %v3536_v39  ;;  %v3877_v39 = vadd.f32 %v3876_v26, %v3875_v22  ;;  %v8817_v22 = vld [vmem:[#allocation2 + $0xab8] sm:$0xff] }
 0x6c7   :  { %4160 = vmatpush.msrb.mxu3 %v8817_v22  ;;  %4221 = vmatpush.msra.mxu1 %v8817_v22 }
 0x6c8   :  { %v8786_v61 = vadd.f32 %v8680_v56, %v3557_v53  ;;  %v3870_v53 = vrot.slane %v3869_v28, 2  ;;  %v3878_v8 = vrot.slane %v3877_v39, 2 }
 0x6c9   :  { %4161 = vmatpush.msrb.mxu3 %v8825_v45  ;;  %4222 = vmatpush.msra.mxu1 %v8825_v45 }
 0x6ca   :  { %v3917_v44 = vmul.f32 %v8786_v61, %v8786_v61  ;;  %v3871_v26 = vadd.f32 %v3870_v53, %v3869_v28  ;;  %v3879_v14 = vadd.f32 %v3878_v8, %v3877_v39  ;;  %v8835_v28 = vld [vmem:[#allocation2 + $0xaa0] sm:$0xff] }
 0x6cb   :  { %v3515_v7 = vpop.f32.mrf.mxu3 }
 0x6cc   :  { %v3516_v41 = vadd.f32 %v3515_v7, %v3495_v38  ;;  %v3836_v7 = vrot.slane %v3835_v36, 2  ;;  %v3872_v39 = vrot.slane %v3871_v26, 1 }
 0x6ce   :  { %v8767_v47 = vadd.f32 %v8680_v56, %v3516_v41  ;;  %v3845_v41 = vadd.f32 %v3844_v4, %v3843_v52  ;;  %v3837_v1 = vadd.f32 %v3836_v7, %v3835_v36  ;;  %v3823_v52 = vadd.f32 %v3822_v48, %v3806_v33 }
 0x6cf   :  { %v3861_v36 = vrot.slane %v3860_v17, 2  ;;  %v3887_v7 = vrot.slane %v3886_v13, 2 }
 0x6d0   :  { %v3900_v38 = vmul.f32 %v8767_v47, %v8767_v47  ;;  %v3892_v43 = vsel %vm421_vm0, %v8767_v47, 0.0  ;;  %v3838_v42 = vrot.slane %v3837_v1, 1  ;;  %v3846_v29 = vrot.slane %v3845_v41, 1 }
 0x6d1   :  { %v3893_v60 = vrot.slane %v3892_v43, 4  ;;  %v3862_v20 = vadd.f32 %v3861_v36, %v3860_v17  ;;  %v3855_v17 = vrot.slane %v3854_v35, 1 }
 0x6d2   :  { %v3901_v27 = vsel %vm421_vm0, %v3900_v38, 0.0  ;;  %v3830_v38 = vadd.f32 %v3829_v25, %v3828_v46  ;;  %v3839_v24 = vadd.f32 %v3838_v42, %v3837_v1  ;;  %v3847_v46 = vadd.f32 %v3846_v29, %v3845_v41 }
 0x6d3   :  { %v3902_v2 = vrot.slane %v3901_v27, 4  ;;  %v3894_v4 = vadd.f32 %v3893_v60, %v3892_v43  ;;  %v3888_v1 = vadd.f32 %v3887_v7, %v3886_v13  ;;  %v8842_v13 = vld [vmem:[#allocation2 + $0xa98] sm:$0xff]  ;;  %v3880_v29 = vrot.slane %v3879_v14, 1 }
 0x6d4   :  { %v3831_v36 = vadd.f32 %v3830_v38, %v3814_v30 }
 0x6d5   :  { %v3903_v33 = vadd.f32 %v3902_v2, %v3901_v27  ;;  %v3863_v27 = vrot.slane %v3862_v20, 1  ;;  %v3889_v7 = vrot.slane %v3888_v1, 1 }
 0x6d7   :  { %v3904_v25 = vrot.slane %v3903_v33, 2 }
 0x6e7   :  { %v3638_v6 = vpop.f32.mrf.mxu1 }
 0x6e8   :  { %v3639_v23 = vadd.f32 %v3638_v6, %v3618_v40  ;;  %v8831_v40 = vld [vmem:[#allocation2 + $0xaa8] sm:$0xff] }
 0x6e9   :  { %4162 = vmatpush.msrb.mxu3 %v8831_v40  ;;  %4223 = vmatpush.msra.mxu1 %v8831_v40 }
 0x6ea   :  { %v8815_v5 = vadd.f32 %v8680_v56, %v3639_v23  ;;  %v3895_v23 = vrot.slane %v3894_v4, 2 }
 0x6eb   :  { %4163 = vmatpush.msrb.mxu3 %v8835_v28  ;;  %4224 = vmatpush.msra.mxu1 %v8835_v28 }
 0x6ec   :  { %v3951_v34 = vmul.f32 %v8815_v5, %v8815_v5  ;;  %v3943_v42 = vsel %vm421_vm0, %v8815_v5, 0.0  ;;  %v3896_v8 = vadd.f32 %v3895_v23, %v3894_v4  ;;  %v3873_v4 = vadd.f32 %v3872_v39, %v3871_v26  ;;  %v8850_v23 = vld [vmem:[#allocation2 + $0xa88] sm:$0xff] }
 0x6ed   :  { %v3597_v31 = vpop.f32.mrf.mxu3  ;;  %4164 = vmatpush.msrb.mxu3 %v8842_v13  ;;  %4225 = vmatpush.msra.mxu1 %v8842_v13 }
 0x6ee   :  { %v3598_v16 = vadd.f32 %v3597_v31, %v3577_v37  ;;  %v3909_v37 = vsel %vm421_vm0, %v8786_v61, 0.0  ;;  %v3952_v53 = vsel %vm421_vm0, %v3951_v34, 0.0 }
 0x6ef   :  { %v3910_v48 = vrot.slane %v3909_v37, 4  ;;  %v3953_v34 = vrot.slane %v3952_v53, 4 }
 0x6f0   :  { %v8793_v63 = vadd.f32 %v8680_v56, %v3598_v16  ;;  %v3918_v16 = vsel %vm421_vm0, %v3917_v44, 0.0 }
 0x6f1   :  { %v3919_v6 = vrot.slane %v3918_v16, 4  ;;  %v3911_v60 = vadd.f32 %v3910_v48, %v3909_v37  ;;  %v3856_v37 = vadd.f32 %v3855_v17, %v3854_v35  ;;  %v3864_v48 = vadd.f32 %v3863_v27, %v3862_v20 }
 0x6f2   :  { %v3934_v31 = vmul.f32 %v8793_v63, %v8793_v63  ;;  %v3926_v62 = vsel %vm421_vm0, %v8793_v63, 0.0  ;;  %v3881_v20 = vadd.f32 %v3880_v29, %v3879_v14 }
 0x6f3   :  { %v3927_v43 = vrot.slane %v3926_v62, 4  ;;  %v3920_v2 = vadd.f32 %v3919_v6, %v3918_v16  ;;  %v3912_v38 = vrot.slane %v3911_v60, 2  ;;  %v8846_v16 = vld [vmem:[#allocation2 + $0xa90] sm:$0xff]  ;;  %v3848_v6 = vadd.f32 %v3847_v46, %v3831_v36 }
 0x6f4   :  { %v3935_v12 = vsel %vm421_vm0, %v3934_v31, 0.0  ;;  %v3840_v31 = vadd.f32 %v3839_v24, %v3823_v52  ;;  %v3700_v52 = vpop.f32.mrf.mxu0  ;;  %v3944_v24 = vrot.slane %v3943_v42, 4  ;;  %4165 = vmatpush.msrb.mxu3 %v8846_v16  ;;  %4226 = vmatpush.msra.mxu1 %v8846_v16 }
 0x6f5   :  { %v3936_v44 = vrot.slane %v3935_v12, 4  ;;  %v3928_v41 = vadd.f32 %v3927_v43, %v3926_v62  ;;  %v3905_v62 = vadd.f32 %v3904_v25, %v3903_v33  ;;  %v3865_v33 = vadd.f32 %v3864_v48, %v3848_v6 }
 0x6f6   :  { %v3857_v35 = vadd.f32 %v3856_v37, %v3840_v31  ;;  %4166 = vmatpush.msrb.mxu3 %v8850_v23  ;;  %4227 = vmatpush.msra.mxu1 %v8850_v23  ;;  %v3913_v46 = vadd.f32 %v3912_v38, %v3911_v60  ;;  %v3945_v36 = vadd.f32 %v3944_v24, %v3943_v42  ;;  %v8857_v31 = vld [vmem:[#allocation2 + $0xa80] sm:$0xff]  ;;  %v3659_v37 = vpop.f32.mrf.mxu2 }
 0x6f7   :  { %v3937_v30 = vadd.f32 %v3936_v44, %v3935_v12  ;;  %v3921_v12 = vrot.slane %v3920_v2, 2  ;;  %v3929_v17 = vrot.slane %v3928_v41, 2  ;;  %v3897_v44 = vrot.slane %v3896_v8, 1 }
 0x6f8   :  { %v3906_v26 = vrot.slane %v3905_v62, 1  ;;  %v3954_v25 = vadd.f32 %v3953_v34, %v3952_v53  ;;  %4167 = vmatpush.msrb.mxu3 %v8857_v31  ;;  %4228 = vmatpush.msra.mxu1 %v8857_v31  ;;  %v3874_v29 = vadd.f32 %v3873_v4, %v3857_v35  ;;  %v3882_v24 = vadd.f32 %v3881_v20, %v3865_v33 }
 0x6f9   :  { %v3938_v27 = vrot.slane %v3937_v30, 2  ;;  %v3898_v53 = vadd.f32 %v3897_v44, %v3896_v8  ;;  %v3946_v6 = vrot.slane %v3945_v36, 2 }
 0x6fa   :  { %4273 = vmatpush.msra.mxu3 %v8751_v19  ;;  %4333 = vmatpush.msrb.mxu1 %v8751_v19  ;;  %v3955_v35 = vrot.slane %v3954_v25, 2 }
 0x6fb   :  { %v3899_v20 = vadd.f32 %v3898_v53, %v3882_v24  ;;  %v3947_v33 = vadd.f32 %v3946_v6, %v3945_v36 }
 0x6fc   :  { %4274 = vmatpush.msra.mxu3 %v8758_v55  ;;  %4334 = vmatpush.msrb.mxu1 %v8758_v55 }
 0x6fd   :  { %v3948_v24 = vrot.slane %v3947_v33, 1 }
 0x6fe   :  { %4275 = vmatpush.msra.mxu3 %v8769_v10  ;;  %4335 = vmatpush.msrb.mxu1 %v8769_v10 }
 0x700   :  { %4276 = vmatpush.msra.mxu3 %v8776_v49  ;;  %4336 = vmatpush.msrb.mxu1 %v8776_v49 }
 0x702   :  { %4277 = vmatpush.msra.mxu3 %v8783_v50  ;;  %4337 = vmatpush.msrb.mxu1 %v8783_v50 }
 0x704   :  { %4278 = vmatpush.msra.mxu3 %v8795_v9  ;;  %4338 = vmatpush.msrb.mxu1 %v8795_v9 }
 0x706   :  { %4279 = vmatpush.msra.mxu3 %v8800_v57  ;;  %4339 = vmatpush.msrb.mxu1 %v8800_v57 }
 0x708   :  { %v3720_v21 = vpop.f32.mrf.mxu1  ;;  %4280 = vmatpush.msra.mxu3 %v8808_v59  ;;  %4340 = vmatpush.msrb.mxu1 %v8808_v59 }
 0x709   :  { %v3721_v43 = vadd.f32 %v3720_v21, %v3700_v52  ;;  %v3890_v21 = vadd.f32 %v3889_v7, %v3888_v1  ;;  %v3922_v1 = vadd.f32 %v3921_v12, %v3920_v2  ;;  %v3930_v52 = vadd.f32 %v3929_v17, %v3928_v41 }
 0x70a   :  { %v3939_v7 = vadd.f32 %v3938_v27, %v3937_v30  ;;  %v3914_v2 = vrot.slane %v3913_v46, 1  ;;  %v3907_v41 = vadd.f32 %v3906_v26, %v3905_v62  ;;  %4281 = vmatpush.msra.mxu3 %v8817_v22  ;;  %4341 = vmatpush.msrb.mxu1 %v8817_v22 }
 0x70b   :  { %v8853_v18 = vadd.f32 %v8680_v56, %v3721_v43  ;;  %v3923_v12 = vrot.slane %v3922_v1, 1  ;;  %v3891_v8 = vadd.f32 %v3890_v21, %v3874_v29  ;;  %v3931_v30 = vrot.slane %v3930_v52, 1 }
 0x70c   :  { %v3940_v44 = vrot.slane %v3939_v7, 1  ;;  %v3915_v21 = vadd.f32 %v3914_v2, %v3913_v46  ;;  %4282 = vmatpush.msra.mxu3 %v8825_v45  ;;  %4342 = vmatpush.msrb.mxu1 %v8825_v45 }
 0x70d   :  { %9758 = vst [vmem:[#allocation55_spill] sm:$0xff] %v8853_v18  ;;  %v3977_v14 = vsel %vm421_vm0, %v8853_v18, 0.0  ;;  %v3985_v39 = vmul.f32 %v8853_v18, %v8853_v18  ;;  %v3932_v29 = vadd.f32 %v3931_v30, %v3930_v52  ;;  %v3924_v36 = vadd.f32 %v3923_v12, %v3922_v1 }
 0x70e   :  { %v3978_v60 = vrot.slane %v3977_v14, 4  ;;  %v3679_v42 = vpop.f32.mrf.mxu3  ;;  %4283 = vmatpush.msra.mxu3 %v8831_v40  ;;  %4343 = vmatpush.msrb.mxu1 %v8831_v40 }
 0x70f   :  { %v3986_v48 = vsel %vm421_vm0, %v3985_v39, 0.0  ;;  %v3680_v38 = vadd.f32 %v3679_v42, %v3659_v37  ;;  %v3956_v39 = vadd.f32 %v3955_v35, %v3954_v25 }
 0x710   :  { %v3979_v34 = vadd.f32 %v3978_v60, %v3977_v14  ;;  %v3987_v43 = vrot.slane %v3986_v48, 4  ;;  %v3908_v14 = vadd.f32 %v3907_v41, %v3891_v8  ;;  %4284 = vmatpush.msra.mxu3 %v8835_v28  ;;  %4344 = vmatpush.msrb.mxu1 %v8835_v28 }
 0x711   :  { %v8871_v4 = vadd.f32 %v8680_v56, %v3680_v38  ;;  %v3941_v38 = vadd.f32 %v3940_v44, %v3939_v7  ;;  %v3957_v46 = vrot.slane %v3956_v39, 1  ;;  %v3949_v7 = vadd.f32 %v3948_v24, %v3947_v33 }
 0x712   :  { %v3988_v17 = vadd.f32 %v3987_v43, %v3986_v48  ;;  %v3980_v26 = vrot.slane %v3979_v34, 2  ;;  %v3916_v48 = vadd.f32 %v3915_v21, %v3899_v20  ;;  %v3925_v25 = vadd.f32 %v3924_v36, %v3908_v14  ;;  %4285 = vmatpush.msra.mxu3 %v8842_v13  ;;  %4345 = vmatpush.msrb.mxu1 %v8842_v13 }
 0x713   :  { %v3960_v27 = vsel %vm421_vm0, %v8871_v4, 0.0  ;;  %v3968_v62 = vmul.f32 %v8871_v4, %v8871_v4  ;;  %v3958_v30 = vadd.f32 %v3957_v46, %v3956_v39 }
 0x714   :  { %v3961_v56 = vrot.slane %v3960_v27, 4  ;;  %v3989_v60 = vrot.slane %v3988_v17, 2  ;;  %v3981_v6 = vadd.f32 %v3980_v26, %v3979_v34  ;;  %v3933_v52 = vadd.f32 %v3932_v29, %v3916_v48  ;;  %4286 = vmatpush.msra.mxu3 %v8846_v16  ;;  %4346 = vmatpush.msrb.mxu1 %v8846_v16 }
 0x715   :  { %v3969_v37 = vsel %vm421_vm0, %v3968_v62, 0.0  ;;  %v3942_v1 = vadd.f32 %v3941_v38, %v3925_v25  ;;  %v4010_v25 = vld [vmem:[#allocation4 + $0x19] sm:$0x1] }
 0x716   :  { %v3962_v42 = vadd.f32 %v3961_v56, %v3960_v27  ;;  %v3970_v53 = vrot.slane %v3969_v37, 4  ;;  %v3990_v2 = vadd.f32 %v3989_v60, %v3988_v17  ;;  %v3982_v12 = vrot.slane %v3981_v6, 1  ;;  %4287 = vmatpush.msra.mxu3 %v8850_v23  ;;  %4347 = vmatpush.msrb.mxu1 %v8850_v23 }
 0x717   :  { %v3950_v44 = vadd.f32 %v3949_v7, %v3933_v52  ;;  %v3959_v62 = vadd.f32 %v3958_v30, %v3942_v1 }
 0x718   :  { %v3963_v43 = vrot.slane %v3962_v42, 2  ;;  %v3971_v18 = vadd.f32 %v3970_v53, %v3969_v37  ;;  %v3991_v20 = vrot.slane %v3990_v2, 1  ;;  %v3983_v26 = vadd.f32 %v3982_v12, %v3981_v6  ;;  %4288 = vmatpush.msra.mxu3 %v8857_v31  ;;  %4348 = vmatpush.msrb.mxu1 %v8857_v31 }
 0x71a   :  { %v3964_v41 = vadd.f32 %v3963_v43, %v3962_v42  ;;  %v3972_v35 = vrot.slane %v3971_v18, 2 }
 0x71c   :  { %v3965_v34 = vrot.slane %v3964_v41, 1  ;;  %v3973_v8 = vadd.f32 %v3972_v35, %v3971_v18  ;;  %v3992_v18 = vadd.f32 %v3991_v20, %v3990_v2 }
 0x71e   :  { %v3966_v27 = vadd.f32 %v3965_v34, %v3964_v41  ;;  %v3974_v17 = vrot.slane %v3973_v8, 1  ;;  %v4012_v41 = vld [vmem:[#allocation4 + $0x1a] sm:$0x1] }
 0x720   :  { %v3967_v56 = vadd.f32 %v3966_v27, %v3950_v44  ;;  %v3975_v33 = vadd.f32 %v3974_v17, %v3973_v8 }
 0x722   :  { %v3976_v21 = vadd.f32 %v3975_v33, %v3959_v62  ;;  %v3984_v14 = vadd.f32 %v3983_v26, %v3967_v56 }
 0x724   :  { %v3993_v39 = vadd.f32 %v3992_v18, %v3976_v21  ;;  %v3994_v37 = vmul.f32 0.03125, %v3984_v14 }
 0x726   :  { %v3995_v29 = vmul.f32 0.03125, %v3993_v39  ;;  %v3996_v60 = vmul.f32 %v3994_v37, %v3994_v37 }
 0x728   :  { %v3997_v42 = vsub.f32 %v3995_v29, %v3996_v60 }
 0x72a   :  { %v3998_v53 = vmax.f32 %v3997_v42, 0.0 }
 0x72c   :  { %v3999_v36 = vadd.f32 1e-05, %v3998_v53 }
 0x72e   :  { %5225 = vrsqrt.f32 %v3999_v36  ;;  %vm4006_vm10 = vweird.f32 %v3999_v36 }
 0x734   :  { %v5226_v48 = vpop.eup %5225 }
 0x735   :  { %v4001_v38 = vmul.f32 %v5226_v48, %v3999_v36  ;;  %vm4007_vm9 = vweird.f32 %v5226_v48 }
 0x736   :  { %vm4008_vm11 = vmor %vm4006_vm10, %vm4007_vm9 }
 0x737   :  { %v4002_v24 = vmul.f32 %v5226_v48, %v4001_v38  ;;  %v9759_v38 = vld [vmem:[#allocation55_spill] sm:$0xff] }
 0x739   :  { %v4003_v6 = vmul.f32 0.5, %v4002_v24 }
 0x73b   :  { %v4004_v43 = vsub.f32 1.5, %v4003_v6 }
 0x73d   :  { %v4005_v46 = vmul.f32 %v5226_v48, %v4004_v43 }
 0x73f   :  { %v4009_v52 = vsel %vm4008_vm11, %v5226_v48, %v4005_v46  ;;  %v9761_v46 = vld [vmem:[#allocation27_spill] sm:$0xff] }
 0x740   :  { %v4011_v2 = vmul.f32 %v4010_v25, %v4009_v52 }
 0x742   :  { %v4013_v35 = vmul.f32 %v4011_v2, %v3994_v37  ;;  %v8906_v1 = vperm.slane %v4011_v2, 0 }
 0x744   :  { %v4014_v7 = vsub.f32 %v4012_v41, %v4013_v35  ;;  %v4087_v12 = vmul.f32 %v8906_v1, %v8871_v4  ;;  %v4016_v8 = vmul.f32 %v8906_v1, %v8683_v0  ;;  %v4022_v30 = vmul.f32 %v8906_v1, %v8686_v15 }
 0x745   :  { %v4047_v20 = vmul.f32 %v8906_v1, %v8731_v32  ;;  %v4027_v4 = vmul.f32 %v8906_v1, %v8691_v11  ;;  %v4032_v62 = vmul.f32 %v8906_v1, %v8704_v54  ;;  %v4052_v26 = vmul.f32 %v8906_v1, %v8734_v58 }
 0x746   :  { %v8910_v34 = vperm.slane %v4014_v7, 0  ;;  %v4057_v11 = vmul.f32 %v8906_v1, %v8746_v51  ;;  %v4062_v54 = vmul.f32 %v8906_v1, %v8749_v3  ;;  %v4067_v14 = vmul.f32 %v8906_v1, %v8767_v47 }
 0x747   :  { %v4072_v39 = vmul.f32 %v8906_v1, %v8786_v61  ;;  %v4077_v61 = vmul.f32 %v8906_v1, %v8793_v63  ;;  %v4082_v48 = vmul.f32 %v8906_v1, %v8815_v5  ;;  %v4092_v63 = vmul.f32 %v8906_v1, %v9759_v38  ;;  %v9760_v5 = vld [vmem:[#allocation39_spill] sm:$0xff] }
 0x748   :  { %v8919_v44 = vadd.f32 %v4087_v12, %v8910_v34  ;;  %v4018_v27 = vadd.f32 %v8910_v34, %v4016_v8  ;;  %v4023_v17 = vadd.f32 %v4022_v30, %v8910_v34  ;;  %v8928_v0 = vadd.f32 %v4047_v20, %v8910_v34 }
 0x749   :  { %v4028_v18 = vadd.f32 %v4027_v4, %v8910_v34  ;;  %v4033_v21 = vadd.f32 %v4032_v62, %v8910_v34  ;;  %v8943_v58 = vadd.f32 %v4052_v26, %v8910_v34  ;;  %v8948_v37 = vadd.f32 %v4057_v11, %v8910_v34 }
 0x74a   :  { %vm4019_vm12 = vcmp.ge.f32.partialorder %v4018_v27, 0.0  ;;  %v4020_v15 = vmul.f32 0.2, %v4018_v27  ;;  %vm4024_vm13 = vcmp.ge.f32.partialorder %v4023_v17, 0.0  ;;  %v4025_v32 = vmul.f32 0.2, %v4023_v17 }
 0x74b   :  { %v8951_v51 = vadd.f32 %v4062_v54, %v8910_v34  ;;  %v8954_v3 = vadd.f32 %v4067_v14, %v8910_v34  ;;  %v4030_v47 = vmul.f32 0.2, %v4028_v18  ;;  %v4035_v29 = vmul.f32 0.2, %v4033_v21  ;;  %v4149_v54 = vpop.f32.mrf.mxu2 }
 0x74c   :  { %v4021_v56 = vsel %vm4019_vm12, %v4018_v27, %v4020_v15  ;;  %v4026_v33 = vsel %vm4024_vm13, %v4023_v17, %v4025_v32  ;;  %v8959_v60 = vadd.f32 %v4072_v39, %v8910_v34  ;;  %vm4029_vm14 = vcmp.ge.f32.partialorder %v4028_v18, 0.0  ;;  %v4210_v15 = vpop.f32.mrf.mxu0 }
 0x74d   :  { %4168 = vmatmul.f32.vlgmr.msrb.gmra.mxu3 %v4021_v56  ;;  %4229 = vmatmul.f32.vlgmr.msra.gmra.mxu1 %v4026_v33  ;;  %vm4034_vm15 = vcmp.ge.f32.partialorder %v4033_v21, 0.0  ;;  %v8966_v42 = vadd.f32 %v4077_v61, %v8910_v34  ;;  %v4031_v53 = vsel %vm4029_vm14, %v4028_v18, %v4030_v47  ;;  %v8977_v24 = vadd.f32 %v4082_v48, %v8910_v34 }
 0x74e   :  { %4393 = vmatpush.msrb.mxu3 %v8751_v19  ;;  %4453 = vmatpush.msra.mxu1 %v8751_v19  ;;  %v4036_v36 = vsel %vm4034_vm15, %v4033_v21, %v4035_v29  ;;  %v8980_v6 = vadd.f32 %v4092_v63, %v8910_v34  ;;  %v4037_v43 = vmul.f32 %v8906_v1, %v9760_v5  ;;  %v4050_v12 = vmul.f32 0.2, %v8928_v0  ;;  %v9127_v21 = vld [vmem:[#allocation2 + $0xaf8] sm:$0xff] }
 0x74f   :  { %v4042_v25 = vmul.f32 %v8906_v1, %v9761_v46  ;;  %vm4049_vm3 = vcmp.ge.f32.partialorder %v8928_v0, 0.0  ;;  %vm4054_vm4 = vcmp.ge.f32.partialorder %v8943_v58, 0.0  ;;  %v4060_v20 = vmul.f32 0.2, %v8948_v37 }
 0x750   :  { %4394 = vmatpush.msrb.mxu3 %v8758_v55  ;;  %4454 = vmatpush.msra.mxu1 %v8758_v55  ;;  %v4038_v52 = vadd.f32 %v4037_v43, %v8910_v34  ;;  %v4051_v8 = vsel %vm4049_vm3, %v8928_v0, %v4050_v12  ;;  %v4065_v27 = vmul.f32 0.2, %v8951_v51  ;;  %vm4059_vm5 = vcmp.ge.f32.partialorder %v8948_v37, 0.0  ;;  %v9118_v0 = vld [vmem:[#allocation4 + $0x1b] ss:$0 sm:$0xff] }
 0x751   :  { %v4043_v2 = vadd.f32 %v4042_v25, %v8910_v34  ;;  %v4055_v34 = vmul.f32 0.2, %v8943_v58  ;;  %vm4064_vm6 = vcmp.ge.f32.partialorder %v8951_v51, 0.0  ;;  %v4061_v17 = vsel %vm4059_vm5, %v8948_v37, %v4060_v20 }
 0x752   :  { %4395 = vmatpush.msrb.mxu3 %v8769_v10  ;;  %4455 = vmatpush.msra.mxu1 %v8769_v10  ;;  %v4040_v41 = vmul.f32 0.2, %v4038_v52  ;;  %vm4039_vm1 = vcmp.ge.f32.partialorder %v4038_v52, 0.0  ;;  %v4066_v4 = vsel %vm4064_vm6, %v8951_v51, %v4065_v27  ;;  %v4075_v62 = vmul.f32 0.2, %v8959_v60 }
 0x753   :  { %v4045_v35 = vmul.f32 0.2, %v4043_v2  ;;  %vm4044_vm2 = vcmp.ge.f32.partialorder %v4043_v2, 0.0  ;;  %v4056_v30 = vsel %vm4054_vm4, %v8943_v58, %v4055_v34  ;;  %vm4069_vm7 = vcmp.ge.f32.partialorder %v8954_v3, 0.0  ;;  %v4270_v61 = vpop.f32.mrf.mxu2 }
 0x754   :  { %4396 = vmatpush.msrb.mxu3 %v8776_v49  ;;  %4456 = vmatpush.msra.mxu1 %v8776_v49  ;;  %v4041_v1 = vsel %vm4039_vm1, %v4038_v52, %v4040_v41  ;;  %vm4074_vm8 = vcmp.ge.f32.partialorder %v8959_v60, 0.0  ;;  %v4330_v39 = vpop.f32.mrf.mxu0  ;;  %v4085_v46 = vmul.f32 0.2, %v8977_v24  ;;  %vm4079_vm9 = vcmp.ge.f32.partialorder %v8966_v42, 0.0 }
 0x755   :  { %4289 = vmatmul.f32.vlgmr.msra.gmra.mxu3 %v4031_v53  ;;  %4349 = vmatmul.f32.vlgmr.msrb.gmra.mxu1 %v4036_v36  ;;  %v4046_v7 = vsel %vm4044_vm2, %v4043_v2, %v4045_v35  ;;  %v4076_v33 = vsel %vm4074_vm8, %v8959_v60, %v4075_v62  ;;  %vm4084_vm10 = vcmp.ge.f32.partialorder %v8977_v24, 0.0 }
 0x756   :  { %4397 = vmatpush.msrb.mxu3 %v8783_v50  ;;  %4457 = vmatpush.msra.mxu1 %v8783_v50  ;;  %v4086_v35 = vsel %vm4084_vm10, %v8977_v24, %v4085_v46  ;;  %v5355_v46 = vld [vmem:[#allocation2 + $0xab8] sm:$0xff] }
 0x758   :  { %4398 = vmatpush.msrb.mxu3 %v8795_v9  ;;  %4458 = vmatpush.msra.mxu1 %v8795_v9 }
 0x75a   :  { %4399 = vmatpush.msrb.mxu3 %v8800_v57  ;;  %4459 = vmatpush.msra.mxu1 %v8800_v57 }
 0x75c   :  { %4400 = vmatpush.msrb.mxu3 %v8808_v59  ;;  %4460 = vmatpush.msra.mxu1 %v8808_v59 }
 0x75e   :  { %4401 = vmatpush.msrb.mxu3 %v8817_v22  ;;  %4461 = vmatpush.msra.mxu1 %v8817_v22 }
 0x760   :  { %4402 = vmatpush.msrb.mxu3 %v8825_v45  ;;  %4462 = vmatpush.msra.mxu1 %v8825_v45 }
 0x762   :  { %4403 = vmatpush.msrb.mxu3 %v8831_v40  ;;  %4463 = vmatpush.msra.mxu1 %v8831_v40 }
 0x764   :  { %4404 = vmatpush.msrb.mxu3 %v8835_v28  ;;  %4464 = vmatpush.msra.mxu1 %v8835_v28 }
 0x766   :  { %4405 = vmatpush.msrb.mxu3 %v8842_v13  ;;  %4465 = vmatpush.msra.mxu1 %v8842_v13 }
 0x768   :  { %4406 = vmatpush.msrb.mxu3 %v8846_v16  ;;  %4466 = vmatpush.msra.mxu1 %v8846_v16 }
 0x76a   :  { %4407 = vmatpush.msrb.mxu3 %v8850_v23  ;;  %4467 = vmatpush.msra.mxu1 %v8850_v23 }
 0x76c   :  { %4408 = vmatpush.msrb.mxu3 %v8857_v31  ;;  %4468 = vmatpush.msra.mxu1 %v8857_v31 }
 0x76d   :  { %4409 = vmatmul.f32.vlgmr.msrb.gmra.mxu3 %v4041_v1  ;;  %4469 = vmatmul.f32.vlgmr.msra.gmra.mxu1 %v4046_v7 }
 0x76e   :  { %4513 = vmatpush.msra.mxu3 %v8751_v19  ;;  %4573 = vmatpush.msrb.mxu1 %v8751_v19 }
 0x770   :  { %4514 = vmatpush.msra.mxu3 %v8758_v55  ;;  %4574 = vmatpush.msrb.mxu1 %v8758_v55 }
 0x772   :  { %4515 = vmatpush.msra.mxu3 %v8769_v10  ;;  %4575 = vmatpush.msrb.mxu1 %v8769_v10 }
 0x774   :  { %4516 = vmatpush.msra.mxu3 %v8776_v49  ;;  %4576 = vmatpush.msrb.mxu1 %v8776_v49 }
 0x776   :  { %4517 = vmatpush.msra.mxu3 %v8783_v50  ;;  %4577 = vmatpush.msrb.mxu1 %v8783_v50 }
 0x778   :  { %4518 = vmatpush.msra.mxu3 %v8795_v9  ;;  %4578 = vmatpush.msrb.mxu1 %v8795_v9 }
 0x77a   :  { %4519 = vmatpush.msra.mxu3 %v8800_v57  ;;  %4579 = vmatpush.msrb.mxu1 %v8800_v57 }
 0x77c   :  { %4520 = vmatpush.msra.mxu3 %v8808_v59  ;;  %4580 = vmatpush.msrb.mxu1 %v8808_v59 }
 0x77e   :  { %4521 = vmatpush.msra.mxu3 %v8817_v22  ;;  %4581 = vmatpush.msrb.mxu1 %v8817_v22 }
 0x780   :  { %4522 = vmatpush.msra.mxu3 %v8825_v45  ;;  %4582 = vmatpush.msrb.mxu1 %v8825_v45 }
 0x782   :  { %4523 = vmatpush.msra.mxu3 %v8831_v40  ;;  %4583 = vmatpush.msrb.mxu1 %v8831_v40 }
 0x784   :  { %4524 = vmatpush.msra.mxu3 %v8835_v28  ;;  %4584 = vmatpush.msrb.mxu1 %v8835_v28 }
 0x786   :  { %4525 = vmatpush.msra.mxu3 %v8842_v13  ;;  %4585 = vmatpush.msrb.mxu1 %v8842_v13 }
 0x788   :  { %4526 = vmatpush.msra.mxu3 %v8846_v16  ;;  %4586 = vmatpush.msrb.mxu1 %v8846_v16 }
 0x78a   :  { %4527 = vmatpush.msra.mxu3 %v8850_v23  ;;  %4587 = vmatpush.msrb.mxu1 %v8850_v23 }
 0x78c   :  { %4528 = vmatpush.msra.mxu3 %v8857_v31  ;;  %4588 = vmatpush.msrb.mxu1 %v8857_v31 }
 0x78d   :  { %4529 = vmatmul.f32.vlgmr.msra.gmra.mxu3 %v4051_v8  ;;  %4589 = vmatmul.f32.vlgmr.msrb.gmra.mxu1 %v4056_v30  ;;  %v5348_v30 = vld [vmem:[#allocation2 + $0xaf0] sm:$0xff] }
 0x78e   :  { %4633 = vmatpush.msrb.mxu3 %v8751_v19  ;;  %4693 = vmatpush.msra.mxu1 %v8751_v19 }
 0x790   :  { %4634 = vmatpush.msrb.mxu3 %v8758_v55  ;;  %4694 = vmatpush.msra.mxu1 %v8758_v55 }
 0x792   :  { %4635 = vmatpush.msrb.mxu3 %v8769_v10  ;;  %4695 = vmatpush.msra.mxu1 %v8769_v10 }
 0x794   :  { %4636 = vmatpush.msrb.mxu3 %v8776_v49  ;;  %4696 = vmatpush.msra.mxu1 %v8776_v49 }
 0x796   :  { %4637 = vmatpush.msrb.mxu3 %v8783_v50  ;;  %4697 = vmatpush.msra.mxu1 %v8783_v50 }
 0x798   :  { %4638 = vmatpush.msrb.mxu3 %v8795_v9  ;;  %4698 = vmatpush.msra.mxu1 %v8795_v9 }
 0x79a   :  { %4639 = vmatpush.msrb.mxu3 %v8800_v57  ;;  %4699 = vmatpush.msra.mxu1 %v8800_v57 }
 0x79c   :  { %4640 = vmatpush.msrb.mxu3 %v8808_v59  ;;  %4700 = vmatpush.msra.mxu1 %v8808_v59 }
 0x79e   :  { %4641 = vmatpush.msrb.mxu3 %v8817_v22  ;;  %4701 = vmatpush.msra.mxu1 %v8817_v22 }
 0x7a0   :  { %4642 = vmatpush.msrb.mxu3 %v8825_v45  ;;  %4702 = vmatpush.msra.mxu1 %v8825_v45 }
 0x7a2   :  { %4643 = vmatpush.msrb.mxu3 %v8831_v40  ;;  %4703 = vmatpush.msra.mxu1 %v8831_v40 }
 0x7a4   :  { %4644 = vmatpush.msrb.mxu3 %v8835_v28  ;;  %4704 = vmatpush.msra.mxu1 %v8835_v28 }
 0x7a6   :  { %4645 = vmatpush.msrb.mxu3 %v8842_v13  ;;  %4705 = vmatpush.msra.mxu1 %v8842_v13 }
 0x7a8   :  { %4646 = vmatpush.msrb.mxu3 %v8846_v16  ;;  %4706 = vmatpush.msra.mxu1 %v8846_v16 }
 0x7aa   :  { %4647 = vmatpush.msrb.mxu3 %v8850_v23  ;;  %4707 = vmatpush.msra.mxu1 %v8850_v23 }
 0x7ac   :  { %4648 = vmatpush.msrb.mxu3 %v8857_v31  ;;  %4708 = vmatpush.msra.mxu1 %v8857_v31 }
 0x7ad   :  { %4649 = vmatmul.f32.vlgmr.msrb.gmra.mxu3 %v4061_v17  ;;  %4709 = vmatmul.f32.vlgmr.msra.gmra.mxu1 %v4066_v4 }
 0x7ae   :  { %4753 = vmatpush.msra.mxu3 %v8751_v19  ;;  %4813 = vmatpush.msrb.mxu1 %v8751_v19  ;;  %v4070_v19 = vmul.f32 0.2, %v8954_v3 }
 0x7b0   :  { %4754 = vmatpush.msra.mxu3 %v8758_v55  ;;  %4814 = vmatpush.msrb.mxu1 %v8758_v55  ;;  %v4071_v56 = vsel %vm4069_vm7, %v8954_v3, %v4070_v19 }
 0x7b2   :  { %4755 = vmatpush.msra.mxu3 %v8769_v10  ;;  %4815 = vmatpush.msrb.mxu1 %v8769_v10 }
 0x7b4   :  { %4756 = vmatpush.msra.mxu3 %v8776_v49  ;;  %4816 = vmatpush.msrb.mxu1 %v8776_v49 }
 0x7b6   :  { %4757 = vmatpush.msra.mxu3 %v8783_v50  ;;  %4817 = vmatpush.msrb.mxu1 %v8783_v50 }
 0x7b8   :  { %4758 = vmatpush.msra.mxu3 %v8795_v9  ;;  %4818 = vmatpush.msrb.mxu1 %v8795_v9 }
 0x7ba   :  { %4759 = vmatpush.msra.mxu3 %v8800_v57  ;;  %4819 = vmatpush.msrb.mxu1 %v8800_v57 }
 0x7bc   :  { %4760 = vmatpush.msra.mxu3 %v8808_v59  ;;  %4820 = vmatpush.msrb.mxu1 %v8808_v59 }
 0x7be   :  { %4761 = vmatpush.msra.mxu3 %v8817_v22  ;;  %4821 = vmatpush.msrb.mxu1 %v8817_v22 }
 0x7c0   :  { %4762 = vmatpush.msra.mxu3 %v8825_v45  ;;  %4822 = vmatpush.msrb.mxu1 %v8825_v45 }
 0x7c2   :  { %4763 = vmatpush.msra.mxu3 %v8831_v40  ;;  %4823 = vmatpush.msrb.mxu1 %v8831_v40 }
 0x7c4   :  { %4764 = vmatpush.msra.mxu3 %v8835_v28  ;;  %4824 = vmatpush.msrb.mxu1 %v8835_v28 }
 0x7c6   :  { %4765 = vmatpush.msra.mxu3 %v8842_v13  ;;  %4825 = vmatpush.msrb.mxu1 %v8842_v13 }
 0x7c8   :  { %4766 = vmatpush.msra.mxu3 %v8846_v16  ;;  %4826 = vmatpush.msrb.mxu1 %v8846_v16 }
 0x7ca   :  { %4767 = vmatpush.msra.mxu3 %v8850_v23  ;;  %4827 = vmatpush.msrb.mxu1 %v8850_v23  ;;  %v4230_v32 = vpop.f32.mrf.mxu1 }
 0x7cb   :  { %v4231_v26 = vadd.f32 %v4230_v32, %v4210_v15 }
 0x7cc   :  { %4768 = vmatpush.msra.mxu3 %v8857_v31  ;;  %4828 = vmatpush.msrb.mxu1 %v8857_v31 }
 0x7cd   :  { %4769 = vmatmul.f32.vlgmr.msra.gmra.mxu3 %v4071_v56  ;;  %4829 = vmatmul.f32.vlgmr.msrb.gmra.mxu1 %v4076_v33  ;;  %v4233_v18 = vadd.f32 %v9118_v0, %v4231_v26  ;;  %v5349_v56 = vld [vmem:[#allocation2 + $0xae8] sm:$0xff] }
 0x7ce   :  { %4873 = vmatpush.msrb.mxu3 %v9127_v21  ;;  %4933 = vmatpush.msra.mxu1 %v9127_v21 }
 0x7cf   :  { %v5180_v11 = vmul.f32 -1.442695, %v4233_v18 }
 0x7d0   :  { %4874 = vmatpush.msrb.mxu3 %v8758_v55  ;;  %4934 = vmatpush.msra.mxu1 %v8758_v55  ;;  %v4169_v14 = vpop.f32.mrf.mxu3 }
 0x7d1   :  { %5227 = vpow2.f32 %v5180_v11  ;;  %v4170_v58 = vadd.f32 %v4169_v14, %v4149_v54 }
 0x7d2   :  { %4875 = vmatpush.msrb.mxu3 %v8769_v10  ;;  %4935 = vmatpush.msra.mxu1 %v8769_v10  ;;  %v4350_v37 = vpop.f32.mrf.mxu1 }
 0x7d3   :  { %v4173_v51 = vadd.f32 %v9118_v0, %v4170_v58  ;;  %v4351_v3 = vadd.f32 %v4350_v37, %v4330_v39  ;;  %v5350_v39 = vld [vmem:[#allocation2 + $0xae0] sm:$0xff] }
 0x7d4   :  { %4876 = vmatpush.msrb.mxu3 %v8776_v49  ;;  %4936 = vmatpush.msra.mxu1 %v8776_v49 }
 0x7d5   :  { %v5179_v47 = vmul.f32 -1.442695, %v4173_v51  ;;  %v4353_v29 = vadd.f32 %v9118_v0, %v4351_v3  ;;  %v4450_v3 = vpop.f32.mrf.mxu0 }
 0x7d6   :  { %4877 = vmatpush.msrb.mxu3 %v8783_v50  ;;  %4937 = vmatpush.msra.mxu1 %v8783_v50 }
 0x7d7   :  { %v5228_v55 = vpop.eup %5227  ;;  %5229 = vpow2.f32 %v5179_v47  ;;  %v5182_v60 = vmul.f32 -1.442695, %v4353_v29 }
 0x7d8   :  { %v9141_v10 = vadd.f32 1.0, %v5228_v55  ;;  %4878 = vmatpush.msrb.mxu3 %v8795_v9  ;;  %4938 = vmatpush.msra.mxu1 %v8795_v9  ;;  %v4290_v53 = vpop.f32.mrf.mxu3 }
 0x7d9   :  { %5231 = vpow2.f32 %v5182_v60  ;;  %v4291_v49 = vadd.f32 %v4290_v53, %v4270_v61  ;;  %v5351_v61 = vld [vmem:[#allocation2 + $0xad8] sm:$0xff] }
 0x7da   :  { %5233 = vrcp.f32 %v9141_v10  ;;  %4879 = vmatpush.msrb.mxu3 %v8800_v57  ;;  %4939 = vmatpush.msra.mxu1 %v8800_v57  ;;  %vm4243_vm11 = vweird.f32 %v9141_v10 }
 0x7db   :  { %v4293_v50 = vadd.f32 %v9118_v0, %v4291_v49 }
 0x7dc   :  { %4880 = vmatpush.msrb.mxu3 %v8808_v59  ;;  %4940 = vmatpush.msra.mxu1 %v8808_v59 }
 0x7dd   :  { %v5230_v36 = vpop.eup %5229  ;;  %v5181_v48 = vmul.f32 -1.442695, %v4293_v50 }
 0x7de   :  { %v9151_v38 = vadd.f32 1.0, %v5230_v36  ;;  %4881 = vmatpush.msrb.mxu3 %v8817_v22  ;;  %4941 = vmatpush.msra.mxu1 %v8817_v22 }
 0x7df   :  { %v5232_v9 = vpop.eup %5231  ;;  %5235 = vpow2.f32 %v5181_v48  ;;  %v5352_v48 = vld [vmem:[#allocation2 + $0xad0] sm:$0xff] }
 0x7e0   :  { %v9155_v63 = vpop.eup %5233  ;;  %5237 = vrcp.f32 %v9151_v38  ;;  %4882 = vmatpush.msrb.mxu3 %v8825_v45  ;;  %4942 = vmatpush.msra.mxu1 %v8825_v45  ;;  %v9160_v57 = vadd.f32 1.0, %v5232_v9  ;;  %vm4183_vm14 = vweird.f32 %v9151_v38  ;;  %v4187_v19 = vand.u32 2147483647, %v9151_v38 }
 0x7e1   :  { %v4239_v59 = vmul.f32 %v9155_v63, %v9141_v10  ;;  %vm4244_vm12 = vweird.f32 %v9155_v63  ;;  %v4189_v62 = vand.u32 2147483648, %v9151_v38 }
 0x7e2   :  { %4883 = vmatpush.msrb.mxu3 %v8831_v40  ;;  %4943 = vmatpush.msra.mxu1 %v8831_v40  ;;  %5239 = vrcp.f32 %v9160_v57  ;;  %vm4363_vm15 = vweird.f32 %v9160_v57  ;;  %v4369_v8 = vand.u32 2147483648, %v9160_v57  ;;  %vm9217_vm1 = vmor %vm4243_vm11, %vm4244_vm12  ;;  %v4367_v17 = vand.u32 2147483647, %v9160_v57 }
 0x7e3   :  { %v4240_v45 = vsub.f32 1.0, %v4239_v59  ;;  %v4190_v29 = vor.u32 1.1754944e-38, %v4189_v62  ;;  %vm4188_vm10 = vcmp.eq.f32.partialorder %v4187_v19, 8.507059e+37  ;;  %vm5122_vm12 = vcmask 1045508   ;;  %v5353_v59 = vld [vmem:[#allocation2 + $0xac8] sm:$0xff] }
 0x7e4   :  { %4884 = vmatpush.msrb.mxu3 %v8835_v28  ;;  %4944 = vmatpush.msra.mxu1 %v8835_v28  ;;  %v4080_v28 = vmul.f32 0.2, %v8966_v42  ;;  %v4370_v14 = vor.u32 1.1754944e-38, %v4369_v8  ;;  %vm4368_vm7 = vcmp.eq.f32.partialorder %v4367_v17, 8.507059e+37 }
 0x7e5   :  { %v5236_v22 = vpop.eup %5235 }
 0x7e6   :  { %v9169_v5 = vpop.eup %5237  ;;  %v9171_v43 = vadd.f32 1.0, %v5236_v22  ;;  %4885 = vmatpush.msrb.mxu3 %v8842_v13  ;;  %4945 = vmatpush.msra.mxu1 %v8842_v13  ;;  %v4081_v41 = vsel %vm4079_vm9, %v8966_v42, %v4080_v28  ;;  %v4249_v42 = vand.u32 2147483648, %v9141_v10  ;;  %v5354_v28 = vld [vmem:[#allocation2 + $0xac0] sm:$0xff] }
 0x7e7   :  { %v4179_v40 = vmul.f32 %v9169_v5, %v9151_v38  ;;  %vm4184_vm2 = vweird.f32 %v9169_v5 }
 0x7e8   :  { %5241 = vrcp.f32 %v9171_v43  ;;  %4886 = vmatpush.msrb.mxu3 %v8846_v16  ;;  %4946 = vmatpush.msra.mxu1 %v8846_v16  ;;  %v9182_v25 = vpop.eup %5239  ;;  %v4241_v16 = vmul.f32 %v9155_v63, %v4240_v45  ;;  %v4307_v32 = vand.u32 2147483647, %v9171_v43  ;;  %v4309_v26 = vand.u32 2147483648, %v9171_v43  ;;  %vm9246_vm6 = vmor %vm4183_vm14, %vm4184_vm2 }
 0x7e9   :  { %v4180_v52 = vsub.f32 1.0, %v4179_v40  ;;  %v4359_v13 = vmul.f32 %v9182_v25, %v9160_v57  ;;  %vm4364_vm13 = vweird.f32 %v9182_v25  ;;  %v4250_v11 = vor.u32 1.1754944e-38, %v4249_v42  ;;  %v4390_v57 = vpop.f32.mrf.mxu2  ;;  %v5361_v42 = vld [vmem:[#allocation2 + $0xa88] sm:$0xff] }
 0x7ea   :  { %4887 = vmatpush.msrb.mxu3 %v8850_v23  ;;  %4947 = vmatpush.msra.mxu1 %v8850_v23  ;;  %v4247_v23 = vand.u32 2147483647, %v9141_v10  ;;  %vm9228_vm3 = vmor %vm4363_vm15, %vm4364_vm13  ;;  %v4470_v58 = vpop.f32.mrf.mxu1  ;;  %vm4303_vm8 = vweird.f32 %v9171_v43  ;;  %v4310_v60 = vor.u32 1.1754944e-38, %v4309_v26  ;;  %vm4308_vm11 = vcmp.eq.f32.partialorder %v4307_v32, 8.507059e+37 }
 0x7eb   :  { %v4360_v2 = vsub.f32 1.0, %v4359_v13  ;;  %v4181_v1 = vmul.f32 %v9169_v5, %v4180_v52  ;;  %v4471_v53 = vadd.f32 %v4470_v58, %v4450_v3  ;;  %vm5124_vm13 = vcmask 1043456   ;;  %v5356_v13 = vld [vmem:[#allocation2 + $0xab0] sm:$0xff] }
 0x7ec   :  { %4888 = vmatpush.msrb.mxu3 %v8857_v31  ;;  %4948 = vmatpush.msra.mxu1 %v8857_v31  ;;  %v4242_v31 = vadd.f32 %v9155_v63, %v4241_v16  ;;  %vm4248_vm5 = vcmp.eq.f32.partialorder %v4247_v23, 8.507059e+37  ;;  %v5357_v16 = vld [vmem:[#allocation2 + $0xaa8] sm:$0xff]  ;;  %v4095_v23 = vmul.f32 0.2, %v8980_v6  ;;  %vm4089_vm14 = vcmp.ge.f32.partialorder %v8919_v44, 0.0 }
 0x7ed   :  { %4889 = vmatmul.f32.vlgmr.msrb.gmra.mxu3 %v4081_v41  ;;  %4949 = vmatmul.f32.vlgmr.msra.gmra.mxu1 %v4086_v35  ;;  %v4361_v12 = vmul.f32 %v9182_v25, %v4360_v2  ;;  %v4182_v27 = vadd.f32 %v9169_v5, %v4181_v1  ;;  %v5358_v41 = vld [vmem:[#allocation2 + $0xaa0] sm:$0xff]  ;;  %v5359_v35 = vld [vmem:[#allocation2 + $0xa98] sm:$0xff]  ;;  %v5360_v1 = vld [vmem:[#allocation2 + $0xa90] sm:$0xff]  ;;  %vm4094_vm15 = vcmp.ge.f32.partialorder %v8980_v6, 0.0 }
 0x7ee   :  { %v9196_v7 = vpop.eup %5241  ;;  %4993 = vmatpush.msra.mxu3 %v9127_v21  ;;  %5053 = vmatpush.msrb.mxu1 %v9127_v21  ;;  %v4246_v33 = vsel %vm9217_vm1, %v9155_v63, %v4242_v31  ;;  %v4570_v31 = vpop.f32.mrf.mxu0 }
 0x7ef   :  { %v4299_v24 = vmul.f32 %v9196_v7, %v9171_v43  ;;  %v4362_v34 = vadd.f32 %v9182_v25, %v4361_v12  ;;  %vm4304_vm4 = vweird.f32 %v9196_v7  ;;  %v4186_v37 = vsel %vm9246_vm6, %v9169_v5, %v4182_v27 }
 0x7f0   :  { %4994 = vmatpush.msra.mxu3 %v5348_v30  ;;  %5054 = vmatpush.msrb.mxu1 %v5348_v30  ;;  %v4251_v47 = vsel %vm4248_vm5, %v4250_v11, %v4246_v33  ;;  %vm4305_vm9 = vmor %vm4303_vm8, %vm4304_vm4  ;;  %v4191_v49 = vsel %vm4188_vm10, %v4190_v29, %v4186_v37  ;;  %v4410_v36 = vpop.f32.mrf.mxu3  ;;  %v4473_v43 = vadd.f32 %v9118_v0, %v4471_v53  ;;  %v5362_v30 = vld [vmem:[#allocation2 + $0xa80] sm:$0xff] }
 0x7f1   :  { %v4300_v4 = vsub.f32 1.0, %v4299_v24  ;;  %v4366_v18 = vsel %vm9228_vm3, %v9182_v25, %v4362_v34  ;;  %v5109_v38 = vrot.slane %v4251_v47, 6  ;;  %v4411_v45 = vadd.f32 %v4410_v36, %v4390_v57  ;;  %v4510_v62 = vpop.f32.mrf.mxu2 }
 0x7f2   :  { %4995 = vmatpush.msra.mxu3 %v5349_v56  ;;  %5055 = vmatpush.msrb.mxu1 %v5349_v56  ;;  %v4371_v55 = vsel %vm4368_vm7, %v4370_v14, %v4366_v18  ;;  %v5184_v25 = vmul.f32 -1.442695, %v4473_v43  ;;  %v4096_v27 = vsel %vm4094_vm15, %v8980_v6, %v4095_v23 }
 0x7f3   :  { %v4301_v21 = vmul.f32 %v9196_v7, %v4300_v4  ;;  %v5111_v9 = vrot.slane %v4371_v55, 2  ;;  %v5121_v22 = vsel %vm421_vm0, %v4191_v49, %v5109_v38  ;;  %v4413_v52 = vadd.f32 %v9118_v0, %v4411_v45 }
 0x7f4   :  { %4996 = vmatpush.msra.mxu3 %v5350_v39  ;;  %5056 = vmatpush.msrb.mxu1 %v5350_v39  ;;  %5243 = vpow2.f32 %v5184_v25 }
 0x7f5   :  { %v4302_v51 = vadd.f32 %v9196_v7, %v4301_v21  ;;  %v5183_v2 = vmul.f32 -1.442695, %v4413_v52 }
 0x7f6   :  { %4997 = vmatpush.msra.mxu3 %v5351_v61  ;;  %5057 = vmatpush.msrb.mxu1 %v5351_v61 }
 0x7f7   :  { %v4306_v10 = vsel %vm4305_vm9, %v9196_v7, %v4302_v51  ;;  %5245 = vpow2.f32 %v5183_v2  ;;  %v4090_v7 = vmul.f32 0.2, %v8919_v44 }
 0x7f8   :  { %v4311_v50 = vsel %vm4308_vm11, %v4310_v60, %v4306_v10  ;;  %4998 = vmatpush.msra.mxu3 %v5352_v48  ;;  %5058 = vmatpush.msrb.mxu1 %v5352_v48 }
 0x7f9   :  { %v5110_v63 = vrot.slane %v4311_v50, 4  ;;  %v4091_v20 = vsel %vm4089_vm14, %v8919_v44, %v4090_v7 }
 0x7fa   :  { %4999 = vmatpush.msra.mxu3 %v5353_v59  ;;  %5059 = vmatpush.msrb.mxu1 %v5353_v59  ;;  %v5244_v12 = vpop.eup %5243 }
 0x7fb   :  { %v5123_v5 = vsel %vm5122_vm12, %v5110_v63, %v5111_v9  ;;  %v9270_v8 = vadd.f32 1.0, %v5244_v12 }
 0x7fc   :  { %v5125_v40 = vsel %vm5124_vm13, %v5121_v22, %v5123_v5  ;;  %5000 = vmatpush.msra.mxu3 %v5354_v28  ;;  %5060 = vmatpush.msrb.mxu1 %v5354_v28 }
 0x7fd   :  { %5139 = vst [vmem:[%s9378_s5] sm:$0xff] %v5125_v40  ;;  %v5246_v17 = vpop.eup %5245  ;;  %5247 = vrcp.f32 %v9270_v8  ;;  %vm4483_vm1 = vweird.f32 %v9270_v8  ;;  %v4487_v53 = vand.u32 2147483647, %v9270_v8  ;;  %v4489_v36 = vand.u32 2147483648, %v9270_v8 }
 0x7fe   :  { %5001 = vmatpush.msra.mxu3 %v5355_v46  ;;  %5061 = vmatpush.msrb.mxu1 %v5355_v46  ;;  %v9276_v15 = vadd.f32 1.0, %v5246_v17 }
 0x7ff   :  { %vm4488_vm10 = vcmp.eq.f32.partialorder %v4487_v53, 8.507059e+37  ;;  %v4490_v25 = vor.u32 1.1754944e-38, %v4489_v36 }
 0x800   :  { %5002 = vmatpush.msra.mxu3 %v5356_v13  ;;  %5062 = vmatpush.msrb.mxu1 %v5356_v13  ;;  %vm4423_vm4 = vweird.f32 %v9276_v15  ;;  %v4427_v22 = vand.u32 2147483647, %v9276_v15  ;;  %v4429_v5 = vand.u32 2147483648, %v9276_v15 }
 0x802   :  { %5003 = vmatpush.msra.mxu3 %v5357_v16  ;;  %5063 = vmatpush.msrb.mxu1 %v5357_v16 }
 0x803   :  { %v5248_v6 = vpop.eup %5247 }
 0x804   :  { %5004 = vmatpush.msra.mxu3 %v5358_v41  ;;  %5064 = vmatpush.msrb.mxu1 %v5358_v41  ;;  %v4479_v11 = vmul.f32 %v5248_v6, %v9270_v8  ;;  %vm4484_vm2 = vweird.f32 %v5248_v6  ;;  %v4430_v41 = vor.u32 1.1754944e-38, %v4429_v5 }
 0x805   :  { %vm9286_vm6 = vmor %vm4483_vm1, %vm4484_vm2  ;;  %vm4428_vm2 = vcmp.eq.f32.partialorder %v4427_v22, 8.507059e+37 }
 0x806   :  { %5005 = vmatpush.msra.mxu3 %v5359_v35  ;;  %5065 = vmatpush.msrb.mxu1 %v5359_v35  ;;  %v4480_v58 = vsub.f32 1.0, %v4479_v11 }
 0x808   :  { %5006 = vmatpush.msra.mxu3 %v5360_v1  ;;  %5066 = vmatpush.msrb.mxu1 %v5360_v1  ;;  %v4481_v47 = vmul.f32 %v5248_v6, %v4480_v58 }
 0x80a   :  { %5007 = vmatpush.msra.mxu3 %v5361_v42  ;;  %5067 = vmatpush.msrb.mxu1 %v5361_v42  ;;  %v4590_v24 = vpop.f32.mrf.mxu1  ;;  %v4482_v10 = vadd.f32 %v5248_v6, %v4481_v47 }
 0x80b   :  { %v4591_v34 = vadd.f32 %v4590_v24, %v4570_v31 }
 0x80c   :  { %5008 = vmatpush.msra.mxu3 %v5362_v30  ;;  %5068 = vmatpush.msrb.mxu1 %v5362_v30  ;;  %v4486_v59 = vsel %vm9286_vm6, %v5248_v6, %v4482_v10 }
 0x80d   :  { %5009 = vmatmul.f32.vlgmr.msra.gmra.mxu3 %v4091_v20  ;;  %5069 = vmatmul.f32.vlgmr.msrb.gmra.mxu1 %v4096_v27  ;;  %v4593_v4 = vadd.f32 %v9118_v0, %v4591_v34  ;;  %v4491_v2 = vsel %vm4488_vm10, %v4490_v25, %v4486_v59  ;;  %v4690_v27 = vpop.f32.mrf.mxu0 }
 0x80e   :  { %v5112_v31 = vrot.slane %v4491_v2, 6 }
 0x80f   :  { %v5186_v19 = vmul.f32 -1.442695, %v4593_v4 }
 0x810   :  { %v4530_v32 = vpop.f32.mrf.mxu3 }
 0x811   :  { %5249 = vpow2.f32 %v5186_v19  ;;  %v4531_v26 = vadd.f32 %v4530_v32, %v4510_v62  ;;  %v4630_v19 = vpop.f32.mrf.mxu2 }
 0x812   :  { %5251 = vrcp.f32 %v9276_v15 }
 0x813   :  { %v4533_v56 = vadd.f32 %v9118_v0, %v4531_v26 }
 0x815   :  { %v5185_v44 = vmul.f32 -1.442695, %v4533_v56  ;;  %v4810_v6 = vpop.f32.mrf.mxu0 }
 0x817   :  { %v5250_v33 = vpop.eup %5249  ;;  %5253 = vpow2.f32 %v5185_v44 }
 0x818   :  { %v4597_v18 = vadd.f32 1.0, %v5250_v33  ;;  %v5252_v21 = vpop.eup %5251 }
 0x819   :  { %v4419_v14 = vmul.f32 %v5252_v21, %v9276_v15  ;;  %vm4424_vm5 = vweird.f32 %v5252_v21  ;;  %v4750_v58 = vpop.f32.mrf.mxu2 }
 0x81a   :  { %5255 = vrcp.f32 %v4597_v18  ;;  %v4609_v48 = vand.u32 2147483648, %v4597_v18  ;;  %vm4603_vm7 = vweird.f32 %v4597_v18  ;;  %v4607_v63 = vand.u32 2147483647, %v4597_v18  ;;  %vm4425_vm11 = vmor %vm4423_vm4, %vm4424_vm5 }
 0x81b   :  { %v4420_v51 = vsub.f32 1.0, %v4419_v14 }
 0x81c   :  { %v4610_v52 = vor.u32 1.1754944e-38, %v4609_v48  ;;  %vm4608_vm14 = vcmp.eq.f32.partialorder %v4607_v63, 8.507059e+37 }
 0x81d   :  { %v5254_v54 = vpop.eup %5253  ;;  %v4421_v55 = vmul.f32 %v5252_v21, %v4420_v51 }
 0x81e   :  { %v4537_v39 = vadd.f32 1.0, %v5254_v54 }
 0x81f   :  { %v4422_v9 = vadd.f32 %v5252_v21, %v4421_v55 }
 0x820   :  { %v5256_v37 = vpop.eup %5255  ;;  %5257 = vrcp.f32 %v4537_v39  ;;  %v4549_v45 = vand.u32 2147483648, %v4537_v39  ;;  %v4547_v46 = vand.u32 2147483647, %v4537_v39  ;;  %vm4543_vm15 = vweird.f32 %v4537_v39 }
 0x821   :  { %v4599_v3 = vmul.f32 %v5256_v37, %v4597_v18  ;;  %vm4604_vm3 = vweird.f32 %v5256_v37  ;;  %v4426_v13 = vsel %vm4425_vm11, %v5252_v21, %v4422_v9 }
 0x822   :  { %vm9294_vm8 = vmor %vm4603_vm7, %vm4604_vm3  ;;  %v4550_v1 = vor.u32 1.1754944e-38, %v4549_v45  ;;  %vm4548_vm3 = vcmp.eq.f32.partialorder %v4547_v46, 8.507059e+37  ;;  %v4431_v23 = vsel %vm4428_vm2, %v4430_v41, %v4426_v13 }
 0x823   :  { %v4600_v29 = vsub.f32 1.0, %v4599_v3  ;;  %v5126_v34 = vsel %vm421_vm0, %v4431_v23, %v5112_v31 }
 0x825   :  { %v4601_v60 = vmul.f32 %v5256_v37, %v4600_v29 }
 0x826   :  { %v5258_v61 = vpop.eup %5257 }
 0x827   :  { %v4602_v49 = vadd.f32 %v5256_v37, %v4601_v60  ;;  %v4539_v50 = vmul.f32 %v5258_v61, %v4537_v39  ;;  %vm4544_vm9 = vweird.f32 %v5258_v61 }
 0x828   :  { %vm4545_vm1 = vmor %vm4543_vm15, %vm4544_vm9 }
 0x829   :  { %v4540_v57 = vsub.f32 1.0, %v4539_v50  ;;  %v4606_v40 = vsel %vm9294_vm8, %v5256_v37, %v4602_v49 }
 0x82a   :  { %v4611_v35 = vsel %vm4608_vm14, %v4610_v52, %v4606_v40  ;;  %v4710_v20 = vpop.f32.mrf.mxu1 }
 0x82b   :  { %v4541_v28 = vmul.f32 %v5258_v61, %v4540_v57  ;;  %v5114_v42 = vrot.slane %v4611_v35, 2  ;;  %v4711_v17 = vadd.f32 %v4710_v20, %v4690_v27 }
 0x82d   :  { %v4542_v16 = vadd.f32 %v5258_v61, %v4541_v28  ;;  %v4713_v62 = vadd.f32 %v9118_v0, %v4711_v17 }
 0x82f   :  { %v4546_v7 = vsel %vm4545_vm1, %v5258_v61, %v4542_v16  ;;  %v5188_v32 = vmul.f32 -1.442695, %v4713_v62 }
 0x830   :  { %v4551_v12 = vsel %vm4548_vm3, %v4550_v1, %v4546_v7  ;;  %v4650_v4 = vpop.f32.mrf.mxu3 }
 0x831   :  { %v5113_v24 = vrot.slane %v4551_v12, 4  ;;  %v4651_v15 = vadd.f32 %v4650_v4, %v4630_v19  ;;  %5259 = vpow2.f32 %v5188_v32 }
 0x833   :  { %v5127_v8 = vsel %vm5122_vm12, %v5113_v24, %v5114_v42  ;;  %v4653_v26 = vadd.f32 %v9118_v0, %v4651_v15 }
 0x834   :  { %v5128_v30 = vsel %vm5124_vm13, %v5126_v34, %v5127_v8 }
 0x835   :  { %5140 = vst [vmem:[%s9378_s5 + $0x8] sm:$0xff] %v5128_v30  ;;  %v5187_v56 = vmul.f32 -1.442695, %v4653_v26 }
 0x837   :  { %5261 = vpow2.f32 %v5187_v56  ;;  %v5260_v44 = vpop.eup %5259 }
 0x838   :  { %v4717_v21 = vadd.f32 1.0, %v5260_v44 }
 0x83a   :  { %5263 = vrcp.f32 %v4717_v21  ;;  %vm4723_vm4 = vweird.f32 %v4717_v21  ;;  %v4727_v45 = vand.u32 2147483647, %v4717_v21  ;;  %v4729_v46 = vand.u32 2147483648, %v4717_v21 }
 0x83c   :  { %vm4728_vm15 = vcmp.eq.f32.partialorder %v4727_v45, 8.507059e+37  ;;  %v4730_v24 = vor.u32 1.1754944e-38, %v4729_v46 }
 0x83d   :  { %v5262_v11 = vpop.eup %5261 }
 0x83e   :  { %v9312_v39 = vadd.f32 1.0, %v5262_v11 }
 0x840   :  { %v5264_v29 = vpop.eup %5263  ;;  %vm4663_vm7 = vweird.f32 %v9312_v39  ;;  %v4667_v35 = vand.u32 2147483647, %v9312_v39  ;;  %v4669_v1 = vand.u32 2147483648, %v9312_v39 }
 0x841   :  { %v4719_v10 = vmul.f32 %v5264_v29, %v4717_v21  ;;  %vm4724_vm5 = vweird.f32 %v5264_v29  ;;  %v4930_v21 = vpop.f32.mrf.mxu0 }
 0x842   :  { %vm9318_vm9 = vmor %vm4723_vm4, %vm4724_vm5  ;;  %v4670_v27 = vor.u32 1.1754944e-38, %v4669_v1  ;;  %vm4668_vm5 = vcmp.eq.f32.partialorder %v4667_v35, 8.507059e+37 }
 0x843   :  { %v4720_v50 = vsub.f32 1.0, %v4719_v10 }
 0x845   :  { %v4721_v63 = vmul.f32 %v5264_v29, %v4720_v50 }
 0x847   :  { %v4722_v43 = vadd.f32 %v5264_v29, %v4721_v63 }
 0x849   :  { %v4726_v41 = vsel %vm9318_vm9, %v5264_v29, %v4722_v43  ;;  %v5050_v29 = vpop.f32.mrf.mxu0 }
 0x84a   :  { %v4830_v33 = vpop.f32.mrf.mxu1  ;;  %v4731_v20 = vsel %vm4728_vm15, %v4730_v24, %v4726_v41 }
 0x84b   :  { %v4831_v18 = vadd.f32 %v4830_v33, %v4810_v6  ;;  %v5115_v32 = vrot.slane %v4731_v20, 6 }
 0x84d   :  { %v4833_v54 = vadd.f32 %v9118_v0, %v4831_v18 }
 0x84f   :  { %v5190_v14 = vmul.f32 -1.442695, %v4833_v54 }
 0x850   :  { %v4770_v37 = vpop.f32.mrf.mxu3 }
 0x851   :  { %5265 = vpow2.f32 %v5190_v14  ;;  %v4771_v51 = vadd.f32 %v4770_v37, %v4750_v58  ;;  %v4870_v14 = vpop.f32.mrf.mxu2 }
 0x852   :  { %5267 = vrcp.f32 %v9312_v39 }
 0x853   :  { %v4773_v3 = vadd.f32 %v9118_v0, %v4771_v51 }
 0x855   :  { %v5189_v47 = vmul.f32 -1.442695, %v4773_v3 }
 0x857   :  { %v5266_v55 = vpop.eup %5265  ;;  %5269 = vpow2.f32 %v5189_v47 }
 0x858   :  { %v4837_v60 = vadd.f32 1.0, %v5266_v55  ;;  %v5268_v61 = vpop.eup %5267 }
 0x859   :  { %v4659_v49 = vmul.f32 %v5268_v61, %v9312_v39  ;;  %vm4664_vm8 = vweird.f32 %v5268_v61  ;;  %v4990_v50 = vpop.f32.mrf.mxu2 }
 0x85a   :  { %5271 = vrcp.f32 %v4837_v60  ;;  %v4849_v25 = vand.u32 2147483648, %v4837_v60  ;;  %vm4843_vm10 = vweird.f32 %v4837_v60  ;;  %v4847_v16 = vand.u32 2147483647, %v4837_v60  ;;  %vm4665_vm1 = vmor %vm4663_vm7, %vm4664_vm8 }
 0x85b   :  { %v4660_v38 = vsub.f32 1.0, %v4659_v49 }
 0x85c   :  { %v4850_v34 = vor.u32 1.1754944e-38, %v4849_v25  ;;  %vm4848_vm2 = vcmp.eq.f32.partialorder %v4847_v16, 8.507059e+37 }
 0x85d   :  { %v5270_v53 = vpop.eup %5269  ;;  %v4661_v59 = vmul.f32 %v5268_v61, %v4660_v38 }
 0x85e   :  { %v4777_v36 = vadd.f32 1.0, %v5270_v53 }
 0x85f   :  { %v4662_v13 = vadd.f32 %v5268_v61, %v4661_v59 }
 0x860   :  { %v5272_v48 = vpop.eup %5271  ;;  %5273 = vrcp.f32 %v4777_v36  ;;  %v4789_v23 = vand.u32 2147483648, %v4777_v36  ;;  %v4787_v42 = vand.u32 2147483647, %v4777_v36  ;;  %vm4783_vm3 = vweird.f32 %v4777_v36 }
 0x861   :  { %v4839_v9 = vmul.f32 %v5272_v48, %v4837_v60  ;;  %vm4844_vm6 = vweird.f32 %v5272_v48  ;;  %v4666_v8 = vsel %vm4665_vm1, %v5268_v61, %v4662_v13 }
 0x862   :  { %vm9326_vm11 = vmor %vm4843_vm10, %vm4844_vm6  ;;  %v4790_v4 = vor.u32 1.1754944e-38, %v4789_v23  ;;  %vm4788_vm6 = vcmp.eq.f32.partialorder %v4787_v42, 8.507059e+37  ;;  %v4671_v62 = vsel %vm4668_vm5, %v4670_v27, %v4666_v8 }
 0x863   :  { %v4840_v57 = vsub.f32 1.0, %v4839_v9  ;;  %v5129_v44 = vsel %vm421_vm0, %v4671_v62, %v5115_v32 }
 0x865   :  { %v4841_v22 = vmul.f32 %v5272_v48, %v4840_v57 }
 0x866   :  { %v5274_v5 = vpop.eup %5273 }
 0x867   :  { %v4842_v40 = vadd.f32 %v5272_v48, %v4841_v22  ;;  %v4779_v28 = vmul.f32 %v5274_v5, %v4777_v36  ;;  %vm4784_vm14 = vweird.f32 %v5274_v5 }
 0x868   :  { %vm4785_vm4 = vmor %vm4783_vm3, %vm4784_vm14 }
 0x869   :  { %v4780_v2 = vsub.f32 1.0, %v4779_v28  ;;  %v4846_v12 = vsel %vm9326_vm11, %v5272_v48, %v4842_v40 }
 0x86a   :  { %v4851_v17 = vsel %vm4848_vm2, %v4850_v34, %v4846_v12  ;;  %v4950_v18 = vpop.f32.mrf.mxu1 }
 0x86b   :  { %v4781_v31 = vmul.f32 %v5274_v5, %v4780_v2  ;;  %v5117_v26 = vrot.slane %v4851_v17, 2  ;;  %v4951_v11 = vadd.f32 %v4950_v18, %v4930_v21 }
 0x86d   :  { %v4782_v30 = vadd.f32 %v5274_v5, %v4781_v31  ;;  %v4953_v58 = vadd.f32 %v9118_v0, %v4951_v11 }
 0x86f   :  { %v4786_v19 = vsel %vm4785_vm4, %v5274_v5, %v4782_v30  ;;  %v5192_v37 = vmul.f32 -1.442695, %v4953_v58 }
 0x870   :  { %v4791_v15 = vsel %vm4788_vm6, %v4790_v4, %v4786_v19  ;;  %v4890_v54 = vpop.f32.mrf.mxu3 }
 0x871   :  { %v5116_v56 = vrot.slane %v4791_v15, 4  ;;  %v4891_v39 = vadd.f32 %v4890_v54, %v4870_v14  ;;  %5275 = vpow2.f32 %v5192_v37 }
 0x873   :  { %v5130_v6 = vsel %vm5122_vm12, %v5116_v56, %v5117_v26  ;;  %v4893_v51 = vadd.f32 %v9118_v0, %v4891_v39 }
 0x874   :  { %v5131_v33 = vsel %vm5124_vm13, %v5129_v44, %v5130_v6 }
 0x875   :  { %5141 = vst [vmem:[%s9378_s5 + $0x10] sm:$0xff] %v5131_v33  ;;  %v5191_v3 = vmul.f32 -1.442695, %v4893_v51 }
 0x877   :  { %5277 = vpow2.f32 %v5191_v3  ;;  %v5276_v47 = vpop.eup %5275 }
 0x878   :  { %v4957_v61 = vadd.f32 1.0, %v5276_v47 }
 0x87a   :  { %5279 = vrcp.f32 %v4957_v61  ;;  %vm4963_vm7 = vweird.f32 %v4957_v61  ;;  %v4967_v7 = vand.u32 2147483647, %v4957_v61  ;;  %v4969_v31 = vand.u32 2147483648, %v4957_v61 }
 0x87c   :  { %vm4968_vm3 = vcmp.eq.f32.partialorder %v4967_v7, 8.507059e+37  ;;  %v4970_v26 = vor.u32 1.1754944e-38, %v4969_v31 }
 0x87d   :  { %v5278_v10 = vpop.eup %5277 }
 0x87e   :  { %v9344_v36 = vadd.f32 1.0, %v5278_v10 }
 0x880   :  { %v5280_v57 = vpop.eup %5279  ;;  %vm4903_vm10 = vweird.f32 %v9344_v36  ;;  %v4907_v27 = vand.u32 2147483647, %v9344_v36  ;;  %v4909_v17 = vand.u32 2147483648, %v9344_v36 }
 0x881   :  { %v4959_v43 = vmul.f32 %v5280_v57, %v4957_v61  ;;  %vm4964_vm8 = vweird.f32 %v5280_v57 }
 0x882   :  { %vm9350_vm14 = vmor %vm4963_vm7, %vm4964_vm8  ;;  %v4910_v18 = vor.u32 1.1754944e-38, %v4909_v17  ;;  %vm4908_vm8 = vcmp.eq.f32.partialorder %v4907_v27, 8.507059e+37 }
 0x883   :  { %v4960_v28 = vsub.f32 1.0, %v4959_v43 }
 0x88a   :  { %v5070_v55 = vpop.f32.mrf.mxu1 }
 0x88b   :  { %v5071_v60 = vadd.f32 %v5070_v55, %v5050_v29 }
 0x88d   :  { %v5073_v53 = vadd.f32 %v9118_v0, %v5071_v60 }
 0x88f   :  { %v5194_v49 = vmul.f32 -1.442695, %v5073_v53 }
 0x890   :  { %v5010_v48 = vpop.f32.mrf.mxu3 }
 0x891   :  { %5281 = vpow2.f32 %v5194_v49  ;;  %v5011_v38 = vadd.f32 %v5010_v48, %v4990_v50 }
 0x892   :  { %5283 = vrcp.f32 %v9344_v36 }
 0x893   :  { %v5013_v9 = vadd.f32 %v9118_v0, %v5011_v38  ;;  %v4961_v0 = vmul.f32 %v5280_v57, %v4960_v28 }
 0x895   :  { %v5193_v63 = vmul.f32 -1.442695, %v5013_v9  ;;  %v4962_v1 = vadd.f32 %v5280_v57, %v4961_v0 }
 0x897   :  { %v5282_v59 = vpop.eup %5281  ;;  %5285 = vpow2.f32 %v5193_v63  ;;  %v4966_v20 = vsel %vm9350_vm14, %v5280_v57, %v4962_v1 }
 0x898   :  { %v5077_v22 = vadd.f32 1.0, %v5282_v59  ;;  %v5284_v5 = vpop.eup %5283  ;;  %v4971_v33 = vsel %vm4968_vm3, %v4970_v26, %v4966_v20 }
 0x899   :  { %v4899_v40 = vmul.f32 %v5284_v5, %v9344_v36  ;;  %vm4904_vm11 = vweird.f32 %v5284_v5  ;;  %v5118_v39 = vrot.slane %v4971_v33, 6 }
 0x89a   :  { %5287 = vrcp.f32 %v5077_v22  ;;  %v5089_v42 = vand.u32 2147483648, %v5077_v22  ;;  %vm5083_vm15 = vweird.f32 %v5077_v22  ;;  %v5087_v8 = vand.u32 2147483647, %v5077_v22  ;;  %vm4905_vm4 = vmor %vm4903_vm10, %vm4904_vm11 }
 0x89b   :  { %v4900_v52 = vsub.f32 1.0, %v4899_v40 }
 0x89c   :  { %v5090_v56 = vor.u32 1.1754944e-38, %v5089_v42  ;;  %vm5088_vm5 = vcmp.eq.f32.partialorder %v5087_v8, 8.507059e+37 }
 0x89d   :  { %v5286_v45 = vpop.eup %5285  ;;  %v4901_v2 = vmul.f32 %v5284_v5, %v4900_v52 }
 0x89e   :  { %v5017_v46 = vadd.f32 1.0, %v5286_v45 }
 0x89f   :  { %v4902_v34 = vadd.f32 %v5284_v5, %v4901_v2 }
 0x8a0   :  { %v5288_v25 = vpop.eup %5287  ;;  %5289 = vrcp.f32 %v5017_v46  ;;  %v5029_v19 = vand.u32 2147483648, %v5017_v46  ;;  %v5027_v32 = vand.u32 2147483647, %v5017_v46  ;;  %vm5023_vm6 = vweird.f32 %v5017_v46 }
 0x8a1   :  { %v5079_v13 = vmul.f32 %v5288_v25, %v5077_v22  ;;  %vm5084_vm9 = vweird.f32 %v5288_v25  ;;  %v4906_v44 = vsel %vm4905_vm4, %v5284_v5, %v4902_v34 }
 0x8a2   :  { %vm9358_vm1 = vmor %vm5083_vm15, %vm5084_vm9  ;;  %v5030_v11 = vor.u32 1.1754944e-38, %v5029_v19  ;;  %vm5028_vm9 = vcmp.eq.f32.partialorder %v5027_v32, 8.507059e+37  ;;  %v4911_v14 = vsel %vm4908_vm8, %v4910_v18, %v4906_v44 }
 0x8a3   :  { %v5080_v16 = vsub.f32 1.0, %v5079_v13  ;;  %v5132_v3 = vsel %vm421_vm0, %v4911_v14, %v5118_v39 }
 0x8a5   :  { %v5081_v41 = vmul.f32 %v5288_v25, %v5080_v16 }
 0x8a6   :  { %v5290_v35 = vpop.eup %5289 }
 0x8a7   :  { %v5082_v23 = vadd.f32 %v5288_v25, %v5081_v41  ;;  %v5019_v12 = vmul.f32 %v5290_v35, %v5017_v46  ;;  %vm5024_vm2 = vweird.f32 %v5290_v35 }
 0x8a8   :  { %vm5025_vm7 = vmor %vm5023_vm6, %vm5024_vm2 }
 0x8a9   :  { %v5020_v30 = vsub.f32 1.0, %v5019_v12  ;;  %v5086_v62 = vsel %vm9358_vm1, %v5288_v25, %v5082_v23 }
 0x8aa   :  { %v5091_v21 = vsel %vm5088_vm5, %v5090_v56, %v5086_v62 }
 0x8ab   :  { %v5021_v15 = vmul.f32 %v5290_v35, %v5020_v30  ;;  %v5120_v37 = vrot.slane %v5091_v21, 2 }
 0x8ad   :  { %v5022_v6 = vadd.f32 %v5290_v35, %v5021_v15 }
 0x8af   :  { %v5026_v54 = vsel %vm5025_vm7, %v5290_v35, %v5022_v6 }
 0x8b0   :  { %v5031_v58 = vsel %vm5028_vm9, %v5030_v11, %v5026_v54 }
 0x8b1   :  { %v5119_v51 = vrot.slane %v5031_v58, 4 }
 0x8b3   :  { %v5133_v47 = vsel %vm5122_vm12, %v5119_v51, %v5120_v37 }
 0x8b4   :  { %v5134_v29 = vsel %vm5124_vm13, %v5132_v3, %v5133_v47 }
 0x8b5   :  { %5142 = vst [vmem:[%s9378_s5 + $0x18] sm:$0xff] %v5134_v29 }
 0x8b6   :  { %5147 = vsyncpa [#allocation3], 1 }
 0x8b7   :  { %5148 = vsyncpa [#allocation5], 1 }

</bundles_post_ra>
